<compile_context>
chip_gen: v6e
topology: v6e:2x2x1
jax: 0.10.0
libtpu: 0.0.40
codegen_flags: <defaults>
</compile_context>

<pallas_src>
import functools

import jax
import jax.numpy as jnp
from jax.experimental import pallas as pl
from jax.experimental.pallas import tpu as pltpu

# ------------------------- module-derived constants -------------------------
IMAGE_SIZE = (256, 128)                    # (H, W) from ReIDDetectMultiBackend
PIXEL_MEAN = (0.485, 0.456, 0.406)
PIXEL_STD = (0.229, 0.224, 0.225)
C_IN = 3
C_AUG = C_IN + 1                           # rgb + "valid" mask channel
C_HIDDEN = 128                             # synthetic backbone width
FEAT_DIM = 128                             # synthetic embedding dim
KH = KW = 3
STRIDE = 2
PAD = 1
K_RAW = KH * KW * C_IN                     # 27
K_AUG = KH * KW * C_AUG                    # 36 (pixels + per-tap validity)


# ----------------- fused kernel: conv+ReLU -> GAP -> FC (per image) ----------
def _fused_reid_kernel(p_ref, wc_ref, wf_ref, bf_ref, o_ref):
    """One image per grid step, everything resident in VMEM.

    p_ref : (1, K_AUG, M)       uint8   transposed augmented im2col patches
    wc_ref: (C_HIDDEN, K_AUG)   float32 conv weights (normalize + pad + bias folded)
    wf_ref: (FEAT, C_HIDDEN)    float32 FC weights (transposed, GAP 1/M folded)
    bf_ref: (FEAT, 1)           float32 FC bias
    o_ref : (1, FEAT, 1)        float32 embedding
    """
    # uint8 -> i32 -> f32 (exact; normalization is folded into wc).
    p = p_ref[0].astype(jnp.int32).astype(jnp.float32)                  # (K, M)
    # 3x3/s2 conv as one MXU matmul: channels on sublanes, spatial lane-dense.
    h = jnp.dot(wc_ref[...], p, preferred_element_type=jnp.float32)    # (C, M)
    h = jnp.maximum(h, 0.0)                                            # ReLU
    # global average pool: lane reduction; the 1/M scale lives in wf.
    pooled = jnp.sum(h, axis=1, keepdims=True)                         # (C, 1)
    feat = jnp.dot(wf_ref[...], pooled,
                   preferred_element_type=jnp.float32) + bf_ref[...]   # (F, 1)
    o_ref[...] = feat[None]                                            # (1, F, 1)


def fused_reid_call(p_t, w_conv_lhs, w_fc_lhs, b_fc_col):
    """p_t: (N, K_AUG, M) uint8 -> (N, FEAT_DIM, 1) float32."""
    n, k, m = p_t.shape
    return pl.pallas_call(
        _fused_reid_kernel,
        out_shape=jax.ShapeDtypeStruct((n, FEAT_DIM, 1), jnp.float32),
        grid=(n,),
        in_specs=[
            pl.BlockSpec((1, k, m), lambda i: (i, 0, 0)),              # streamed
            pl.BlockSpec((C_HIDDEN, k), lambda i: (0, 0)),             # resident
            pl.BlockSpec((FEAT_DIM, C_HIDDEN), lambda i: (0, 0)),      # resident
            pl.BlockSpec((FEAT_DIM, 1), lambda i: (0, 0)),             # resident
        ],
        out_specs=pl.BlockSpec((1, FEAT_DIM, 1), lambda i: (i, 0, 0)),
        compiler_params=pltpu.CompilerParams(
            dimension_semantics=("parallel",),
            vmem_limit_bytes=32 * 1024 * 1024),
    )(p_t, w_conv_lhs, w_fc_lhs, b_fc_col)


# ------------------------------- JAX glue (jitted) ---------------------------
def _im2col_u8_aug_t(im_u8):
    """uint8 (N,H,W,3) -> transposed augmented patches (N, K_AUG, H_out*W_out) uint8.

    A constant ones channel is appended before zero-padding, so each im2col
    column (i,j,3) carries the exact "this tap is in-bounds" indicator; the
    normalization offset (-mean/std) only applies to in-bounds taps and is
    folded into the matching weight rows."""
    n, h, w, _ = im_u8.shape
    ones = jnp.ones((n, h, w, 1), jnp.uint8)
    x = jnp.concatenate([im_u8, ones], axis=-1)                    # (N,H,W,4)
    xp = jnp.pad(x, ((0, 0), (PAD, PAD), (PAD, PAD), (0, 0)))      # zero pad
    h_out = (h + 2 * PAD - KH) // STRIDE + 1
    w_out = (w + 2 * PAD - KW) // STRIDE + 1
    cols = [xp[:, i:i + STRIDE * h_out:STRIDE, j:j + STRIDE * w_out:STRIDE, :]
            for i in range(KH) for j in range(KW)]
    patches = jnp.concatenate(cols, axis=-1)                       # (N,Ho,Wo,36)
    # transpose so the kernel's streamed operand is lane-dense (8192-wide rows)
    p_t = jnp.transpose(patches, (0, 3, 1, 2)).reshape(n, K_AUG, h_out * w_out)
    return p_t, h_out, w_out


def _fold_params(params, m_spatial):
    """Fold /255, mean/std, zero-padding and conv bias into the conv weight
    matrix; fold the GAP 1/(H_out*W_out) scale into the FC weights."""
    mean = jnp.asarray(PIXEL_MEAN, jnp.float32)
    std = jnp.asarray(PIXEL_STD, jnp.float32)
    s = 1.0 / (255.0 * std)                     # n = u*s + t for in-bounds taps
    t = -mean / std
    w3 = params["w_conv"].reshape(KH * KW, C_IN, C_HIDDEN)       # rows = (i,j,c)
    w_pix = w3 * s[None, :, None]                                # uint8-pixel rows
    w_msk = jnp.sum(t[None, :, None] * w3, axis=1, keepdims=True)  # "valid" rows
    w_fold = jnp.concatenate([w_pix, w_msk], axis=1).reshape(K_AUG, C_HIDDEN)
    # centre tap (i=1,j=1) is always in-bounds -> its mask column is identically
    # 1, so the conv bias folds into that row exactly.
    center = (1 * KW + 1) * C_AUG + C_IN
    w_fold = w_fold.at[center].add(params["b_conv"].reshape(C_HIDDEN))
    w_conv_lhs = w_fold.T                                        # (C_HIDDEN, K_AUG)
    w_fc_lhs = params["w_fc"].T / float(m_spatial)               # GAP scale folded
    b_fc_col = params["b_fc"].reshape(FEAT_DIM, 1)
    return w_conv_lhs, w_fc_lhs, b_fc_col


@jax.jit
def reid_forward(im_batch_u8, params):
    """im_batch_u8: uint8 (N, 256, 128, 3) -> float32 features (N, FEAT_DIM)."""
    n, h, w, c = im_batch_u8.shape
    assert (h, w) == IMAGE_SIZE and c == C_IN
    p_t, h_out, w_out = _im2col_u8_aug_t(im_batch_u8)
    w_conv_lhs, w_fc_lhs, b_fc_col = _fold_params(params, h_out * w_out)
    out = fused_reid_call(p_t, w_conv_lhs, w_fc_lhs, b_fc_col)
    return out.reshape(n, FEAT_DIM)


# ------------------------------- reference & init ----------------------------
def init_params(key):
    k1, k2, k3, k4 = jax.random.split(key, 4)
    return {
        "w_conv": 0.05 * jax.random.normal(k1, (K_RAW, C_HIDDEN), jnp.float32),
        "b_conv": 0.05 * jax.random.normal(k2, (1, C_HIDDEN), jnp.float32),
        "w_fc": 0.05 * jax.random.normal(k3, (C_HIDDEN, FEAT_DIM), jnp.float32),
        "b_fc": 0.05 * jax.random.normal(k4, (1, FEAT_DIM), jnp.float32),
    }


def reid_forward_reference(im_batch_u8, params):
    """Pure-JAX f32 reference mirroring the PyTorch semantics."""
    x = im_batch_u8.astype(jnp.float32) / 255.0
    mean = jnp.asarray(PIXEL_MEAN, jnp.float32)
    std = jnp.asarray(PIXEL_STD, jnp.float32)
    x = (x - mean) / std
    n, h, w, _ = x.shape
    xp = jnp.pad(x, ((0, 0), (PAD, PAD), (PAD, PAD), (0, 0)))
    h_out = (h + 2 * PAD - KH) // STRIDE + 1
    w_out = (w + 2 * PAD - KW) // STRIDE + 1
    cols = [xp[:, i:i + STRIDE * h_out:STRIDE, j:j + STRIDE * w_out:STRIDE, :]
            for i in range(KH) for j in range(KW)]
    patches = jnp.concatenate(cols, axis=-1).reshape(n, h_out * w_out, K_RAW)
    hmat = jnp.maximum(
        jnp.matmul(patches, params["w_conv"],
                   precision=jax.lax.Precision.HIGHEST) + params["b_conv"], 0.0)
    pooled = hmat.mean(axis=1)
    return jnp.matmul(pooled, params["w_fc"],
                      precision=jax.lax.Precision.HIGHEST) + params["b_fc"]


if __name__ == "__main__":
    key = jax.random.PRNGKey(0)
    k_img, k_par = jax.random.split(key)

    N = 2
    H, W = IMAGE_SIZE
    im_batch = jax.random.randint(k_img, (N, H, W, C_IN), 0, 256, dtype=jnp.int32)
    im_batch = im_batch.astype(jnp.uint8)

    params = init_params(k_par)

    feats = jax.block_until_ready(reid_forward(im_batch, params))

    assert feats.shape == (N, FEAT_DIM), feats.shape
    assert feats.dtype == jnp.float32

    ref = reid_forward_reference(im_batch, params)
    max_err = float(jnp.max(jnp.abs(feats - ref)))
    assert jnp.allclose(feats, ref, rtol=5e-3, atol=5e-3), max_err

    print("KERNEL_OK")
</pallas_src>

<mosaic_0001>
module attributes {stable_mosaic.version = 11 : i64} {
  func.func @_fused_reid_kernel(%arg0: i32, %arg1: memref<1x36x8192xi8, #tpu.memory_space<vmem>>, %arg2: memref<128x36xf32, #tpu.memory_space<vmem>>, %arg3: memref<128x128xf32, #tpu.memory_space<vmem>>, %arg4: memref<128x1xf32, #tpu.memory_space<vmem>>, %arg5: memref<1x128x1xf32, #tpu.memory_space<vmem>>) attributes {dimension_semantics = [#tpu.dimension_semantics<parallel>], iteration_bounds = array<i64: 2>, scalar_prefetch = 0 : i64, scratch_operands = 0 : i64, tpu.core_type = #tpu.core_type<tc>, window_params = [{transform_indices = @transform_0, window_bounds = array<i64: 1, 36, 8192>}, {pipeline_mode = #tpu.pipeline_mode<synchronous>, transform_indices = @transform_1, window_bounds = array<i64: 128, 36>}, {pipeline_mode = #tpu.pipeline_mode<synchronous>, transform_indices = @transform_2, window_bounds = array<i64: 128, 128>}, {pipeline_mode = #tpu.pipeline_mode<synchronous>, transform_indices = @transform_3, window_bounds = array<i64: 128, 1>}, {transform_indices = @transform_4, window_bounds = array<i64: 1, 128, 1>}]} {
    %c0 = arith.constant 0 : index
    %c0_0 = arith.constant 0 : index
    %c0_1 = arith.constant 0 : index
    %0 = vector.load %arg1[%c0, %c0_0, %c0_1] : memref<1x36x8192xi8, #tpu.memory_space<vmem>>, vector<1x36x8192xi8>
    %1 = vector.shape_cast %0 : vector<1x36x8192xi8> to vector<36x8192xi8>
    %2 = arith.extui %1 : vector<36x8192xi8> to vector<36x8192xi32>
    %3 = arith.sitofp %2 : vector<36x8192xi32> to vector<36x8192xf32>
    %c0_2 = arith.constant 0 : index
    %c0_3 = arith.constant 0 : index
    %4 = vector.load %arg2[%c0_2, %c0_3] : memref<128x36xf32, #tpu.memory_space<vmem>>, vector<128x36xf32>
    %cst = arith.constant dense<0.000000e+00> : vector<128x8192xf32>
    %5 = tpu.matmul %4, %3, %cst {dimension_numbers = #tpu.dot_dimension_numbers<[1], [0], [0], [1], [0, 0, 1, 1], [], []>} : vector<128x36xf32>, vector<36x8192xf32>, vector<128x8192xf32> -> vector<128x8192xf32>
    %cst_4 = arith.constant 0.000000e+00 : f32
    %6 = vector.broadcast %cst_4 : f32 to vector<128x8192xf32>
    %7 = arith.maximumf %5, %6 : vector<128x8192xf32>
    %cst_5 = arith.constant dense<0.000000e+00> : vector<128xf32>
    %8 = vector.multi_reduction <add>, %7, %cst_5 [1] : vector<128x8192xf32> to vector<128xf32>
    %9 = vector.shape_cast %8 : vector<128xf32> to vector<128x1xf32>
    %c0_6 = arith.constant 0 : index
    %c0_7 = arith.constant 0 : index
    %10 = vector.load %arg3[%c0_6, %c0_7] : memref<128x128xf32, #tpu.memory_space<vmem>>, vector<128x128xf32>
    %cst_8 = arith.constant dense<0.000000e+00> : vector<128x1xf32>
    %11 = tpu.matmul %10, %9, %cst_8 {dimension_numbers = #tpu.dot_dimension_numbers<[1], [0], [0], [1], [0, 0, 1, 1], [], []>} : vector<128x128xf32>, vector<128x1xf32>, vector<128x1xf32> -> vector<128x1xf32>
    %c0_9 = arith.constant 0 : index
    %c0_10 = arith.constant 0 : index
    %12 = vector.load %arg4[%c0_9, %c0_10] : memref<128x1xf32, #tpu.memory_space<vmem>>, vector<128x1xf32>
    %13 = arith.addf %11, %12 : vector<128x1xf32>
    %14 = vector.shape_cast %13 : vector<128x1xf32> to vector<1x128x1xf32>
    %c0_11 = arith.constant 0 : index
    %c0_12 = arith.constant 0 : index
    %c0_13 = arith.constant 0 : index
    %15 = vector.load %arg5[%c0_11, %c0_12, %c0_13] : memref<1x128x1xf32, #tpu.memory_space<vmem>>, vector<1x128x1xf32>
    tpu.vector_store %arg5[%c0_11, %c0_12, %c0_13], %14 {strides = array<i32>} : memref<1x128x1xf32, #tpu.memory_space<vmem>>, vector<1x128x1xf32>,
    return
  }
  func.func @transform_0(%arg0: i32) -> (i32, i32, i32) {
    %c0_i32 = arith.constant 0 : i32
    %c0_i32_0 = arith.constant 0 : i32
    %c0_i32_1 = arith.constant 0 : i32
    return %arg0, %c0_i32, %c0_i32_0 : i32, i32, i32
  }
  func.func @transform_1(%arg0: i32) -> (i32, i32) {
    %c0_i32 = arith.constant 0 : i32
    %c0_i32_0 = arith.constant 0 : i32
    %c0_i32_1 = arith.constant 0 : i32
    return %c0_i32, %c0_i32_0 : i32, i32
  }
  func.func @transform_2(%arg0: i32) -> (i32, i32) {
    %c0_i32 = arith.constant 0 : i32
    %c0_i32_0 = arith.constant 0 : i32
    %c0_i32_1 = arith.constant 0 : i32
    return %c0_i32, %c0_i32_0 : i32, i32
  }
  func.func @transform_3(%arg0: i32) -> (i32, i32) {
    %c0_i32 = arith.constant 0 : i32
    %c0_i32_0 = arith.constant 0 : i32
    %c0_i32_1 = arith.constant 0 : i32
    return %c0_i32, %c0_i32_0 : i32, i32
  }
  func.func @transform_4(%arg0: i32) -> (i32, i32, i32) {
    %c0_i32 = arith.constant 0 : i32
    %c0_i32_0 = arith.constant 0 : i32
    %c0_i32_1 = arith.constant 0 : i32
    return %arg0, %c0_i32, %c0_i32_0 : i32, i32, i32
  }
}

</mosaic_0001>

<bundles_post_ra>
// kernel: reid_forward.1
= control target key start
LH: loop header
LB: loop body
LE: loop exit
PB: predicated region body
PF: predicated region fallthrough
CT: control target
= control target key end

     0   :  { %s9802_s15 = smov 0   ;;  %s14377_s0 = inlined_call_operand.vmem [shape: u8[2,36,8192], index: 0, kind: input, shape index: {}]   ;;  %s14378_s1 = inlined_call_operand.vmem [shape: f32[128,36], index: 1, kind: input, shape index: {}]   ;;  %s14379_s2 = inlined_call_operand.vmem [shape: f32[128,128], index: 2, kind: input, shape index: {}]   ;;  %s14380_s3 = inlined_call_operand.vmem [shape: f32[128,1], index: 3, kind: input, shape index: {}]   ;;  %s14381_s4 = inlined_call_operand.vmem [shape: f32[2,128,1], index: 4, kind: output, shape index: {}]  }
   0x1 LB: > { %s8961_s16 = sadd.s32 4294967295, %s9774_s15   ;;  %p8965_p0 = scmp.ge.s32.totalorder %s9774_s15, 1  ;;  %s9774_s15 = sphi %s9802_s15, %s14_s15  }
   0x2   : > { %p162_p1 = scmp.lt.s32.totalorder %s9774_s15, 3 }
   0x4   : > { %p163_p2 = pnand %p8965_p0, %p162_p1 }
   0x6   : > { %166 = sbr.rel (%p163_p2) target bundleno = 1667 (0x683), region = 36 }
   0xb   : > { %p188_p3 = scmp.lt.s32.totalorder %s8961_s16, 1  ;;  %v9776_v0 = vmov 0.0   ;;  %vm1303_vm0 = vcmask 1043456   ;;  %vm1254_vm1 = vcmask 293888   ;;  %v9858_v46 = vld [vmem:[%s14378_s1] sm:$0xff]  ;;  %v9882_v62 = vld [vmem:[%s14378_s1 + $0x8] sm:$0xff] }
   0xc   : > { %1560 = vmatprep.mubr.f32.mxu0 %v9776_v0  ;;  %1632 = vmatprep.mubr.f32.mxu1 %v9776_v0  ;;  %v9863_v47 = vld [vmem:[%s14378_s1 + $0x60] sm:$0xff]  ;;  %v9887_v63 = vld [vmem:[%s14378_s1 + $0x68] sm:$0xff]  ;;  %vm8889_vm2 = vcmask 7168  }
   0xd   : > { %s14405_s16 = smov (!%p188_p3, %s8961_s16), 1 }
   0xe   : > { %s9646_s17 = smul.u32 640, %s14405_s16  ;;  %s9547_s30 = sshll.u32 %s14405_s16, 7 }
   0xf   : > { %s14295_s8 = scalar_lea.vmem %s14381_s4, %s9547_s30 }
  0x10   : > { %s9818_s20 = scalar_lea.vmem %s14377_s0, %s9646_s17 }
  0x11   : > { %v262_v1 = vld [vmem:[%s9818_s20 + $0x200] sm:$0x55]  ;;  %v9848_v41 = vld [vmem:[%s9818_s20 + $0x208] sm:$0x55] }
  0x12   : > { %v9822_v2 = vld [vmem:[%s9818_s20 + $0x180] sm:$0xff]  ;;  %v535_v4 = vunpack.c.1.s8 %v262_v1  ;;  %v534_v5 = vunpack.c.0.s8 %v262_v1  ;;  %v536_v23 = vunpack.c.2.s8 %v262_v1  ;;  %v537_v29 = vunpack.c.3.s8 %v262_v1  ;;  %v9851_v42 = vld [vmem:[%s9818_s20 + $0x188] sm:$0xff] }
  0x13   : > { %v9825_v3 = vld [vmem:[%s9818_s20 + $0x100] sm:$0xff]  ;;  %v471_v6 = vunpack.c.1.s8 %v9822_v2  ;;  %v470_v8 = vunpack.c.0.s8 %v9822_v2  ;;  %v473_v36 = vunpack.c.3.s8 %v9822_v2  ;;  %v472_v40 = vunpack.c.2.s8 %v9822_v2  ;;  %v9875_v61 = vld [vmem:[%s9818_s20 + $0x108] sm:$0xff] }
  0x14   : > { %v9829_v7 = vld [vmem:[%s9818_s20 + $0x80] sm:$0xff]  ;;  %v407_v9 = vunpack.c.1.s8 %v9825_v3  ;;  %v406_v10 = vunpack.c.0.s8 %v9825_v3  ;;  %v855_v12 = vand.u32 255, %v535_v4  ;;  %v854_v13 = vand.u32 255, %v534_v5 }
  0x15   : > { %v343_v11 = vunpack.c.1.s8 %v9829_v7  ;;  %v791_v14 = vand.u32 255, %v471_v6  ;;  %v790_v15 = vand.u32 255, %v470_v8  ;;  %v9836_v18 = vld [vmem:[%s9818_s20] sm:$0xff]  ;;  %v342_v26 = vunpack.c.0.s8 %v9829_v7 }
  0x16   : > { %v727_v16 = vand.u32 255, %v407_v9  ;;  %v726_v17 = vand.u32 255, %v406_v10  ;;  %v1175_v19 = vcvt.s32.f32 %v855_v12  ;;  %v1174_v20 = vcvt.s32.f32 %v854_v13 }
  0x17   : > { %v1111_v21 = vcvt.s32.f32 %v791_v14  ;;  %v663_v22 = vand.u32 255, %v343_v11  ;;  %v1110_v24 = vcvt.s32.f32 %v790_v15  ;;  %v279_v27 = vunpack.c.1.s8 %v9836_v18  ;;  %v9897_v14 = vld [vmem:[%s9818_s20 + $0x88] sm:$0xff]  ;;  %v9913_v15 = vld [vmem:[%s14378_s1 + $0x70] sm:$0xff] }
  0x18   : > { %v1047_v25 = vcvt.s32.f32 %v727_v16  ;;  %8969 = vmatprep.subr.msk.mxu0 %vm1303_vm0, %v1175_v19  ;;  %9636 = vmatprep.subr.msk.mxu1 %vm1303_vm0, %v1175_v19  ;;  %v278_v28 = vunpack.c.0.s8 %v9836_v18  ;;  %v1046_v30 = vcvt.s32.f32 %v726_v17  ;;  %v662_v32 = vand.u32 255, %v342_v26 }
  0x19   : > { %8970 = vmatpush1.msk.msra.mxu0 %vm1303_vm0, %v1174_v20  ;;  %9641 = vmatpush1.msk.msra.mxu1 %vm1303_vm0, %v1174_v20  ;;  %v983_v31 = vcvt.s32.f32 %v663_v22  ;;  %v599_v33 = vand.u32 255, %v279_v27  ;;  %v856_v35 = vand.u32 255, %v536_v23  ;;  %v857_v39 = vand.u32 255, %v537_v29  ;;  %v9919_v23 = vld [vmem:[%s9818_s20 + $0x8] sm:$0xff]  ;;  %v9931_v29 = vld [vmem:[%s14378_s1 + $0x18] sm:$0xff] }
  0x1a   : > { %1520 = vmatprep.subr.mxu0 %v1111_v21  ;;  %9637 = vmatprep.subr.mxu1 %v1111_v21  ;;  %v598_v34 = vand.u32 255, %v278_v28  ;;  %v982_v37 = vcvt.s32.f32 %v662_v32  ;;  %v409_v44 = vunpack.c.3.s8 %v9825_v3  ;;  %v408_v45 = vunpack.c.2.s8 %v9825_v3 }
  0x1b   : > { %1521 = vmatpush1.msra.mxu0 %v1110_v24  ;;  %9642 = vmatpush1.msra.mxu1 %v1110_v24  ;;  %v919_v38 = vcvt.s32.f32 %v599_v33  ;;  %v793_v48 = vand.u32 255, %v473_v36  ;;  %v539_v49 = vunpack.c.1.s8 %v9848_v41  ;;  %v538_v50 = vunpack.c.0.s8 %v9848_v41 }
  0x1c   : > { %1522 = vmatprep.subr.mxu0 %v1047_v25  ;;  %9638 = vmatprep.subr.mxu1 %v1047_v25  ;;  %v918_v43 = vcvt.s32.f32 %v598_v34  ;;  %v475_v51 = vunpack.c.1.s8 %v9851_v42  ;;  %v1176_v52 = vcvt.s32.f32 %v856_v35  ;;  %v1177_v53 = vcvt.s32.f32 %v857_v39 }
  0x1d   : > { %1523 = vmatpush1.msra.mxu0 %v1046_v30  ;;  %9643 = vmatpush1.msra.mxu1 %v1046_v30  ;;  %v792_v54 = vand.u32 255, %v472_v40  ;;  %v345_v55 = vunpack.c.3.s8 %v9829_v7  ;;  %v859_v56 = vand.u32 255, %v539_v49  ;;  %v858_v57 = vand.u32 255, %v538_v50  ;;  %v9936_v30 = vld [vmem:[%s14378_s1 + $0x78] sm:$0xff] }
  0x1e   : > { %1524 = vmatprep.subr.mxu0 %v983_v31  ;;  %9639 = vmatprep.subr.mxu1 %v983_v31  ;;  %v795_v58 = vand.u32 255, %v475_v51  ;;  %v474_v59 = vunpack.c.0.s8 %v9851_v42  ;;  %v729_v60 = vand.u32 255, %v409_v44  ;;  %v1113_v1 = vcvt.s32.f32 %v793_v48  ;;  %v9948_v44 = vld [vmem:[%s9818_s20 + $0x210] sm:$0x55] }
  0x1f   : > { %1525 = vmatpush1.msra.mxu0 %v982_v37  ;;  %9644 = vmatpush1.msra.mxu1 %v982_v37  ;;  %v728_v2 = vand.u32 255, %v408_v45  ;;  %v344_v3 = vunpack.c.2.s8 %v9829_v7  ;;  %v1179_v4 = vcvt.s32.f32 %v859_v56  ;;  %v1112_v5 = vcvt.s32.f32 %v792_v54  ;;  %v9908_v7 = vld [vmem:[%s14378_s1 + $0x10] sm:$0xff]  ;;  %v9954_v45 = vld [vmem:[%s14378_s1 + $0x20] sm:$0xff] }
  0x20   : > { %1526 = vmatprep.subr.mxu0 %v919_v38  ;;  %9640 = vmatprep.subr.mxu1 %v919_v38  ;;  %v281_v6 = vunpack.c.3.s8 %v9836_v18  ;;  %v280_v8 = vunpack.c.2.s8 %v9836_v18  ;;  %v1178_v9 = vcvt.s32.f32 %v858_v57  ;;  %v665_v10 = vand.u32 255, %v345_v55 }
  0x21   : > { %1527 = vmatpush1.msra.mxu0 %v918_v43  ;;  %9645 = vmatpush1.msra.mxu1 %v918_v43  ;;  %v1115_v11 = vcvt.s32.f32 %v795_v58  ;;  %v794_v12 = vand.u32 255, %v474_v59  ;;  %v411_v13 = vunpack.c.1.s8 %v9875_v61  ;;  %v1049_v16 = vcvt.s32.f32 %v729_v60  ;;  %v9970_v59 = vld [vmem:[%s14378_s1 + $0x28] sm:$0xff] }
  0x22   : > { %8971 = vmatmul.mubr.msk.f32.vlgmr.msra.gmra.mxu0 %vm1254_vm1, %v9858_v46  ;;  %8983 = vmatmul.mubr.msk.f32.vlgmr.msra.gmra.mxu1 %vm1254_vm1, %v9863_v47  ;;  %v1048_v17 = vcvt.s32.f32 %v728_v2  ;;  %v664_v18 = vand.u32 255, %v344_v3  ;;  %v410_v19 = vunpack.c.0.s8 %v9875_v61  ;;  %v601_v20 = vand.u32 255, %v281_v6 }
  0x23   : > { %1566 = vmatprep.mubr.f32.mxu0 %v9776_v0  ;;  %1638 = vmatprep.mubr.f32.mxu1 %v9776_v0  ;;  %v600_v21 = vand.u32 255, %v280_v8  ;;  %v347_v22 = vunpack.c.1.s8 %v9897_v14  ;;  %v541_v24 = vunpack.c.3.s8 %v9848_v41  ;;  %v985_v25 = vcvt.s32.f32 %v665_v10  ;;  %v9985_v10 = vld [vmem:[%s14378_s1 + $0x30] sm:$0xff] }
  0x24   : > { %8987 = vmatprep.subr.msk.mxu1 %vm1303_vm0, %v1177_v53  ;;  %9005 = vmatprep.subr.msk.mxu0 %vm1303_vm0, %v1179_v4  ;;  %v1114_v26 = vcvt.s32.f32 %v794_v12  ;;  %v731_v27 = vand.u32 255, %v411_v13  ;;  %v540_v28 = vunpack.c.2.s8 %v9848_v41  ;;  %v984_v31 = vcvt.s32.f32 %v664_v18 }
  0x25   : > { %8988 = vmatpush1.msk.msra.mxu1 %vm1303_vm0, %v1176_v52  ;;  %9006 = vmatpush1.msk.msra.mxu0 %vm1303_vm0, %v1178_v9  ;;  %v730_v32 = vand.u32 255, %v410_v19  ;;  %v346_v33 = vunpack.c.0.s8 %v9897_v14  ;;  %v283_v34 = vunpack.c.1.s8 %v9919_v23  ;;  %v921_v35 = vcvt.s32.f32 %v601_v20  ;;  %v9998_v20 = vld [vmem:[%s14378_s1 + $0x38] sm:$0xff] }
  0x26   : > { %8972 = vmatmul.mubr.msk.f32.gmra.mxu0 %vm1254_vm1, %v9882_v62  ;;  %8984 = vmatmul.mubr.msk.f32.gmra.mxu1 %vm1254_vm1, %v9887_v63  ;;  %v667_v36 = vand.u32 255, %v347_v22  ;;  %v861_v37 = vand.u32 255, %v541_v24  ;;  %v477_v38 = vunpack.c.3.s8 %v9851_v42  ;;  %v920_v39 = vcvt.s32.f32 %v600_v21 }
  0x27   : > { %1572 = vmatprep.mubr.f32.mxu0 %v9776_v0  ;;  %1644 = vmatprep.mubr.f32.mxu1 %v9776_v0  ;;  %v1051_v40 = vcvt.s32.f32 %v731_v27  ;;  %v860_v41 = vand.u32 255, %v540_v28  ;;  %v476_v43 = vunpack.c.2.s8 %v9851_v42  ;;  %v1050_v48 = vcvt.s32.f32 %v730_v32  ;;  %v10022_v32 = vld [vmem:[%s14378_s1 + $0x48] sm:$0xff] }
  0x28   : > { %1681 = vmatprep.subr.mxu1 %v1113_v1  ;;  %1842 = vmatprep.subr.mxu0 %v1115_v11  ;;  %v666_v49 = vand.u32 255, %v346_v33  ;;  %v603_v50 = vand.u32 255, %v283_v34  ;;  %v282_v42 = vunpack.c.0.s8 %v9919_v23  ;;  %v987_v51 = vcvt.s32.f32 %v667_v36  ;;  %v10029_v34 = vld [vmem:[%s9818_s20 + $0x190] sm:$0xff] }
  0x29   : > { %1682 = vmatpush1.msra.mxu1 %v1112_v5  ;;  %1843 = vmatpush1.msra.mxu0 %v1114_v26  ;;  %v1181_v52 = vcvt.s32.f32 %v861_v37  ;;  %v797_v53 = vand.u32 255, %v477_v38  ;;  %v413_v54 = vunpack.c.3.s8 %v9875_v61  ;;  %v1180_v55 = vcvt.s32.f32 %v860_v41  ;;  %v10011_v26 = vld [vmem:[%s14378_s1 + $0x40] sm:$0xff]  ;;  %v10046_v38 = vld [vmem:[%s9818_s20 + $0x110] sm:$0xff] }
  0x2a   : > { %8973 = vmatmul.mubr.msk.f32.gmra.mxu0 %vm1254_vm1, %v9908_v7  ;;  %8985 = vmatmul.mubr.msk.f32.gmra.mxu1 %vm1254_vm1, %v9913_v15  ;;  %v796_v56 = vand.u32 255, %v476_v43  ;;  %v412_v57 = vunpack.c.2.s8 %v9875_v61  ;;  %v543_v58 = vunpack.c.1.s8 %v9948_v44  ;;  %v986_v60 = vcvt.s32.f32 %v666_v49  ;;  %v10062_v49 = vld [vmem:[%s9818_s20 + $0x90] sm:$0xff] }
  0x2b   : > { %1683 = vmatprep.subr.mxu1 %v1049_v16  ;;  %1578 = vmatprep.mubr.f32.mxu0 %v9776_v0  ;;  %v602_v1 = vand.u32 255, %v282_v42  ;;  %v923_v61 = vcvt.s32.f32 %v603_v50  ;;  %v1117_v2 = vcvt.s32.f32 %v797_v53  ;;  %v733_v3 = vand.u32 255, %v413_v54 }
  0x2c   : > { %1650 = vmatprep.mubr.f32.mxu1 %v9776_v0  ;;  %1684 = vmatpush1.msra.mxu1 %v1048_v17  ;;  %v349_v4 = vunpack.c.3.s8 %v9897_v14  ;;  %v1116_v5 = vcvt.s32.f32 %v796_v56  ;;  %v732_v6 = vand.u32 255, %v412_v57  ;;  %v348_v8 = vunpack.c.2.s8 %v9897_v14 }
  0x2d   : > { %1685 = vmatprep.subr.mxu1 %v985_v25  ;;  %1844 = vmatprep.subr.mxu0 %v1051_v40  ;;  %v863_v9 = vand.u32 255, %v543_v58  ;;  %v922_v11 = vcvt.s32.f32 %v602_v1  ;;  %v1053_v12 = vcvt.s32.f32 %v733_v3  ;;  %v285_v14 = vunpack.c.3.s8 %v9919_v23 }
  0x2e   : > { %8974 = vmatmul.mubr.msk.f32.gmra.mxu0 %vm1254_vm1, %v9931_v29  ;;  %8986 = vmatmul.mubr.msk.f32.gmra.mxu1 %vm1254_vm1, %v9936_v30  ;;  %v669_v13 = vand.u32 255, %v349_v4  ;;  %v1052_v16 = vcvt.s32.f32 %v732_v6  ;;  %v668_v17 = vand.u32 255, %v348_v8  ;;  %v284_v18 = vunpack.c.2.s8 %v9919_v23 }
  0x2f   : > { %1686 = vmatpush1.msra.mxu1 %v984_v31  ;;  %1584 = vmatprep.mubr.f32.mxu0 %v9776_v0  ;;  %v1183_v19 = vcvt.s32.f32 %v863_v9  ;;  %v605_v22 = vand.u32 255, %v285_v14  ;;  %v545_v23 = vunpack.c.3.s8 %v9948_v44  ;;  %v542_v36 = vunpack.c.0.s8 %v9948_v44 }
  0x30   : > { %1687 = vmatprep.subr.mxu1 %v921_v35  ;;  %1721 = vmatprep.mubr.f32.mxu1 %v9776_v0  ;;  %v989_v21 = vcvt.s32.f32 %v669_v13  ;;  %v988_v24 = vcvt.s32.f32 %v668_v17  ;;  %v604_v25 = vand.u32 255, %v284_v18  ;;  %v10036_v35 = vld [vmem:[%s14378_s1 + $0x50] sm:$0xff]  ;;  %v479_v37 = vunpack.c.1.s8 %v10029_v34 }
  0x31   : > { %1688 = vmatpush1.msra.mxu1 %v920_v39  ;;  %1845 = vmatpush1.msra.mxu0 %v1050_v48  ;;  %v925_v27 = vcvt.s32.f32 %v605_v22  ;;  %v865_v28 = vand.u32 255, %v545_v23  ;;  %v10053_v39 = vld [vmem:[%s14378_s1 + $0x58] sm:$0xff]  ;;  %v862_v40 = vand.u32 255, %v542_v36  ;;  %v478_v41 = vunpack.c.0.s8 %v10029_v34 }
  0x32   : > { %8975 = vmatmul.mubr.msk.f32.gmra.mxu0 %vm1254_vm1, %v9954_v45  ;;  %8989 = vmatmul.mubr.msk.f32.vlgmr.msra.gmra.mxu1 %vm1254_vm1, %v9858_v46  ;;  %v924_v31 = vcvt.s32.f32 %v604_v25  ;;  %v799_v43 = vand.u32 255, %v479_v37  ;;  %v415_v48 = vunpack.c.1.s8 %v10046_v38  ;;  %v351_v54 = vunpack.c.1.s8 %v10062_v49 }
  0x33   : > { %1590 = vmatprep.mubr.f32.mxu0 %v9776_v0  ;;  %1727 = vmatprep.mubr.f32.mxu1 %v9776_v0  ;;  %v1185_v33 = vcvt.s32.f32 %v865_v28  ;;  %v1182_v50 = vcvt.s32.f32 %v862_v40  ;;  %v798_v42 = vand.u32 255, %v478_v41  ;;  %v350_v58 = vunpack.c.0.s8 %v10062_v49 }
  0x34   : > { %9023 = vmatprep.subr.msk.mxu1 %vm1303_vm0, %v1181_v52  ;;  %1846 = vmatprep.subr.mxu0 %v987_v51  ;;  %v414_v51 = vunpack.c.0.s8 %v10046_v38  ;;  %v1119_v52 = vcvt.s32.f32 %v799_v43  ;;  %v735_v53 = vand.u32 255, %v415_v48  ;;  %v671_v1 = vand.u32 255, %v351_v54 }
  0x35   : > { %9024 = vmatpush1.msk.msra.mxu1 %vm1303_vm0, %v1180_v55  ;;  %1847 = vmatpush1.msra.mxu0 %v986_v60  ;;  %v10073_v55 = vld [vmem:[%s9818_s20 + $0x10] sm:$0xff]  ;;  %v1118_v56 = vcvt.s32.f32 %v798_v42  ;;  %v670_v4 = vand.u32 255, %v350_v58  ;;  %v544_v18 = vunpack.c.2.s8 %v9948_v44  ;;  %v480_v22 = vunpack.c.2.s8 %v10029_v34  ;;  %v10175_v58 = vld [vmem:[%s9818_s20 + $0x198] sm:$0xff] }
  0x36   : > { %8976 = vmatmul.mubr.msk.f32.gmra.mxu0 %vm1254_vm1, %v9970_v59  ;;  %8990 = vmatmul.mubr.msk.f32.gmra.mxu1 %vm1254_vm1, %v9882_v62  ;;  %v734_v57 = vand.u32 255, %v414_v51  ;;  %v1055_v60 = vcvt.s32.f32 %v735_v53  ;;  %v991_v6 = vcvt.s32.f32 %v671_v1  ;;  %v352_v37 = vunpack.c.2.s8 %v10062_v49 }
  0x37   : > { %1596 = vmatprep.mubr.f32.mxu0 %v9776_v0  ;;  %1733 = vmatprep.mubr.f32.mxu1 %v9776_v0  ;;  %v800_v25 = vand.u32 255, %v480_v22  ;;  %v289_v41 = vunpack.c.3.s8 %v10073_v55  ;;  %v483_v1 = vunpack.c.1.s8 %v10175_v58 }
  0x38   : > { %2003 = vmatprep.subr.mxu1 %v1117_v2  ;;  %1848 = vmatprep.subr.mxu0 %v923_v61  ;;  %v287_v61 = vunpack.c.1.s8 %v10073_v55  ;;  %v10085_v2 = vld [vmem:[%s9818_s20 + $0x218] sm:$0x55]  ;;  %v1054_v3 = vcvt.s32.f32 %v734_v57  ;;  %v672_v48 = vand.u32 255, %v352_v37 }
  0x39   : > { %2004 = vmatpush1.msra.mxu1 %v1116_v5  ;;  %1849 = vmatpush1.msra.mxu0 %v922_v11  ;;  %v286_v5 = vunpack.c.0.s8 %v10073_v55  ;;  %v547_v9 = vunpack.c.1.s8 %v10085_v2  ;;  %v990_v11 = vcvt.s32.f32 %v670_v4  ;;  %v609_v42 = vand.u32 255, %v289_v41 }
  0x3a   : > { %8977 = vmatmul.mubr.msk.f32.gmra.mxu0 %vm1254_vm1, %v9985_v10  ;;  %8991 = vmatmul.mubr.msk.f32.gmra.mxu1 %vm1254_vm1, %v9908_v7  ;;  %v607_v8 = vand.u32 255, %v287_v61  ;;  %v549_v51 = vunpack.c.3.s8 %v10085_v2  ;;  %v10186_v61 = vld [vmem:[%s9818_s20 + $0x118] sm:$0xff]  ;;  %v482_v4 = vunpack.c.0.s8 %v10175_v58 }
  0x3b   : > { %1602 = vmatprep.mubr.f32.mxu0 %v9776_v0  ;;  %1739 = vmatprep.mubr.f32.mxu1 %v9776_v0  ;;  %v867_v14 = vand.u32 255, %v547_v9  ;;  %v929_v54 = vcvt.s32.f32 %v609_v42  ;;  %v484_v42 = vunpack.c.2.s8 %v10175_v58 }
  0x3c   : > { %2005 = vmatprep.subr.mxu1 %v1053_v12  ;;  %9041 = vmatprep.subr.msk.mxu0 %vm1303_vm0, %v1183_v19  ;;  %v606_v12 = vand.u32 255, %v286_v5  ;;  %v927_v13 = vcvt.s32.f32 %v607_v8  ;;  %v481_v19 = vunpack.c.3.s8 %v10029_v34  ;;  %v1120_v34 = vcvt.s32.f32 %v800_v25  ;;  %v10197_v8 = vld [vmem:[%s9818_s20 + $0x98] sm:$0xff] }
  0x3d   : > { %2006 = vmatpush1.msra.mxu1 %v1052_v16  ;;  %v1187_v17 = vcvt.s32.f32 %v867_v14  ;;  %v803_v5 = vand.u32 255, %v483_v1  ;;  %v356_v1 = vunpack.c.2.s8 %v10197_v8 }
  0x3e   : > { %8978 = vmatmul.mubr.msk.f32.gmra.mxu0 %vm1254_vm1, %v9998_v20  ;;  %8992 = vmatmul.mubr.msk.f32.gmra.mxu1 %vm1254_vm1, %v9931_v29  ;;  %v926_v16 = vcvt.s32.f32 %v606_v12  ;;  %v801_v23 = vand.u32 255, %v481_v19  ;;  %v418_v12 = vunpack.c.0.s8 %v10186_v61 }
  0x3f   : > { %1608 = vmatprep.mubr.f32.mxu0 %v9776_v0  ;;  %1745 = vmatprep.mubr.f32.mxu1 %v9776_v0 }
  0x40   : > { %2007 = vmatprep.subr.mxu1 %v989_v21  ;;  %v864_v21 = vand.u32 255, %v544_v18  ;;  %v1121_v28 = vcvt.s32.f32 %v801_v23  ;;  %v738_v19 = vand.u32 255, %v418_v12 }
  0x41   : > { %2008 = vmatpush1.msra.mxu1 %v988_v24  ;;  %v417_v24 = vunpack.c.3.s8 %v10046_v38 }
  0x42   : > { %8979 = vmatmul.mubr.msk.f32.gmra.mxu0 %vm1254_vm1, %v10011_v26  ;;  %8993 = vmatmul.mubr.msk.f32.gmra.mxu1 %vm1254_vm1, %v9954_v45  ;;  %v1184_v44 = vcvt.s32.f32 %v864_v21  ;;  %v354_v21 = vunpack.c.0.s8 %v10197_v8  ;;  %v1058_v25 = vcvt.s32.f32 %v738_v19 }
  0x43   : > { %1614 = vmatprep.mubr.f32.mxu0 %v9776_v0  ;;  %1751 = vmatprep.mubr.f32.mxu1 %v9776_v0 }
  0x44   : > { %2009 = vmatprep.subr.mxu1 %v925_v27  ;;  %v416_v27 = vunpack.c.2.s8 %v10046_v38 }
  0x45   : > { %2010 = vmatpush1.msra.mxu1 %v924_v31  ;;  %v737_v31 = vand.u32 255, %v417_v24 }
  0x46   : > { %8980 = vmatmul.mubr.msk.f32.gmra.mxu0 %vm1254_vm1, %v10022_v32  ;;  %8994 = vmatmul.mubr.msk.f32.gmra.mxu1 %vm1254_vm1, %v9970_v59  ;;  %v736_v36 = vand.u32 255, %v416_v27  ;;  %v674_v27 = vand.u32 255, %v354_v21  ;;  %v10310_v21 = vld [vmem:[%s9818_s20 + $0x1a0] sm:$0xff] }
  0x47   : > { %1620 = vmatprep.mubr.f32.mxu0 %v9776_v0  ;;  %1757 = vmatprep.mubr.f32.mxu1 %v9776_v0  ;;  %v1057_v38 = vcvt.s32.f32 %v737_v31 }
  0x48   : > { %9059 = vmatprep.subr.msk.mxu1 %vm1303_vm0, %v1185_v33  ;;  %v353_v33 = vunpack.c.3.s8 %v10062_v49  ;;  %v1056_v43 = vcvt.s32.f32 %v736_v36  ;;  %v288_v49 = vunpack.c.2.s8 %v10073_v55  ;;  %v869_v55 = vand.u32 255, %v549_v51 }
  0x49   : > { %v994_v36 = vcvt.s32.f32 %v674_v27 }
  0x4a   : > { %8981 = vmatmul.mubr.msk.f32.gmra.mxu0 %vm1254_vm1, %v10036_v35  ;;  %8995 = vmatmul.mubr.msk.f32.gmra.mxu1 %vm1254_vm1, %v9985_v10  ;;  %v673_v40 = vand.u32 255, %v353_v33  ;;  %v608_v53 = vand.u32 255, %v288_v49  ;;  %v1189_v57 = vcvt.s32.f32 %v869_v55  ;;  %v485_v49 = vunpack.c.3.s8 %v10175_v58 }
  0x4b   : > { %1626 = vmatprep.mubr.f32.mxu0 %v9776_v0  ;;  %1763 = vmatprep.mubr.f32.mxu1 %v9776_v0 }
  0x4c   : > { %v805_v51 = vand.u32 255, %v485_v49 }
  0x4e   : > { %8982 = vmatmul.mubr.msk.f32.gmra.mxu0 %vm1254_vm1, %v10053_v39  ;;  %8996 = vmatmul.mubr.msk.f32.gmra.mxu1 %vm1254_vm1, %v9998_v20  ;;  %v1125_v55 = vcvt.s32.f32 %v805_v51 }
  0x4f   : > { %1769 = vmatprep.mubr.f32.mxu1 %v9776_v0  ;;  %1882 = vmatprep.mubr.f32.mxu0 %v9776_v0 }
  0x52   : > { %8997 = vmatmul.mubr.msk.f32.gmra.mxu1 %vm1254_vm1, %v10011_v26  ;;  %9007 = vmatmul.mubr.msk.f32.vlgmr.msra.gmra.mxu0 %vm1254_vm1, %v9858_v46 }
  0x53   : > { %1775 = vmatprep.mubr.f32.mxu1 %v9776_v0  ;;  %1888 = vmatprep.mubr.f32.mxu0 %v9776_v0 }
  0x54   : > { %9042 = vmatpush1.msk.msra.mxu0 %vm1303_vm0, %v1182_v50  ;;  %v993_v50 = vcvt.s32.f32 %v673_v40 }
  0x55   : > { %2164 = vmatprep.subr.mxu0 %v1119_v52  ;;  %v992_v52 = vcvt.s32.f32 %v672_v48  ;;  %v548_v48 = vunpack.c.2.s8 %v10085_v2 }
  0x56   : > { %8998 = vmatmul.mubr.msk.f32.gmra.mxu1 %vm1254_vm1, %v10022_v32  ;;  %9008 = vmatmul.mubr.msk.f32.gmra.mxu0 %vm1254_vm1, %v9882_v62 }
  0x57   : > { %1781 = vmatprep.mubr.f32.mxu1 %v9776_v0  ;;  %1894 = vmatprep.mubr.f32.mxu0 %v9776_v0 }
  0x58   : > { %2165 = vmatpush1.msra.mxu0 %v1118_v56  ;;  %v928_v56 = vcvt.s32.f32 %v608_v53  ;;  %v804_v53 = vand.u32 255, %v484_v42 }
  0x59   : > { %2166 = vmatprep.subr.mxu0 %v1055_v60  ;;  %v546_v60 = vunpack.c.0.s8 %v10085_v2 }
  0x5a   : > { %8999 = vmatmul.mubr.msk.f32.gmra.mxu1 %vm1254_vm1, %v10036_v35  ;;  %9009 = vmatmul.mubr.msk.f32.gmra.mxu0 %vm1254_vm1, %v9908_v7  ;;  %v1124_v58 = vcvt.s32.f32 %v804_v53 }
  0x5b   : > { %1787 = vmatprep.mubr.f32.mxu1 %v9776_v0  ;;  %1900 = vmatprep.mubr.f32.mxu0 %v9776_v0 }
  0x5c   : > { %2167 = vmatpush1.msra.mxu0 %v1054_v3  ;;  %v866_v3 = vand.u32 255, %v546_v60 }
  0x5d   : > { %2168 = vmatprep.subr.mxu0 %v991_v6  ;;  %v419_v6 = vunpack.c.1.s8 %v10186_v61 }
  0x5e   : > { %9000 = vmatmul.mubr.msk.f32.gmra.mxu1 %vm1254_vm1, %v10053_v39  ;;  %9010 = vmatmul.mubr.msk.f32.gmra.mxu0 %vm1254_vm1, %v9931_v29  ;;  %v1186_v9 = vcvt.s32.f32 %v866_v3 }
  0x5f   : > { %1793 = vmatprep.mubr.f32.mxu1 %v9776_v0  ;;  %1906 = vmatprep.mubr.f32.mxu0 %v9776_v0  ;;  %v739_v14 = vand.u32 255, %v419_v6  ;;  %v676_v6 = vand.u32 255, %v356_v1  ;;  %v10376_v1 = vld [vmem:[%s14378_s1 + $0x60] sm:$0xff] }
  0x60   : > { %2169 = vmatpush1.msra.mxu0 %v990_v11  ;;  %v802_v11 = vand.u32 255, %v482_v4 }
  0x61   : > { %2170 = vmatprep.subr.mxu0 %v927_v13  ;;  %v1123_v13 = vcvt.s32.f32 %v803_v5  ;;  %v1059_v22 = vcvt.s32.f32 %v739_v14 }
  0x62   : > { %9001 = vmatmul.mubr.msk.f32.gmra.mxu1 %vm1254_vm1, %v9863_v47  ;;  %9011 = vmatmul.mubr.msk.f32.gmra.mxu0 %vm1254_vm1, %v9954_v45  ;;  %v1122_v18 = vcvt.s32.f32 %v802_v11 }
  0x63   : > { %1799 = vmatprep.mubr.f32.mxu1 %v9776_v0  ;;  %1912 = vmatprep.mubr.f32.mxu0 %v9776_v0 }
  0x64   : > { %2171 = vmatpush1.msra.mxu0 %v926_v16  ;;  %v355_v16 = vunpack.c.1.s8 %v10197_v8 }
  0x65   : > { %9077 = vmatprep.subr.msk.mxu0 %vm1303_vm0, %v1187_v17  ;;  %v10208_v17 = vld [vmem:[%s9818_s20 + $0x18] sm:$0xff] }
  0x66   : > { %9002 = vmatmul.mubr.msk.f32.gmra.mxu1 %vm1254_vm1, %v9887_v63  ;;  %9012 = vmatmul.mubr.msk.f32.gmra.mxu0 %vm1254_vm1, %v9970_v59  ;;  %v675_v23 = vand.u32 255, %v355_v16  ;;  %v291_v24 = vunpack.c.1.s8 %v10208_v17  ;;  %v293_v4 = vunpack.c.3.s8 %v10208_v17 }
  0x67   : > { %1805 = vmatprep.mubr.f32.mxu1 %v9776_v0  ;;  %1918 = vmatprep.mubr.f32.mxu0 %v9776_v0 }
  0x68   : > { %v995_v31 = vcvt.s32.f32 %v675_v23  ;;  %v611_v33 = vand.u32 255, %v291_v24  ;;  %v613_v11 = vand.u32 255, %v293_v4  ;;  %v486_v24 = vunpack.c.0.s8 %v10310_v21 }
  0x6a   : > { %9003 = vmatmul.mubr.msk.f32.gmra.mxu1 %vm1254_vm1, %v9913_v15  ;;  %9013 = vmatmul.mubr.msk.f32.gmra.mxu0 %vm1254_vm1, %v9985_v10  ;;  %v933_v16 = vcvt.s32.f32 %v613_v11  ;;  %v10388_v11 = vld [vmem:[%s14378_s1 + $0x68] sm:$0xff] }
  0x6b   : > { %1811 = vmatprep.mubr.f32.mxu1 %v9776_v0  ;;  %1924 = vmatprep.mubr.f32.mxu0 %v9776_v0 }
  0x6e   : > { %9004 = vmatmul.mubr.msk.f32.gmra.mxu1 %vm1254_vm1, %v9936_v30  ;;  %9014 = vmatmul.mubr.msk.f32.gmra.mxu0 %vm1254_vm1, %v9998_v20 }
  0x6f   : > { %1930 = vmatprep.mubr.f32.mxu0 %v9776_v0  ;;  %2043 = vmatprep.mubr.f32.mxu1 %v9776_v0 }
  0x72   : > { %9015 = vmatmul.mubr.msk.f32.gmra.mxu0 %vm1254_vm1, %v10011_v26  ;;  %9025 = vmatmul.mubr.msk.f32.vlgmr.msra.gmra.mxu1 %vm1254_vm1, %v9858_v46 }
  0x73   : > { %1936 = vmatprep.mubr.f32.mxu0 %v9776_v0  ;;  %2049 = vmatprep.mubr.f32.mxu1 %v9776_v0 }
  0x74   : > { %9060 = vmatpush1.msk.msra.mxu1 %vm1303_vm0, %v1184_v44  ;;  %v10220_v44 = vld [vmem:[%s9818_s20 + $0x220] sm:$0x55] }
  0x75   : > { %2325 = vmatprep.subr.mxu1 %v1121_v28  ;;  %v290_v28 = vunpack.c.0.s8 %v10208_v17  ;;  %v553_v12 = vunpack.c.3.s8 %v10220_v44 }
  0x76   : > { %9016 = vmatmul.mubr.msk.f32.gmra.mxu0 %vm1254_vm1, %v10022_v32  ;;  %9026 = vmatmul.mubr.msk.f32.gmra.mxu1 %vm1254_vm1, %v9882_v62 }
  0x77   : > { %1942 = vmatprep.mubr.f32.mxu0 %v9776_v0  ;;  %2055 = vmatprep.mubr.f32.mxu1 %v9776_v0  ;;  %v610_v37 = vand.u32 255, %v290_v28 }
  0x78   : > { %2326 = vmatpush1.msra.mxu1 %v1120_v34  ;;  %v551_v34 = vunpack.c.1.s8 %v10220_v44 }
  0x79   : > { %2327 = vmatprep.subr.mxu1 %v1057_v38  ;;  %v931_v38 = vcvt.s32.f32 %v611_v33  ;;  %v930_v41 = vcvt.s32.f32 %v610_v37 }
  0x7a   : > { %9017 = vmatmul.mubr.msk.f32.gmra.mxu0 %vm1254_vm1, %v10036_v35  ;;  %9027 = vmatmul.mubr.msk.f32.gmra.mxu1 %vm1254_vm1, %v9908_v7  ;;  %v871_v40 = vand.u32 255, %v551_v34 }
  0x7b   : > { %1948 = vmatprep.mubr.f32.mxu0 %v9776_v0  ;;  %2061 = vmatprep.mubr.f32.mxu1 %v9776_v0 }
  0x7c   : > { %2328 = vmatpush1.msra.mxu1 %v1056_v43  ;;  %v1191_v43 = vcvt.s32.f32 %v871_v40 }
  0x7d   : > { %2329 = vmatprep.subr.mxu1 %v993_v50  ;;  %v868_v50 = vand.u32 255, %v548_v48 }
  0x7e   : > { %9018 = vmatmul.mubr.msk.f32.gmra.mxu0 %vm1254_vm1, %v10053_v39  ;;  %9028 = vmatmul.mubr.msk.f32.gmra.mxu1 %vm1254_vm1, %v9931_v29 }
  0x7f   : > { %1954 = vmatprep.mubr.f32.mxu0 %v9776_v0  ;;  %2067 = vmatprep.mubr.f32.mxu1 %v9776_v0  ;;  %v1188_v2 = vcvt.s32.f32 %v868_v50 }
  0x80   : > { %2330 = vmatpush1.msra.mxu1 %v992_v52  ;;  %v421_v52 = vunpack.c.3.s8 %v10186_v61 }
  0x81   : > { %2331 = vmatprep.subr.mxu1 %v929_v54  ;;  %v420_v54 = vunpack.c.2.s8 %v10186_v61 }
  0x82   : > { %9019 = vmatmul.mubr.msk.f32.gmra.mxu0 %vm1254_vm1, %v9863_v47  ;;  %9029 = vmatmul.mubr.msk.f32.gmra.mxu1 %vm1254_vm1, %v9954_v45 }
  0x83   : > { %1960 = vmatprep.mubr.f32.mxu0 %v9776_v0  ;;  %2073 = vmatprep.mubr.f32.mxu1 %v9776_v0  ;;  %v740_v60 = vand.u32 255, %v420_v54 }
  0x84   : > { %2332 = vmatpush1.msra.mxu1 %v928_v56  ;;  %v741_v56 = vand.u32 255, %v421_v52 }
  0x85   : > { %9095 = vmatprep.subr.msk.mxu1 %vm1303_vm0, %v1189_v57  ;;  %v357_v57 = vunpack.c.3.s8 %v10197_v8  ;;  %v1060_v5 = vcvt.s32.f32 %v740_v60  ;;  %v292_v8 = vunpack.c.2.s8 %v10208_v17  ;;  %v873_v17 = vand.u32 255, %v553_v12 }
  0x86   : > { %9020 = vmatmul.mubr.msk.f32.gmra.mxu0 %vm1254_vm1, %v9887_v63  ;;  %9030 = vmatmul.mubr.msk.f32.gmra.mxu1 %vm1254_vm1, %v9970_v59  ;;  %v1061_v61 = vcvt.s32.f32 %v741_v56 }
  0x87   : > { %1966 = vmatprep.mubr.f32.mxu0 %v9776_v0  ;;  %2079 = vmatprep.mubr.f32.mxu1 %v9776_v0  ;;  %v677_v3 = vand.u32 255, %v357_v57  ;;  %v612_v14 = vand.u32 255, %v292_v8  ;;  %v1193_v19 = vcvt.s32.f32 %v873_v17  ;;  %v552_v17 = vunpack.c.2.s8 %v10220_v44 }
  0x8a   : > { %9021 = vmatmul.mubr.msk.f32.gmra.mxu0 %vm1254_vm1, %v9913_v15  ;;  %9031 = vmatmul.mubr.msk.f32.gmra.mxu1 %vm1254_vm1, %v9985_v10 }
  0x8b   : > { %1972 = vmatprep.mubr.f32.mxu0 %v9776_v0  ;;  %2085 = vmatprep.mubr.f32.mxu1 %v9776_v0 }
  0x8e   : > { %9022 = vmatmul.mubr.msk.f32.gmra.mxu0 %vm1254_vm1, %v9936_v30  ;;  %9032 = vmatmul.mubr.msk.f32.gmra.mxu1 %vm1254_vm1, %v9998_v20 }
  0x8f   : > { %2091 = vmatprep.mubr.f32.mxu1 %v9776_v0  ;;  %2204 = vmatprep.mubr.f32.mxu0 %v9776_v0 }
  0x92   : > { %9033 = vmatmul.mubr.msk.f32.gmra.mxu1 %vm1254_vm1, %v10011_v26  ;;  %9043 = vmatmul.mubr.msk.f32.vlgmr.msra.gmra.mxu0 %vm1254_vm1, %v9858_v46 }
  0x93   : > { %2097 = vmatprep.mubr.f32.mxu1 %v9776_v0  ;;  %2210 = vmatprep.mubr.f32.mxu0 %v9776_v0 }
  0x94   : > { %9078 = vmatpush1.msk.msra.mxu0 %vm1303_vm0, %v1186_v9  ;;  %v997_v9 = vcvt.s32.f32 %v677_v3 }
  0x95   : > { %2486 = vmatprep.subr.mxu0 %v1123_v13  ;;  %v996_v13 = vcvt.s32.f32 %v676_v6 }
  0x96   : > { %9034 = vmatmul.mubr.msk.f32.gmra.mxu1 %vm1254_vm1, %v10022_v32  ;;  %9044 = vmatmul.mubr.msk.f32.gmra.mxu0 %vm1254_vm1, %v9882_v62 }
  0x97   : > { %2103 = vmatprep.mubr.f32.mxu1 %v9776_v0  ;;  %2216 = vmatprep.mubr.f32.mxu0 %v9776_v0 }
  0x98   : > { %2487 = vmatpush1.msra.mxu0 %v1122_v18  ;;  %v932_v18 = vcvt.s32.f32 %v612_v14 }
  0x99   : > { %2488 = vmatprep.subr.mxu0 %v1059_v22  ;;  %v487_v22 = vunpack.c.1.s8 %v10310_v21 }
  0x9a   : > { %9035 = vmatmul.mubr.msk.f32.gmra.mxu1 %vm1254_vm1, %v10036_v35  ;;  %9045 = vmatmul.mubr.msk.f32.gmra.mxu0 %vm1254_vm1, %v9908_v7 }
  0x9b   : > { %2109 = vmatprep.mubr.f32.mxu1 %v9776_v0  ;;  %2222 = vmatprep.mubr.f32.mxu0 %v9776_v0 }
  0x9c   : > { %2489 = vmatpush1.msra.mxu0 %v1058_v25  ;;  %v807_v25 = vand.u32 255, %v487_v22 }
  0x9d   : > { %2490 = vmatprep.subr.mxu0 %v995_v31  ;;  %v806_v31 = vand.u32 255, %v486_v24  ;;  %v10405_v24 = vld [vmem:[%s14378_s1 + $0x70] sm:$0xff] }
  0x9e   : > { %9036 = vmatmul.mubr.msk.f32.gmra.mxu1 %vm1254_vm1, %v10053_v39  ;;  %9046 = vmatmul.mubr.msk.f32.gmra.mxu0 %vm1254_vm1, %v9931_v29  ;;  %v1127_v34 = vcvt.s32.f32 %v807_v25 }
  0x9f   : > { %2115 = vmatprep.mubr.f32.mxu1 %v9776_v0  ;;  %2228 = vmatprep.mubr.f32.mxu0 %v9776_v0 }
  0xa0   : > { %2491 = vmatpush1.msra.mxu0 %v994_v36 }
  0xa1   : > { %2492 = vmatprep.subr.mxu0 %v931_v38  ;;  %v1126_v38 = vcvt.s32.f32 %v806_v31 }
  0xa2   : > { %9037 = vmatmul.mubr.msk.f32.gmra.mxu1 %vm1254_vm1, %v9863_v47  ;;  %9047 = vmatmul.mubr.msk.f32.gmra.mxu0 %vm1254_vm1, %v9954_v45 }
  0xa3   : > { %2121 = vmatprep.mubr.f32.mxu1 %v9776_v0  ;;  %2234 = vmatprep.mubr.f32.mxu0 %v9776_v0 }
  0xa4   : > { %2493 = vmatpush1.msra.mxu0 %v930_v41 }
  0xa5   : > { %9113 = vmatprep.subr.msk.mxu0 %vm1303_vm0, %v1191_v43 }
  0xa6   : > { %9038 = vmatmul.mubr.msk.f32.gmra.mxu1 %vm1254_vm1, %v9887_v63  ;;  %9048 = vmatmul.mubr.msk.f32.gmra.mxu0 %vm1254_vm1, %v9970_v59 }
  0xa7   : > { %2127 = vmatprep.mubr.f32.mxu1 %v9776_v0  ;;  %2240 = vmatprep.mubr.f32.mxu0 %v9776_v0 }
  0xaa   : > { %9039 = vmatmul.mubr.msk.f32.gmra.mxu1 %vm1254_vm1, %v9913_v15  ;;  %9049 = vmatmul.mubr.msk.f32.gmra.mxu0 %vm1254_vm1, %v9985_v10 }
  0xab   : > { %2133 = vmatprep.mubr.f32.mxu1 %v9776_v0  ;;  %2246 = vmatprep.mubr.f32.mxu0 %v9776_v0 }
  0xae   : > { %9040 = vmatmul.mubr.msk.f32.gmra.mxu1 %vm1254_vm1, %v9936_v30  ;;  %9050 = vmatmul.mubr.msk.f32.gmra.mxu0 %vm1254_vm1, %v9998_v20 }
  0xaf   : > { %2252 = vmatprep.mubr.f32.mxu0 %v9776_v0  ;;  %2365 = vmatprep.mubr.f32.mxu1 %v9776_v0 }
  0xb2   : > { %9051 = vmatmul.mubr.msk.f32.gmra.mxu0 %vm1254_vm1, %v10011_v26  ;;  %9061 = vmatmul.mubr.msk.f32.vlgmr.msra.gmra.mxu1 %vm1254_vm1, %v9858_v46 }
  0xb3   : > { %2258 = vmatprep.mubr.f32.mxu0 %v9776_v0  ;;  %2371 = vmatprep.mubr.f32.mxu1 %v9776_v0 }
  0xb4   : > { %9096 = vmatpush1.msk.msra.mxu1 %vm1303_vm0, %v1188_v2 }
  0xb5   : > { %2647 = vmatprep.subr.mxu1 %v1125_v55 }
  0xb6   : > { %9052 = vmatmul.mubr.msk.f32.gmra.mxu0 %vm1254_vm1, %v10022_v32  ;;  %9062 = vmatmul.mubr.msk.f32.gmra.mxu1 %vm1254_vm1, %v9882_v62 }
  0xb7   : > { %2264 = vmatprep.mubr.f32.mxu0 %v9776_v0  ;;  %2377 = vmatprep.mubr.f32.mxu1 %v9776_v0 }
  0xb8   : > { %2648 = vmatpush1.msra.mxu1 %v1124_v58 }
  0xb9   : > { %2649 = vmatprep.subr.mxu1 %v1061_v61 }
  0xba   : > { %9053 = vmatmul.mubr.msk.f32.gmra.mxu0 %vm1254_vm1, %v10036_v35  ;;  %9063 = vmatmul.mubr.msk.f32.gmra.mxu1 %vm1254_vm1, %v9908_v7 }
  0xbb   : > { %2270 = vmatprep.mubr.f32.mxu0 %v9776_v0  ;;  %2383 = vmatprep.mubr.f32.mxu1 %v9776_v0 }
  0xbc   : > { %2650 = vmatpush1.msra.mxu1 %v1060_v5 }
  0xbd   : > { %2651 = vmatprep.subr.mxu1 %v997_v9 }
  0xbe   : > { %9054 = vmatmul.mubr.msk.f32.gmra.mxu0 %vm1254_vm1, %v10053_v39  ;;  %9064 = vmatmul.mubr.msk.f32.gmra.mxu1 %vm1254_vm1, %v9931_v29 }
  0xbf   : > { %2276 = vmatprep.mubr.f32.mxu0 %v9776_v0  ;;  %2389 = vmatprep.mubr.f32.mxu1 %v9776_v0 }
  0xc0   : > { %2652 = vmatpush1.msra.mxu1 %v996_v13 }
  0xc1   : > { %2653 = vmatprep.subr.mxu1 %v933_v16 }
  0xc2   : > { %9055 = vmatmul.mubr.msk.f32.gmra.mxu0 %vm1254_vm1, %v9863_v47  ;;  %9065 = vmatmul.mubr.msk.f32.gmra.mxu1 %vm1254_vm1, %v9954_v45  ;;  %v550_v47 = vunpack.c.0.s8 %v10220_v44 }
  0xc3   : > { %2282 = vmatprep.mubr.f32.mxu0 %v9776_v0  ;;  %2395 = vmatprep.mubr.f32.mxu1 %v9776_v0 }
  0xc4   : > { %2654 = vmatpush1.msra.mxu1 %v932_v18  ;;  %v870_v23 = vand.u32 255, %v550_v47  ;;  %v489_v18 = vunpack.c.3.s8 %v10310_v21 }
  0xc5   : > { %9131 = vmatprep.subr.msk.mxu1 %vm1303_vm0, %v1193_v19 }
  0xc6   : > { %9056 = vmatmul.mubr.msk.f32.gmra.mxu0 %vm1254_vm1, %v9887_v63  ;;  %9066 = vmatmul.mubr.msk.f32.gmra.mxu1 %vm1254_vm1, %v9970_v59  ;;  %v10321_v63 = vld [vmem:[%s9818_s20 + $0x120] sm:$0xff]  ;;  %v1190_v28 = vcvt.s32.f32 %v870_v23 }
  0xc7   : > { %2288 = vmatprep.mubr.f32.mxu0 %v9776_v0  ;;  %2401 = vmatprep.mubr.f32.mxu1 %v9776_v0  ;;  %v423_v27 = vunpack.c.1.s8 %v10321_v63  ;;  %v422_v33 = vunpack.c.0.s8 %v10321_v63 }
  0xc9   : > { %v743_v36 = vand.u32 255, %v423_v27  ;;  %v742_v40 = vand.u32 255, %v422_v33  ;;  %v872_v33 = vand.u32 255, %v552_v17 }
  0xca   : > { %9057 = vmatmul.mubr.msk.f32.gmra.mxu0 %vm1254_vm1, %v9913_v15  ;;  %9067 = vmatmul.mubr.msk.f32.gmra.mxu1 %vm1254_vm1, %v9985_v10  ;;  %v10332_v15 = vld [vmem:[%s9818_s20 + $0xa0] sm:$0xff] }
  0xcb   : > { %2294 = vmatprep.mubr.f32.mxu0 %v9776_v0  ;;  %2407 = vmatprep.mubr.f32.mxu1 %v9776_v0  ;;  %v359_v37 = vunpack.c.1.s8 %v10332_v15  ;;  %v358_v41 = vunpack.c.0.s8 %v10332_v15  ;;  %v1063_v43 = vcvt.s32.f32 %v743_v36  ;;  %v1062_v50 = vcvt.s32.f32 %v742_v40 }
  0xcc   : > { %v488_v36 = vunpack.c.2.s8 %v10310_v21  ;;  %v424_v21 = vunpack.c.2.s8 %v10321_v63 }
  0xcd   : > { %v679_v48 = vand.u32 255, %v359_v37  ;;  %v678_v42 = vand.u32 255, %v358_v41 }
  0xce   : > { %9058 = vmatmul.mubr.msk.f32.gmra.mxu0 %vm1254_vm1, %v9936_v30  ;;  %9068 = vmatmul.mubr.msk.f32.gmra.mxu1 %vm1254_vm1, %v9998_v20  ;;  %v10343_v30 = vld [vmem:[%s9818_s20 + $0x20] sm:$0xff] }
  0xcf   : > { %2413 = vmatprep.mubr.f32.mxu1 %v9776_v0  ;;  %2526 = vmatprep.mubr.f32.mxu0 %v9776_v0  ;;  %v295_v49 = vunpack.c.1.s8 %v10343_v30  ;;  %v294_v51 = vunpack.c.0.s8 %v10343_v30  ;;  %v999_v52 = vcvt.s32.f32 %v679_v48  ;;  %v10422_v48 = vld [vmem:[%s14378_s1 + $0x78] sm:$0xff] }
  0xd1   : > { %v615_v2 = vand.u32 255, %v295_v49  ;;  %v614_v54 = vand.u32 255, %v294_v51 }
  0xd2   : > { %9069 = vmatmul.mubr.msk.f32.gmra.mxu1 %vm1254_vm1, %v10011_v26  ;;  %9079 = vmatmul.mubr.msk.f32.vlgmr.msra.gmra.mxu0 %vm1254_vm1, %v9858_v46  ;;  %v10355_v46 = vld [vmem:[%s9818_s20 + $0x228] sm:$0x55] }
  0xd3   : > { %2419 = vmatprep.mubr.f32.mxu1 %v9776_v0  ;;  %2532 = vmatprep.mubr.f32.mxu0 %v9776_v0  ;;  %v555_v53 = vunpack.c.1.s8 %v10355_v46  ;;  %v935_v55 = vcvt.s32.f32 %v615_v2  ;;  %v1192_v2 = vcvt.s32.f32 %v872_v33 }
  0xd4   : > { %9114 = vmatpush1.msk.msra.mxu0 %vm1303_vm0, %v1190_v28 }
  0xd5   : > { %2808 = vmatprep.subr.mxu0 %v1127_v34  ;;  %v875_v56 = vand.u32 255, %v555_v53  ;;  %v809_v34 = vand.u32 255, %v489_v18 }
  0xd6   : > { %9070 = vmatmul.mubr.msk.f32.gmra.mxu1 %vm1254_vm1, %v10022_v32  ;;  %9080 = vmatmul.mubr.msk.f32.gmra.mxu0 %vm1254_vm1, %v9882_v62  ;;  %v998_v62 = vcvt.s32.f32 %v678_v42 }
  0xd7   : > { %2425 = vmatprep.mubr.f32.mxu1 %v9776_v0  ;;  %2538 = vmatprep.mubr.f32.mxu0 %v9776_v0  ;;  %v1195_v57 = vcvt.s32.f32 %v875_v56  ;;  %v1129_v53 = vcvt.s32.f32 %v809_v34 }
  0xd8   : > { %2809 = vmatpush1.msra.mxu0 %v1126_v38 }
  0xd9   : > { %2810 = vmatprep.subr.mxu0 %v1063_v43 }
  0xda   : > { %9071 = vmatmul.mubr.msk.f32.gmra.mxu1 %vm1254_vm1, %v10036_v35  ;;  %9081 = vmatmul.mubr.msk.f32.gmra.mxu0 %vm1254_vm1, %v9908_v7  ;;  %v934_v7 = vcvt.s32.f32 %v614_v54  ;;  %v361_v54 = vunpack.c.3.s8 %v10332_v15 }
  0xdb   : > { %2431 = vmatprep.mubr.f32.mxu1 %v9776_v0  ;;  %2544 = vmatprep.mubr.f32.mxu0 %v9776_v0 }
  0xdc   : > { %2811 = vmatpush1.msra.mxu0 %v1062_v50 }
  0xdd   : > { %2812 = vmatprep.subr.mxu0 %v999_v52 }
  0xde   : > { %9072 = vmatmul.mubr.msk.f32.gmra.mxu1 %vm1254_vm1, %v10053_v39  ;;  %9082 = vmatmul.mubr.msk.f32.gmra.mxu0 %vm1254_vm1, %v9931_v29 }
  0xdf   : > { %2437 = vmatprep.mubr.f32.mxu1 %v9776_v0  ;;  %2550 = vmatprep.mubr.f32.mxu0 %v9776_v0 }
  0xe0   : > { %2813 = vmatpush1.msra.mxu0 %v998_v62  ;;  %v808_v62 = vand.u32 255, %v488_v36  ;;  %v296_v36 = vunpack.c.2.s8 %v10343_v30 }
  0xe1   : > { %2814 = vmatprep.subr.mxu0 %v935_v55 }
  0xe2   : > { %v1562_v58 = vpop.f32.mrf.mxu0  ;;  %v1634_v60 = vpop.f32.mrf.mxu1  ;;  %9073 = vmatmul.mubr.msk.f32.gmra.mxu1 %vm1254_vm1, %v10376_v1  ;;  %9083 = vmatmul.mubr.msk.f32.gmra.mxu0 %vm1254_vm1, %v9954_v45 }
  0xe3   : > { %v6648_v29 = vmax.f32 %v1562_v58, 0.0  ;;  %2443 = vmatprep.mubr.f32.mxu1 %v9776_v0  ;;  %2556 = vmatprep.mubr.f32.mxu0 %v9776_v0  ;;  %v7416_v4 = vmax.f32 %v1634_v60, 0.0  ;;  %v10441_v58 = vld [vmem:[%s14378_s1] sm:$0xff]  ;;  %v744_v60 = vand.u32 255, %v424_v21  ;;  %v10478_v21 = vld [vmem:[%s14378_s1 + $0x10] sm:$0xff] }
  0xe4   : > { %v1564_v61 = vpop.f32.mrf.mxu0  ;;  %v1636_v3 = vpop.f32.mrf.mxu1  ;;  %2815 = vmatpush1.msra.mxu0 %v934_v7 }
  0xe5   : > { %v6649_v5 = vmax.f32 %v1564_v61, 0.0  ;;  %v7417_v6 = vmax.f32 %v1636_v3, 0.0  ;;  %9149 = vmatprep.subr.msk.mxu0 %vm1303_vm0, %v1195_v57 }
  0xe6   : > { %v1568_v8 = vpop.f32.mrf.mxu0  ;;  %v1640_v9 = vpop.f32.mrf.mxu1  ;;  %9074 = vmatmul.mubr.msk.f32.gmra.mxu1 %vm1254_vm1, %v10388_v11  ;;  %9084 = vmatmul.mubr.msk.f32.gmra.mxu0 %vm1254_vm1, %v9970_v59 }
  0xe7   : > { %v10394_v45 = vadd.f32 %v6649_v5, %v6648_v29  ;;  %v10396_v12 = vadd.f32 %v7417_v6, %v7416_v4  ;;  %v6712_v13 = vmax.f32 %v1568_v8, 0.0  ;;  %2449 = vmatprep.mubr.f32.mxu1 %v9776_v0  ;;  %2562 = vmatprep.mubr.f32.mxu0 %v9776_v0  ;;  %v7480_v19 = vmax.f32 %v1640_v9, 0.0 }
  0xe8   : > { %v1570_v14 = vpop.f32.mrf.mxu0  ;;  %v1642_v16 = vpop.f32.mrf.mxu1  ;;  %v1128_v6 = vcvt.s32.f32 %v808_v62  ;;  %v681_v8 = vand.u32 255, %v361_v54  ;;  %v360_v9 = vunpack.c.2.s8 %v10332_v15  ;;  %v1064_v15 = vcvt.s32.f32 %v744_v60 }
  0xe9   : > { %v6713_v47 = vmax.f32 %v1570_v14, 0.0  ;;  %v7481_v22 = vmax.f32 %v1642_v16, 0.0  ;;  %v616_v62 = vand.u32 255, %v296_v36  ;;  %v10532_v36 = vld [vmem:[%s9818_s20 + $0x1a8] sm:$0xff] }
  0xea   : > { %v1574_v23 = vpop.f32.mrf.mxu0  ;;  %v1646_v59 = vpop.f32.mrf.mxu1  ;;  %9075 = vmatmul.mubr.msk.f32.gmra.mxu1 %vm1254_vm1, %v10405_v24  ;;  %9085 = vmatmul.mubr.msk.f32.gmra.mxu0 %vm1254_vm1, %v9985_v10  ;;  %v425_v10 = vunpack.c.3.s8 %v10321_v63  ;;  %v680_v33 = vand.u32 255, %v360_v9 }
  0xeb   : > { %v10411_v25 = vadd.f32 %v6713_v47, %v6712_v13  ;;  %v10413_v44 = vadd.f32 %v7481_v22, %v7480_v19  ;;  %v6776_v27 = vmax.f32 %v1574_v23, 0.0  ;;  %2455 = vmatprep.mubr.f32.mxu1 %v9776_v0  ;;  %2568 = vmatprep.mubr.f32.mxu0 %v9776_v0  ;;  %v7544_v37 = vmax.f32 %v1646_v59, 0.0  ;;  %v10460_v22 = vld [vmem:[%s14378_s1 + $0x8] sm:$0xff] }
  0xec   : > { %v1576_v28 = vpop.f32.mrf.mxu0  ;;  %v1648_v31 = vpop.f32.mrf.mxu1  ;;  %v745_v63 = vand.u32 255, %v425_v10  ;;  %v297_v13 = vunpack.c.3.s8 %v10343_v30  ;;  %v557_v10 = vunpack.c.3.s8 %v10355_v46 }
  0xed   : > { %v6777_v38 = vmax.f32 %v1576_v28, 0.0  ;;  %v7545_v40 = vmax.f32 %v1648_v31, 0.0  ;;  %v1001_v31 = vcvt.s32.f32 %v681_v8 }
  0xee   : > { %v1580_v41 = vpop.f32.mrf.mxu0  ;;  %v1652_v43 = vpop.f32.mrf.mxu1  ;;  %9076 = vmatmul.mubr.msk.f32.gmra.mxu1 %vm1254_vm1, %v10422_v48  ;;  %9086 = vmatmul.mubr.msk.f32.gmra.mxu0 %vm1254_vm1, %v9998_v20  ;;  %v1065_v18 = vcvt.s32.f32 %v745_v63  ;;  %v617_v34 = vand.u32 255, %v297_v13 }
  0xef   : > { %v10429_v49 = vadd.f32 %v6777_v38, %v6776_v27  ;;  %v10431_v50 = vadd.f32 %v7545_v40, %v7544_v37  ;;  %v6840_v42 = vmax.f32 %v1580_v41, 0.0  ;;  %2574 = vmatprep.mubr.f32.mxu0 %v9776_v0  ;;  %2687 = vmatprep.mubr.f32.mxu1 %v9776_v0  ;;  %v7608_v55 = vmax.f32 %v1652_v43, 0.0 }
  0xf0   : > { %v1582_v51 = vpop.f32.mrf.mxu0  ;;  %v1654_v52 = vpop.f32.mrf.mxu1 }
  0xf1   : > { %v6841_v20 = vmax.f32 %v1582_v51, 0.0  ;;  %v7609_v56 = vmax.f32 %v1654_v52, 0.0 }
  0xf2   : > { %v1586_v7 = vpop.f32.mrf.mxu0  ;;  %v1723_v57 = vpop.f32.mrf.mxu1  ;;  %9087 = vmatmul.mubr.msk.f32.gmra.mxu0 %vm1254_vm1, %v10011_v26  ;;  %9097 = vmatmul.mubr.msk.f32.vlgmr.msra.gmra.mxu1 %vm1254_vm1, %v10441_v58 }
  0xf3   : > { %v10445_v29 = vadd.f32 %v6841_v20, %v6840_v42  ;;  %v10447_v61 = vadd.f32 %v7609_v56, %v7608_v55  ;;  %v6904_v3 = vmax.f32 %v1586_v7, 0.0  ;;  %v6650_v4 = vmax.f32 %v1723_v57, 0.0  ;;  %2580 = vmatprep.mubr.f32.mxu0 %v9776_v0  ;;  %2693 = vmatprep.mubr.f32.mxu1 %v9776_v0  ;;  %v10494_v57 = vld [vmem:[%s14378_s1 + $0x18] sm:$0xff] }
  0xf4   : > { %v1588_v26 = vpop.f32.mrf.mxu0  ;;  %v1725_v5 = vpop.f32.mrf.mxu1  ;;  %9132 = vmatpush1.msk.msra.mxu1 %vm1303_vm0, %v1192_v2  ;;  %v1000_v2 = vcvt.s32.f32 %v680_v33  ;;  %v877_v56 = vand.u32 255, %v557_v10 }
  0xf5   : > { %v7673_v14 = vadd.f32 %v10394_v45, %v6650_v4  ;;  %v6905_v16 = vmax.f32 %v1588_v26, 0.0  ;;  %v6651_v17 = vmax.f32 %v1725_v5, 0.0  ;;  %2969 = vmatprep.subr.mxu1 %v1129_v53  ;;  %v937_v53 = vcvt.s32.f32 %v617_v34  ;;  %v10527_v34 = vld [vmem:[%s14378_s1 + $0x28] sm:$0xff] }
  0xf6   : > { %v1592_v19 = vpop.f32.mrf.mxu0  ;;  %v1729_v47 = vpop.f32.mrf.mxu1  ;;  %9088 = vmatmul.mubr.msk.f32.gmra.mxu0 %vm1254_vm1, %v10022_v32  ;;  %9098 = vmatmul.mubr.msk.f32.gmra.mxu1 %vm1254_vm1, %v10460_v22  ;;  %v936_v5 = vcvt.s32.f32 %v616_v62  ;;  %v1197_v13 = vcvt.s32.f32 %v877_v56 }
  0xf7   : > { %v10464_v23 = vadd.f32 %v6905_v16, %v6904_v3  ;;  %v10466_v45 = vadd.f32 %v7673_v14, %v6651_v17  ;;  %v6968_v59 = vmax.f32 %v1592_v19, 0.0  ;;  %v6714_v27 = vmax.f32 %v1729_v47, 0.0  ;;  %2586 = vmatprep.mubr.f32.mxu0 %v9776_v0  ;;  %2699 = vmatprep.mubr.f32.mxu1 %v9776_v0  ;;  %v10510_v17 = vld [vmem:[%s14378_s1 + $0x20] sm:$0xff] }
  0xf8   : > { %v1594_v32 = vpop.f32.mrf.mxu0  ;;  %v1731_v28 = vpop.f32.mrf.mxu1  ;;  %2970 = vmatpush1.msra.mxu1 %v1128_v6 }
  0xf9   : > { %v7738_v37 = vadd.f32 %v10411_v25, %v6714_v27  ;;  %v6969_v38 = vmax.f32 %v1594_v32, 0.0  ;;  %v6715_v40 = vmax.f32 %v1731_v28, 0.0  ;;  %2971 = vmatprep.subr.mxu1 %v1065_v18 }
  0xfa   : > { %v1598_v41 = vpop.f32.mrf.mxu0  ;;  %v1735_v43 = vpop.f32.mrf.mxu1  ;;  %9089 = vmatmul.mubr.msk.f32.gmra.mxu0 %vm1254_vm1, %v10036_v35  ;;  %9099 = vmatmul.mubr.msk.f32.gmra.mxu1 %vm1254_vm1, %v10478_v21 }
  0xfb   : > { %v10482_v30 = vadd.f32 %v6969_v38, %v6968_v59  ;;  %v10484_v25 = vadd.f32 %v7738_v37, %v6715_v40  ;;  %v7032_v42 = vmax.f32 %v1598_v41, 0.0  ;;  %v6778_v51 = vmax.f32 %v1735_v43, 0.0  ;;  %2592 = vmatprep.mubr.f32.mxu0 %v9776_v0  ;;  %2705 = vmatprep.mubr.f32.mxu1 %v9776_v0 }
  0xfc   : > { %v1600_v52 = vpop.f32.mrf.mxu0  ;;  %v1737_v35 = vpop.f32.mrf.mxu1  ;;  %2972 = vmatpush1.msra.mxu1 %v1064_v15  ;;  %v554_v43 = vunpack.c.0.s8 %v10355_v46 }
  0xfd   : > { %v7803_v54 = vadd.f32 %v10429_v49, %v6778_v51  ;;  %v7033_v55 = vmax.f32 %v1600_v52, 0.0  ;;  %v6779_v20 = vmax.f32 %v1737_v35, 0.0  ;;  %2973 = vmatprep.subr.mxu1 %v1001_v31  ;;  %v491_v35 = vunpack.c.1.s8 %v10532_v36 }
  0xfe   : > { %v1604_v63 = vpop.f32.mrf.mxu0  ;;  %v1741_v7 = vpop.f32.mrf.mxu1  ;;  %9090 = vmatmul.mubr.msk.f32.gmra.mxu0 %vm1254_vm1, %v10053_v39  ;;  %9100 = vmatmul.mubr.msk.f32.gmra.mxu1 %vm1254_vm1, %v10494_v57 }
  0xff   : > { %v10498_v60 = vadd.f32 %v7033_v55, %v7032_v42  ;;  %v10500_v49 = vadd.f32 %v7803_v54, %v6779_v20  ;;  %v7096_v3 = vmax.f32 %v1604_v63, 0.0  ;;  %v6842_v4 = vmax.f32 %v1741_v7, 0.0  ;;  %2598 = vmatprep.mubr.f32.mxu0 %v9776_v0  ;;  %2711 = vmatprep.mubr.f32.mxu1 %v9776_v0  ;;  %v10551_v54 = vld [vmem:[%s14378_s1 + $0x30] sm:$0xff] }
 0x100   : > { %v1606_v26 = vpop.f32.mrf.mxu0  ;;  %v1743_v39 = vpop.f32.mrf.mxu1  ;;  %2974 = vmatpush1.msra.mxu1 %v1000_v2  ;;  %v10544_v2 = vld [vmem:[%s9818_s20 + $0x128] sm:$0xff] }
 0x101   : > { %v7868_v6 = vadd.f32 %v10445_v29, %v6842_v4  ;;  %v7097_v8 = vmax.f32 %v1606_v26, 0.0  ;;  %v6843_v9 = vmax.f32 %v1743_v39, 0.0  ;;  %2975 = vmatprep.subr.mxu1 %v937_v53  ;;  %v490_v4 = vunpack.c.0.s8 %v10532_v36 }
 0x102   : > { %v1610_v14 = vpop.f32.mrf.mxu0  ;;  %v1747_v16 = vpop.f32.mrf.mxu1  ;;  %9091 = vmatmul.mubr.msk.f32.gmra.mxu0 %vm1254_vm1, %v10376_v1  ;;  %9101 = vmatmul.mubr.msk.f32.gmra.mxu1 %vm1254_vm1, %v10510_v17  ;;  %v427_v26 = vunpack.c.1.s8 %v10544_v2 }
 0x103   : > { %v10514_v18 = vadd.f32 %v7097_v8, %v7096_v3  ;;  %v10516_v29 = vadd.f32 %v7868_v6, %v6843_v9  ;;  %v7160_v19 = vmax.f32 %v1610_v14, 0.0  ;;  %v6906_v47 = vmax.f32 %v1747_v16, 0.0  ;;  %2604 = vmatprep.mubr.f32.mxu0 %v9776_v0  ;;  %2717 = vmatprep.mubr.f32.mxu1 %v9776_v0  ;;  %v10565_v9 = vld [vmem:[%s9818_s20 + $0xa8] sm:$0xff]  ;;  %v10572_v16 = vld [vmem:[%s14378_s1 + $0x38] sm:$0xff] }
 0x104   : > { %v1612_v15 = vpop.f32.mrf.mxu0  ;;  %v1749_v59 = vpop.f32.mrf.mxu1  ;;  %2976 = vmatpush1.msra.mxu1 %v936_v5  ;;  %v874_v3 = vand.u32 255, %v554_v43  ;;  %v811_v8 = vand.u32 255, %v491_v35  ;;  %v10591_v35 = vld [vmem:[%s14378_s1 + $0x40] sm:$0xff] }
 0x105   : > { %v7933_v27 = vadd.f32 %v10464_v23, %v6906_v47  ;;  %v7161_v32 = vmax.f32 %v1612_v15, 0.0  ;;  %v6907_v28 = vmax.f32 %v1749_v59, 0.0  ;;  %9167 = vmatprep.subr.msk.mxu1 %vm1303_vm0, %v1197_v13 }
 0x106   : > { %v1616_v31 = vpop.f32.mrf.mxu0  ;;  %v1753_v33 = vpop.f32.mrf.mxu1  ;;  %9092 = vmatmul.mubr.msk.f32.gmra.mxu0 %vm1254_vm1, %v10388_v11  ;;  %9102 = vmatmul.mubr.msk.f32.gmra.mxu1 %vm1254_vm1, %v10527_v34  ;;  %v1131_v43 = vcvt.s32.f32 %v811_v8 }
 0x107   : > { %v10534_v23 = vadd.f32 %v7161_v32, %v7160_v19  ;;  %v10536_v37 = vadd.f32 %v7933_v27, %v6907_v28  ;;  %v7224_v38 = vmax.f32 %v1616_v31, 0.0  ;;  %v6970_v40 = vmax.f32 %v1753_v33, 0.0  ;;  %2610 = vmatprep.mubr.f32.mxu0 %v9776_v0  ;;  %2723 = vmatprep.mubr.f32.mxu1 %v9776_v0 }
 0x108   : > { %v1618_v10 = vpop.f32.mrf.mxu0  ;;  %v1755_v41 = vpop.f32.mrf.mxu1  ;;  %v1194_v28 = vcvt.s32.f32 %v874_v3  ;;  %v810_v31 = vand.u32 255, %v490_v4  ;;  %v747_v33 = vand.u32 255, %v427_v26 }
 0x109   : > { %v7998_v42 = vadd.f32 %v10482_v30, %v6970_v40  ;;  %v7225_v51 = vmax.f32 %v1618_v10, 0.0  ;;  %v6971_v52 = vmax.f32 %v1755_v41, 0.0 }
 0x10a   : > { %v1622_v53 = vpop.f32.mrf.mxu0  ;;  %v1759_v62 = vpop.f32.mrf.mxu1  ;;  %9093 = vmatmul.mubr.msk.f32.gmra.mxu0 %vm1254_vm1, %v10405_v24  ;;  %9103 = vmatmul.mubr.msk.f32.gmra.mxu1 %vm1254_vm1, %v10551_v54  ;;  %v1130_v4 = vcvt.s32.f32 %v810_v31  ;;  %v1067_v26 = vcvt.s32.f32 %v747_v33 }
 0x10b   : > { %v10555_v30 = vadd.f32 %v7225_v51, %v7224_v38  ;;  %v10557_v55 = vadd.f32 %v7998_v42, %v6971_v52  ;;  %v7288_v20 = vmax.f32 %v1622_v53, 0.0  ;;  %v7034_v56 = vmax.f32 %v1759_v62, 0.0  ;;  %2616 = vmatprep.mubr.f32.mxu0 %v9776_v0  ;;  %2729 = vmatprep.mubr.f32.mxu1 %v9776_v0  ;;  %v10586_v42 = vld [vmem:[%s9818_s20 + $0x28] sm:$0xff] }
 0x10c   : > { %v1624_v63 = vpop.f32.mrf.mxu0  ;;  %v1761_v7 = vpop.f32.mrf.mxu1  ;;  %v363_v38 = vunpack.c.1.s8 %v10565_v9 }
 0x10d   : > { %v8063_v39 = vadd.f32 %v10498_v60, %v7034_v56  ;;  %v7289_v5 = vmax.f32 %v1624_v63, 0.0  ;;  %v7035_v6 = vmax.f32 %v1761_v7, 0.0  ;;  %v426_v60 = vunpack.c.0.s8 %v10544_v2 }
 0x10e   : > { %v1628_v13 = vpop.f32.mrf.mxu0  ;;  %v1765_v14 = vpop.f32.mrf.mxu1  ;;  %9094 = vmatmul.mubr.msk.f32.gmra.mxu0 %vm1254_vm1, %v10422_v48  ;;  %9104 = vmatmul.mubr.msk.f32.gmra.mxu1 %vm1254_vm1, %v10572_v16 }
 0x10f   : > { %v10577_v19 = vadd.f32 %v7289_v5, %v7288_v20  ;;  %v10579_v47 = vadd.f32 %v8063_v39, %v7035_v6  ;;  %v7352_v15 = vmax.f32 %v1628_v13, 0.0  ;;  %v7098_v59 = vmax.f32 %v1765_v14, 0.0  ;;  %2735 = vmatprep.mubr.f32.mxu1 %v9776_v0  ;;  %2848 = vmatprep.mubr.f32.mxu0 %v9776_v0 }
 0x110   : > { %v1630_v27 = vpop.f32.mrf.mxu0  ;;  %v1767_v32 = vpop.f32.mrf.mxu1  ;;  %v746_v53 = vand.u32 255, %v426_v60  ;;  %v683_v39 = vand.u32 255, %v363_v38  ;;  %v299_v5 = vunpack.c.1.s8 %v10586_v42  ;;  %v10609_v60 = vld [vmem:[%s9818_s20 + $0x230] sm:$0x55] }
 0x111   : > { %v8128_v40 = vadd.f32 %v10514_v18, %v7098_v59  ;;  %v7353_v10 = vmax.f32 %v1630_v27, 0.0  ;;  %v7099_v41 = vmax.f32 %v1767_v32, 0.0  ;;  %v362_v18 = vunpack.c.0.s8 %v10565_v9  ;;  %v10614_v27 = vld [vmem:[%s14378_s1 + $0x48] sm:$0xff] }
 0x112   : > { %v1771_v51 = vpop.f32.mrf.mxu1  ;;  %v1884_v52 = vpop.f32.mrf.mxu0  ;;  %9105 = vmatmul.mubr.msk.f32.gmra.mxu1 %vm1254_vm1, %v10591_v35  ;;  %9115 = vmatmul.mubr.msk.f32.vlgmr.msra.gmra.mxu0 %vm1254_vm1, %v10441_v58 }
 0x113   : > { %v10598_v62 = vadd.f32 %v7353_v10, %v7352_v15  ;;  %v10600_v20 = vadd.f32 %v8128_v40, %v7099_v41  ;;  %v7162_v56 = vmax.f32 %v1771_v51, 0.0  ;;  %v6652_v63 = vmax.f32 %v1884_v52, 0.0  ;;  %2741 = vmatprep.mubr.f32.mxu1 %v9776_v0  ;;  %2854 = vmatprep.mubr.f32.mxu0 %v9776_v0 }
 0x114   : > { %v1773_v7 = vpop.f32.mrf.mxu1  ;;  %v1886_v3 = vpop.f32.mrf.mxu0  ;;  %9150 = vmatpush1.msk.msra.mxu0 %vm1303_vm0, %v1194_v28  ;;  %v1003_v10 = vcvt.s32.f32 %v683_v39  ;;  %v619_v41 = vand.u32 255, %v299_v5  ;;  %v559_v51 = vunpack.c.1.s8 %v10609_v60 }
 0x115   : > { %v8193_v6 = vadd.f32 %v10534_v23, %v7162_v56  ;;  %v7675_v8 = vadd.f32 %v10466_v45, %v6652_v63  ;;  %v7163_v13 = vmax.f32 %v1773_v7, 0.0  ;;  %v6653_v14 = vmax.f32 %v1886_v3, 0.0  ;;  %3130 = vmatprep.subr.mxu0 %v1131_v43  ;;  %v10633_v3 = vld [vmem:[%s14378_s1 + $0x50] sm:$0xff] }
 0x116   : > { %v1777_v15 = vpop.f32.mrf.mxu1  ;;  %v1890_v59 = vpop.f32.mrf.mxu0  ;;  %9106 = vmatmul.mubr.msk.f32.gmra.mxu1 %vm1254_vm1, %v10614_v27  ;;  %9116 = vmatmul.mubr.msk.f32.gmra.mxu0 %vm1254_vm1, %v10460_v22  ;;  %v1066_v23 = vcvt.s32.f32 %v746_v53  ;;  %v682_v45 = vand.u32 255, %v362_v18  ;;  %v298_v43 = vunpack.c.0.s8 %v10586_v42 }
 0x117   : > { %v10620_v32 = vadd.f32 %v8193_v6, %v7163_v13  ;;  %v10622_v28 = vadd.f32 %v7675_v8, %v6653_v14  ;;  %v7226_v31 = vmax.f32 %v1777_v15, 0.0  ;;  %v6716_v33 = vmax.f32 %v1890_v59, 0.0  ;;  %2747 = vmatprep.mubr.f32.mxu1 %v9776_v0  ;;  %2860 = vmatprep.mubr.f32.mxu0 %v9776_v0 }
 0x118   : > { %v1779_v38 = vpop.f32.mrf.mxu1  ;;  %v1892_v40 = vpop.f32.mrf.mxu0  ;;  %3131 = vmatpush1.msra.mxu0 %v1130_v4  ;;  %v1002_v6 = vcvt.s32.f32 %v682_v45  ;;  %v939_v8 = vcvt.s32.f32 %v619_v41  ;;  %v618_v13 = vand.u32 255, %v298_v43  ;;  %v879_v14 = vand.u32 255, %v559_v51 }
 0x119   : > { %v8258_v52 = vadd.f32 %v10555_v30, %v7226_v31  ;;  %v7740_v53 = vadd.f32 %v10484_v25, %v6716_v33  ;;  %v7227_v18 = vmax.f32 %v1779_v38, 0.0  ;;  %v6717_v56 = vmax.f32 %v1892_v40, 0.0  ;;  %3132 = vmatprep.subr.mxu0 %v1067_v26 }
 0x11a   : > { %v1783_v63 = vpop.f32.mrf.mxu1  ;;  %v1896_v7 = vpop.f32.mrf.mxu0  ;;  %9107 = vmatmul.mubr.msk.f32.gmra.mxu1 %vm1254_vm1, %v10633_v3  ;;  %9117 = vmatmul.mubr.msk.f32.gmra.mxu0 %vm1254_vm1, %v10478_v21  ;;  %v938_v43 = vcvt.s32.f32 %v618_v13  ;;  %v1199_v51 = vcvt.s32.f32 %v879_v14 }
 0x11b   : > { %v10639_v4 = vadd.f32 %v8258_v52, %v7227_v18  ;;  %v10641_v30 = vadd.f32 %v7740_v53, %v6717_v56  ;;  %v7290_v25 = vmax.f32 %v1783_v63, 0.0  ;;  %v6780_v39 = vmax.f32 %v1896_v7, 0.0  ;;  %2753 = vmatprep.mubr.f32.mxu1 %v9776_v0  ;;  %2866 = vmatprep.mubr.f32.mxu0 %v9776_v0  ;;  %v10650_v52 = vld [vmem:[%s14378_s1 + $0x58] sm:$0xff] }
 0x11c   : > { %v1785_v26 = vpop.f32.mrf.mxu1  ;;  %v1898_v5 = vpop.f32.mrf.mxu0  ;;  %3133 = vmatpush1.msra.mxu0 %v1066_v23 }
 0x11d   : > { %v8323_v15 = vadd.f32 %v10577_v19, %v7290_v25  ;;  %v7805_v59 = vadd.f32 %v10500_v49, %v6780_v39  ;;  %v7291_v31 = vmax.f32 %v1785_v26, 0.0  ;;  %v6781_v33 = vmax.f32 %v1898_v5, 0.0  ;;  %3134 = vmatprep.subr.mxu0 %v1003_v10 }
 0x11e   : > { %v1789_v38 = vpop.f32.mrf.mxu1  ;;  %v1902_v40 = vpop.f32.mrf.mxu0  ;;  %9108 = vmatmul.mubr.msk.f32.gmra.mxu1 %vm1254_vm1, %v10650_v52  ;;  %9118 = vmatmul.mubr.msk.f32.gmra.mxu0 %vm1254_vm1, %v10494_v57 }
 0x11f   : > { %v10656_v23 = vadd.f32 %v8323_v15, %v7291_v31  ;;  %v10658_v19 = vadd.f32 %v7805_v59, %v6781_v33  ;;  %v7354_v49 = vmax.f32 %v1789_v38, 0.0  ;;  %v6844_v45 = vmax.f32 %v1902_v40, 0.0  ;;  %2759 = vmatprep.mubr.f32.mxu1 %v9776_v0  ;;  %2872 = vmatprep.mubr.f32.mxu0 %v9776_v0 }
 0x120   : > { %v1791_v10 = vpop.f32.mrf.mxu1  ;;  %v1904_v41 = vpop.f32.mrf.mxu0  ;;  %3135 = vmatpush1.msra.mxu0 %v1002_v6 }
 0x121   : > { %v8388_v53 = vadd.f32 %v10598_v62, %v7354_v49  ;;  %v7870_v18 = vadd.f32 %v10516_v29, %v6844_v45  ;;  %v7355_v56 = vmax.f32 %v1791_v10, 0.0  ;;  %v6845_v63 = vmax.f32 %v1904_v41, 0.0  ;;  %3136 = vmatprep.subr.mxu0 %v939_v8 }
 0x122   : > { %v1795_v7 = vpop.f32.mrf.mxu1  ;;  %v1908_v25 = vpop.f32.mrf.mxu0  ;;  %9109 = vmatmul.mubr.msk.f32.gmra.mxu1 %vm1254_vm1, %v10376_v1  ;;  %9119 = vmatmul.mubr.msk.f32.gmra.mxu0 %vm1254_vm1, %v10510_v17  ;;  %v556_v45 = vunpack.c.2.s8 %v10355_v46  ;;  %v493_v10 = vunpack.c.3.s8 %v10532_v36 }
 0x123   : > { %v10668_v39 = vadd.f32 %v8388_v53, %v7355_v56  ;;  %v10670_v26 = vadd.f32 %v7870_v18, %v6845_v63  ;;  %v7418_v5 = vmax.f32 %v1795_v7, 0.0  ;;  %v6908_v6 = vmax.f32 %v1908_v25, 0.0  ;;  %2765 = vmatprep.mubr.f32.mxu1 %v9776_v0  ;;  %2878 = vmatprep.mubr.f32.mxu0 %v9776_v0 }
 0x124   : > { %v1797_v29 = vpop.f32.mrf.mxu1  ;;  %v1910_v62 = vpop.f32.mrf.mxu0  ;;  %3137 = vmatpush1.msra.mxu0 %v938_v43 }
 0x125   : > { %v8453_v8 = vadd.f32 %v10396_v12, %v7418_v5  ;;  %v7935_v13 = vadd.f32 %v10536_v37, %v6908_v6  ;;  %v7419_v14 = vmax.f32 %v1797_v29, 0.0  ;;  %v6909_v15 = vmax.f32 %v1910_v62, 0.0  ;;  %9185 = vmatprep.subr.msk.mxu0 %vm1303_vm0, %v1199_v51 }
 0x126   : > { %v1801_v59 = vpop.f32.mrf.mxu1  ;;  %v1914_v31 = vpop.f32.mrf.mxu0  ;;  %9110 = vmatmul.mubr.msk.f32.gmra.mxu1 %vm1254_vm1, %v10388_v11  ;;  %9120 = vmatmul.mubr.msk.f32.gmra.mxu0 %vm1254_vm1, %v10527_v34  ;;  %v876_v5 = vand.u32 255, %v556_v45  ;;  %v813_v6 = vand.u32 255, %v493_v10  ;;  %v492_v29 = vunpack.c.2.s8 %v10532_v36  ;;  %v429_v62 = vunpack.c.3.s8 %v10544_v2 }
 0x127   : > { %v10681_v33 = vadd.f32 %v8453_v8, %v7419_v14  ;;  %v10683_v38 = vadd.f32 %v7935_v13, %v6909_v15  ;;  %v7482_v40 = vmax.f32 %v1801_v59, 0.0  ;;  %v6972_v12 = vmax.f32 %v1914_v31, 0.0  ;;  %2771 = vmatprep.mubr.f32.mxu1 %v9776_v0  ;;  %2884 = vmatprep.mubr.f32.mxu0 %v9776_v0 }
 0x128   : > { %v1803_v37 = vpop.f32.mrf.mxu1  ;;  %v1916_v49 = vpop.f32.mrf.mxu0  ;;  %v365_v36 = vunpack.c.3.s8 %v10565_v9  ;;  %v1196_v10 = vcvt.s32.f32 %v876_v5 }
 0x129   : > { %v8518_v41 = vadd.f32 %v10413_v44, %v7482_v40  ;;  %v8000_v43 = vadd.f32 %v10557_v55, %v6972_v12  ;;  %v7483_v51 = vmax.f32 %v1803_v37, 0.0  ;;  %v6973_v53 = vmax.f32 %v1916_v49, 0.0 }
 0x12a   : > { %v1807_v18 = vpop.f32.mrf.mxu1  ;;  %v1920_v56 = vpop.f32.mrf.mxu0  ;;  %9111 = vmatmul.mubr.msk.f32.gmra.mxu1 %vm1254_vm1, %v10405_v24  ;;  %9121 = vmatmul.mubr.msk.f32.gmra.mxu0 %vm1254_vm1, %v10551_v54  ;;  %v428_v40 = vunpack.c.2.s8 %v10544_v2 }
 0x12b   : > { %v10695_v63 = vadd.f32 %v8518_v41, %v7483_v51  ;;  %v10697_v7 = vadd.f32 %v8000_v43, %v6973_v53  ;;  %v7546_v46 = vmax.f32 %v1807_v18, 0.0  ;;  %v7036_v25 = vmax.f32 %v1920_v56, 0.0  ;;  %2777 = vmatprep.mubr.f32.mxu1 %v9776_v0  ;;  %2890 = vmatprep.mubr.f32.mxu0 %v9776_v0 }
 0x12c   : > { %v1809_v44 = vpop.f32.mrf.mxu1  ;;  %v1922_v55 = vpop.f32.mrf.mxu0  ;;  %v1133_v41 = vcvt.s32.f32 %v813_v6  ;;  %v812_v43 = vand.u32 255, %v492_v29  ;;  %v749_v51 = vand.u32 255, %v429_v62 }
 0x12d   : > { %v8583_v8 = vadd.f32 %v10431_v50, %v7546_v46  ;;  %v8065_v13 = vadd.f32 %v10579_v47, %v7036_v25  ;;  %v7547_v14 = vmax.f32 %v1809_v44, 0.0  ;;  %v7037_v15 = vmax.f32 %v1922_v55, 0.0 }
 0x12e   : > { %v1813_v59 = vpop.f32.mrf.mxu1  ;;  %v1926_v31 = vpop.f32.mrf.mxu0  ;;  %9112 = vmatmul.mubr.msk.f32.gmra.mxu1 %vm1254_vm1, %v10422_v48  ;;  %9122 = vmatmul.mubr.msk.f32.gmra.mxu0 %vm1254_vm1, %v10572_v16  ;;  %v748_v44 = vand.u32 255, %v428_v40  ;;  %v10723_v55 = vand.u32 255, %v365_v36 }
 0x12f   : > { %v10711_v12 = vadd.f32 %v8583_v8, %v7547_v14  ;;  %v10713_v37 = vadd.f32 %v8065_v13, %v7037_v15  ;;  %v7610_v50 = vmax.f32 %v1813_v59, 0.0  ;;  %v7100_v47 = vmax.f32 %v1926_v31, 0.0  ;;  %2896 = vmatprep.mubr.f32.mxu0 %v9776_v0  ;;  %3009 = vmatprep.mubr.f32.mxu1 %v9776_v0 }
 0x130   : > { %v1815_v49 = vpop.f32.mrf.mxu1  ;;  %v1928_v45 = vpop.f32.mrf.mxu0  ;;  %v1132_v8 = vcvt.s32.f32 %v812_v43  ;;  %v1069_v13 = vcvt.s32.f32 %v749_v51  ;;  %v364_v14 = vunpack.c.2.s8 %v10565_v9  ;;  %v301_v15 = vunpack.c.3.s8 %v10586_v42 }
 0x131   : > { %v8648_v2 = vadd.f32 %v10447_v61, %v7610_v50  ;;  %v8130_v53 = vadd.f32 %v10600_v20, %v7100_v47  ;;  %v7611_v18 = vmax.f32 %v1815_v49, 0.0  ;;  %v7101_v56 = vmax.f32 %v1928_v45, 0.0 }
 0x132   : > { %v1932_v46 = vpop.f32.mrf.mxu0  ;;  %v2045_v25 = vpop.f32.mrf.mxu1  ;;  %9123 = vmatmul.mubr.msk.f32.gmra.mxu0 %vm1254_vm1, %v10591_v35  ;;  %9133 = vmatmul.mubr.msk.f32.vlgmr.msra.gmra.mxu1 %vm1254_vm1, %v10441_v58  ;;  %v1068_v49 = vcvt.s32.f32 %v748_v44  ;;  %v1005_v9 = vcvt.s32.f32 %v10723_v55  ;;  %v684_v51 = vand.u32 255, %v364_v14 }
 0x133   : > { %v10725_v5 = vadd.f32 %v8648_v2, %v7611_v18  ;;  %v10727_v6 = vadd.f32 %v8130_v53, %v7101_v56  ;;  %v7164_v61 = vmax.f32 %v1932_v46, 0.0  ;;  %v6654_v29 = vmax.f32 %v2045_v25, 0.0  ;;  %2902 = vmatprep.mubr.f32.mxu0 %v9776_v0  ;;  %3015 = vmatprep.mubr.f32.mxu1 %v9776_v0 }
 0x134   : > { %v1934_v20 = vpop.f32.mrf.mxu0  ;;  %v2047_v62 = vpop.f32.mrf.mxu1  ;;  %9168 = vmatpush1.msk.msra.mxu1 %vm1303_vm0, %v1196_v10  ;;  %v621_v2 = vand.u32 255, %v301_v15  ;;  %v300_v53 = vunpack.c.2.s8 %v10586_v42  ;;  %v561_v18 = vunpack.c.3.s8 %v10609_v60 }
 0x135   : > { %v8195_v59 = vadd.f32 %v10620_v32, %v7164_v61  ;;  %v7677_v31 = vadd.f32 %v10622_v28, %v6654_v29  ;;  %v7165_v40 = vmax.f32 %v1934_v20, 0.0  ;;  %v6655_v36 = vmax.f32 %v2047_v62, 0.0  ;;  %3291 = vmatprep.subr.mxu1 %v1133_v41 }
 0x136   : > { %v1938_v50 = vpop.f32.mrf.mxu0  ;;  %v2051_v47 = vpop.f32.mrf.mxu1  ;;  %9124 = vmatmul.mubr.msk.f32.gmra.mxu0 %vm1254_vm1, %v10614_v27  ;;  %9134 = vmatmul.mubr.msk.f32.gmra.mxu1 %vm1254_vm1, %v10460_v22  ;;  %v620_v14 = vand.u32 255, %v300_v53  ;;  %v881_v15 = vand.u32 255, %v561_v18 }
 0x137   : > { %v10741_v45 = vadd.f32 %v8195_v59, %v7165_v40  ;;  %v10743_v10 = vadd.f32 %v7677_v31, %v6655_v36  ;;  %v7228_v32 = vmax.f32 %v1938_v50, 0.0  ;;  %v6718_v28 = vmax.f32 %v2051_v47, 0.0  ;;  %2908 = vmatprep.mubr.f32.mxu0 %v9776_v0  ;;  %3021 = vmatprep.mubr.f32.mxu1 %v9776_v0 }
 0x138   : > { %v1940_v41 = vpop.f32.mrf.mxu0  ;;  %v2053_v43 = vpop.f32.mrf.mxu1  ;;  %3292 = vmatpush1.msra.mxu1 %v1132_v8  ;;  %v1004_v8 = vcvt.s32.f32 %v684_v51 }
 0x139   : > { %v8260_v56 = vadd.f32 %v10639_v4, %v7228_v32  ;;  %v7742_v46 = vadd.f32 %v10641_v30, %v6718_v28  ;;  %v7229_v25 = vmax.f32 %v1940_v41, 0.0  ;;  %v6719_v44 = vmax.f32 %v2053_v43, 0.0  ;;  %3293 = vmatprep.subr.mxu1 %v1069_v13 }
 0x13a   : > { %v1944_v55 = vpop.f32.mrf.mxu0  ;;  %v2057_v61 = vpop.f32.mrf.mxu1  ;;  %9125 = vmatmul.mubr.msk.f32.gmra.mxu0 %vm1254_vm1, %v10633_v3  ;;  %9135 = vmatmul.mubr.msk.f32.gmra.mxu1 %vm1254_vm1, %v10478_v21  ;;  %v941_v13 = vcvt.s32.f32 %v621_v2  ;;  %v1201_v43 = vcvt.s32.f32 %v881_v15 }
 0x13b   : > { %v10755_v29 = vadd.f32 %v8260_v56, %v7229_v25  ;;  %v10757_v42 = vadd.f32 %v7742_v46, %v6719_v44  ;;  %v7292_v20 = vmax.f32 %v1944_v55, 0.0  ;;  %v6782_v62 = vmax.f32 %v2057_v61, 0.0  ;;  %2914 = vmatprep.mubr.f32.mxu0 %v9776_v0  ;;  %3027 = vmatprep.mubr.f32.mxu1 %v9776_v0 }
 0x13c   : > { %v1946_v4 = vpop.f32.mrf.mxu0  ;;  %v2059_v30 = vpop.f32.mrf.mxu1  ;;  %3294 = vmatpush1.msra.mxu1 %v1068_v49 }
 0x13d   : > { %v8325_v59 = vadd.f32 %v10656_v23, %v7292_v20  ;;  %v7807_v31 = vadd.f32 %v10658_v19, %v6782_v62  ;;  %v7293_v40 = vmax.f32 %v1946_v4, 0.0  ;;  %v6783_v36 = vmax.f32 %v2059_v30, 0.0  ;;  %3295 = vmatprep.subr.mxu1 %v1005_v9  ;;  %v10788_v30 = vld [vmem:[%s9818_s20 + $0x1b0] sm:$0xff] }
 0x13e   : > { %v1950_v50 = vpop.f32.mrf.mxu0  ;;  %v2063_v47 = vpop.f32.mrf.mxu1  ;;  %9126 = vmatmul.mubr.msk.f32.gmra.mxu0 %vm1254_vm1, %v10650_v52  ;;  %9136 = vmatmul.mubr.msk.f32.gmra.mxu1 %vm1254_vm1, %v10494_v57  ;;  %v940_v9 = vcvt.s32.f32 %v620_v14  ;;  %v558_v14 = vunpack.c.0.s8 %v10609_v60 }
 0x13f   : > { %v10767_v49 = vadd.f32 %v8325_v59, %v7293_v40  ;;  %v10769_v32 = vadd.f32 %v7807_v31, %v6783_v36  ;;  %v7356_v28 = vmax.f32 %v1950_v50, 0.0  ;;  %v6846_v41 = vmax.f32 %v2063_v47, 0.0  ;;  %2920 = vmatprep.mubr.f32.mxu0 %v9776_v0  ;;  %3033 = vmatprep.mubr.f32.mxu1 %v9776_v0 }
 0x140   : > { %v1952_v23 = vpop.f32.mrf.mxu0  ;;  %v2065_v19 = vpop.f32.mrf.mxu1  ;;  %3296 = vmatpush1.msra.mxu1 %v1004_v8 }
 0x141   : > { %v8390_v51 = vadd.f32 %v10668_v39, %v7356_v28  ;;  %v7872_v2 = vadd.f32 %v10670_v26, %v6846_v41  ;;  %v7357_v53 = vmax.f32 %v1952_v23, 0.0  ;;  %v6847_v18 = vmax.f32 %v2065_v19, 0.0  ;;  %3297 = vmatprep.subr.mxu1 %v941_v13  ;;  %v10806_v41 = vld [vmem:[%s9818_s20 + $0x130] sm:$0xff] }
 0x142   : > { %v1956_v56 = vpop.f32.mrf.mxu0  ;;  %v2069_v46 = vpop.f32.mrf.mxu1  ;;  %9127 = vmatmul.mubr.msk.f32.gmra.mxu0 %vm1254_vm1, %v10376_v1  ;;  %9137 = vmatmul.mubr.msk.f32.gmra.mxu1 %vm1254_vm1, %v10510_v17 }
 0x143   : > { %v10779_v25 = vadd.f32 %v8390_v51, %v7357_v53  ;;  %v10781_v44 = vadd.f32 %v7872_v2, %v6847_v18  ;;  %v7420_v55 = vmax.f32 %v1956_v56, 0.0  ;;  %v6910_v39 = vmax.f32 %v2069_v46, 0.0  ;;  %2926 = vmatprep.mubr.f32.mxu0 %v9776_v0  ;;  %3039 = vmatprep.mubr.f32.mxu1 %v9776_v0 }
 0x144   : > { %v1958_v26 = vpop.f32.mrf.mxu0  ;;  %v2071_v61 = vpop.f32.mrf.mxu1  ;;  %3298 = vmatpush1.msra.mxu1 %v940_v9  ;;  %v878_v9 = vand.u32 255, %v558_v14  ;;  %v431_v56 = vunpack.c.1.s8 %v10806_v41 }
 0x145   : > { %v8455_v20 = vadd.f32 %v10681_v33, %v7420_v55  ;;  %v7937_v1 = vadd.f32 %v10683_v38, %v6910_v39  ;;  %v7421_v62 = vmax.f32 %v1958_v26, 0.0  ;;  %v6911_v4 = vmax.f32 %v2071_v61, 0.0  ;;  %9203 = vmatprep.subr.msk.mxu1 %vm1303_vm0, %v1201_v43  ;;  %v10823_v61 = vld [vmem:[%s9818_s20 + $0xb0] sm:$0xff] }
 0x146   : > { %v1962_v8 = vpop.f32.mrf.mxu0  ;;  %v2075_v13 = vpop.f32.mrf.mxu1  ;;  %9128 = vmatmul.mubr.msk.f32.gmra.mxu0 %vm1254_vm1, %v10388_v11  ;;  %9138 = vmatmul.mubr.msk.f32.gmra.mxu1 %vm1254_vm1, %v10527_v34  ;;  %v495_v11 = vunpack.c.1.s8 %v10788_v30  ;;  %v494_v43 = vunpack.c.0.s8 %v10788_v30 }
 0x147   : > { %v10796_v33 = vadd.f32 %v8455_v20, %v7421_v62  ;;  %v10798_v38 = vadd.f32 %v7937_v1, %v6911_v4  ;;  %v7484_v15 = vmax.f32 %v1962_v8, 0.0  ;;  %v6974_v59 = vmax.f32 %v2075_v13, 0.0  ;;  %2932 = vmatprep.mubr.f32.mxu0 %v9776_v0  ;;  %3045 = vmatprep.mubr.f32.mxu1 %v9776_v0 }
 0x148   : > { %v1964_v31 = vpop.f32.mrf.mxu0  ;;  %v2077_v40 = vpop.f32.mrf.mxu1  ;;  %v1198_v62 = vcvt.s32.f32 %v878_v9  ;;  %v814_v4 = vand.u32 255, %v494_v43  ;;  %v366_v43 = vunpack.c.0.s8 %v10823_v61 }
 0x149   : > { %v8520_v36 = vadd.f32 %v10695_v63, %v7484_v15  ;;  %v8002_v50 = vadd.f32 %v10697_v7, %v6974_v59  ;;  %v7485_v47 = vmax.f32 %v1964_v31, 0.0  ;;  %v6975_v28 = vmax.f32 %v2077_v40, 0.0 }
 0x14a   : > { %v1968_v23 = vpop.f32.mrf.mxu0  ;;  %v2081_v19 = vpop.f32.mrf.mxu1  ;;  %9129 = vmatmul.mubr.msk.f32.gmra.mxu0 %vm1254_vm1, %v10405_v24  ;;  %9139 = vmatmul.mubr.msk.f32.gmra.mxu1 %vm1254_vm1, %v10551_v54  ;;  %v815_v24 = vand.u32 255, %v495_v11  ;;  %v430_v31 = vunpack.c.0.s8 %v10806_v41  ;;  %v367_v40 = vunpack.c.1.s8 %v10823_v61  ;;  %v1134_v9 = vcvt.s32.f32 %v814_v4 }
 0x14b   : > { %v10813_v51 = vadd.f32 %v8520_v36, %v7485_v47  ;;  %v10815_v63 = vadd.f32 %v8002_v50, %v6975_v28  ;;  %v7548_v7 = vmax.f32 %v1968_v23, 0.0  ;;  %v7038_v2 = vmax.f32 %v2081_v19, 0.0  ;;  %2938 = vmatprep.mubr.f32.mxu0 %v9776_v0  ;;  %3051 = vmatprep.mubr.f32.mxu1 %v9776_v0  ;;  %v10840_v28 = vld [vmem:[%s9818_s20 + $0x30] sm:$0xff] }
 0x14c   : > { %v1970_v53 = vpop.f32.mrf.mxu0  ;;  %v2083_v18 = vpop.f32.mrf.mxu1  ;;  %v1135_v59 = vcvt.s32.f32 %v815_v24 }
 0x14d   : > { %v8585_v46 = vadd.f32 %v10711_v12, %v7548_v7  ;;  %v8067_v55 = vadd.f32 %v10713_v37, %v7038_v2  ;;  %v7549_v39 = vmax.f32 %v1970_v53, 0.0  ;;  %v7039_v26 = vmax.f32 %v2083_v18, 0.0 }
 0x14e   : > { %v1974_v20 = vpop.f32.mrf.mxu0  ;;  %v2087_v1 = vpop.f32.mrf.mxu1  ;;  %9130 = vmatmul.mubr.msk.f32.gmra.mxu0 %vm1254_vm1, %v10422_v48  ;;  %9140 = vmatmul.mubr.msk.f32.gmra.mxu1 %vm1254_vm1, %v10572_v16  ;;  %v751_v48 = vand.u32 255, %v431_v56  ;;  %v687_v56 = vand.u32 255, %v367_v40 }
 0x14f   : > { %v10829_v8 = vadd.f32 %v8585_v46, %v7549_v39  ;;  %v10831_v12 = vadd.f32 %v8067_v55, %v7039_v26  ;;  %v7612_v37 = vmax.f32 %v1974_v20, 0.0  ;;  %v7102_v13 = vmax.f32 %v2087_v1, 0.0  ;;  %3057 = vmatprep.mubr.f32.mxu1 %v9776_v0  ;;  %3170 = vmatprep.mubr.f32.mxu0 %v9776_v0  ;;  %v10858_v1 = vld [vmem:[%s9818_s20 + $0x238] sm:$0x55] }
 0x150   : > { %v1976_v14 = vpop.f32.mrf.mxu0  ;;  %v2089_v15 = vpop.f32.mrf.mxu1  ;;  %v1071_v24 = vcvt.s32.f32 %v751_v48  ;;  %v303_v46 = vunpack.c.1.s8 %v10840_v28  ;;  %v1007_v40 = vcvt.s32.f32 %v687_v56 }
 0x151   : > { %v8650_v11 = vadd.f32 %v10725_v5, %v7612_v37  ;;  %v8132_v36 = vadd.f32 %v10727_v6, %v7102_v13  ;;  %v7613_v50 = vmax.f32 %v1976_v14, 0.0  ;;  %v7103_v47 = vmax.f32 %v2089_v15, 0.0 }
 0x152   : > { %v2093_v23 = vpop.f32.mrf.mxu1  ;;  %v2206_v19 = vpop.f32.mrf.mxu0  ;;  %9141 = vmatmul.mubr.msk.f32.gmra.mxu1 %vm1254_vm1, %v10591_v35  ;;  %9151 = vmatmul.mubr.msk.f32.vlgmr.msra.gmra.mxu0 %vm1254_vm1, %v10441_v58  ;;  %v750_v58 = vand.u32 255, %v430_v31  ;;  %v302_v13 = vunpack.c.0.s8 %v10840_v28 }
 0x153   : > { %v10847_v7 = vadd.f32 %v8650_v11, %v7613_v50  ;;  %v10849_v5 = vadd.f32 %v8132_v36, %v7103_v47  ;;  %v7166_v6 = vmax.f32 %v2093_v23, 0.0  ;;  %v6656_v2 = vmax.f32 %v2206_v19, 0.0  ;;  %3063 = vmatprep.mubr.f32.mxu1 %v9776_v0  ;;  %3176 = vmatprep.mubr.f32.mxu0 %v9776_v0 }
 0x154   : > { %v2095_v53 = vpop.f32.mrf.mxu1  ;;  %v2208_v18 = vpop.f32.mrf.mxu0  ;;  %9186 = vmatpush1.msk.msra.mxu0 %vm1303_vm0, %v1198_v62  ;;  %v686_v62 = vand.u32 255, %v366_v43  ;;  %v1070_v31 = vcvt.s32.f32 %v750_v58  ;;  %v623_v11 = vand.u32 255, %v303_v46  ;;  %v622_v58 = vand.u32 255, %v302_v13 }
 0x155   : > { %v8197_v55 = vadd.f32 %v10741_v45, %v7166_v6  ;;  %v7679_v39 = vadd.f32 %v10743_v10, %v6656_v2  ;;  %v7167_v26 = vmax.f32 %v2095_v53, 0.0  ;;  %v6657_v20 = vmax.f32 %v2208_v18, 0.0  ;;  %3452 = vmatprep.subr.mxu0 %v1135_v59 }
 0x156   : > { %v2099_v4 = vpop.f32.mrf.mxu1  ;;  %v2212_v37 = vpop.f32.mrf.mxu0  ;;  %9142 = vmatmul.mubr.msk.f32.gmra.mxu1 %vm1254_vm1, %v10614_v27  ;;  %9152 = vmatmul.mubr.msk.f32.gmra.mxu0 %vm1254_vm1, %v10460_v22  ;;  %v563_v22 = vunpack.c.1.s8 %v10858_v1  ;;  %v1006_v18 = vcvt.s32.f32 %v686_v62 }
 0x157   : > { %v10865_v14 = vadd.f32 %v8197_v55, %v7167_v26  ;;  %v10867_v45 = vadd.f32 %v7679_v39, %v6657_v20  ;;  %v7230_v10 = vmax.f32 %v2099_v4, 0.0  ;;  %v6720_v15 = vmax.f32 %v2212_v37, 0.0  ;;  %3069 = vmatprep.mubr.f32.mxu1 %v9776_v0  ;;  %3182 = vmatprep.mubr.f32.mxu0 %v9776_v0 }
 0x158   : > { %v2101_v59 = vpop.f32.mrf.mxu1  ;;  %v2214_v48 = vpop.f32.mrf.mxu0  ;;  %3453 = vmatpush1.msra.mxu0 %v1134_v9  ;;  %v883_v56 = vand.u32 255, %v563_v22  ;;  %v10901_v22 = vld [vmem:[%s14378_s1 + $0x60] sm:$0xff] }
 0x159   : > { %v8262_v36 = vadd.f32 %v10755_v29, %v7230_v10  ;;  %v7744_v50 = vadd.f32 %v10757_v42, %v6720_v15  ;;  %v7231_v47 = vmax.f32 %v2101_v59, 0.0  ;;  %v6721_v23 = vmax.f32 %v2214_v48, 0.0  ;;  %3454 = vmatprep.subr.mxu0 %v1071_v24 }
 0x15a   : > { %v2105_v19 = vpop.f32.mrf.mxu1  ;;  %v2218_v43 = vpop.f32.mrf.mxu0  ;;  %9143 = vmatmul.mubr.msk.f32.gmra.mxu1 %vm1254_vm1, %v10633_v3  ;;  %9153 = vmatmul.mubr.msk.f32.gmra.mxu0 %vm1254_vm1, %v10478_v21  ;;  %v943_v24 = vcvt.s32.f32 %v623_v11  ;;  %v942_v10 = vcvt.s32.f32 %v622_v58  ;;  %v1203_v15 = vcvt.s32.f32 %v883_v56 }
 0x15b   : > { %v10878_v9 = vadd.f32 %v8262_v36, %v7231_v47  ;;  %v10880_v6 = vadd.f32 %v7744_v50, %v6721_v23  ;;  %v7294_v2 = vmax.f32 %v2105_v19, 0.0  ;;  %v6784_v53 = vmax.f32 %v2218_v43, 0.0  ;;  %3075 = vmatprep.mubr.f32.mxu1 %v9776_v0  ;;  %3188 = vmatprep.mubr.f32.mxu0 %v9776_v0 }
 0x15c   : > { %v2107_v29 = vpop.f32.mrf.mxu1  ;;  %v2220_v42 = vpop.f32.mrf.mxu0  ;;  %3455 = vmatpush1.msra.mxu0 %v1070_v31 }
 0x15d   : > { %v8327_v46 = vadd.f32 %v10767_v49, %v7294_v2  ;;  %v7809_v21 = vadd.f32 %v10769_v32, %v6784_v53  ;;  %v7295_v55 = vmax.f32 %v2107_v29, 0.0  ;;  %v6785_v39 = vmax.f32 %v2220_v42, 0.0  ;;  %3456 = vmatprep.subr.mxu0 %v1007_v40  ;;  %v10919_v42 = vld [vmem:[%s14378_s1 + $0x68] sm:$0xff] }
 0x15e   : > { %v2111_v26 = vpop.f32.mrf.mxu1  ;;  %v2224_v20 = vpop.f32.mrf.mxu0  ;;  %9144 = vmatmul.mubr.msk.f32.gmra.mxu1 %vm1254_vm1, %v10650_v52  ;;  %9154 = vmatmul.mubr.msk.f32.gmra.mxu0 %vm1254_vm1, %v10494_v57 }
 0x15f   : > { %v10890_v4 = vadd.f32 %v8327_v46, %v7295_v55  ;;  %v10892_v37 = vadd.f32 %v7809_v21, %v6785_v39  ;;  %v7358_v62 = vmax.f32 %v2111_v26, 0.0  ;;  %v6848_v13 = vmax.f32 %v2224_v20, 0.0  ;;  %3081 = vmatprep.mubr.f32.mxu1 %v9776_v0  ;;  %3194 = vmatprep.mubr.f32.mxu0 %v9776_v0 }
 0x160   : > { %v2113_v49 = vpop.f32.mrf.mxu1  ;;  %v2226_v32 = vpop.f32.mrf.mxu0  ;;  %3457 = vmatpush1.msra.mxu0 %v1006_v18  ;;  %v560_v46 = vunpack.c.2.s8 %v10609_v60  ;;  %v497_v21 = vunpack.c.3.s8 %v10788_v30 }
 0x161   : > { %v8392_v59 = vadd.f32 %v10779_v25, %v7358_v62  ;;  %v7874_v48 = vadd.f32 %v10781_v44, %v6848_v13  ;;  %v7359_v57 = vmax.f32 %v2113_v49, 0.0  ;;  %v6849_v31 = vmax.f32 %v2226_v32, 0.0  ;;  %3458 = vmatprep.subr.mxu0 %v943_v24  ;;  %v10938_v13 = vld [vmem:[%s14378_s1 + $0x70] sm:$0xff] }
 0x162   : > { %v2117_v40 = vpop.f32.mrf.mxu1  ;;  %v2230_v11 = vpop.f32.mrf.mxu0  ;;  %9145 = vmatmul.mubr.msk.f32.gmra.mxu1 %vm1254_vm1, %v10901_v22  ;;  %9155 = vmatmul.mubr.msk.f32.gmra.mxu0 %vm1254_vm1, %v10510_v17 }
 0x163   : > { %v10907_v36 = vadd.f32 %v8392_v59, %v7359_v57  ;;  %v10909_v25 = vadd.f32 %v7874_v48, %v6849_v31  ;;  %v7422_v44 = vmax.f32 %v2117_v40, 0.0  ;;  %v6912_v50 = vmax.f32 %v2230_v11, 0.0  ;;  %3087 = vmatprep.mubr.f32.mxu1 %v9776_v0  ;;  %3200 = vmatprep.mubr.f32.mxu0 %v9776_v0 }
 0x164   : > { %v2119_v47 = vpop.f32.mrf.mxu1  ;;  %v2232_v23 = vpop.f32.mrf.mxu0  ;;  %3459 = vmatpush1.msra.mxu0 %v942_v10  ;;  %v817_v59 = vand.u32 255, %v497_v21  ;;  %v496_v48 = vunpack.c.2.s8 %v10788_v30  ;;  %v433_v57 = vunpack.c.3.s8 %v10806_v41  ;;  %v432_v30 = vunpack.c.2.s8 %v10806_v41 }
 0x165   : > { %v8457_v19 = vadd.f32 %v10796_v33, %v7422_v44  ;;  %v7939_v43 = vadd.f32 %v10798_v38, %v6912_v50  ;;  %v7423_v2 = vmax.f32 %v2119_v47, 0.0  ;;  %v6913_v53 = vmax.f32 %v2232_v23, 0.0  ;;  %9221 = vmatprep.subr.msk.mxu0 %vm1303_vm0, %v1203_v15  ;;  %v10957_v47 = vld [vmem:[%s14378_s1 + $0x78] sm:$0xff] }
 0x166   : > { %v2123_v17 = vpop.f32.mrf.mxu1  ;;  %v2236_v29 = vpop.f32.mrf.mxu0  ;;  %9146 = vmatmul.mubr.msk.f32.gmra.mxu1 %vm1254_vm1, %v10919_v42  ;;  %9156 = vmatmul.mubr.msk.f32.gmra.mxu0 %vm1254_vm1, %v10527_v34  ;;  %v880_v15 = vand.u32 255, %v560_v46 }
 0x167   : > { %v10925_v33 = vadd.f32 %v8457_v19, %v7423_v2  ;;  %v10927_v38 = vadd.f32 %v7939_v43, %v6913_v53  ;;  %v7486_v18 = vmax.f32 %v2123_v17, 0.0  ;;  %v6976_v24 = vmax.f32 %v2236_v29, 0.0  ;;  %3093 = vmatprep.mubr.f32.mxu1 %v9776_v0  ;;  %3206 = vmatprep.mubr.f32.mxu0 %v9776_v0 }
 0x168   : > { %v2125_v58 = vpop.f32.mrf.mxu1  ;;  %v2238_v56 = vpop.f32.mrf.mxu0  ;;  %v1200_v17 = vcvt.s32.f32 %v880_v15  ;;  %v1137_v29 = vcvt.s32.f32 %v817_v59 }
 0x169   : > { %v8522_v55 = vadd.f32 %v10813_v51, %v7486_v18  ;;  %v8004_v34 = vadd.f32 %v10815_v63, %v6976_v24  ;;  %v7487_v39 = vmax.f32 %v2125_v58, 0.0  ;;  %v6977_v26 = vmax.f32 %v2238_v56, 0.0 }
 0x16a   : > { %v2129_v20 = vpop.f32.mrf.mxu1  ;;  %v2242_v62 = vpop.f32.mrf.mxu0  ;;  %9147 = vmatmul.mubr.msk.f32.gmra.mxu1 %vm1254_vm1, %v10938_v13  ;;  %9157 = vmatmul.mubr.msk.f32.gmra.mxu0 %vm1254_vm1, %v10551_v54  ;;  %v816_v18 = vand.u32 255, %v496_v48 }
 0x16b   : > { %v10944_v60 = vadd.f32 %v8522_v55, %v7487_v39  ;;  %v10946_v51 = vadd.f32 %v8004_v34, %v6977_v26  ;;  %v7550_v63 = vmax.f32 %v2129_v20, 0.0  ;;  %v7040_v49 = vmax.f32 %v2242_v62, 0.0  ;;  %3099 = vmatprep.mubr.f32.mxu1 %v9776_v0  ;;  %3212 = vmatprep.mubr.f32.mxu0 %v9776_v0  ;;  %v10978_v55 = vld [vmem:[%s14378_s1] sm:$0xff] }
 0x16c   : > { %v2131_v32 = vpop.f32.mrf.mxu1  ;;  %v2244_v10 = vpop.f32.mrf.mxu0  ;;  %v752_v34 = vand.u32 255, %v432_v30 }
 0x16d   : > { %v8587_v54 = vadd.f32 %v10829_v8, %v7550_v63  ;;  %v8069_v31 = vadd.f32 %v10831_v12, %v7040_v49  ;;  %v7551_v40 = vmax.f32 %v2131_v32, 0.0  ;;  %v7041_v11 = vmax.f32 %v2244_v10, 0.0 }
 0x16e   : > { %v2135_v44 = vpop.f32.mrf.mxu1  ;;  %v2248_v50 = vpop.f32.mrf.mxu0  ;;  %9148 = vmatmul.mubr.msk.f32.gmra.mxu1 %vm1254_vm1, %v10957_v47  ;;  %9158 = vmatmul.mubr.msk.f32.gmra.mxu0 %vm1254_vm1, %v10572_v16  ;;  %v369_v8 = vunpack.c.3.s8 %v10823_v61  ;;  %v753_v16 = vand.u32 255, %v433_v57  ;;  %v1136_v63 = vcvt.s32.f32 %v816_v18  ;;  %v368_v32 = vunpack.c.2.s8 %v10823_v61 }
 0x16f   : > { %v10965_v12 = vadd.f32 %v8587_v54, %v7551_v40  ;;  %v10967_v23 = vadd.f32 %v8069_v31, %v7041_v11  ;;  %v7614_v19 = vmax.f32 %v2135_v44, 0.0  ;;  %v7104_v43 = vmax.f32 %v2248_v50, 0.0  ;;  %3218 = vmatprep.mubr.f32.mxu0 %v9776_v0  ;;  %3331 = vmatprep.mubr.f32.mxu1 %v9776_v0  ;;  %v11000_v40 = vld [vmem:[%s14378_s1 + $0x8] sm:$0xff] }
 0x170   : > { %v2137_v2 = vpop.f32.mrf.mxu1  ;;  %v2250_v53 = vpop.f32.mrf.mxu0  ;;  %v10982_v39 = vand.u32 255, %v369_v8  ;;  %v1073_v49 = vcvt.s32.f32 %v753_v16  ;;  %v305_v10 = vunpack.c.3.s8 %v10840_v28  ;;  %v1072_v61 = vcvt.s32.f32 %v752_v34 }
 0x171   : > { %v8652_v41 = vadd.f32 %v10847_v7, %v7614_v19  ;;  %v8134_v24 = vadd.f32 %v10849_v5, %v7104_v43  ;;  %v7615_v58 = vmax.f32 %v2137_v2, 0.0  ;;  %v7105_v56 = vmax.f32 %v2250_v53, 0.0 }
 0x172   : > { %v2254_v46 = vpop.f32.mrf.mxu0  ;;  %v2367_v21 = vpop.f32.mrf.mxu1  ;;  %9159 = vmatmul.mubr.msk.f32.gmra.mxu0 %vm1254_vm1, %v10591_v35  ;;  %9169 = vmatmul.mubr.msk.f32.vlgmr.msra.gmra.mxu1 %vm1254_vm1, %v10978_v55  ;;  %v688_v8 = vand.u32 255, %v368_v32  ;;  %v625_v19 = vand.u32 255, %v305_v10  ;;  %v304_v43 = vunpack.c.2.s8 %v10840_v28  ;;  %v565_v2 = vunpack.c.3.s8 %v10858_v1  ;;  %v11037_v32 = vld [vmem:[%s14378_s1 + $0x18] sm:$0xff] }
 0x173   : > { %v10984_v7 = vadd.f32 %v8652_v41, %v7615_v58  ;;  %v10986_v5 = vadd.f32 %v8134_v24, %v7105_v56  ;;  %v7168_v26 = vmax.f32 %v2254_v46, 0.0  ;;  %v6658_v20 = vmax.f32 %v2367_v21, 0.0  ;;  %3224 = vmatprep.mubr.f32.mxu0 %v9776_v0  ;;  %3337 = vmatprep.mubr.f32.mxu1 %v9776_v0  ;;  %v11020_v24 = vld [vmem:[%s14378_s1 + $0x10] sm:$0xff] }
 0x174   : > { %v2256_v35 = vpop.f32.mrf.mxu0  ;;  %v2369_v62 = vpop.f32.mrf.mxu1  ;;  %9204 = vmatpush1.msk.msra.mxu1 %vm1303_vm0, %v1200_v17  ;;  %v1008_v46 = vcvt.s32.f32 %v688_v8  ;;  %v945_v21 = vcvt.s32.f32 %v625_v19  ;;  %v624_v34 = vand.u32 255, %v304_v43 }
 0x175   : > { %v8199_v15 = vadd.f32 %v10865_v14, %v7168_v26  ;;  %v7681_v59 = vadd.f32 %v10867_v45, %v6658_v20  ;;  %v7169_v48 = vmax.f32 %v2256_v35, 0.0  ;;  %v6659_v57 = vmax.f32 %v2369_v62, 0.0  ;;  %3613 = vmatprep.subr.mxu1 %v1137_v29 }
 0x176   : > { %v2260_v54 = vpop.f32.mrf.mxu0  ;;  %v2373_v31 = vpop.f32.mrf.mxu1  ;;  %9160 = vmatmul.mubr.msk.f32.gmra.mxu0 %vm1254_vm1, %v10614_v27  ;;  %9170 = vmatmul.mubr.msk.f32.gmra.mxu1 %vm1254_vm1, %v11000_v40  ;;  %v1009_v14 = vcvt.s32.f32 %v10982_v39  ;;  %v885_v39 = vand.u32 255, %v565_v2 }
 0x177   : > { %v11005_v45 = vadd.f32 %v8199_v15, %v7169_v48  ;;  %v11007_v11 = vadd.f32 %v7681_v59, %v6659_v57  ;;  %v7232_v44 = vmax.f32 %v2260_v54, 0.0  ;;  %v6722_v50 = vmax.f32 %v2373_v31, 0.0  ;;  %3230 = vmatprep.mubr.f32.mxu0 %v9776_v0  ;;  %3343 = vmatprep.mubr.f32.mxu1 %v9776_v0 }
 0x178   : > { %v2262_v27 = vpop.f32.mrf.mxu0  ;;  %v2375_v30 = vpop.f32.mrf.mxu1  ;;  %3614 = vmatpush1.msra.mxu1 %v1136_v63  ;;  %v944_v48 = vcvt.s32.f32 %v624_v34  ;;  %v1205_v57 = vcvt.s32.f32 %v885_v39 }
 0x179   : > { %v8264_v53 = vadd.f32 %v10878_v9, %v7232_v44  ;;  %v7746_v17 = vadd.f32 %v10880_v6, %v6722_v50  ;;  %v7233_v29 = vmax.f32 %v2262_v27, 0.0  ;;  %v6723_v18 = vmax.f32 %v2375_v30, 0.0  ;;  %3615 = vmatprep.subr.mxu1 %v1073_v49  ;;  %v11054_v27 = vld [vmem:[%s14378_s1 + $0x20] sm:$0xff] }
 0x17a   : > { %v2266_v16 = vpop.f32.mrf.mxu0  ;;  %v2379_v41 = vpop.f32.mrf.mxu1  ;;  %9161 = vmatmul.mubr.msk.f32.gmra.mxu0 %vm1254_vm1, %v10633_v3  ;;  %9171 = vmatmul.mubr.msk.f32.gmra.mxu1 %vm1254_vm1, %v11020_v24 }
 0x17b   : > { %v11024_v28 = vadd.f32 %v8264_v53, %v7233_v29  ;;  %v11026_v9 = vadd.f32 %v7746_v17, %v6723_v18  ;;  %v7296_v6 = vmax.f32 %v2266_v16, 0.0  ;;  %v6786_v58 = vmax.f32 %v2379_v41, 0.0  ;;  %3236 = vmatprep.mubr.f32.mxu0 %v9776_v0  ;;  %3349 = vmatprep.mubr.f32.mxu1 %v9776_v0  ;;  %v11067_v18 = vld [vmem:[%s9818_s20 + $0x1b8] sm:$0xff] }
 0x17c   : > { %v2268_v56 = vpop.f32.mrf.mxu0  ;;  %v2381_v3 = vpop.f32.mrf.mxu1  ;;  %3616 = vmatpush1.msra.mxu1 %v1072_v61  ;;  %v499_v34 = vunpack.c.1.s8 %v11067_v18 }
 0x17d   : > { %v8329_v26 = vadd.f32 %v10890_v4, %v7296_v6  ;;  %v7811_v20 = vadd.f32 %v10892_v37, %v6786_v58  ;;  %v7297_v35 = vmax.f32 %v2268_v56, 0.0  ;;  %v6787_v62 = vmax.f32 %v2381_v3, 0.0  ;;  %3617 = vmatprep.subr.mxu1 %v1009_v14  ;;  %v11075_v6 = vld [vmem:[%s14378_s1 + $0x28] sm:$0xff] }
 0x17e   : > { %v2272_v63 = vpop.f32.mrf.mxu0  ;;  %v2385_v49 = vpop.f32.mrf.mxu1  ;;  %9162 = vmatmul.mubr.msk.f32.gmra.mxu0 %vm1254_vm1, %v10650_v52  ;;  %9172 = vmatmul.mubr.msk.f32.gmra.mxu1 %vm1254_vm1, %v11037_v32 }
 0x17f   : > { %v11041_v10 = vadd.f32 %v8329_v26, %v7297_v35  ;;  %v11043_v4 = vadd.f32 %v7811_v20, %v6787_v62  ;;  %v7360_v37 = vmax.f32 %v2272_v63, 0.0  ;;  %v6850_v15 = vmax.f32 %v2385_v49, 0.0  ;;  %3242 = vmatprep.mubr.f32.mxu0 %v9776_v0  ;;  %3355 = vmatprep.mubr.f32.mxu1 %v9776_v0  ;;  %v11090_v62 = vld [vmem:[%s9818_s20 + $0x138] sm:$0xff] }
 0x180   : > { %v2274_v59 = vpop.f32.mrf.mxu0  ;;  %v2387_v52 = vpop.f32.mrf.mxu1  ;;  %3618 = vmatpush1.msra.mxu1 %v1008_v46 }
 0x181   : > { %v8394_v54 = vadd.f32 %v10907_v36, %v7360_v37  ;;  %v7876_v31 = vadd.f32 %v10909_v25, %v6850_v15  ;;  %v7361_v61 = vmax.f32 %v2274_v59, 0.0  ;;  %v6851_v14 = vmax.f32 %v2387_v52, 0.0  ;;  %3619 = vmatprep.subr.mxu1 %v945_v21  ;;  %v11097_v37 = vld [vmem:[%s14378_s1 + $0x30] sm:$0xff]  ;;  %v11108_v52 = vld [vmem:[%s9818_s20 + $0xb8] sm:$0xff] }
 0x182   : > { %v2278_v44 = vpop.f32.mrf.mxu0  ;;  %v2391_v50 = vpop.f32.mrf.mxu1  ;;  %9163 = vmatmul.mubr.msk.f32.gmra.mxu0 %vm1254_vm1, %v10901_v22  ;;  %9173 = vmatmul.mubr.msk.f32.gmra.mxu1 %vm1254_vm1, %v11054_v27  ;;  %v562_v21 = vunpack.c.0.s8 %v10858_v1 }
 0x183   : > { %v11058_v36 = vadd.f32 %v8394_v54, %v7361_v61  ;;  %v11060_v25 = vadd.f32 %v7876_v31, %v6851_v14  ;;  %v7424_v30 = vmax.f32 %v2278_v44, 0.0  ;;  %v6914_v8 = vmax.f32 %v2391_v50, 0.0  ;;  %3248 = vmatprep.mubr.f32.mxu0 %v9776_v0  ;;  %3361 = vmatprep.mubr.f32.mxu1 %v9776_v0 }
 0x184   : > { %v2280_v19 = vpop.f32.mrf.mxu0  ;;  %v2393_v43 = vpop.f32.mrf.mxu1  ;;  %3620 = vmatpush1.msra.mxu1 %v944_v48  ;;  %v882_v54 = vand.u32 255, %v562_v21  ;;  %v819_v31 = vand.u32 255, %v499_v34  ;;  %v498_v61 = vunpack.c.0.s8 %v11067_v18  ;;  %v435_v14 = vunpack.c.1.s8 %v11090_v62 }
 0x185   : > { %v8459_v2 = vadd.f32 %v10925_v33, %v7424_v30  ;;  %v7941_v53 = vadd.f32 %v10927_v38, %v6914_v8  ;;  %v7425_v17 = vmax.f32 %v2280_v19, 0.0  ;;  %v6915_v29 = vmax.f32 %v2393_v43, 0.0  ;;  %9239 = vmatprep.subr.msk.mxu1 %vm1303_vm0, %v1205_v57 }
 0x186   : > { %v2284_v16 = vpop.f32.mrf.mxu0  ;;  %v2397_v41 = vpop.f32.mrf.mxu1  ;;  %9164 = vmatmul.mubr.msk.f32.gmra.mxu0 %vm1254_vm1, %v10919_v42  ;;  %9174 = vmatmul.mubr.msk.f32.gmra.mxu1 %vm1254_vm1, %v11075_v6  ;;  %v755_v21 = vand.u32 255, %v435_v14 }
 0x187   : > { %v11079_v33 = vadd.f32 %v8459_v2, %v7425_v17  ;;  %v11081_v38 = vadd.f32 %v7941_v53, %v6915_v29  ;;  %v7488_v58 = vmax.f32 %v2284_v16, 0.0  ;;  %v6978_v56 = vmax.f32 %v2397_v41, 0.0  ;;  %3254 = vmatprep.mubr.f32.mxu0 %v9776_v0  ;;  %3367 = vmatprep.mubr.f32.mxu1 %v9776_v0  ;;  %v11119_v2 = vld [vmem:[%s14378_s1 + $0x38] sm:$0xff] }
 0x188   : > { %v2286_v3 = vpop.f32.mrf.mxu0  ;;  %v2399_v46 = vpop.f32.mrf.mxu1  ;;  %v434_v53 = vunpack.c.0.s8 %v11090_v62 }
 0x189   : > { %v8524_v39 = vadd.f32 %v10944_v60, %v7488_v58  ;;  %v8006_v26 = vadd.f32 %v10946_v51, %v6978_v56  ;;  %v7489_v20 = vmax.f32 %v2286_v3, 0.0  ;;  %v6979_v35 = vmax.f32 %v2399_v46, 0.0 }
 0x18a   : > { %v2290_v63 = vpop.f32.mrf.mxu0  ;;  %v2403_v49 = vpop.f32.mrf.mxu1  ;;  %9165 = vmatmul.mubr.msk.f32.gmra.mxu0 %vm1254_vm1, %v10938_v13  ;;  %9175 = vmatmul.mubr.msk.f32.gmra.mxu1 %vm1254_vm1, %v11097_v37  ;;  %v1202_v56 = vcvt.s32.f32 %v882_v54  ;;  %v1139_v3 = vcvt.s32.f32 %v819_v31  ;;  %v818_v46 = vand.u32 255, %v498_v61 }
 0x18b   : > { %v11101_v60 = vadd.f32 %v8524_v39, %v7489_v20  ;;  %v11103_v51 = vadd.f32 %v8006_v26, %v6979_v35  ;;  %v7552_v15 = vmax.f32 %v2290_v63, 0.0  ;;  %v7042_v59 = vmax.f32 %v2403_v49, 0.0  ;;  %3260 = vmatprep.mubr.f32.mxu0 %v9776_v0  ;;  %3373 = vmatprep.mubr.f32.mxu1 %v9776_v0  ;;  %v11134_v35 = vld [vmem:[%s9818_s20 + $0x38] sm:$0xff] }
 0x18c   : > { %v2292_v48 = vpop.f32.mrf.mxu0  ;;  %v2405_v57 = vpop.f32.mrf.mxu1  ;;  %v1138_v14 = vcvt.s32.f32 %v818_v46 }
 0x18d   : > { %v8589_v44 = vadd.f32 %v10965_v12, %v7552_v15  ;;  %v8071_v50 = vadd.f32 %v10967_v23, %v7042_v59  ;;  %v7553_v30 = vmax.f32 %v2292_v48, 0.0  ;;  %v7043_v8 = vmax.f32 %v2405_v57, 0.0  ;;  %v11139_v15 = vld [vmem:[%s14378_s1 + $0x40] sm:$0xff] }
 0x18e   : > { %v2296_v19 = vpop.f32.mrf.mxu0  ;;  %v2409_v43 = vpop.f32.mrf.mxu1  ;;  %9166 = vmatmul.mubr.msk.f32.gmra.mxu0 %vm1254_vm1, %v10957_v47  ;;  %9176 = vmatmul.mubr.msk.f32.gmra.mxu1 %vm1254_vm1, %v11119_v2  ;;  %v371_v12 = vunpack.c.1.s8 %v11108_v52 }
 0x18f   : > { %v11125_v23 = vadd.f32 %v8589_v44, %v7553_v30  ;;  %v11127_v17 = vadd.f32 %v8071_v50, %v7043_v8  ;;  %v7616_v29 = vmax.f32 %v2296_v19, 0.0  ;;  %v7106_v16 = vmax.f32 %v2409_v43, 0.0  ;;  %3379 = vmatprep.mubr.f32.mxu1 %v9776_v0  ;;  %3492 = vmatprep.mubr.f32.mxu0 %v9776_v0 }
 0x190   : > { %v2298_v41 = vpop.f32.mrf.mxu0  ;;  %v2411_v58 = vpop.f32.mrf.mxu1  ;;  %v11145_v59 = vand.u32 255, %v371_v12  ;;  %v1075_v44 = vcvt.s32.f32 %v755_v21  ;;  %v370_v50 = vunpack.c.0.s8 %v11108_v52  ;;  %v307_v30 = vunpack.c.1.s8 %v11134_v35  ;;  %v11159_v12 = vld [vmem:[%s9818_s20 + $0x240] sm:$0x55] }
 0x191   : > { %v8654_v34 = vadd.f32 %v10984_v7, %v7616_v29  ;;  %v8136_v39 = vadd.f32 %v10986_v5, %v7106_v16  ;;  %v7617_v26 = vmax.f32 %v2298_v41, 0.0  ;;  %v7107_v20 = vmax.f32 %v2411_v58, 0.0  ;;  %v11164_v41 = vld [vmem:[%s14378_s1 + $0x48] sm:$0xff] }
 0x192   : > { %v2415_v63 = vpop.f32.mrf.mxu1  ;;  %v2528_v49 = vpop.f32.mrf.mxu0  ;;  %9177 = vmatmul.mubr.msk.f32.gmra.mxu1 %vm1254_vm1, %v11139_v15  ;;  %9187 = vmatmul.mubr.msk.f32.vlgmr.msra.gmra.mxu0 %vm1254_vm1, %v10978_v55  ;;  %v754_v7 = vand.u32 255, %v434_v53 }
 0x193   : > { %v11147_v5 = vadd.f32 %v8654_v34, %v7617_v26  ;;  %v11149_v48 = vadd.f32 %v8136_v39, %v7107_v20  ;;  %v7170_v57 = vmax.f32 %v2415_v63, 0.0  ;;  %v6660_v54 = vmax.f32 %v2528_v49, 0.0  ;;  %3385 = vmatprep.mubr.f32.mxu1 %v9776_v0  ;;  %3498 = vmatprep.mubr.f32.mxu0 %v9776_v0 }
 0x194   : > { %v2417_v31 = vpop.f32.mrf.mxu1  ;;  %v2530_v61 = vpop.f32.mrf.mxu0  ;;  %9222 = vmatpush1.msk.msra.mxu0 %vm1303_vm0, %v1202_v56  ;;  %v690_v39 = vand.u32 255, %v370_v50  ;;  %v627_v26 = vand.u32 255, %v307_v30  ;;  %v306_v20 = vunpack.c.0.s8 %v11134_v35  ;;  %v567_v63 = vunpack.c.1.s8 %v11159_v12 }
 0x195   : > { %v8201_v8 = vadd.f32 %v11005_v45, %v7170_v57  ;;  %v7683_v19 = vadd.f32 %v11007_v11, %v6660_v54  ;;  %v7171_v43 = vmax.f32 %v2417_v31, 0.0  ;;  %v6661_v53 = vmax.f32 %v2530_v61, 0.0  ;;  %3774 = vmatprep.subr.mxu0 %v1139_v3  ;;  %v11184_v61 = vld [vmem:[%s14378_s1 + $0x50] sm:$0xff] }
 0x196   : > { %v2421_v29 = vpop.f32.mrf.mxu1  ;;  %v2534_v16 = vpop.f32.mrf.mxu0  ;;  %9178 = vmatmul.mubr.msk.f32.gmra.mxu1 %vm1254_vm1, %v11164_v41  ;;  %9188 = vmatmul.mubr.msk.f32.gmra.mxu0 %vm1254_vm1, %v11000_v40  ;;  %v1074_v45 = vcvt.s32.f32 %v754_v7  ;;  %v1011_v11 = vcvt.s32.f32 %v11145_v59 }
 0x197   : > { %v11171_v58 = vadd.f32 %v8201_v8, %v7171_v43  ;;  %v11173_v56 = vadd.f32 %v7683_v19, %v6661_v53  ;;  %v7234_v3 = vmax.f32 %v2421_v29, 0.0  ;;  %v6724_v46 = vmax.f32 %v2534_v16, 0.0  ;;  %3391 = vmatprep.mubr.f32.mxu1 %v9776_v0  ;;  %3504 = vmatprep.mubr.f32.mxu0 %v9776_v0 }
 0x198   : > { %v2423_v21 = vpop.f32.mrf.mxu1  ;;  %v2536_v34 = vpop.f32.mrf.mxu0  ;;  %3775 = vmatpush1.msra.mxu0 %v1138_v14  ;;  %v1010_v8 = vcvt.s32.f32 %v690_v39  ;;  %v947_v19 = vcvt.s32.f32 %v627_v26  ;;  %v626_v43 = vand.u32 255, %v306_v20  ;;  %v887_v53 = vand.u32 255, %v567_v63 }
 0x199   : > { %v8266_v49 = vadd.f32 %v11024_v28, %v7234_v3  ;;  %v7748_v7 = vadd.f32 %v11026_v9, %v6724_v46  ;;  %v7235_v59 = vmax.f32 %v2423_v21, 0.0  ;;  %v6725_v57 = vmax.f32 %v2536_v34, 0.0  ;;  %3776 = vmatprep.subr.mxu0 %v1075_v44 }
 0x19a   : > { %v2427_v54 = vpop.f32.mrf.mxu1  ;;  %v2540_v31 = vpop.f32.mrf.mxu0  ;;  %9179 = vmatmul.mubr.msk.f32.gmra.mxu1 %vm1254_vm1, %v11184_v61  ;;  %9189 = vmatmul.mubr.msk.f32.gmra.mxu0 %vm1254_vm1, %v11020_v24  ;;  %v946_v20 = vcvt.s32.f32 %v626_v43  ;;  %v1207_v63 = vcvt.s32.f32 %v887_v53 }
 0x19b   : > { %v11190_v14 = vadd.f32 %v8266_v49, %v7235_v59  ;;  %v11192_v28 = vadd.f32 %v7748_v7, %v6725_v57  ;;  %v7298_v9 = vmax.f32 %v2427_v54, 0.0  ;;  %v6788_v50 = vmax.f32 %v2540_v31, 0.0  ;;  %3397 = vmatprep.mubr.f32.mxu1 %v9776_v0  ;;  %3510 = vmatprep.mubr.f32.mxu0 %v9776_v0  ;;  %v11201_v49 = vld [vmem:[%s14378_s1 + $0x58] sm:$0xff] }
 0x19c   : > { %v2429_v44 = vpop.f32.mrf.mxu1  ;;  %v2542_v30 = vpop.f32.mrf.mxu0  ;;  %3777 = vmatpush1.msra.mxu0 %v1074_v45 }
 0x19d   : > { %v8331_v29 = vadd.f32 %v11041_v10, %v7298_v9  ;;  %v7813_v16 = vadd.f32 %v11043_v4, %v6788_v50  ;;  %v7299_v3 = vmax.f32 %v2429_v44, 0.0  ;;  %v6789_v46 = vmax.f32 %v2542_v30, 0.0  ;;  %3778 = vmatprep.subr.mxu0 %v1011_v11 }
 0x19e   : > { %v2433_v21 = vpop.f32.mrf.mxu1  ;;  %v2546_v34 = vpop.f32.mrf.mxu0  ;;  %9180 = vmatmul.mubr.msk.f32.gmra.mxu1 %vm1254_vm1, %v11201_v49  ;;  %9190 = vmatmul.mubr.msk.f32.gmra.mxu0 %vm1254_vm1, %v11037_v32 }
 0x19f   : > { %v11207_v45 = vadd.f32 %v8331_v29, %v7299_v3  ;;  %v11209_v10 = vadd.f32 %v7813_v16, %v6789_v46  ;;  %v7362_v4 = vmax.f32 %v2433_v21, 0.0  ;;  %v6852_v39 = vmax.f32 %v2546_v34, 0.0  ;;  %3403 = vmatprep.mubr.f32.mxu1 %v9776_v0  ;;  %3516 = vmatprep.mubr.f32.mxu0 %v9776_v0 }
 0x1a0   : > { %v2435_v11 = vpop.f32.mrf.mxu1  ;;  %v2548_v26 = vpop.f32.mrf.mxu0  ;;  %3779 = vmatpush1.msra.mxu0 %v1010_v8 }
 0x1a1   : > { %v8396_v7 = vadd.f32 %v11058_v36, %v7362_v4  ;;  %v7878_v59 = vadd.f32 %v11060_v25, %v6852_v39  ;;  %v7363_v57 = vmax.f32 %v2435_v11, 0.0  ;;  %v6853_v54 = vmax.f32 %v2548_v26, 0.0  ;;  %3780 = vmatprep.subr.mxu0 %v947_v19 }
 0x1a2   : > { %v2439_v31 = vpop.f32.mrf.mxu1  ;;  %v2552_v9 = vpop.f32.mrf.mxu0  ;;  %9181 = vmatmul.mubr.msk.f32.gmra.mxu1 %vm1254_vm1, %v10901_v22  ;;  %9191 = vmatmul.mubr.msk.f32.gmra.mxu0 %vm1254_vm1, %v11054_v27  ;;  %v564_v39 = vunpack.c.2.s8 %v10858_v1  ;;  %v501_v11 = vunpack.c.3.s8 %v11067_v18 }
 0x1a3   : > { %v11219_v50 = vadd.f32 %v8396_v7, %v7363_v57  ;;  %v11221_v44 = vadd.f32 %v7878_v59, %v6853_v54  ;;  %v7426_v30 = vmax.f32 %v2439_v31, 0.0  ;;  %v6916_v8 = vmax.f32 %v2552_v9, 0.0  ;;  %3409 = vmatprep.mubr.f32.mxu1 %v9776_v0  ;;  %3522 = vmatprep.mubr.f32.mxu0 %v9776_v0 }
 0x1a4   : > { %v2441_v36 = vpop.f32.mrf.mxu1  ;;  %v2554_v25 = vpop.f32.mrf.mxu0  ;;  %3781 = vmatpush1.msra.mxu0 %v946_v20 }
 0x1a5   : > { %v8461_v19 = vadd.f32 %v11079_v33, %v7426_v30  ;;  %v7943_v43 = vadd.f32 %v11081_v38, %v6916_v8  ;;  %v7427_v53 = vmax.f32 %v2441_v36, 0.0  ;;  %v6917_v29 = vmax.f32 %v2554_v25, 0.0  ;;  %9257 = vmatprep.subr.msk.mxu0 %vm1303_vm0, %v1207_v63 }
 0x1a6   : > { %v2445_v16 = vpop.f32.mrf.mxu1  ;;  %v2558_v3 = vpop.f32.mrf.mxu0  ;;  %9182 = vmatmul.mubr.msk.f32.gmra.mxu1 %vm1254_vm1, %v10919_v42  ;;  %9192 = vmatmul.mubr.msk.f32.gmra.mxu0 %vm1254_vm1, %v11075_v6  ;;  %v884_v30 = vand.u32 255, %v564_v39  ;;  %v821_v8 = vand.u32 255, %v501_v11  ;;  %v500_v36 = vunpack.c.2.s8 %v11067_v18  ;;  %v437_v25 = vunpack.c.3.s8 %v11090_v62 }
 0x1a7   : > { %v11232_v46 = vadd.f32 %v8461_v19, %v7427_v53  ;;  %v11234_v21 = vadd.f32 %v7943_v43, %v6917_v29  ;;  %v7490_v34 = vmax.f32 %v2445_v16, 0.0  ;;  %v6980_v33 = vmax.f32 %v2558_v3, 0.0  ;;  %3415 = vmatprep.mubr.f32.mxu1 %v9776_v0  ;;  %3528 = vmatprep.mubr.f32.mxu0 %v9776_v0 }
 0x1a8   : > { %v2447_v38 = vpop.f32.mrf.mxu1  ;;  %v2560_v4 = vpop.f32.mrf.mxu0  ;;  %v373_v18 = vunpack.c.3.s8 %v11108_v52  ;;  %v1141_v11 = vcvt.s32.f32 %v821_v8 }
 0x1a9   : > { %v8526_v26 = vadd.f32 %v11101_v60, %v7490_v34  ;;  %v8008_v20 = vadd.f32 %v11103_v51, %v6980_v33  ;;  %v7491_v63 = vmax.f32 %v2447_v38, 0.0  ;;  %v6981_v7 = vmax.f32 %v2560_v4, 0.0 }
 0x1aa   : > { %v2451_v59 = vpop.f32.mrf.mxu1  ;;  %v2564_v57 = vpop.f32.mrf.mxu0  ;;  %9183 = vmatmul.mubr.msk.f32.gmra.mxu1 %vm1254_vm1, %v10938_v13  ;;  %9193 = vmatmul.mubr.msk.f32.gmra.mxu0 %vm1254_vm1, %v11097_v37  ;;  %v436_v34 = vunpack.c.2.s8 %v11090_v62 }
 0x1ab   : > { %v11246_v54 = vadd.f32 %v8526_v26, %v7491_v63  ;;  %v11248_v31 = vadd.f32 %v8008_v20, %v6981_v7  ;;  %v7554_v1 = vmax.f32 %v2451_v59, 0.0  ;;  %v7044_v9 = vmax.f32 %v2564_v57, 0.0  ;;  %3421 = vmatprep.mubr.f32.mxu1 %v9776_v0  ;;  %3534 = vmatprep.mubr.f32.mxu0 %v9776_v0 }
 0x1ac   : > { %v2453_v60 = vpop.f32.mrf.mxu1  ;;  %v2566_v51 = vpop.f32.mrf.mxu0  ;;  %v820_v26 = vand.u32 255, %v500_v36  ;;  %v757_v20 = vand.u32 255, %v437_v25 }
 0x1ad   : > { %v8591_v19 = vadd.f32 %v11125_v23, %v7554_v1  ;;  %v8073_v43 = vadd.f32 %v11127_v17, %v7044_v9  ;;  %v7555_v53 = vmax.f32 %v2453_v60, 0.0  ;;  %v7045_v29 = vmax.f32 %v2566_v51, 0.0 }
 0x1ae   : > { %v2457_v16 = vpop.f32.mrf.mxu1  ;;  %v2570_v3 = vpop.f32.mrf.mxu0  ;;  %9184 = vmatmul.mubr.msk.f32.gmra.mxu1 %vm1254_vm1, %v10957_v47  ;;  %9194 = vmatmul.mubr.msk.f32.gmra.mxu0 %vm1254_vm1, %v11119_v2  ;;  %v1204_v47 = vcvt.s32.f32 %v884_v30  ;;  %v756_v9 = vand.u32 255, %v436_v34  ;;  %v11274_v60 = vand.u32 255, %v373_v18  ;;  %v1140_v25 = vcvt.s32.f32 %v820_v26 }
 0x1af   : > { %v11262_v33 = vadd.f32 %v8591_v19, %v7555_v53  ;;  %v11264_v38 = vadd.f32 %v8073_v43, %v7045_v29  ;;  %v7618_v23 = vmax.f32 %v2457_v16, 0.0  ;;  %v7108_v17 = vmax.f32 %v2570_v3, 0.0  ;;  %3540 = vmatprep.mubr.f32.mxu0 %v9776_v0  ;;  %3653 = vmatprep.mubr.f32.mxu1 %v9776_v0 }
 0x1b0   : > { %v2459_v4 = vpop.f32.mrf.mxu1  ;;  %v2572_v39 = vpop.f32.mrf.mxu0  ;;  %v1077_v19 = vcvt.s32.f32 %v757_v20  ;;  %v309_v43 = vunpack.c.3.s8 %v11134_v35  ;;  %v569_v20 = vunpack.c.3.s8 %v11159_v12 }
 0x1b1   : > { %v8656_v62 = vadd.f32 %v11147_v5, %v7618_v23  ;;  %v8138_v63 = vadd.f32 %v11149_v48, %v7108_v17  ;;  %v7619_v7 = vmax.f32 %v2459_v4, 0.0  ;;  %v7109_v59 = vmax.f32 %v2572_v39, 0.0 }
 0x1b2   : > { %v2576_v57 = vpop.f32.mrf.mxu0  ;;  %v2689_v1 = vpop.f32.mrf.mxu1  ;;  %9195 = vmatmul.mubr.msk.f32.gmra.mxu0 %vm1254_vm1, %v11139_v15  ;;  %9205 = vmatmul.mubr.msk.f32.vlgmr.msra.gmra.mxu1 %vm1254_vm1, %v10978_v55  ;;  %v372_v55 = vunpack.c.2.s8 %v11108_v52  ;;  %v1076_v23 = vcvt.s32.f32 %v756_v9  ;;  %v1013_v52 = vcvt.s32.f32 %v11274_v60  ;;  %v629_v26 = vand.u32 255, %v309_v43 }
 0x1b3   : > { %v11276_v51 = vadd.f32 %v8656_v62, %v7619_v7  ;;  %v11278_v30 = vadd.f32 %v8138_v63, %v7109_v59  ;;  %v7172_v5 = vmax.f32 %v2576_v57, 0.0  ;;  %v6662_v8 = vmax.f32 %v2689_v1, 0.0  ;;  %3546 = vmatprep.mubr.f32.mxu0 %v9776_v0  ;;  %3659 = vmatprep.mubr.f32.mxu1 %v9776_v0 }
 0x1b4   : > { %v2578_v48 = vpop.f32.mrf.mxu0  ;;  %v2691_v36 = vpop.f32.mrf.mxu1  ;;  %9240 = vmatpush1.msk.msra.mxu1 %vm1303_vm0, %v1204_v47 }
 0x1b5   : > { %v8203_v53 = vadd.f32 %v11171_v58, %v7172_v5  ;;  %v7685_v29 = vadd.f32 %v11173_v56, %v6662_v8  ;;  %v7173_v16 = vmax.f32 %v2578_v48, 0.0  ;;  %v6663_v3 = vmax.f32 %v2691_v36, 0.0  ;;  %3935 = vmatprep.subr.mxu1 %v1141_v11 }
 0x1b6   : > { %v2582_v34 = vpop.f32.mrf.mxu0  ;;  %v2695_v18 = vpop.f32.mrf.mxu1  ;;  %9196 = vmatmul.mubr.msk.f32.gmra.mxu0 %vm1254_vm1, %v11164_v41  ;;  %9206 = vmatmul.mubr.msk.f32.gmra.mxu1 %vm1254_vm1, %v11000_v40  ;;  %v692_v11 = vand.u32 255, %v372_v55  ;;  %v308_v40 = vunpack.c.2.s8 %v11134_v35  ;;  %v949_v48 = vcvt.s32.f32 %v629_v26 }
 0x1b7   : > { %v11292_v17 = vadd.f32 %v8203_v53, %v7173_v16  ;;  %v11294_v4 = vadd.f32 %v7685_v29, %v6663_v3  ;;  %v7236_v58 = vmax.f32 %v2582_v34, 0.0  ;;  %v6726_v56 = vmax.f32 %v2695_v18, 0.0  ;;  %3552 = vmatprep.mubr.f32.mxu0 %v9776_v0  ;;  %3665 = vmatprep.mubr.f32.mxu1 %v9776_v0 }
 0x1b8   : > { %v2584_v39 = vpop.f32.mrf.mxu0  ;;  %v2697_v47 = vpop.f32.mrf.mxu1  ;;  %3936 = vmatpush1.msra.mxu1 %v1140_v25  ;;  %v1012_v8 = vcvt.s32.f32 %v692_v11  ;;  %v628_v36 = vand.u32 255, %v308_v40  ;;  %v889_v25 = vand.u32 255, %v569_v20 }
 0x1b9   : > { %v8268_v62 = vadd.f32 %v11190_v14, %v7236_v58  ;;  %v7750_v63 = vadd.f32 %v11192_v28, %v6726_v56  ;;  %v7237_v7 = vmax.f32 %v2584_v39, 0.0  ;;  %v6727_v59 = vmax.f32 %v2697_v47, 0.0  ;;  %3937 = vmatprep.subr.mxu1 %v1077_v19 }
 0x1ba   : > { %v2588_v57 = vpop.f32.mrf.mxu0  ;;  %v2701_v1 = vpop.f32.mrf.mxu1  ;;  %9197 = vmatmul.mubr.msk.f32.gmra.mxu0 %vm1254_vm1, %v11184_v61  ;;  %9207 = vmatmul.mubr.msk.f32.gmra.mxu1 %vm1254_vm1, %v11020_v24 }
 0x1bb   : > { %v11306_v9 = vadd.f32 %v8268_v62, %v7237_v7  ;;  %v11308_v35 = vadd.f32 %v7750_v63, %v6727_v59  ;;  %v7300_v60 = vmax.f32 %v2588_v57, 0.0  ;;  %v6790_v5 = vmax.f32 %v2701_v1, 0.0  ;;  %3558 = vmatprep.mubr.f32.mxu0 %v9776_v0  ;;  %3671 = vmatprep.mubr.f32.mxu1 %v9776_v0 }
 0x1bc   : > { %v2590_v14 = vpop.f32.mrf.mxu0  ;;  %v2703_v28 = vpop.f32.mrf.mxu1  ;;  %3938 = vmatpush1.msra.mxu1 %v1076_v23  ;;  %v948_v23 = vcvt.s32.f32 %v628_v36 }
 0x1bd   : > { %v8333_v19 = vadd.f32 %v11207_v45, %v7300_v60  ;;  %v7815_v24 = vadd.f32 %v11209_v10, %v6790_v5  ;;  %v7301_v55 = vmax.f32 %v2590_v14, 0.0  ;;  %v6791_v43 = vmax.f32 %v2703_v28, 0.0  ;;  %3939 = vmatprep.subr.mxu1 %v1013_v52 }
 0x1be   : > { %v2594_v53 = vpop.f32.mrf.mxu0  ;;  %v2707_v29 = vpop.f32.mrf.mxu1  ;;  %9198 = vmatmul.mubr.msk.f32.gmra.mxu0 %vm1254_vm1, %v11201_v49  ;;  %9208 = vmatmul.mubr.msk.f32.gmra.mxu1 %vm1254_vm1, %v11037_v32  ;;  %v1209_v52 = vcvt.s32.f32 %v889_v25 }
 0x1bf   : > { %v11318_v16 = vadd.f32 %v8333_v19, %v7301_v55  ;;  %v11320_v3 = vadd.f32 %v7815_v24, %v6791_v43  ;;  %v7364_v34 = vmax.f32 %v2594_v53, 0.0  ;;  %v6854_v18 = vmax.f32 %v2707_v29, 0.0  ;;  %3564 = vmatprep.mubr.f32.mxu0 %v9776_v0  ;;  %3677 = vmatprep.mubr.f32.mxu1 %v9776_v0  ;;  %v11357_v19 = vld [vmem:[%s9818_s20 + $0x140] sm:$0xff] }
 0x1c0   : > { %v2596_v45 = vpop.f32.mrf.mxu0  ;;  %v2709_v10 = vpop.f32.mrf.mxu1  ;;  %3940 = vmatpush1.msra.mxu1 %v1012_v8  ;;  %v566_v8 = vunpack.c.0.s8 %v11159_v12 }
 0x1c1   : > { %v8398_v58 = vadd.f32 %v11219_v50, %v7364_v34  ;;  %v7880_v56 = vadd.f32 %v11221_v44, %v6854_v18  ;;  %v7365_v32 = vmax.f32 %v2596_v45, 0.0  ;;  %v6855_v39 = vmax.f32 %v2709_v10, 0.0  ;;  %3941 = vmatprep.subr.mxu1 %v949_v48 }
 0x1c2   : > { %v2600_v47 = vpop.f32.mrf.mxu0  ;;  %v2713_v11 = vpop.f32.mrf.mxu1  ;;  %9199 = vmatmul.mubr.msk.f32.gmra.mxu0 %vm1254_vm1, %v10901_v22  ;;  %9209 = vmatmul.mubr.msk.f32.gmra.mxu1 %vm1254_vm1, %v11054_v27  ;;  %v11339_v27 = vld [vmem:[%s9818_s20 + $0x1c0] sm:$0xff]  ;;  %v886_v45 = vand.u32 255, %v566_v8 }
 0x1c3   : > { %v11330_v26 = vadd.f32 %v8398_v58, %v7365_v32  ;;  %v11332_v40 = vadd.f32 %v7880_v56, %v6855_v39  ;;  %v7428_v20 = vmax.f32 %v2600_v47, 0.0  ;;  %v6918_v50 = vmax.f32 %v2713_v11, 0.0  ;;  %3570 = vmatprep.mubr.f32.mxu0 %v9776_v0  ;;  %3683 = vmatprep.mubr.f32.mxu1 %v9776_v0  ;;  %v11379_v47 = vld [vmem:[%s14378_s1 + $0x78] sm:$0xff] }
 0x1c4   : > { %v2602_v44 = vpop.f32.mrf.mxu0  ;;  %v2715_v62 = vpop.f32.mrf.mxu1  ;;  %3942 = vmatpush1.msra.mxu1 %v948_v23  ;;  %v438_v11 = vunpack.c.0.s8 %v11357_v19 }
 0x1c5   : > { %v8463_v63 = vadd.f32 %v11232_v46, %v7428_v20  ;;  %v7945_v22 = vadd.f32 %v11234_v21, %v6918_v50  ;;  %v7429_v7 = vmax.f32 %v2602_v44, 0.0  ;;  %v6919_v59 = vmax.f32 %v2715_v62, 0.0  ;;  %9275 = vmatprep.subr.msk.mxu1 %vm1303_vm0, %v1209_v52 }
 0x1c6   : > { %v2606_v57 = vpop.f32.mrf.mxu0  ;;  %v2719_v1 = vpop.f32.mrf.mxu1  ;;  %9200 = vmatmul.mubr.msk.f32.gmra.mxu0 %vm1254_vm1, %v10919_v42  ;;  %9210 = vmatmul.mubr.msk.f32.gmra.mxu1 %vm1254_vm1, %v11075_v6  ;;  %v503_v42 = vunpack.c.1.s8 %v11339_v27 }
 0x1c7   : > { %v11346_v60 = vadd.f32 %v8463_v63, %v7429_v7  ;;  %v11348_v46 = vadd.f32 %v7945_v22, %v6919_v59  ;;  %v7492_v21 = vmax.f32 %v2606_v57, 0.0  ;;  %v6982_v5 = vmax.f32 %v2719_v1, 0.0  ;;  %3576 = vmatprep.mubr.f32.mxu0 %v9776_v0  ;;  %3689 = vmatprep.mubr.f32.mxu1 %v9776_v0 }
 0x1c8   : > { %v2608_v14 = vpop.f32.mrf.mxu0  ;;  %v2721_v28 = vpop.f32.mrf.mxu1  ;;  %v823_v10 = vand.u32 255, %v503_v42  ;;  %v1206_v22 = vcvt.s32.f32 %v886_v45 }
 0x1c9   : > { %v8528_v48 = vadd.f32 %v11246_v54, %v7492_v21  ;;  %v8010_v6 = vadd.f32 %v11248_v31, %v6982_v5  ;;  %v7493_v36 = vmax.f32 %v2608_v14, 0.0  ;;  %v6983_v25 = vmax.f32 %v2721_v28, 0.0  ;;  %v11370_v31 = vld [vmem:[%s9818_s20 + $0xc0] sm:$0xff] }
 0x1ca   : > { %v2612_v24 = vpop.f32.mrf.mxu0  ;;  %v2725_v55 = vpop.f32.mrf.mxu1  ;;  %9201 = vmatmul.mubr.msk.f32.gmra.mxu0 %vm1254_vm1, %v10938_v13  ;;  %9211 = vmatmul.mubr.msk.f32.gmra.mxu1 %vm1254_vm1, %v11097_v37  ;;  %v502_v13 = vunpack.c.0.s8 %v11339_v27  ;;  %v439_v37 = vunpack.c.1.s8 %v11357_v19  ;;  %v1143_v7 = vcvt.s32.f32 %v823_v10  ;;  %v11396_v28 = vld [vmem:[%s9818_s20 + $0x40] sm:$0xff] }
 0x1cb   : > { %v11363_v43 = vadd.f32 %v8528_v48, %v7493_v36  ;;  %v11365_v53 = vadd.f32 %v8010_v6, %v6983_v25  ;;  %v7556_v29 = vmax.f32 %v2612_v24, 0.0  ;;  %v7046_v54 = vmax.f32 %v2725_v55, 0.0  ;;  %3582 = vmatprep.mubr.f32.mxu0 %v9776_v0  ;;  %3695 = vmatprep.mubr.f32.mxu1 %v9776_v0  ;;  %v11403_v48 = vld [vmem:[%s14378_s1] sm:$0xff] }
 0x1cc   : > { %v2614_v34 = vpop.f32.mrf.mxu0  ;;  %v2727_v18 = vpop.f32.mrf.mxu1  ;;  %v822_v59 = vand.u32 255, %v502_v13  ;;  %v759_v57 = vand.u32 255, %v439_v37  ;;  %v311_v45 = vunpack.c.1.s8 %v11396_v28 }
 0x1cd   : > { %v8593_v23 = vadd.f32 %v11262_v33, %v7556_v29  ;;  %v8075_v52 = vadd.f32 %v11264_v38, %v7046_v54  ;;  %v7557_v58 = vmax.f32 %v2614_v34, 0.0  ;;  %v7047_v56 = vmax.f32 %v2727_v18, 0.0 }
 0x1ce   : > { %v2618_v32 = vpop.f32.mrf.mxu0  ;;  %v2731_v39 = vpop.f32.mrf.mxu1  ;;  %9202 = vmatmul.mubr.msk.f32.gmra.mxu0 %vm1254_vm1, %v11379_v47  ;;  %9212 = vmatmul.mubr.msk.f32.gmra.mxu1 %vm1254_vm1, %v11119_v2  ;;  %v375_v33 = vunpack.c.1.s8 %v11370_v31  ;;  %v1142_v54 = vcvt.s32.f32 %v822_v59  ;;  %v1079_v34 = vcvt.s32.f32 %v759_v57  ;;  %v374_v18 = vunpack.c.0.s8 %v11370_v31 }
 0x1cf   : > { %v11387_v38 = vadd.f32 %v8593_v23, %v7557_v58  ;;  %v11389_v20 = vadd.f32 %v8075_v52, %v7047_v56  ;;  %v7620_v50 = vmax.f32 %v2618_v32, 0.0  ;;  %v7110_v44 = vmax.f32 %v2731_v39, 0.0  ;;  %3701 = vmatprep.mubr.f32.mxu1 %v9776_v0  ;;  %3814 = vmatprep.mubr.f32.mxu0 %v9776_v0  ;;  %v11421_v52 = vld [vmem:[%s9818_s20 + $0x248] sm:$0x55] }
 0x1d0   : > { %v2620_v62 = vpop.f32.mrf.mxu0  ;;  %v2733_v63 = vpop.f32.mrf.mxu1  ;;  %v11407_v6 = vand.u32 255, %v375_v33  ;;  %v11428_v32 = vld [vmem:[%s14378_s1 + $0x8] sm:$0xff]  ;;  %v571_v59 = vunpack.c.1.s8 %v11421_v52 }
 0x1d1   : > { %v8658_v1 = vadd.f32 %v11276_v51, %v7620_v50  ;;  %v8140_v21 = vadd.f32 %v11278_v30, %v7110_v44  ;;  %v7621_v5 = vmax.f32 %v2620_v62, 0.0  ;;  %v7111_v14 = vmax.f32 %v2733_v63, 0.0 }
 0x1d2   : > { %v2737_v8 = vpop.f32.mrf.mxu1  ;;  %v2850_v42 = vpop.f32.mrf.mxu0  ;;  %9213 = vmatmul.mubr.msk.f32.gmra.mxu1 %vm1254_vm1, %v11139_v15  ;;  %9223 = vmatmul.mubr.msk.f32.vlgmr.msra.gmra.mxu0 %vm1254_vm1, %v11403_v48  ;;  %v758_v51 = vand.u32 255, %v438_v11  ;;  %v694_v63 = vand.u32 255, %v374_v18 }
 0x1d3   : > { %v11409_v30 = vadd.f32 %v8658_v1, %v7621_v5  ;;  %v11411_v36 = vadd.f32 %v8140_v21, %v7111_v14  ;;  %v7174_v25 = vmax.f32 %v2737_v8, 0.0  ;;  %v6664_v24 = vmax.f32 %v2850_v42, 0.0  ;;  %3707 = vmatprep.mubr.f32.mxu1 %v9776_v0  ;;  %3820 = vmatprep.mubr.f32.mxu0 %v9776_v0  ;;  %v11448_v42 = vld [vmem:[%s14378_s1 + $0x10] sm:$0xff] }
 0x1d4   : > { %v2739_v55 = vpop.f32.mrf.mxu1  ;;  %v2852_v29 = vpop.f32.mrf.mxu0  ;;  %9258 = vmatpush1.msk.msra.mxu0 %vm1303_vm0, %v1206_v22  ;;  %v631_v22 = vand.u32 255, %v311_v45 }
 0x1d5   : > { %v8205_v10 = vadd.f32 %v11292_v17, %v7174_v25  ;;  %v7687_v13 = vadd.f32 %v11294_v4, %v6664_v24  ;;  %v7175_v37 = vmax.f32 %v2739_v55, 0.0  ;;  %v6665_v23 = vmax.f32 %v2852_v29, 0.0  ;;  %4096 = vmatprep.subr.mxu0 %v1143_v7 }
 0x1d6   : > { %v2743_v58 = vpop.f32.mrf.mxu1  ;;  %v2856_v56 = vpop.f32.mrf.mxu0  ;;  %9214 = vmatmul.mubr.msk.f32.gmra.mxu1 %vm1254_vm1, %v11164_v41  ;;  %9224 = vmatmul.mubr.msk.f32.gmra.mxu0 %vm1254_vm1, %v11428_v32  ;;  %v1078_v17 = vcvt.s32.f32 %v758_v51  ;;  %v1015_v4 = vcvt.s32.f32 %v11407_v6  ;;  %v310_v7 = vunpack.c.0.s8 %v11396_v28  ;;  %v1014_v55 = vcvt.s32.f32 %v694_v63 }
 0x1d7   : > { %v11433_v39 = vadd.f32 %v8205_v10, %v7175_v37  ;;  %v11435_v11 = vadd.f32 %v7687_v13, %v6665_v23  ;;  %v7238_v33 = vmax.f32 %v2743_v58, 0.0  ;;  %v6728_v50 = vmax.f32 %v2856_v56, 0.0  ;;  %3713 = vmatprep.mubr.f32.mxu1 %v9776_v0  ;;  %3826 = vmatprep.mubr.f32.mxu0 %v9776_v0  ;;  %v11465_v58 = vld [vmem:[%s14378_s1 + $0x18] sm:$0xff] }
 0x1d8   : > { %v2745_v44 = vpop.f32.mrf.mxu1  ;;  %v2858_v62 = vpop.f32.mrf.mxu0  ;;  %4097 = vmatpush1.msra.mxu0 %v1142_v54  ;;  %v951_v29 = vcvt.s32.f32 %v631_v22  ;;  %v630_v54 = vand.u32 255, %v310_v7 }
 0x1d9   : > { %v8270_v57 = vadd.f32 %v11306_v9, %v7238_v33  ;;  %v7752_v1 = vadd.f32 %v11308_v35, %v6728_v50  ;;  %v7239_v21 = vmax.f32 %v2745_v44, 0.0  ;;  %v6729_v5 = vmax.f32 %v2858_v62, 0.0  ;;  %4098 = vmatprep.subr.mxu0 %v1079_v34 }
 0x1da   : > { %v2749_v14 = vpop.f32.mrf.mxu1  ;;  %v2862_v8 = vpop.f32.mrf.mxu0  ;;  %9215 = vmatmul.mubr.msk.f32.gmra.mxu1 %vm1254_vm1, %v11184_v61  ;;  %9225 = vmatmul.mubr.msk.f32.gmra.mxu0 %vm1254_vm1, %v11448_v42  ;;  %v891_v34 = vand.u32 255, %v571_v59  ;;  %v950_v50 = vcvt.s32.f32 %v630_v54 }
 0x1db   : > { %v11452_v51 = vadd.f32 %v8270_v57, %v7239_v21  ;;  %v11454_v9 = vadd.f32 %v7752_v1, %v6729_v5  ;;  %v7302_v35 = vmax.f32 %v2749_v14, 0.0  ;;  %v6792_v6 = vmax.f32 %v2862_v8, 0.0  ;;  %3719 = vmatprep.mubr.f32.mxu1 %v9776_v0  ;;  %3832 = vmatprep.mubr.f32.mxu0 %v9776_v0  ;;  %v11480_v1 = vld [vmem:[%s14378_s1 + $0x60] sm:$0xff] }
 0x1dc   : > { %v2751_v25 = vpop.f32.mrf.mxu1  ;;  %v2864_v24 = vpop.f32.mrf.mxu0  ;;  %4099 = vmatpush1.msra.mxu0 %v1078_v17  ;;  %v1211_v44 = vcvt.s32.f32 %v891_v34  ;;  %v11487_v21 = vld [vmem:[%s14378_s1 + $0x20] sm:$0xff]  ;;  %v11503_v34 = vld [vmem:[%s14378_s1 + $0x68] sm:$0xff] }
 0x1dd   : > { %v8335_v18 = vadd.f32 %v11318_v16, %v7302_v35  ;;  %v7817_v45 = vadd.f32 %v11320_v3, %v6792_v6  ;;  %v7303_v10 = vmax.f32 %v2751_v25, 0.0  ;;  %v6793_v13 = vmax.f32 %v2864_v24, 0.0  ;;  %4100 = vmatprep.subr.mxu0 %v1015_v4 }
 0x1de   : > { %v2755_v37 = vpop.f32.mrf.mxu1  ;;  %v2868_v23 = vpop.f32.mrf.mxu0  ;;  %9216 = vmatmul.mubr.msk.f32.gmra.mxu1 %vm1254_vm1, %v11201_v49  ;;  %9226 = vmatmul.mubr.msk.f32.gmra.mxu0 %vm1254_vm1, %v11465_v58 }
 0x1df   : > { %v11469_v56 = vadd.f32 %v8335_v18, %v7303_v10  ;;  %v11471_v16 = vadd.f32 %v7817_v45, %v6793_v13  ;;  %v7366_v3 = vmax.f32 %v2755_v37, 0.0  ;;  %v6856_v17 = vmax.f32 %v2868_v23, 0.0  ;;  %3725 = vmatprep.mubr.f32.mxu1 %v9776_v0  ;;  %3838 = vmatprep.mubr.f32.mxu0 %v9776_v0 }
 0x1e0   : > { %v2757_v4 = vpop.f32.mrf.mxu1  ;;  %v2870_v33 = vpop.f32.mrf.mxu0  ;;  %4101 = vmatpush1.msra.mxu0 %v1014_v55  ;;  %v568_v23 = vunpack.c.2.s8 %v11159_v12  ;;  %v11534_v12 = vld [vmem:[%s14378_s1 + $0x30] sm:$0xff] }
 0x1e1   : > { %v8400_v62 = vadd.f32 %v11330_v26, %v7366_v3  ;;  %v7882_v63 = vadd.f32 %v11332_v40, %v6856_v17  ;;  %v7367_v22 = vmax.f32 %v2757_v4, 0.0  ;;  %v6857_v7 = vmax.f32 %v2870_v33, 0.0  ;;  %4102 = vmatprep.subr.mxu0 %v951_v29 }
 0x1e2   : > { %v2761_v59 = vpop.f32.mrf.mxu1  ;;  %v2874_v57 = vpop.f32.mrf.mxu0  ;;  %9217 = vmatmul.mubr.msk.f32.gmra.mxu1 %vm1254_vm1, %v11480_v1  ;;  %9227 = vmatmul.mubr.msk.f32.gmra.mxu0 %vm1254_vm1, %v11487_v21  ;;  %v505_v3 = vunpack.c.3.s8 %v11339_v27 }
 0x1e3   : > { %v11491_v26 = vadd.f32 %v8400_v62, %v7367_v22  ;;  %v11493_v40 = vadd.f32 %v7882_v63, %v6857_v7  ;;  %v7430_v5 = vmax.f32 %v2761_v59, 0.0  ;;  %v6920_v14 = vmax.f32 %v2874_v57, 0.0  ;;  %3731 = vmatprep.mubr.f32.mxu1 %v9776_v0  ;;  %3844 = vmatprep.mubr.f32.mxu0 %v9776_v0  ;;  %v11527_v63 = vld [vmem:[%s14378_s1 + $0x70] sm:$0xff] }
 0x1e4   : > { %v2763_v8 = vpop.f32.mrf.mxu1  ;;  %v2876_v35 = vpop.f32.mrf.mxu0  ;;  %4103 = vmatpush1.msra.mxu0 %v950_v50 }
 0x1e5   : > { %v8465_v6 = vadd.f32 %v11346_v60, %v7430_v5  ;;  %v7947_v25 = vadd.f32 %v11348_v46, %v6920_v14  ;;  %v7431_v24 = vmax.f32 %v2763_v8, 0.0  ;;  %v6921_v55 = vmax.f32 %v2876_v35, 0.0  ;;  %9293 = vmatprep.subr.msk.mxu0 %vm1303_vm0, %v1211_v44  ;;  %v11510_v60 = vld [vmem:[%s14378_s1 + $0x28] sm:$0xff] }
 0x1e6   : > { %v2767_v29 = vpop.f32.mrf.mxu1  ;;  %v2880_v54 = vpop.f32.mrf.mxu0  ;;  %9218 = vmatmul.mubr.msk.f32.gmra.mxu1 %vm1254_vm1, %v11503_v34  ;;  %9228 = vmatmul.mubr.msk.f32.gmra.mxu0 %vm1254_vm1, %v11510_v60  ;;  %v888_v5 = vand.u32 255, %v568_v23  ;;  %v825_v14 = vand.u32 255, %v505_v3  ;;  %v504_v8 = vunpack.c.2.s8 %v11339_v27  ;;  %v441_v35 = vunpack.c.3.s8 %v11357_v19 }
 0x1e7   : > { %v11514_v46 = vadd.f32 %v8465_v6, %v7431_v24  ;;  %v11516_v18 = vadd.f32 %v7947_v25, %v6921_v55  ;;  %v7494_v45 = vmax.f32 %v2767_v29, 0.0  ;;  %v6984_v10 = vmax.f32 %v2880_v54, 0.0  ;;  %3737 = vmatprep.mubr.f32.mxu1 %v9776_v0  ;;  %3850 = vmatprep.mubr.f32.mxu0 %v9776_v0 }
 0x1e8   : > { %v2769_v13 = vpop.f32.mrf.mxu1  ;;  %v2882_v37 = vpop.f32.mrf.mxu0  ;;  %v377_v27 = vunpack.c.3.s8 %v11370_v31  ;;  %v1208_v3 = vcvt.s32.f32 %v888_v5 }
 0x1e9   : > { %v8530_v17 = vadd.f32 %v11363_v43, %v7494_v45  ;;  %v8012_v4 = vadd.f32 %v11365_v53, %v6984_v10  ;;  %v7495_v33 = vmax.f32 %v2769_v13, 0.0  ;;  %v6985_v50 = vmax.f32 %v2882_v37, 0.0 }
 0x1ea   : > { %v2773_v44 = vpop.f32.mrf.mxu1  ;;  %v2886_v62 = vpop.f32.mrf.mxu0  ;;  %9219 = vmatmul.mubr.msk.f32.gmra.mxu1 %vm1254_vm1, %v11527_v63  ;;  %9229 = vmatmul.mubr.msk.f32.gmra.mxu0 %vm1254_vm1, %v11534_v12  ;;  %v440_v45 = vunpack.c.2.s8 %v11357_v19 }
 0x1eb   : > { %v11538_v43 = vadd.f32 %v8530_v17, %v7495_v33  ;;  %v11540_v53 = vadd.f32 %v8012_v4, %v6985_v50  ;;  %v7558_v22 = vmax.f32 %v2773_v44, 0.0  ;;  %v7048_v7 = vmax.f32 %v2886_v62, 0.0  ;;  %3743 = vmatprep.mubr.f32.mxu1 %v9776_v0  ;;  %3856 = vmatprep.mubr.f32.mxu0 %v9776_v0 }
 0x1ec   : > { %v2775_v59 = vpop.f32.mrf.mxu1  ;;  %v2888_v57 = vpop.f32.mrf.mxu0  ;;  %v1145_v17 = vcvt.s32.f32 %v825_v14  ;;  %v824_v4 = vand.u32 255, %v504_v8 }
 0x1ed   : > { %v8595_v6 = vadd.f32 %v11387_v38, %v7558_v22  ;;  %v8077_v25 = vadd.f32 %v11389_v20, %v7048_v7  ;;  %v7559_v24 = vmax.f32 %v2775_v59, 0.0  ;;  %v7049_v55 = vmax.f32 %v2888_v57, 0.0 }
 0x1ee   : > { %v2779_v29 = vpop.f32.mrf.mxu1  ;;  %v2892_v54 = vpop.f32.mrf.mxu0  ;;  %9220 = vmatmul.mubr.msk.f32.gmra.mxu1 %vm1254_vm1, %v11379_v47  ;;  %9230 = vmatmul.mubr.msk.f32.gmra.mxu0 %vm1254_vm1, %v11119_v2  ;;  %v761_v2 = vand.u32 255, %v441_v35  ;;  %v760_v7 = vand.u32 255, %v440_v45  ;;  %v11566_v59 = vand.u32 255, %v377_v27 }
 0x1ef   : > { %v11554_v10 = vadd.f32 %v8595_v6, %v7559_v24  ;;  %v11556_v13 = vadd.f32 %v8077_v25, %v7049_v55  ;;  %v7622_v38 = vmax.f32 %v2779_v29, 0.0  ;;  %v7112_v20 = vmax.f32 %v2892_v54, 0.0  ;;  %3862 = vmatprep.mubr.f32.mxu0 %v9776_v0  ;;  %3975 = vmatprep.mubr.f32.mxu1 %v9776_v0 }
 0x1f0   : > { %v2781_v37 = vpop.f32.mrf.mxu1  ;;  %v2894_v23 = vpop.f32.mrf.mxu0  ;;  %v1081_v35 = vcvt.s32.f32 %v761_v2  ;;  %v376_v6 = vunpack.c.2.s8 %v11370_v31  ;;  %v313_v25 = vunpack.c.3.s8 %v11396_v28  ;;  %v1017_v31 = vcvt.s32.f32 %v11566_v59 }
 0x1f1   : > { %v8660_v19 = vadd.f32 %v11409_v30, %v7622_v38  ;;  %v8142_v33 = vadd.f32 %v11411_v36, %v7112_v20  ;;  %v7623_v50 = vmax.f32 %v2781_v37, 0.0  ;;  %v7113_v44 = vmax.f32 %v2894_v23, 0.0 }
 0x1f2   : > { %v2898_v62 = vpop.f32.mrf.mxu0  ;;  %v3011_v22 = vpop.f32.mrf.mxu1  ;;  %9231 = vmatmul.mubr.msk.f32.gmra.mxu0 %vm1254_vm1, %v11139_v15  ;;  %9241 = vmatmul.mubr.msk.f32.vlgmr.msra.gmra.mxu1 %vm1254_vm1, %v11403_v48  ;;  %v1144_v15 = vcvt.s32.f32 %v824_v4  ;;  %v1080_v38 = vcvt.s32.f32 %v760_v7  ;;  %v312_v4 = vunpack.c.2.s8 %v11396_v28  ;;  %v573_v2 = vunpack.c.3.s8 %v11421_v52 }
 0x1f3   : > { %v11568_v57 = vadd.f32 %v8660_v19, %v7623_v50  ;;  %v11570_v5 = vadd.f32 %v8142_v33, %v7113_v44  ;;  %v7176_v30 = vmax.f32 %v2898_v62, 0.0  ;;  %v6666_v14 = vmax.f32 %v3011_v22, 0.0  ;;  %3868 = vmatprep.mubr.f32.mxu0 %v9776_v0  ;;  %3981 = vmatprep.mubr.f32.mxu1 %v9776_v0 }
 0x1f4   : > { %v2900_v36 = vpop.f32.mrf.mxu0  ;;  %v3013_v8 = vpop.f32.mrf.mxu1  ;;  %9276 = vmatpush1.msk.msra.mxu1 %vm1303_vm0, %v1208_v3 }
 0x1f5   : > { %v8207_v24 = vadd.f32 %v11433_v39, %v7176_v30  ;;  %v7689_v55 = vadd.f32 %v11435_v11, %v6666_v14  ;;  %v7177_v29 = vmax.f32 %v2900_v36, 0.0  ;;  %v6667_v54 = vmax.f32 %v3013_v8, 0.0  ;;  %4257 = vmatprep.subr.mxu1 %v1145_v17 }
 0x1f6   : > { %v2904_v45 = vpop.f32.mrf.mxu0  ;;  %v3017_v27 = vpop.f32.mrf.mxu1  ;;  %9232 = vmatmul.mubr.msk.f32.gmra.mxu0 %vm1254_vm1, %v11164_v41  ;;  %9242 = vmatmul.mubr.msk.f32.gmra.mxu1 %vm1254_vm1, %v11428_v32  ;;  %v696_v41 = vand.u32 255, %v376_v6  ;;  %v633_v17 = vand.u32 255, %v313_v25  ;;  %v632_v8 = vand.u32 255, %v312_v4 }
 0x1f7   : > { %v11584_v20 = vadd.f32 %v8207_v24, %v7177_v29  ;;  %v11586_v37 = vadd.f32 %v7689_v55, %v6667_v54  ;;  %v7240_v39 = vmax.f32 %v2904_v45, 0.0  ;;  %v6730_v11 = vmax.f32 %v3017_v27, 0.0  ;;  %3874 = vmatprep.mubr.f32.mxu0 %v9776_v0  ;;  %3987 = vmatprep.mubr.f32.mxu1 %v9776_v0 }
 0x1f8   : > { %v2906_v23 = vpop.f32.mrf.mxu0  ;;  %v3019_v3 = vpop.f32.mrf.mxu1  ;;  %4258 = vmatpush1.msra.mxu1 %v1144_v15  ;;  %v1016_v14 = vcvt.s32.f32 %v696_v41  ;;  %v953_v36 = vcvt.s32.f32 %v633_v17 }
 0x1f9   : > { %v8272_v19 = vadd.f32 %v11452_v51, %v7240_v39  ;;  %v7754_v33 = vadd.f32 %v11454_v9, %v6730_v11  ;;  %v7241_v50 = vmax.f32 %v2906_v23, 0.0  ;;  %v6731_v44 = vmax.f32 %v3019_v3, 0.0  ;;  %4259 = vmatprep.subr.mxu1 %v1081_v35 }
 0x1fa   : > { %v2910_v62 = vpop.f32.mrf.mxu0  ;;  %v3023_v22 = vpop.f32.mrf.mxu1  ;;  %9233 = vmatmul.mubr.msk.f32.gmra.mxu0 %vm1254_vm1, %v11184_v61  ;;  %9243 = vmatmul.mubr.msk.f32.gmra.mxu1 %vm1254_vm1, %v11448_v42  ;;  %v893_v61 = vand.u32 255, %v573_v2 }
 0x1fb   : > { %v11598_v7 = vadd.f32 %v8272_v19, %v7241_v50  ;;  %v11600_v28 = vadd.f32 %v7754_v33, %v6731_v44  ;;  %v7304_v59 = vmax.f32 %v2910_v62, 0.0  ;;  %v6794_v30 = vmax.f32 %v3023_v22, 0.0  ;;  %3880 = vmatprep.mubr.f32.mxu0 %v9776_v0  ;;  %3993 = vmatprep.mubr.f32.mxu1 %v9776_v0  ;;  %v11631_v22 = vld [vmem:[%s9818_s20 + $0x1c8] sm:$0xff] }
 0x1fc   : > { %v2912_v51 = vpop.f32.mrf.mxu0  ;;  %v3025_v9 = vpop.f32.mrf.mxu1  ;;  %4260 = vmatpush1.msra.mxu1 %v1080_v38  ;;  %v952_v38 = vcvt.s32.f32 %v632_v8  ;;  %v570_v8 = vunpack.c.0.s8 %v11421_v52 }
 0x1fd   : > { %v8337_v15 = vadd.f32 %v11469_v56, %v7304_v59  ;;  %v7819_v35 = vadd.f32 %v11471_v16, %v6794_v30  ;;  %v7305_v6 = vmax.f32 %v2912_v51, 0.0  ;;  %v6795_v25 = vmax.f32 %v3025_v9, 0.0  ;;  %4261 = vmatprep.subr.mxu1 %v1017_v31 }
 0x1fe   : > { %v2916_v24 = vpop.f32.mrf.mxu0  ;;  %v3029_v55 = vpop.f32.mrf.mxu1  ;;  %9234 = vmatmul.mubr.msk.f32.gmra.mxu0 %vm1254_vm1, %v11201_v49  ;;  %9244 = vmatmul.mubr.msk.f32.gmra.mxu1 %vm1254_vm1, %v11465_v58  ;;  %v1213_v31 = vcvt.s32.f32 %v893_v61  ;;  %v507_v61 = vunpack.c.1.s8 %v11631_v22 }
 0x1ff   : > { %v11610_v29 = vadd.f32 %v8337_v15, %v7305_v6  ;;  %v11612_v54 = vadd.f32 %v7819_v35, %v6795_v25  ;;  %v7368_v45 = vmax.f32 %v2916_v24, 0.0  ;;  %v6858_v27 = vmax.f32 %v3029_v55, 0.0  ;;  %3886 = vmatprep.mubr.f32.mxu0 %v9776_v0  ;;  %3999 = vmatprep.mubr.f32.mxu1 %v9776_v0  ;;  %v11649_v24 = vld [vmem:[%s9818_s20 + $0x148] sm:$0xff] }
 0x200   : > { %v2918_v56 = vpop.f32.mrf.mxu0  ;;  %v3031_v16 = vpop.f32.mrf.mxu1  ;;  %4262 = vmatpush1.msra.mxu1 %v1016_v14 }
 0x201   : > { %v8402_v49 = vadd.f32 %v11491_v26, %v7368_v45  ;;  %v7884_v39 = vadd.f32 %v11493_v40, %v6858_v27  ;;  %v7369_v11 = vmax.f32 %v2918_v56, 0.0  ;;  %v6859_v23 = vmax.f32 %v3031_v16, 0.0  ;;  %4263 = vmatprep.subr.mxu1 %v953_v36 }
 0x202   : > { %v2922_v3 = vpop.f32.mrf.mxu0  ;;  %v3035_v41 = vpop.f32.mrf.mxu1  ;;  %9235 = vmatmul.mubr.msk.f32.gmra.mxu0 %vm1254_vm1, %v11480_v1  ;;  %9245 = vmatmul.mubr.msk.f32.gmra.mxu1 %vm1254_vm1, %v11487_v21 }
 0x203   : > { %v11622_v17 = vadd.f32 %v8402_v49, %v7369_v11  ;;  %v11624_v4 = vadd.f32 %v7884_v39, %v6859_v23  ;;  %v7432_v2 = vmax.f32 %v2922_v3, 0.0  ;;  %v6922_v26 = vmax.f32 %v3035_v41, 0.0  ;;  %3892 = vmatprep.mubr.f32.mxu0 %v9776_v0  ;;  %4005 = vmatprep.mubr.f32.mxu1 %v9776_v0 }
 0x204   : > { %v2924_v40 = vpop.f32.mrf.mxu0  ;;  %v3037_v19 = vpop.f32.mrf.mxu1  ;;  %4264 = vmatpush1.msra.mxu1 %v952_v38  ;;  %v890_v49 = vand.u32 255, %v570_v8  ;;  %v827_v39 = vand.u32 255, %v507_v61  ;;  %v506_v11 = vunpack.c.0.s8 %v11631_v22  ;;  %v443_v23 = vunpack.c.1.s8 %v11649_v24 }
 0x205   : > { %v8467_v33 = vadd.f32 %v11514_v46, %v7432_v2  ;;  %v7949_v50 = vadd.f32 %v11516_v18, %v6922_v26  ;;  %v7433_v44 = vmax.f32 %v2924_v40, 0.0  ;;  %v6923_v62 = vmax.f32 %v3037_v19, 0.0  ;;  %9311 = vmatprep.subr.msk.mxu1 %vm1303_vm0, %v1213_v31 }
 0x206   : > { %v2928_v59 = vpop.f32.mrf.mxu0  ;;  %v3041_v30 = vpop.f32.mrf.mxu1  ;;  %9236 = vmatmul.mubr.msk.f32.gmra.mxu0 %vm1254_vm1, %v11503_v34  ;;  %9246 = vmatmul.mubr.msk.f32.gmra.mxu1 %vm1254_vm1, %v11510_v60  ;;  %v763_v8 = vand.u32 255, %v443_v23 }
 0x207   : > { %v11638_v51 = vadd.f32 %v8467_v33, %v7433_v44  ;;  %v11640_v46 = vadd.f32 %v7949_v50, %v6923_v62  ;;  %v7496_v18 = vmax.f32 %v2928_v59, 0.0  ;;  %v6986_v9 = vmax.f32 %v3041_v30, 0.0  ;;  %3898 = vmatprep.mubr.f32.mxu0 %v9776_v0  ;;  %4011 = vmatprep.mubr.f32.mxu1 %v9776_v0  ;;  %v11673_v33 = vld [vmem:[%s14378_s1 + $0x38] sm:$0xff] }
 0x208   : > { %v2930_v14 = vpop.f32.mrf.mxu0  ;;  %v3043_v36 = vpop.f32.mrf.mxu1  ;;  %v442_v50 = vunpack.c.0.s8 %v11649_v24 }
 0x209   : > { %v8532_v15 = vadd.f32 %v11538_v43, %v7496_v18  ;;  %v8014_v35 = vadd.f32 %v11540_v53, %v6986_v9  ;;  %v7497_v6 = vmax.f32 %v2930_v14, 0.0  ;;  %v6987_v25 = vmax.f32 %v3043_v36, 0.0  ;;  %v11662_v53 = vld [vmem:[%s9818_s20 + $0xc8] sm:$0xff] }
 0x20a   : > { %v2934_v55 = vpop.f32.mrf.mxu0  ;;  %v3047_v45 = vpop.f32.mrf.mxu1  ;;  %9237 = vmatmul.mubr.msk.f32.gmra.mxu0 %vm1254_vm1, %v11527_v63  ;;  %9247 = vmatmul.mubr.msk.f32.gmra.mxu1 %vm1254_vm1, %v11534_v12  ;;  %v1210_v9 = vcvt.s32.f32 %v890_v49  ;;  %v1147_v14 = vcvt.s32.f32 %v827_v39  ;;  %v826_v36 = vand.u32 255, %v506_v11 }
 0x20b   : > { %v11655_v27 = vadd.f32 %v8532_v15, %v7497_v6  ;;  %v11657_v56 = vadd.f32 %v8014_v35, %v6987_v25  ;;  %v7560_v16 = vmax.f32 %v2934_v55, 0.0  ;;  %v7050_v43 = vmax.f32 %v3047_v45, 0.0  ;;  %3904 = vmatprep.mubr.f32.mxu0 %v9776_v0  ;;  %4017 = vmatprep.mubr.f32.mxu1 %v9776_v0  ;;  %v11688_v25 = vld [vmem:[%s9818_s20 + $0x48] sm:$0xff] }
 0x20c   : > { %v2936_v38 = vpop.f32.mrf.mxu0  ;;  %v3049_v31 = vpop.f32.mrf.mxu1  ;;  %v1146_v23 = vcvt.s32.f32 %v826_v36 }
 0x20d   : > { %v8597_v3 = vadd.f32 %v11554_v10, %v7560_v16  ;;  %v8079_v41 = vadd.f32 %v11556_v13, %v7050_v43  ;;  %v7561_v2 = vmax.f32 %v2936_v38, 0.0  ;;  %v7051_v26 = vmax.f32 %v3049_v31, 0.0  ;;  %v11693_v16 = vld [vmem:[%s14378_s1 + $0x40] sm:$0xff] }
 0x20e   : > { %v2940_v40 = vpop.f32.mrf.mxu0  ;;  %v3053_v19 = vpop.f32.mrf.mxu1  ;;  %9238 = vmatmul.mubr.msk.f32.gmra.mxu0 %vm1254_vm1, %v11379_v47  ;;  %9248 = vmatmul.mubr.msk.f32.gmra.mxu1 %vm1254_vm1, %v11673_v33  ;;  %v379_v10 = vunpack.c.1.s8 %v11662_v53 }
 0x20f   : > { %v11679_v13 = vadd.f32 %v8597_v3, %v7561_v2  ;;  %v11681_v44 = vadd.f32 %v8079_v41, %v7051_v26  ;;  %v7624_v62 = vmax.f32 %v2940_v40, 0.0  ;;  %v7114_v59 = vmax.f32 %v3053_v19, 0.0  ;;  %4023 = vmatprep.mubr.f32.mxu1 %v9776_v0  ;;  %4136 = vmatprep.mubr.f32.mxu0 %v9776_v0 }
 0x210   : > { %v2942_v30 = vpop.f32.mrf.mxu0  ;;  %v3055_v18 = vpop.f32.mrf.mxu1  ;;  %v11699_v43 = vand.u32 255, %v379_v10  ;;  %v1083_v3 = vcvt.s32.f32 %v763_v8  ;;  %v378_v41 = vunpack.c.0.s8 %v11662_v53  ;;  %v315_v2 = vunpack.c.1.s8 %v11688_v25  ;;  %v11713_v10 = vld [vmem:[%s9818_s20 + $0x250] sm:$0x55] }
 0x211   : > { %v8662_v61 = vadd.f32 %v11568_v57, %v7624_v62  ;;  %v8144_v15 = vadd.f32 %v11570_v5, %v7114_v59  ;;  %v7625_v35 = vmax.f32 %v2942_v30, 0.0  ;;  %v7115_v6 = vmax.f32 %v3055_v18, 0.0  ;;  %v11718_v30 = vld [vmem:[%s14378_s1 + $0x48] sm:$0xff] }
 0x212   : > { %v3059_v55 = vpop.f32.mrf.mxu1  ;;  %v3172_v45 = vpop.f32.mrf.mxu0  ;;  %9249 = vmatmul.mubr.msk.f32.gmra.mxu1 %vm1254_vm1, %v11693_v16  ;;  %9259 = vmatmul.mubr.msk.f32.vlgmr.msra.gmra.mxu0 %vm1254_vm1, %v11403_v48  ;;  %v762_v57 = vand.u32 255, %v442_v50 }
 0x213   : > { %v11701_v5 = vadd.f32 %v8662_v61, %v7625_v35  ;;  %v11703_v38 = vadd.f32 %v8144_v15, %v7115_v6  ;;  %v7178_v31 = vmax.f32 %v3059_v55, 0.0  ;;  %v6668_v49 = vmax.f32 %v3172_v45, 0.0  ;;  %4029 = vmatprep.mubr.f32.mxu1 %v9776_v0  ;;  %4142 = vmatprep.mubr.f32.mxu0 %v9776_v0 }
 0x214   : > { %v3061_v39 = vpop.f32.mrf.mxu1  ;;  %v3174_v11 = vpop.f32.mrf.mxu0  ;;  %9294 = vmatpush1.msk.msra.mxu0 %vm1303_vm0, %v1210_v9  ;;  %v698_v15 = vand.u32 255, %v378_v41  ;;  %v635_v35 = vand.u32 255, %v315_v2  ;;  %v314_v6 = vunpack.c.0.s8 %v11688_v25  ;;  %v575_v55 = vunpack.c.1.s8 %v11713_v10 }
 0x215   : > { %v8209_v26 = vadd.f32 %v11584_v20, %v7178_v31  ;;  %v7691_v40 = vadd.f32 %v11586_v37, %v6668_v49  ;;  %v7179_v19 = vmax.f32 %v3061_v39, 0.0  ;;  %v6669_v50 = vmax.f32 %v3174_v11, 0.0  ;;  %4418 = vmatprep.subr.mxu0 %v1147_v14  ;;  %v11738_v11 = vld [vmem:[%s14378_s1 + $0x50] sm:$0xff] }
 0x216   : > { %v3065_v62 = vpop.f32.mrf.mxu1  ;;  %v3178_v59 = vpop.f32.mrf.mxu0  ;;  %9250 = vmatmul.mubr.msk.f32.gmra.mxu1 %vm1254_vm1, %v11718_v30  ;;  %9260 = vmatmul.mubr.msk.f32.gmra.mxu0 %vm1254_vm1, %v11428_v32  ;;  %v1082_v20 = vcvt.s32.f32 %v762_v57  ;;  %v1019_v37 = vcvt.s32.f32 %v11699_v43 }
 0x217   : > { %v11725_v18 = vadd.f32 %v8209_v26, %v7179_v19  ;;  %v11727_v9 = vadd.f32 %v7691_v40, %v6669_v50  ;;  %v7242_v14 = vmax.f32 %v3065_v62, 0.0  ;;  %v6732_v36 = vmax.f32 %v3178_v59, 0.0  ;;  %4035 = vmatprep.mubr.f32.mxu1 %v9776_v0  ;;  %4148 = vmatprep.mubr.f32.mxu0 %v9776_v0 }
 0x218   : > { %v3067_v8 = vpop.f32.mrf.mxu1  ;;  %v3180_v61 = vpop.f32.mrf.mxu0  ;;  %4419 = vmatpush1.msra.mxu0 %v1146_v23  ;;  %v1018_v26 = vcvt.s32.f32 %v698_v15  ;;  %v955_v40 = vcvt.s32.f32 %v635_v35  ;;  %v634_v19 = vand.u32 255, %v314_v6  ;;  %v895_v50 = vand.u32 255, %v575_v55 }
 0x219   : > { %v8274_v45 = vadd.f32 %v11598_v7, %v7242_v14  ;;  %v7756_v57 = vadd.f32 %v11600_v28, %v6732_v36  ;;  %v7243_v43 = vmax.f32 %v3067_v8, 0.0  ;;  %v6733_v31 = vmax.f32 %v3180_v61, 0.0  ;;  %4420 = vmatprep.subr.mxu0 %v1083_v3 }
 0x21a   : > { %v3071_v49 = vpop.f32.mrf.mxu1  ;;  %v3184_v39 = vpop.f32.mrf.mxu0  ;;  %9251 = vmatmul.mubr.msk.f32.gmra.mxu1 %vm1254_vm1, %v11738_v11  ;;  %9261 = vmatmul.mubr.msk.f32.gmra.mxu0 %vm1254_vm1, %v11448_v42  ;;  %v954_v6 = vcvt.s32.f32 %v634_v19  ;;  %v1215_v55 = vcvt.s32.f32 %v895_v50 }
 0x21b   : > { %v11744_v23 = vadd.f32 %v8274_v45, %v7243_v43  ;;  %v11746_v7 = vadd.f32 %v7756_v57, %v6733_v31  ;;  %v7306_v28 = vmax.f32 %v3071_v49, 0.0  ;;  %v6796_v41 = vmax.f32 %v3184_v39, 0.0  ;;  %4041 = vmatprep.mubr.f32.mxu1 %v9776_v0  ;;  %4154 = vmatprep.mubr.f32.mxu0 %v9776_v0  ;;  %v11755_v45 = vld [vmem:[%s14378_s1 + $0x58] sm:$0xff] }
 0x21c   : > { %v3073_v3 = vpop.f32.mrf.mxu1  ;;  %v3186_v2 = vpop.f32.mrf.mxu0  ;;  %4421 = vmatpush1.msra.mxu0 %v1082_v20 }
 0x21d   : > { %v8339_v62 = vadd.f32 %v11610_v29, %v7306_v28  ;;  %v7821_v59 = vadd.f32 %v11612_v54, %v6796_v41  ;;  %v7307_v14 = vmax.f32 %v3073_v3, 0.0  ;;  %v6797_v36 = vmax.f32 %v3186_v2, 0.0  ;;  %4422 = vmatprep.subr.mxu0 %v1019_v37 }
 0x21e   : > { %v3077_v8 = vpop.f32.mrf.mxu1  ;;  %v3190_v61 = vpop.f32.mrf.mxu0  ;;  %9252 = vmatmul.mubr.msk.f32.gmra.mxu1 %vm1254_vm1, %v11755_v45  ;;  %9262 = vmatmul.mubr.msk.f32.gmra.mxu0 %vm1254_vm1, %v11465_v58 }
 0x21f   : > { %v11761_v20 = vadd.f32 %v8339_v62, %v7307_v14  ;;  %v11763_v29 = vadd.f32 %v7821_v59, %v6797_v36  ;;  %v7370_v54 = vmax.f32 %v3077_v8, 0.0  ;;  %v6860_v15 = vmax.f32 %v3190_v61, 0.0  ;;  %4047 = vmatprep.mubr.f32.mxu1 %v9776_v0  ;;  %4160 = vmatprep.mubr.f32.mxu0 %v9776_v0 }
 0x220   : > { %v3079_v37 = vpop.f32.mrf.mxu1  ;;  %v3192_v35 = vpop.f32.mrf.mxu0  ;;  %4423 = vmatpush1.msra.mxu0 %v1018_v26 }
 0x221   : > { %v8404_v57 = vadd.f32 %v11622_v17, %v7370_v54  ;;  %v7886_v43 = vadd.f32 %v11624_v4, %v6860_v15  ;;  %v7371_v31 = vmax.f32 %v3079_v37, 0.0  ;;  %v6861_v49 = vmax.f32 %v3192_v35, 0.0  ;;  %4424 = vmatprep.subr.mxu0 %v955_v40 }
 0x222   : > { %v3083_v39 = vpop.f32.mrf.mxu1  ;;  %v3196_v28 = vpop.f32.mrf.mxu0  ;;  %9253 = vmatmul.mubr.msk.f32.gmra.mxu1 %vm1254_vm1, %v11480_v1  ;;  %9263 = vmatmul.mubr.msk.f32.gmra.mxu0 %vm1254_vm1, %v11487_v21  ;;  %v572_v15 = vunpack.c.2.s8 %v11421_v52  ;;  %v509_v37 = vunpack.c.3.s8 %v11631_v22 }
 0x223   : > { %v11773_v41 = vadd.f32 %v8404_v57, %v7371_v31  ;;  %v11775_v3 = vadd.f32 %v7886_v43, %v6861_v49  ;;  %v7434_v2 = vmax.f32 %v3083_v39, 0.0  ;;  %v6924_v26 = vmax.f32 %v3196_v28, 0.0  ;;  %4053 = vmatprep.mubr.f32.mxu1 %v9776_v0  ;;  %4166 = vmatprep.mubr.f32.mxu0 %v9776_v0 }
 0x224   : > { %v3085_v17 = vpop.f32.mrf.mxu1  ;;  %v3198_v4 = vpop.f32.mrf.mxu0  ;;  %4425 = vmatpush1.msra.mxu0 %v954_v6 }
 0x225   : > { %v8469_v40 = vadd.f32 %v11638_v51, %v7434_v2  ;;  %v7951_v19 = vadd.f32 %v11640_v46, %v6924_v26  ;;  %v7435_v50 = vmax.f32 %v3085_v17, 0.0  ;;  %v6925_v62 = vmax.f32 %v3198_v4, 0.0  ;;  %9329 = vmatprep.subr.msk.mxu0 %vm1303_vm0, %v1215_v55 }
 0x226   : > { %v3089_v59 = vpop.f32.mrf.mxu1  ;;  %v3202_v14 = vpop.f32.mrf.mxu0  ;;  %9254 = vmatmul.mubr.msk.f32.gmra.mxu1 %vm1254_vm1, %v11503_v34  ;;  %9264 = vmatmul.mubr.msk.f32.gmra.mxu0 %vm1254_vm1, %v11510_v60  ;;  %v892_v2 = vand.u32 255, %v572_v15  ;;  %v829_v26 = vand.u32 255, %v509_v37  ;;  %v508_v17 = vunpack.c.2.s8 %v11631_v22  ;;  %v445_v4 = vunpack.c.3.s8 %v11649_v24 }
 0x227   : > { %v11786_v36 = vadd.f32 %v8469_v40, %v7435_v50  ;;  %v11788_v8 = vadd.f32 %v7951_v19, %v6925_v62  ;;  %v7498_v61 = vmax.f32 %v3089_v59, 0.0  ;;  %v6988_v51 = vmax.f32 %v3202_v14, 0.0  ;;  %4059 = vmatprep.mubr.f32.mxu1 %v9776_v0  ;;  %4172 = vmatprep.mubr.f32.mxu0 %v9776_v0 }
 0x228   : > { %v3091_v46 = vpop.f32.mrf.mxu1  ;;  %v3204_v54 = vpop.f32.mrf.mxu0  ;;  %v381_v22 = vunpack.c.3.s8 %v11662_v53  ;;  %v1149_v37 = vcvt.s32.f32 %v829_v26 }
 0x229   : > { %v8534_v35 = vadd.f32 %v11655_v27, %v7498_v61  ;;  %v8016_v6 = vadd.f32 %v11657_v56, %v6988_v51  ;;  %v7499_v55 = vmax.f32 %v3091_v46, 0.0  ;;  %v6989_v57 = vmax.f32 %v3204_v54, 0.0 }
 0x22a   : > { %v3095_v43 = vpop.f32.mrf.mxu1  ;;  %v3208_v31 = vpop.f32.mrf.mxu0  ;;  %9255 = vmatmul.mubr.msk.f32.gmra.mxu1 %vm1254_vm1, %v11527_v63  ;;  %9265 = vmatmul.mubr.msk.f32.gmra.mxu0 %vm1254_vm1, %v11534_v12  ;;  %v444_v61 = vunpack.c.2.s8 %v11649_v24 }
 0x22b   : > { %v11800_v49 = vadd.f32 %v8534_v35, %v7499_v55  ;;  %v11802_v39 = vadd.f32 %v8016_v6, %v6989_v57  ;;  %v7562_v52 = vmax.f32 %v3095_v43, 0.0  ;;  %v7052_v28 = vmax.f32 %v3208_v31, 0.0  ;;  %4065 = vmatprep.mubr.f32.mxu1 %v9776_v0  ;;  %4178 = vmatprep.mubr.f32.mxu0 %v9776_v0 }
 0x22c   : > { %v3097_v27 = vpop.f32.mrf.mxu1  ;;  %v3210_v56 = vpop.f32.mrf.mxu0  ;;  %v828_v35 = vand.u32 255, %v508_v17  ;;  %v765_v6 = vand.u32 255, %v445_v4 }
 0x22d   : > { %v8599_v40 = vadd.f32 %v11679_v13, %v7562_v52  ;;  %v8081_v19 = vadd.f32 %v11681_v44, %v7052_v28  ;;  %v7563_v50 = vmax.f32 %v3097_v27, 0.0  ;;  %v7053_v62 = vmax.f32 %v3210_v56, 0.0 }
 0x22e   : > { %v3101_v59 = vpop.f32.mrf.mxu1  ;;  %v3214_v14 = vpop.f32.mrf.mxu0  ;;  %9256 = vmatmul.mubr.msk.f32.gmra.mxu1 %vm1254_vm1, %v11379_v47  ;;  %9266 = vmatmul.mubr.msk.f32.gmra.mxu0 %vm1254_vm1, %v11673_v33  ;;  %v1212_v47 = vcvt.s32.f32 %v892_v2  ;;  %v764_v28 = vand.u32 255, %v444_v61  ;;  %v11828_v27 = vand.u32 255, %v381_v22  ;;  %v1148_v4 = vcvt.s32.f32 %v828_v35 }
 0x22f   : > { %v11816_v51 = vadd.f32 %v8599_v40, %v7563_v50  ;;  %v11818_v46 = vadd.f32 %v8081_v19, %v7053_v62  ;;  %v7626_v13 = vmax.f32 %v3101_v59, 0.0  ;;  %v7116_v44 = vmax.f32 %v3214_v14, 0.0  ;;  %4184 = vmatprep.mubr.f32.mxu0 %v9776_v0  ;;  %4297 = vmatprep.mubr.f32.mxu1 %v9776_v0 }
 0x230   : > { %v3103_v54 = vpop.f32.mrf.mxu1  ;;  %v3216_v15 = vpop.f32.mrf.mxu0  ;;  %v1085_v40 = vcvt.s32.f32 %v765_v6  ;;  %v317_v19 = vunpack.c.3.s8 %v11688_v25  ;;  %v577_v6 = vunpack.c.3.s8 %v11713_v10 }
 0x231   : > { %v8664_v24 = vadd.f32 %v11701_v5, %v7626_v13  ;;  %v8146_v55 = vadd.f32 %v11703_v38, %v7116_v44  ;;  %v7627_v57 = vmax.f32 %v3103_v54, 0.0  ;;  %v7117_v43 = vmax.f32 %v3216_v15, 0.0 }
 0x232   : > { %v3220_v31 = vpop.f32.mrf.mxu0  ;;  %v3333_v52 = vpop.f32.mrf.mxu1  ;;  %9267 = vmatmul.mubr.msk.f32.gmra.mxu0 %vm1254_vm1, %v11693_v16  ;;  %9277 = vmatmul.mubr.msk.f32.vlgmr.msra.gmra.mxu1 %vm1254_vm1, %v11403_v48  ;;  %v380_v48 = vunpack.c.2.s8 %v11662_v53  ;;  %v1084_v13 = vcvt.s32.f32 %v764_v28  ;;  %v1021_v53 = vcvt.s32.f32 %v11828_v27  ;;  %v637_v35 = vand.u32 255, %v317_v19 }
 0x233   : > { %v11830_v56 = vadd.f32 %v8664_v24, %v7627_v57  ;;  %v11832_v2 = vadd.f32 %v8146_v55, %v7117_v43  ;;  %v7180_v5 = vmax.f32 %v3220_v31, 0.0  ;;  %v6670_v26 = vmax.f32 %v3333_v52, 0.0  ;;  %4190 = vmatprep.mubr.f32.mxu0 %v9776_v0  ;;  %4303 = vmatprep.mubr.f32.mxu1 %v9776_v0 }
 0x234   : > { %v3222_v38 = vpop.f32.mrf.mxu0  ;;  %v3335_v17 = vpop.f32.mrf.mxu1  ;;  %9312 = vmatpush1.msk.msra.mxu1 %vm1303_vm0, %v1212_v47 }
 0x235   : > { %v8211_v50 = vadd.f32 %v11725_v18, %v7180_v5  ;;  %v7693_v62 = vadd.f32 %v11727_v9, %v6670_v26  ;;  %v7181_v59 = vmax.f32 %v3222_v38, 0.0  ;;  %v6671_v14 = vmax.f32 %v3335_v17, 0.0  ;;  %4579 = vmatprep.subr.mxu1 %v1149_v37 }
 0x236   : > { %v3226_v61 = vpop.f32.mrf.mxu0  ;;  %v3339_v22 = vpop.f32.mrf.mxu1  ;;  %9268 = vmatmul.mubr.msk.f32.gmra.mxu0 %vm1254_vm1, %v11718_v30  ;;  %9278 = vmatmul.mubr.msk.f32.gmra.mxu1 %vm1254_vm1, %v11428_v32  ;;  %v700_v37 = vand.u32 255, %v380_v48  ;;  %v316_v32 = vunpack.c.2.s8 %v11688_v25  ;;  %v957_v38 = vcvt.s32.f32 %v637_v35 }
 0x237   : > { %v11846_v44 = vadd.f32 %v8211_v50, %v7181_v59  ;;  %v11848_v54 = vadd.f32 %v7693_v62, %v6671_v14  ;;  %v7244_v18 = vmax.f32 %v3226_v61, 0.0  ;;  %v6734_v9 = vmax.f32 %v3339_v22, 0.0  ;;  %4196 = vmatprep.mubr.f32.mxu0 %v9776_v0  ;;  %4309 = vmatprep.mubr.f32.mxu1 %v9776_v0 }
 0x238   : > { %v3228_v15 = vpop.f32.mrf.mxu0  ;;  %v3341_v47 = vpop.f32.mrf.mxu1  ;;  %4580 = vmatpush1.msra.mxu1 %v1148_v4  ;;  %v1020_v26 = vcvt.s32.f32 %v700_v37  ;;  %v636_v17 = vand.u32 255, %v316_v32  ;;  %v897_v4 = vand.u32 255, %v577_v6 }
 0x239   : > { %v8276_v24 = vadd.f32 %v11744_v23, %v7244_v18  ;;  %v7758_v55 = vadd.f32 %v11746_v7, %v6734_v9  ;;  %v7245_v57 = vmax.f32 %v3228_v15, 0.0  ;;  %v6735_v43 = vmax.f32 %v3341_v47, 0.0  ;;  %4581 = vmatprep.subr.mxu1 %v1085_v40 }
 0x23a   : > { %v3232_v31 = vpop.f32.mrf.mxu0  ;;  %v3345_v52 = vpop.f32.mrf.mxu1  ;;  %9269 = vmatmul.mubr.msk.f32.gmra.mxu0 %vm1254_vm1, %v11738_v11  ;;  %9279 = vmatmul.mubr.msk.f32.gmra.mxu1 %vm1254_vm1, %v11448_v42 }
 0x23b   : > { %v11860_v28 = vadd.f32 %v8276_v24, %v7245_v57  ;;  %v11862_v25 = vadd.f32 %v7758_v55, %v6735_v43  ;;  %v7308_v27 = vmax.f32 %v3232_v31, 0.0  ;;  %v6798_v5 = vmax.f32 %v3345_v52, 0.0  ;;  %4202 = vmatprep.mubr.f32.mxu0 %v9776_v0  ;;  %4315 = vmatprep.mubr.f32.mxu1 %v9776_v0 }
 0x23c   : > { %v3234_v23 = vpop.f32.mrf.mxu0  ;;  %v3347_v7 = vpop.f32.mrf.mxu1  ;;  %4582 = vmatpush1.msra.mxu1 %v1084_v13  ;;  %v956_v13 = vcvt.s32.f32 %v636_v17 }
 0x23d   : > { %v8341_v40 = vadd.f32 %v11761_v20, %v7308_v27  ;;  %v7823_v42 = vadd.f32 %v11763_v29, %v6798_v5  ;;  %v7309_v48 = vmax.f32 %v3234_v23, 0.0  ;;  %v6799_v19 = vmax.f32 %v3347_v7, 0.0  ;;  %4583 = vmatprep.subr.mxu1 %v1021_v53 }
 0x23e   : > { %v3238_v50 = vpop.f32.mrf.mxu0  ;;  %v3351_v62 = vpop.f32.mrf.mxu1  ;;  %9270 = vmatmul.mubr.msk.f32.gmra.mxu0 %vm1254_vm1, %v11755_v45  ;;  %9280 = vmatmul.mubr.msk.f32.gmra.mxu1 %vm1254_vm1, %v11465_v58  ;;  %v1217_v53 = vcvt.s32.f32 %v897_v4 }
 0x23f   : > { %v11872_v59 = vadd.f32 %v8341_v40, %v7309_v48  ;;  %v11874_v14 = vadd.f32 %v7823_v42, %v6799_v19  ;;  %v7372_v61 = vmax.f32 %v3238_v50, 0.0  ;;  %v6862_v22 = vmax.f32 %v3351_v62, 0.0  ;;  %4208 = vmatprep.mubr.f32.mxu0 %v9776_v0  ;;  %4321 = vmatprep.mubr.f32.mxu1 %v9776_v0  ;;  %v11911_v40 = vld [vmem:[%s9818_s20 + $0x150] sm:$0xff] }
 0x240   : > { %v3240_v20 = vpop.f32.mrf.mxu0  ;;  %v3353_v29 = vpop.f32.mrf.mxu1  ;;  %4584 = vmatpush1.msra.mxu1 %v1020_v26  ;;  %v574_v26 = vunpack.c.0.s8 %v11713_v10 }
 0x241   : > { %v8406_v18 = vadd.f32 %v11773_v41, %v7372_v61  ;;  %v7888_v9 = vadd.f32 %v11775_v3, %v6862_v22  ;;  %v7373_v58 = vmax.f32 %v3240_v20, 0.0  ;;  %v6863_v15 = vmax.f32 %v3353_v29, 0.0  ;;  %4585 = vmatprep.subr.mxu1 %v957_v38 }
 0x242   : > { %v3244_v47 = vpop.f32.mrf.mxu0  ;;  %v3357_v37 = vpop.f32.mrf.mxu1  ;;  %9271 = vmatmul.mubr.msk.f32.gmra.mxu0 %vm1254_vm1, %v11480_v1  ;;  %9281 = vmatmul.mubr.msk.f32.gmra.mxu1 %vm1254_vm1, %v11487_v21  ;;  %v11893_v21 = vld [vmem:[%s9818_s20 + $0x1d0] sm:$0xff]  ;;  %v894_v20 = vand.u32 255, %v574_v26 }
 0x243   : > { %v11884_v35 = vadd.f32 %v8406_v18, %v7373_v58  ;;  %v11886_v32 = vadd.f32 %v7888_v9, %v6863_v15  ;;  %v7436_v6 = vmax.f32 %v3244_v47, 0.0  ;;  %v6926_v41 = vmax.f32 %v3357_v37, 0.0  ;;  %4214 = vmatprep.mubr.f32.mxu0 %v9776_v0  ;;  %4327 = vmatprep.mubr.f32.mxu1 %v9776_v0  ;;  %v11933_v47 = vld [vmem:[%s14378_s1 + $0x78] sm:$0xff] }
 0x244   : > { %v3246_v3 = vpop.f32.mrf.mxu0  ;;  %v3359_v24 = vpop.f32.mrf.mxu1  ;;  %4586 = vmatpush1.msra.mxu1 %v956_v13  ;;  %v446_v37 = vunpack.c.0.s8 %v11911_v40 }
 0x245   : > { %v8471_v55 = vadd.f32 %v11786_v36, %v7436_v6  ;;  %v7953_v1 = vadd.f32 %v11788_v8, %v6926_v41  ;;  %v7437_v57 = vmax.f32 %v3246_v3, 0.0  ;;  %v6927_v43 = vmax.f32 %v3359_v24, 0.0  ;;  %9347 = vmatprep.subr.msk.mxu1 %vm1303_vm0, %v1217_v53 }
 0x246   : > { %v3250_v31 = vpop.f32.mrf.mxu0  ;;  %v3363_v52 = vpop.f32.mrf.mxu1  ;;  %9272 = vmatmul.mubr.msk.f32.gmra.mxu0 %vm1254_vm1, %v11503_v34  ;;  %9282 = vmatmul.mubr.msk.f32.gmra.mxu1 %vm1254_vm1, %v11510_v60  ;;  %v511_v34 = vunpack.c.1.s8 %v11893_v21 }
 0x247   : > { %v11900_v27 = vadd.f32 %v8471_v55, %v7437_v57  ;;  %v11902_v36 = vadd.f32 %v7953_v1, %v6927_v43  ;;  %v7500_v8 = vmax.f32 %v3250_v31, 0.0  ;;  %v6990_v5 = vmax.f32 %v3363_v52, 0.0  ;;  %4220 = vmatprep.mubr.f32.mxu0 %v9776_v0  ;;  %4333 = vmatprep.mubr.f32.mxu1 %v9776_v0 }
 0x248   : > { %v3252_v23 = vpop.f32.mrf.mxu0  ;;  %v3365_v7 = vpop.f32.mrf.mxu1  ;;  %v831_v29 = vand.u32 255, %v511_v34  ;;  %v1214_v1 = vcvt.s32.f32 %v894_v20 }
 0x249   : > { %v8536_v38 = vadd.f32 %v11800_v49, %v7500_v8  ;;  %v8018_v60 = vadd.f32 %v11802_v39, %v6990_v5  ;;  %v7501_v17 = vmax.f32 %v3252_v23, 0.0  ;;  %v6991_v4 = vmax.f32 %v3365_v7, 0.0  ;;  %v11924_v39 = vld [vmem:[%s9818_s20 + $0xd0] sm:$0xff] }
 0x24a   : > { %v3256_v42 = vpop.f32.mrf.mxu0  ;;  %v3369_v48 = vpop.f32.mrf.mxu1  ;;  %9273 = vmatmul.mubr.msk.f32.gmra.mxu0 %vm1254_vm1, %v11527_v63  ;;  %9283 = vmatmul.mubr.msk.f32.gmra.mxu1 %vm1254_vm1, %v11534_v12  ;;  %v510_v63 = vunpack.c.0.s8 %v11893_v21  ;;  %v447_v12 = vunpack.c.1.s8 %v11911_v40  ;;  %v1151_v57 = vcvt.s32.f32 %v831_v29  ;;  %v11950_v7 = vld [vmem:[%s9818_s20 + $0x50] sm:$0xff] }
 0x24b   : > { %v11917_v19 = vadd.f32 %v8536_v38, %v7501_v17  ;;  %v11919_v50 = vadd.f32 %v8018_v60, %v6991_v4  ;;  %v7564_v62 = vmax.f32 %v3256_v42, 0.0  ;;  %v7054_v49 = vmax.f32 %v3369_v48, 0.0  ;;  %4226 = vmatprep.mubr.f32.mxu0 %v9776_v0  ;;  %4339 = vmatprep.mubr.f32.mxu1 %v9776_v0  ;;  %v11957_v38 = vld [vmem:[%s14378_s1] sm:$0xff] }
 0x24c   : > { %v3258_v61 = vpop.f32.mrf.mxu0  ;;  %v3371_v22 = vpop.f32.mrf.mxu1  ;;  %v830_v43 = vand.u32 255, %v510_v63  ;;  %v767_v31 = vand.u32 255, %v447_v12  ;;  %v319_v20 = vunpack.c.1.s8 %v11950_v7 }
 0x24d   : > { %v8601_v13 = vadd.f32 %v11816_v51, %v7564_v62  ;;  %v8083_v53 = vadd.f32 %v11818_v46, %v7054_v49  ;;  %v7565_v18 = vmax.f32 %v3258_v61, 0.0  ;;  %v7055_v9 = vmax.f32 %v3371_v22, 0.0 }
 0x24e   : > { %v3262_v58 = vpop.f32.mrf.mxu0  ;;  %v3375_v15 = vpop.f32.mrf.mxu1  ;;  %9274 = vmatmul.mubr.msk.f32.gmra.mxu0 %vm1254_vm1, %v11933_v47  ;;  %9284 = vmatmul.mubr.msk.f32.gmra.mxu1 %vm1254_vm1, %v11673_v33  ;;  %v383_v51 = vunpack.c.1.s8 %v11924_v39  ;;  %v1150_v49 = vcvt.s32.f32 %v830_v43  ;;  %v1087_v61 = vcvt.s32.f32 %v767_v31  ;;  %v382_v22 = vunpack.c.0.s8 %v11924_v39 }
 0x24f   : > { %v11941_v46 = vadd.f32 %v8601_v13, %v7565_v18  ;;  %v11943_v6 = vadd.f32 %v8083_v53, %v7055_v9  ;;  %v7628_v41 = vmax.f32 %v3262_v58, 0.0  ;;  %v7118_v3 = vmax.f32 %v3375_v15, 0.0  ;;  %4345 = vmatprep.mubr.f32.mxu1 %v9776_v0  ;;  %4458 = vmatprep.mubr.f32.mxu0 %v9776_v0  ;;  %v11975_v53 = vld [vmem:[%s9818_s20 + $0x258] sm:$0x55]  ;;  %v11982_v58 = vld [vmem:[%s14378_s1 + $0x8] sm:$0xff] }
 0x250   : > { %v3264_v24 = vpop.f32.mrf.mxu0  ;;  %v3377_v55 = vpop.f32.mrf.mxu1  ;;  %v11961_v60 = vand.u32 255, %v383_v51  ;;  %v579_v43 = vunpack.c.1.s8 %v11975_v53 }
 0x251   : > { %v8666_v52 = vadd.f32 %v11830_v56, %v7628_v41  ;;  %v8148_v8 = vadd.f32 %v11832_v2, %v7118_v3  ;;  %v7629_v5 = vmax.f32 %v3264_v24, 0.0  ;;  %v7119_v23 = vmax.f32 %v3377_v55, 0.0 }
 0x252   : > { %v3381_v26 = vpop.f32.mrf.mxu1  ;;  %v3494_v34 = vpop.f32.mrf.mxu0  ;;  %9285 = vmatmul.mubr.msk.f32.gmra.mxu1 %vm1254_vm1, %v11693_v16  ;;  %9295 = vmatmul.mubr.msk.f32.vlgmr.msra.gmra.mxu0 %vm1254_vm1, %v11957_v38  ;;  %v766_v56 = vand.u32 255, %v446_v37  ;;  %v702_v55 = vand.u32 255, %v382_v22 }
 0x253   : > { %v11963_v2 = vadd.f32 %v8666_v52, %v7629_v5  ;;  %v11965_v17 = vadd.f32 %v8148_v8, %v7119_v23  ;;  %v7182_v4 = vmax.f32 %v3381_v26, 0.0  ;;  %v6672_v42 = vmax.f32 %v3494_v34, 0.0  ;;  %4351 = vmatprep.mubr.f32.mxu1 %v9776_v0  ;;  %4464 = vmatprep.mubr.f32.mxu0 %v9776_v0  ;;  %v12002_v34 = vld [vmem:[%s14378_s1 + $0x10] sm:$0xff] }
 0x254   : > { %v3383_v48 = vpop.f32.mrf.mxu1  ;;  %v3496_v62 = vpop.f32.mrf.mxu0  ;;  %9330 = vmatpush1.msk.msra.mxu0 %vm1303_vm0, %v1214_v1  ;;  %v639_v1 = vand.u32 255, %v319_v20 }
 0x255   : > { %v8213_v29 = vadd.f32 %v11846_v44, %v7182_v4  ;;  %v7695_v63 = vadd.f32 %v11848_v54, %v6672_v42  ;;  %v7183_v12 = vmax.f32 %v3383_v48, 0.0  ;;  %v6673_v13 = vmax.f32 %v3496_v62, 0.0  ;;  %4740 = vmatprep.subr.mxu0 %v1151_v57 }
 0x256   : > { %v3387_v18 = vpop.f32.mrf.mxu1  ;;  %v3500_v9 = vpop.f32.mrf.mxu0  ;;  %9286 = vmatmul.mubr.msk.f32.gmra.mxu1 %vm1254_vm1, %v11718_v30  ;;  %9296 = vmatmul.mubr.msk.f32.gmra.mxu0 %vm1254_vm1, %v11982_v58  ;;  %v1086_v44 = vcvt.s32.f32 %v766_v56  ;;  %v1023_v54 = vcvt.s32.f32 %v11961_v60  ;;  %v318_v57 = vunpack.c.0.s8 %v11950_v7  ;;  %v1022_v48 = vcvt.s32.f32 %v702_v55 }
 0x257   : > { %v11987_v15 = vadd.f32 %v8213_v29, %v7183_v12  ;;  %v11989_v37 = vadd.f32 %v7695_v63, %v6673_v13  ;;  %v7246_v51 = vmax.f32 %v3387_v18, 0.0  ;;  %v6736_v41 = vmax.f32 %v3500_v9, 0.0  ;;  %4357 = vmatprep.mubr.f32.mxu1 %v9776_v0  ;;  %4470 = vmatprep.mubr.f32.mxu0 %v9776_v0  ;;  %v12019_v18 = vld [vmem:[%s14378_s1 + $0x18] sm:$0xff] }
 0x258   : > { %v3389_v3 = vpop.f32.mrf.mxu1  ;;  %v3502_v24 = vpop.f32.mrf.mxu0  ;;  %4741 = vmatpush1.msra.mxu0 %v1150_v49  ;;  %v959_v62 = vcvt.s32.f32 %v639_v1  ;;  %v638_v49 = vand.u32 255, %v318_v57 }
 0x259   : > { %v8278_v31 = vadd.f32 %v11860_v28, %v7246_v51  ;;  %v7760_v52 = vadd.f32 %v11862_v25, %v6736_v41  ;;  %v7247_v8 = vmax.f32 %v3389_v3, 0.0  ;;  %v6737_v5 = vmax.f32 %v3502_v24, 0.0  ;;  %4742 = vmatprep.subr.mxu0 %v1087_v61 }
 0x25a   : > { %v3393_v23 = vpop.f32.mrf.mxu1  ;;  %v3506_v26 = vpop.f32.mrf.mxu0  ;;  %9287 = vmatmul.mubr.msk.f32.gmra.mxu1 %vm1254_vm1, %v11738_v11  ;;  %9297 = vmatmul.mubr.msk.f32.gmra.mxu0 %vm1254_vm1, %v12002_v34  ;;  %v899_v61 = vand.u32 255, %v579_v43  ;;  %v958_v41 = vcvt.s32.f32 %v638_v49 }
 0x25b   : > { %v12006_v56 = vadd.f32 %v8278_v31, %v7247_v8  ;;  %v12008_v28 = vadd.f32 %v7760_v52, %v6737_v5  ;;  %v7310_v25 = vmax.f32 %v3393_v23, 0.0  ;;  %v6800_v60 = vmax.f32 %v3506_v26, 0.0  ;;  %4363 = vmatprep.mubr.f32.mxu1 %v9776_v0  ;;  %4476 = vmatprep.mubr.f32.mxu0 %v9776_v0  ;;  %v12034_v52 = vld [vmem:[%s14378_s1 + $0x60] sm:$0xff] }
 0x25c   : > { %v3395_v4 = vpop.f32.mrf.mxu1  ;;  %v3508_v42 = vpop.f32.mrf.mxu0  ;;  %4743 = vmatpush1.msra.mxu0 %v1086_v44  ;;  %v1219_v3 = vcvt.s32.f32 %v899_v61  ;;  %v12041_v8 = vld [vmem:[%s14378_s1 + $0x20] sm:$0xff]  ;;  %v12057_v61 = vld [vmem:[%s14378_s1 + $0x68] sm:$0xff] }
 0x25d   : > { %v8343_v22 = vadd.f32 %v11872_v59, %v7310_v25  ;;  %v7825_v20 = vadd.f32 %v11874_v14, %v6800_v60  ;;  %v7311_v29 = vmax.f32 %v3395_v4, 0.0  ;;  %v6801_v63 = vmax.f32 %v3508_v42, 0.0  ;;  %4744 = vmatprep.subr.mxu0 %v1023_v54 }
 0x25e   : > { %v3399_v12 = vpop.f32.mrf.mxu1  ;;  %v3512_v13 = vpop.f32.mrf.mxu0  ;;  %9288 = vmatmul.mubr.msk.f32.gmra.mxu1 %vm1254_vm1, %v11755_v45  ;;  %9298 = vmatmul.mubr.msk.f32.gmra.mxu0 %vm1254_vm1, %v12019_v18 }
 0x25f   : > { %v12023_v9 = vadd.f32 %v8343_v22, %v7311_v29  ;;  %v12025_v59 = vadd.f32 %v7825_v20, %v6801_v63  ;;  %v7374_v14 = vmax.f32 %v3399_v12, 0.0  ;;  %v6864_v44 = vmax.f32 %v3512_v13, 0.0  ;;  %4369 = vmatprep.mubr.f32.mxu1 %v9776_v0  ;;  %4482 = vmatprep.mubr.f32.mxu0 %v9776_v0 }
 0x260   : > { %v3401_v54 = vpop.f32.mrf.mxu1  ;;  %v3514_v51 = vpop.f32.mrf.mxu0  ;;  %4745 = vmatpush1.msra.mxu0 %v1022_v48  ;;  %v576_v13 = vunpack.c.2.s8 %v11713_v10  ;;  %v12088_v10 = vld [vmem:[%s14378_s1 + $0x30] sm:$0xff] }
 0x261   : > { %v8408_v24 = vadd.f32 %v11884_v35, %v7374_v14  ;;  %v7890_v55 = vadd.f32 %v11886_v32, %v6864_v44  ;;  %v7375_v1 = vmax.f32 %v3401_v54, 0.0  ;;  %v6865_v57 = vmax.f32 %v3514_v51, 0.0  ;;  %4746 = vmatprep.subr.mxu0 %v959_v62 }
 0x262   : > { %v3405_v43 = vpop.f32.mrf.mxu1  ;;  %v3518_v31 = vpop.f32.mrf.mxu0  ;;  %9289 = vmatmul.mubr.msk.f32.gmra.mxu1 %vm1254_vm1, %v12034_v52  ;;  %9299 = vmatmul.mubr.msk.f32.gmra.mxu0 %vm1254_vm1, %v12041_v8  ;;  %v513_v14 = vunpack.c.3.s8 %v11893_v21 }
 0x263   : > { %v12045_v35 = vadd.f32 %v8408_v24, %v7375_v1  ;;  %v12047_v32 = vadd.f32 %v7890_v55, %v6865_v57  ;;  %v7438_v5 = vmax.f32 %v3405_v43, 0.0  ;;  %v6928_v23 = vmax.f32 %v3518_v31, 0.0  ;;  %4375 = vmatprep.mubr.f32.mxu1 %v9776_v0  ;;  %4488 = vmatprep.mubr.f32.mxu0 %v9776_v0  ;;  %v12081_v55 = vld [vmem:[%s14378_s1 + $0x70] sm:$0xff] }
 0x264   : > { %v3407_v26 = vpop.f32.mrf.mxu1  ;;  %v3520_v25 = vpop.f32.mrf.mxu0  ;;  %4747 = vmatpush1.msra.mxu0 %v958_v41 }
 0x265   : > { %v8473_v60 = vadd.f32 %v11900_v27, %v7438_v5  ;;  %v7955_v4 = vadd.f32 %v11902_v36, %v6928_v23  ;;  %v7439_v42 = vmax.f32 %v3407_v26, 0.0  ;;  %v6929_v48 = vmax.f32 %v3520_v25, 0.0  ;;  %9365 = vmatprep.subr.msk.mxu0 %vm1303_vm0, %v1219_v3  ;;  %v12064_v27 = vld [vmem:[%s14378_s1 + $0x28] sm:$0xff] }
 0x266   : > { %v3411_v62 = vpop.f32.mrf.mxu1  ;;  %v3524_v49 = vpop.f32.mrf.mxu0  ;;  %9290 = vmatmul.mubr.msk.f32.gmra.mxu1 %vm1254_vm1, %v12057_v61  ;;  %9300 = vmatmul.mubr.msk.f32.gmra.mxu0 %vm1254_vm1, %v12064_v27  ;;  %v896_v5 = vand.u32 255, %v576_v13  ;;  %v833_v23 = vand.u32 255, %v513_v14  ;;  %v512_v26 = vunpack.c.2.s8 %v11893_v21  ;;  %v449_v25 = vunpack.c.3.s8 %v11911_v40 }
 0x267   : > { %v12068_v36 = vadd.f32 %v8473_v60, %v7439_v42  ;;  %v12070_v22 = vadd.f32 %v7955_v4, %v6929_v48  ;;  %v7502_v20 = vmax.f32 %v3411_v62, 0.0  ;;  %v6992_v29 = vmax.f32 %v3524_v49, 0.0  ;;  %4381 = vmatprep.mubr.f32.mxu1 %v9776_v0  ;;  %4494 = vmatprep.mubr.f32.mxu0 %v9776_v0 }
 0x268   : > { %v3413_v63 = vpop.f32.mrf.mxu1  ;;  %v3526_v12 = vpop.f32.mrf.mxu0  ;;  %v385_v21 = vunpack.c.3.s8 %v11924_v39  ;;  %v1216_v14 = vcvt.s32.f32 %v896_v5 }
 0x269   : > { %v8538_v44 = vadd.f32 %v11917_v19, %v7502_v20  ;;  %v8020_v54 = vadd.f32 %v11919_v50, %v6992_v29  ;;  %v7503_v51 = vmax.f32 %v3413_v63, 0.0  ;;  %v6993_v41 = vmax.f32 %v3526_v12, 0.0 }
 0x26a   : > { %v3417_v3 = vpop.f32.mrf.mxu1  ;;  %v3530_v24 = vpop.f32.mrf.mxu0  ;;  %9291 = vmatmul.mubr.msk.f32.gmra.mxu1 %vm1254_vm1, %v12081_v55  ;;  %9301 = vmatmul.mubr.msk.f32.gmra.mxu0 %vm1254_vm1, %v12088_v10  ;;  %v448_v20 = vunpack.c.2.s8 %v11911_v40 }
 0x26b   : > { %v12092_v19 = vadd.f32 %v8538_v44, %v7503_v51  ;;  %v12094_v50 = vadd.f32 %v8020_v54, %v6993_v41  ;;  %v7566_v1 = vmax.f32 %v3417_v3, 0.0  ;;  %v7056_v57 = vmax.f32 %v3530_v24, 0.0  ;;  %4387 = vmatprep.mubr.f32.mxu1 %v9776_v0  ;;  %4500 = vmatprep.mubr.f32.mxu0 %v9776_v0 }
 0x26c   : > { %v3419_v43 = vpop.f32.mrf.mxu1  ;;  %v3532_v31 = vpop.f32.mrf.mxu0  ;;  %v1153_v44 = vcvt.s32.f32 %v833_v23  ;;  %v832_v54 = vand.u32 255, %v512_v26 }
 0x26d   : > { %v8603_v60 = vadd.f32 %v11941_v46, %v7566_v1  ;;  %v8085_v4 = vadd.f32 %v11943_v6, %v7056_v57  ;;  %v7567_v42 = vmax.f32 %v3419_v43, 0.0  ;;  %v7057_v48 = vmax.f32 %v3532_v31, 0.0 }
 0x26e   : > { %v3423_v62 = vpop.f32.mrf.mxu1  ;;  %v3536_v49 = vpop.f32.mrf.mxu0  ;;  %9292 = vmatmul.mubr.msk.f32.gmra.mxu1 %vm1254_vm1, %v11933_v47  ;;  %9302 = vmatmul.mubr.msk.f32.gmra.mxu0 %vm1254_vm1, %v11673_v33  ;;  %v769_v33 = vand.u32 255, %v449_v25  ;;  %v768_v57 = vand.u32 255, %v448_v20  ;;  %v12120_v43 = vand.u32 255, %v385_v21 }
 0x26f   : > { %v12108_v29 = vadd.f32 %v8603_v60, %v7567_v42  ;;  %v12110_v63 = vadd.f32 %v8085_v4, %v7057_v48  ;;  %v7630_v46 = vmax.f32 %v3423_v62, 0.0  ;;  %v7120_v6 = vmax.f32 %v3536_v49, 0.0  ;;  %4506 = vmatprep.mubr.f32.mxu0 %v9776_v0  ;;  %4619 = vmatprep.mubr.f32.mxu1 %v9776_v0 }
 0x270   : > { %v3425_v12 = vpop.f32.mrf.mxu1  ;;  %v3538_v13 = vpop.f32.mrf.mxu0  ;;  %v1089_v25 = vcvt.s32.f32 %v769_v33  ;;  %v384_v60 = vunpack.c.2.s8 %v11924_v39  ;;  %v321_v4 = vunpack.c.3.s8 %v11950_v7  ;;  %v1025_v39 = vcvt.s32.f32 %v12120_v43 }
 0x271   : > { %v8668_v40 = vadd.f32 %v11963_v2, %v7630_v46  ;;  %v8150_v51 = vadd.f32 %v11965_v17, %v7120_v6  ;;  %v7631_v41 = vmax.f32 %v3425_v12, 0.0  ;;  %v7121_v3 = vmax.f32 %v3538_v13, 0.0 }
 0x272   : > { %v3542_v24 = vpop.f32.mrf.mxu0  ;;  %v3655_v1 = vpop.f32.mrf.mxu1  ;;  %9303 = vmatmul.mubr.msk.f32.gmra.mxu0 %vm1254_vm1, %v11693_v16  ;;  %9313 = vmatmul.mubr.msk.f32.vlgmr.msra.gmra.mxu1 %vm1254_vm1, %v11957_v38  ;;  %v1152_v16 = vcvt.s32.f32 %v832_v54  ;;  %v1088_v46 = vcvt.s32.f32 %v768_v57  ;;  %v320_v54 = vunpack.c.2.s8 %v11950_v7  ;;  %v581_v33 = vunpack.c.3.s8 %v11975_v53 }
 0x273   : > { %v12122_v31 = vadd.f32 %v8668_v40, %v7631_v41  ;;  %v12124_v5 = vadd.f32 %v8150_v51, %v7121_v3  ;;  %v7184_v2 = vmax.f32 %v3542_v24, 0.0  ;;  %v6674_v23 = vmax.f32 %v3655_v1, 0.0  ;;  %4512 = vmatprep.mubr.f32.mxu0 %v9776_v0  ;;  %4625 = vmatprep.mubr.f32.mxu1 %v9776_v0 }
 0x274   : > { %v3544_v17 = vpop.f32.mrf.mxu0  ;;  %v3657_v26 = vpop.f32.mrf.mxu1  ;;  %9348 = vmatpush1.msk.msra.mxu1 %vm1303_vm0, %v1216_v14 }
 0x275   : > { %v8215_v42 = vadd.f32 %v11987_v15, %v7184_v2  ;;  %v7697_v48 = vadd.f32 %v11989_v37, %v6674_v23  ;;  %v7185_v62 = vmax.f32 %v3544_v17, 0.0  ;;  %v6675_v49 = vmax.f32 %v3657_v26, 0.0  ;;  %4901 = vmatprep.subr.mxu1 %v1153_v44 }
 0x276   : > { %v3548_v20 = vpop.f32.mrf.mxu0  ;;  %v3661_v21 = vpop.f32.mrf.mxu1  ;;  %9304 = vmatmul.mubr.msk.f32.gmra.mxu0 %vm1254_vm1, %v11718_v30  ;;  %9314 = vmatmul.mubr.msk.f32.gmra.mxu1 %vm1254_vm1, %v11982_v58  ;;  %v704_v30 = vand.u32 255, %v384_v60  ;;  %v641_v44 = vand.u32 255, %v321_v4  ;;  %v640_v26 = vand.u32 255, %v320_v54 }
 0x277   : > { %v12138_v6 = vadd.f32 %v8215_v42, %v7185_v62  ;;  %v12140_v12 = vadd.f32 %v7697_v48, %v6675_v49  ;;  %v7248_v15 = vmax.f32 %v3548_v20, 0.0  ;;  %v6738_v37 = vmax.f32 %v3661_v21, 0.0  ;;  %4518 = vmatprep.mubr.f32.mxu0 %v9776_v0  ;;  %4631 = vmatprep.mubr.f32.mxu1 %v9776_v0 }
 0x278   : > { %v3550_v13 = vpop.f32.mrf.mxu0  ;;  %v3663_v14 = vpop.f32.mrf.mxu1  ;;  %4902 = vmatpush1.msra.mxu1 %v1152_v16  ;;  %v1024_v23 = vcvt.s32.f32 %v704_v30  ;;  %v961_v17 = vcvt.s32.f32 %v641_v44 }
 0x279   : > { %v8280_v40 = vadd.f32 %v12006_v56, %v7248_v15  ;;  %v7762_v51 = vadd.f32 %v12008_v28, %v6738_v37  ;;  %v7249_v41 = vmax.f32 %v3550_v13, 0.0  ;;  %v6739_v3 = vmax.f32 %v3663_v14, 0.0  ;;  %4903 = vmatprep.subr.mxu1 %v1089_v25 }
 0x27a   : > { %v3554_v24 = vpop.f32.mrf.mxu0  ;;  %v3667_v1 = vpop.f32.mrf.mxu1  ;;  %9305 = vmatmul.mubr.msk.f32.gmra.mxu0 %vm1254_vm1, %v11738_v11  ;;  %9315 = vmatmul.mubr.msk.f32.gmra.mxu1 %vm1254_vm1, %v12002_v34  ;;  %v901_v11 = vand.u32 255, %v581_v33 }
 0x27b   : > { %v12152_v57 = vadd.f32 %v8280_v40, %v7249_v41  ;;  %v12154_v7 = vadd.f32 %v7762_v51, %v6739_v3  ;;  %v7312_v43 = vmax.f32 %v3554_v24, 0.0  ;;  %v6802_v2 = vmax.f32 %v3667_v1, 0.0  ;;  %4524 = vmatprep.mubr.f32.mxu0 %v9776_v0  ;;  %4637 = vmatprep.mubr.f32.mxu1 %v9776_v0  ;;  %v12185_v1 = vld [vmem:[%s9818_s20 + $0x1d8] sm:$0xff] }
 0x27c   : > { %v3556_v56 = vpop.f32.mrf.mxu0  ;;  %v3669_v28 = vpop.f32.mrf.mxu1  ;;  %4904 = vmatpush1.msra.mxu1 %v1088_v46  ;;  %v960_v46 = vcvt.s32.f32 %v640_v26  ;;  %v578_v26 = vunpack.c.0.s8 %v11975_v53 }
 0x27d   : > { %v8345_v16 = vadd.f32 %v12023_v9, %v7312_v43  ;;  %v7827_v25 = vadd.f32 %v12025_v59, %v6802_v2  ;;  %v7313_v60 = vmax.f32 %v3556_v56, 0.0  ;;  %v6803_v4 = vmax.f32 %v3669_v28, 0.0  ;;  %4905 = vmatprep.subr.mxu1 %v1025_v39 }
 0x27e   : > { %v3560_v42 = vpop.f32.mrf.mxu0  ;;  %v3673_v48 = vpop.f32.mrf.mxu1  ;;  %9306 = vmatmul.mubr.msk.f32.gmra.mxu0 %vm1254_vm1, %v11755_v45  ;;  %9316 = vmatmul.mubr.msk.f32.gmra.mxu1 %vm1254_vm1, %v12019_v18  ;;  %v1221_v39 = vcvt.s32.f32 %v901_v11  ;;  %v515_v11 = vunpack.c.1.s8 %v12185_v1 }
 0x27f   : > { %v12164_v62 = vadd.f32 %v8345_v16, %v7313_v60  ;;  %v12166_v49 = vadd.f32 %v7827_v25, %v6803_v4  ;;  %v7376_v20 = vmax.f32 %v3560_v42, 0.0  ;;  %v6866_v21 = vmax.f32 %v3673_v48, 0.0  ;;  %4530 = vmatprep.mubr.f32.mxu0 %v9776_v0  ;;  %4643 = vmatprep.mubr.f32.mxu1 %v9776_v0  ;;  %v12203_v42 = vld [vmem:[%s9818_s20 + $0x158] sm:$0xff] }
 0x280   : > { %v3562_v9 = vpop.f32.mrf.mxu0  ;;  %v3675_v59 = vpop.f32.mrf.mxu1  ;;  %4906 = vmatpush1.msra.mxu1 %v1024_v23 }
 0x281   : > { %v8410_v45 = vadd.f32 %v12045_v35, %v7376_v20  ;;  %v7892_v15 = vadd.f32 %v12047_v32, %v6866_v21  ;;  %v7377_v37 = vmax.f32 %v3562_v9, 0.0  ;;  %v6867_v13 = vmax.f32 %v3675_v59, 0.0  ;;  %4907 = vmatprep.subr.mxu1 %v961_v17 }
 0x282   : > { %v3566_v14 = vpop.f32.mrf.mxu0  ;;  %v3679_v30 = vpop.f32.mrf.mxu1  ;;  %9307 = vmatmul.mubr.msk.f32.gmra.mxu0 %vm1254_vm1, %v12034_v52  ;;  %9317 = vmatmul.mubr.msk.f32.gmra.mxu1 %vm1254_vm1, %v12041_v8 }
 0x283   : > { %v12176_v44 = vadd.f32 %v8410_v45, %v7377_v37  ;;  %v12178_v54 = vadd.f32 %v7892_v15, %v6867_v13  ;;  %v7440_v33 = vmax.f32 %v3566_v14, 0.0  ;;  %v6930_v35 = vmax.f32 %v3679_v30, 0.0  ;;  %4536 = vmatprep.mubr.f32.mxu0 %v9776_v0  ;;  %4649 = vmatprep.mubr.f32.mxu1 %v9776_v0 }
 0x284   : > { %v3568_v32 = vpop.f32.mrf.mxu0  ;;  %v3681_v40 = vpop.f32.mrf.mxu1  ;;  %4908 = vmatpush1.msra.mxu1 %v960_v46  ;;  %v898_v45 = vand.u32 255, %v578_v26  ;;  %v835_v15 = vand.u32 255, %v515_v11  ;;  %v514_v37 = vunpack.c.0.s8 %v12185_v1  ;;  %v451_v13 = vunpack.c.1.s8 %v12203_v42 }
 0x285   : > { %v8475_v51 = vadd.f32 %v12068_v36, %v7440_v33  ;;  %v7957_v41 = vadd.f32 %v12070_v22, %v6930_v35  ;;  %v7441_v3 = vmax.f32 %v3568_v32, 0.0  ;;  %v6931_v24 = vmax.f32 %v3681_v40, 0.0  ;;  %9383 = vmatprep.subr.msk.mxu1 %vm1303_vm0, %v1221_v39 }
 0x286   : > { %v3572_v43 = vpop.f32.mrf.mxu0  ;;  %v3685_v2 = vpop.f32.mrf.mxu1  ;;  %9308 = vmatmul.mubr.msk.f32.gmra.mxu0 %vm1254_vm1, %v12057_v61  ;;  %9318 = vmatmul.mubr.msk.f32.gmra.mxu1 %vm1254_vm1, %v12064_v27  ;;  %v771_v26 = vand.u32 255, %v451_v13 }
 0x287   : > { %v12192_v56 = vadd.f32 %v8475_v51, %v7441_v3  ;;  %v12194_v36 = vadd.f32 %v7957_v41, %v6931_v24  ;;  %v7504_v22 = vmax.f32 %v3572_v43, 0.0  ;;  %v6994_v28 = vmax.f32 %v3685_v2, 0.0  ;;  %4542 = vmatprep.mubr.f32.mxu0 %v9776_v0  ;;  %4655 = vmatprep.mubr.f32.mxu1 %v9776_v0  ;;  %v12227_v51 = vld [vmem:[%s14378_s1 + $0x38] sm:$0xff] }
 0x288   : > { %v3574_v23 = vpop.f32.mrf.mxu0  ;;  %v3687_v17 = vpop.f32.mrf.mxu1  ;;  %v450_v41 = vunpack.c.0.s8 %v12203_v42 }
 0x289   : > { %v8540_v16 = vadd.f32 %v12092_v19, %v7504_v22  ;;  %v8022_v25 = vadd.f32 %v12094_v50, %v6994_v28  ;;  %v7505_v60 = vmax.f32 %v3574_v23, 0.0  ;;  %v6995_v4 = vmax.f32 %v3687_v17, 0.0  ;;  %v12216_v50 = vld [vmem:[%s9818_s20 + $0xd8] sm:$0xff] }
 0x28a   : > { %v3578_v48 = vpop.f32.mrf.mxu0  ;;  %v3691_v20 = vpop.f32.mrf.mxu1  ;;  %9309 = vmatmul.mubr.msk.f32.gmra.mxu0 %vm1254_vm1, %v12081_v55  ;;  %9319 = vmatmul.mubr.msk.f32.gmra.mxu1 %vm1254_vm1, %v12088_v10  ;;  %v1218_v28 = vcvt.s32.f32 %v898_v45  ;;  %v1155_v23 = vcvt.s32.f32 %v835_v15  ;;  %v834_v17 = vand.u32 255, %v514_v37 }
 0x28b   : > { %v12209_v21 = vadd.f32 %v8540_v16, %v7505_v60  ;;  %v12211_v9 = vadd.f32 %v8022_v25, %v6995_v4  ;;  %v7568_v59 = vmax.f32 %v3578_v48, 0.0  ;;  %v7058_v19 = vmax.f32 %v3691_v20, 0.0  ;;  %4548 = vmatprep.mubr.f32.mxu0 %v9776_v0  ;;  %4661 = vmatprep.mubr.f32.mxu1 %v9776_v0  ;;  %v12242_v4 = vld [vmem:[%s9818_s20 + $0x58] sm:$0xff] }
 0x28c   : > { %v3580_v46 = vpop.f32.mrf.mxu0  ;;  %v3693_v39 = vpop.f32.mrf.mxu1  ;;  %v1154_v13 = vcvt.s32.f32 %v834_v17 }
 0x28d   : > { %v8605_v14 = vadd.f32 %v12108_v29, %v7568_v59  ;;  %v8087_v30 = vadd.f32 %v12110_v63, %v7058_v19  ;;  %v7569_v33 = vmax.f32 %v3580_v46, 0.0  ;;  %v7059_v35 = vmax.f32 %v3693_v39, 0.0  ;;  %v12247_v59 = vld [vmem:[%s14378_s1 + $0x40] sm:$0xff] }
 0x28e   : > { %v3584_v32 = vpop.f32.mrf.mxu0  ;;  %v3697_v40 = vpop.f32.mrf.mxu1  ;;  %9310 = vmatmul.mubr.msk.f32.gmra.mxu0 %vm1254_vm1, %v11933_v47  ;;  %9320 = vmatmul.mubr.msk.f32.gmra.mxu1 %vm1254_vm1, %v12227_v51  ;;  %v387_v29 = vunpack.c.1.s8 %v12216_v50 }
 0x28f   : > { %v12233_v63 = vadd.f32 %v8605_v14, %v7569_v33  ;;  %v12235_v3 = vadd.f32 %v8087_v30, %v7059_v35  ;;  %v7632_v24 = vmax.f32 %v3584_v32, 0.0  ;;  %v7122_v43 = vmax.f32 %v3697_v40, 0.0  ;;  %4667 = vmatprep.mubr.f32.mxu1 %v9776_v0  ;;  %4780 = vmatprep.mubr.f32.mxu0 %v9776_v0 }
 0x290   : > { %v3586_v2 = vpop.f32.mrf.mxu0  ;;  %v3699_v22 = vpop.f32.mrf.mxu1  ;;  %v12253_v19 = vand.u32 255, %v387_v29  ;;  %v1091_v14 = vcvt.s32.f32 %v771_v26  ;;  %v386_v30 = vunpack.c.0.s8 %v12216_v50  ;;  %v323_v33 = vunpack.c.1.s8 %v12242_v4  ;;  %v12267_v29 = vld [vmem:[%s9818_s20 + $0x260] sm:$0x55] }
 0x291   : > { %v8670_v11 = vadd.f32 %v12122_v31, %v7632_v24  ;;  %v8152_v16 = vadd.f32 %v12124_v5, %v7122_v43  ;;  %v7633_v25 = vmax.f32 %v3586_v2, 0.0  ;;  %v7123_v60 = vmax.f32 %v3699_v22, 0.0  ;;  %v12272_v2 = vld [vmem:[%s14378_s1 + $0x48] sm:$0xff] }
 0x292   : > { %v3703_v48 = vpop.f32.mrf.mxu1  ;;  %v3816_v20 = vpop.f32.mrf.mxu0  ;;  %9321 = vmatmul.mubr.msk.f32.gmra.mxu1 %vm1254_vm1, %v12247_v59  ;;  %9331 = vmatmul.mubr.msk.f32.vlgmr.msra.gmra.mxu0 %vm1254_vm1, %v11957_v38  ;;  %v770_v31 = vand.u32 255, %v450_v41 }
 0x293   : > { %v12255_v5 = vadd.f32 %v8670_v11, %v7633_v25  ;;  %v12257_v46 = vadd.f32 %v8152_v16, %v7123_v60  ;;  %v7186_v39 = vmax.f32 %v3703_v48, 0.0  ;;  %v6676_v45 = vmax.f32 %v3816_v20, 0.0  ;;  %4673 = vmatprep.mubr.f32.mxu1 %v9776_v0  ;;  %4786 = vmatprep.mubr.f32.mxu0 %v9776_v0 }
 0x294   : > { %v3705_v15 = vpop.f32.mrf.mxu1  ;;  %v3818_v37 = vpop.f32.mrf.mxu0  ;;  %9366 = vmatpush1.msk.msra.mxu0 %vm1303_vm0, %v1218_v28  ;;  %v706_v16 = vand.u32 255, %v386_v30  ;;  %v643_v25 = vand.u32 255, %v323_v33  ;;  %v322_v60 = vunpack.c.0.s8 %v12242_v4  ;;  %v583_v48 = vunpack.c.1.s8 %v12267_v29 }
 0x295   : > { %v8217_v35 = vadd.f32 %v12138_v6, %v7186_v39  ;;  %v7699_v32 = vadd.f32 %v12140_v12, %v6676_v45  ;;  %v7187_v40 = vmax.f32 %v3705_v15, 0.0  ;;  %v6677_v41 = vmax.f32 %v3818_v37, 0.0  ;;  %5062 = vmatprep.subr.mxu0 %v1155_v23  ;;  %v12292_v37 = vld [vmem:[%s14378_s1 + $0x50] sm:$0xff] }
 0x296   : > { %v3709_v24 = vpop.f32.mrf.mxu1  ;;  %v3822_v43 = vpop.f32.mrf.mxu0  ;;  %9322 = vmatmul.mubr.msk.f32.gmra.mxu1 %vm1254_vm1, %v12272_v2  ;;  %9332 = vmatmul.mubr.msk.f32.gmra.mxu0 %vm1254_vm1, %v11982_v58  ;;  %v1090_v6 = vcvt.s32.f32 %v770_v31  ;;  %v1027_v12 = vcvt.s32.f32 %v12253_v19 }
 0x297   : > { %v12279_v22 = vadd.f32 %v8217_v35, %v7187_v40  ;;  %v12281_v28 = vadd.f32 %v7699_v32, %v6677_v41  ;;  %v7250_v23 = vmax.f32 %v3709_v24, 0.0  ;;  %v6740_v17 = vmax.f32 %v3822_v43, 0.0  ;;  %4679 = vmatprep.mubr.f32.mxu1 %v9776_v0  ;;  %4792 = vmatprep.mubr.f32.mxu0 %v9776_v0 }
 0x298   : > { %v3711_v26 = vpop.f32.mrf.mxu1  ;;  %v3824_v11 = vpop.f32.mrf.mxu0  ;;  %5063 = vmatpush1.msra.mxu0 %v1154_v13  ;;  %v1026_v35 = vcvt.s32.f32 %v706_v16  ;;  %v963_v32 = vcvt.s32.f32 %v643_v25  ;;  %v642_v40 = vand.u32 255, %v322_v60  ;;  %v903_v41 = vand.u32 255, %v583_v48 }
 0x299   : > { %v8282_v20 = vadd.f32 %v12152_v57, %v7250_v23  ;;  %v7764_v31 = vadd.f32 %v12154_v7, %v6740_v17  ;;  %v7251_v19 = vmax.f32 %v3711_v26, 0.0  ;;  %v6741_v39 = vmax.f32 %v3824_v11, 0.0  ;;  %5064 = vmatprep.subr.mxu0 %v1091_v14 }
 0x29a   : > { %v3715_v45 = vpop.f32.mrf.mxu1  ;;  %v3828_v15 = vpop.f32.mrf.mxu0  ;;  %9323 = vmatmul.mubr.msk.f32.gmra.mxu1 %vm1254_vm1, %v12292_v37  ;;  %9333 = vmatmul.mubr.msk.f32.gmra.mxu0 %vm1254_vm1, %v12002_v34  ;;  %v962_v60 = vcvt.s32.f32 %v642_v40  ;;  %v1223_v48 = vcvt.s32.f32 %v903_v41 }
 0x29b   : > { %v12298_v13 = vadd.f32 %v8282_v20, %v7251_v19  ;;  %v12300_v57 = vadd.f32 %v7764_v31, %v6741_v39  ;;  %v7314_v7 = vmax.f32 %v3715_v45, 0.0  ;;  %v6804_v30 = vmax.f32 %v3828_v15, 0.0  ;;  %4685 = vmatprep.mubr.f32.mxu1 %v9776_v0  ;;  %4798 = vmatprep.mubr.f32.mxu0 %v9776_v0  ;;  %v12309_v20 = vld [vmem:[%s14378_s1 + $0x58] sm:$0xff] }
 0x29c   : > { %v3717_v14 = vpop.f32.mrf.mxu1  ;;  %v3830_v33 = vpop.f32.mrf.mxu0  ;;  %5065 = vmatpush1.msra.mxu0 %v1090_v6 }
 0x29d   : > { %v8347_v24 = vadd.f32 %v12164_v62, %v7314_v7  ;;  %v7829_v43 = vadd.f32 %v12166_v49, %v6804_v30  ;;  %v7315_v23 = vmax.f32 %v3717_v14, 0.0  ;;  %v6805_v17 = vmax.f32 %v3830_v33, 0.0  ;;  %5066 = vmatprep.subr.mxu0 %v1027_v12 }
 0x29e   : > { %v3721_v26 = vpop.f32.mrf.mxu1  ;;  %v3834_v11 = vpop.f32.mrf.mxu0  ;;  %9324 = vmatmul.mubr.msk.f32.gmra.mxu1 %vm1254_vm1, %v12309_v20  ;;  %9334 = vmatmul.mubr.msk.f32.gmra.mxu0 %vm1254_vm1, %v12019_v18 }
 0x29f   : > { %v12315_v6 = vadd.f32 %v8347_v24, %v7315_v23  ;;  %v12317_v62 = vadd.f32 %v7829_v43, %v6805_v17  ;;  %v7378_v49 = vmax.f32 %v3721_v26, 0.0  ;;  %v6868_v16 = vmax.f32 %v3834_v11, 0.0  ;;  %4691 = vmatprep.mubr.f32.mxu1 %v9776_v0  ;;  %4804 = vmatprep.mubr.f32.mxu0 %v9776_v0 }
 0x2a0   : > { %v3723_v12 = vpop.f32.mrf.mxu1  ;;  %v3836_v25 = vpop.f32.mrf.mxu0  ;;  %5067 = vmatpush1.msra.mxu0 %v1026_v35 }
 0x2a1   : > { %v8412_v31 = vadd.f32 %v12176_v44, %v7378_v49  ;;  %v7894_v19 = vadd.f32 %v12178_v54, %v6868_v16  ;;  %v7379_v39 = vmax.f32 %v3723_v12, 0.0  ;;  %v6869_v45 = vmax.f32 %v3836_v25, 0.0  ;;  %5068 = vmatprep.subr.mxu0 %v963_v32 }
 0x2a2   : > { %v3727_v15 = vpop.f32.mrf.mxu1  ;;  %v3840_v7 = vpop.f32.mrf.mxu0  ;;  %9325 = vmatmul.mubr.msk.f32.gmra.mxu1 %vm1254_vm1, %v12034_v52  ;;  %9335 = vmatmul.mubr.msk.f32.gmra.mxu0 %vm1254_vm1, %v12041_v8  ;;  %v580_v16 = vunpack.c.2.s8 %v11975_v53  ;;  %v517_v12 = vunpack.c.3.s8 %v12185_v1 }
 0x2a3   : > { %v12327_v30 = vadd.f32 %v8412_v31, %v7379_v39  ;;  %v12329_v14 = vadd.f32 %v7894_v19, %v6869_v45  ;;  %v7442_v33 = vmax.f32 %v3727_v15, 0.0  ;;  %v6932_v35 = vmax.f32 %v3840_v7, 0.0  ;;  %4697 = vmatprep.mubr.f32.mxu1 %v9776_v0  ;;  %4810 = vmatprep.mubr.f32.mxu0 %v9776_v0 }
 0x2a4   : > { %v3729_v44 = vpop.f32.mrf.mxu1  ;;  %v3842_v54 = vpop.f32.mrf.mxu0  ;;  %5069 = vmatpush1.msra.mxu0 %v962_v60 }
 0x2a5   : > { %v8477_v32 = vadd.f32 %v12192_v56, %v7442_v33  ;;  %v7959_v40 = vadd.f32 %v12194_v36, %v6932_v35  ;;  %v7443_v41 = vmax.f32 %v3729_v44, 0.0  ;;  %v6933_v24 = vmax.f32 %v3842_v54, 0.0  ;;  %9401 = vmatprep.subr.msk.mxu0 %vm1303_vm0, %v1223_v48 }
 0x2a6   : > { %v3733_v43 = vpop.f32.mrf.mxu1  ;;  %v3846_v23 = vpop.f32.mrf.mxu0  ;;  %9326 = vmatmul.mubr.msk.f32.gmra.mxu1 %vm1254_vm1, %v12057_v61  ;;  %9336 = vmatmul.mubr.msk.f32.gmra.mxu0 %vm1254_vm1, %v12064_v27  ;;  %v900_v33 = vand.u32 255, %v580_v16  ;;  %v837_v35 = vand.u32 255, %v517_v12  ;;  %v516_v44 = vunpack.c.2.s8 %v12185_v1  ;;  %v453_v54 = vunpack.c.3.s8 %v12203_v42 }
 0x2a7   : > { %v12340_v17 = vadd.f32 %v8477_v32, %v7443_v41  ;;  %v12342_v26 = vadd.f32 %v7959_v40, %v6933_v24  ;;  %v7506_v11 = vmax.f32 %v3733_v43, 0.0  ;;  %v6996_v56 = vmax.f32 %v3846_v23, 0.0  ;;  %4703 = vmatprep.mubr.f32.mxu1 %v9776_v0  ;;  %4816 = vmatprep.mubr.f32.mxu0 %v9776_v0 }
 0x2a8   : > { %v3735_v36 = vpop.f32.mrf.mxu1  ;;  %v3848_v49 = vpop.f32.mrf.mxu0  ;;  %v389_v1 = vunpack.c.3.s8 %v12216_v50  ;;  %v1157_v12 = vcvt.s32.f32 %v837_v35 }
 0x2a9   : > { %v8542_v25 = vadd.f32 %v12209_v21, %v7506_v11  ;;  %v8024_v60 = vadd.f32 %v12211_v9, %v6996_v56  ;;  %v7507_v48 = vmax.f32 %v3735_v36, 0.0  ;;  %v6997_v31 = vmax.f32 %v3848_v49, 0.0 }
 0x2aa   : > { %v3739_v19 = vpop.f32.mrf.mxu1  ;;  %v3852_v39 = vpop.f32.mrf.mxu0  ;;  %9327 = vmatmul.mubr.msk.f32.gmra.mxu1 %vm1254_vm1, %v12081_v55  ;;  %9337 = vmatmul.mubr.msk.f32.gmra.mxu0 %vm1254_vm1, %v12088_v10  ;;  %v452_v11 = vunpack.c.2.s8 %v12203_v42 }
 0x2ab   : > { %v12354_v45 = vadd.f32 %v8542_v25, %v7507_v48  ;;  %v12356_v15 = vadd.f32 %v8024_v60, %v6997_v31  ;;  %v7570_v53 = vmax.f32 %v3739_v19, 0.0  ;;  %v7060_v7 = vmax.f32 %v3852_v39, 0.0  ;;  %4709 = vmatprep.mubr.f32.mxu1 %v9776_v0  ;;  %4822 = vmatprep.mubr.f32.mxu0 %v9776_v0 }
 0x2ac   : > { %v3741_v21 = vpop.f32.mrf.mxu1  ;;  %v3854_v9 = vpop.f32.mrf.mxu0  ;;  %v836_v25 = vand.u32 255, %v516_v44  ;;  %v773_v60 = vand.u32 255, %v453_v54 }
 0x2ad   : > { %v8607_v32 = vadd.f32 %v12233_v63, %v7570_v53  ;;  %v8089_v40 = vadd.f32 %v12235_v3, %v7060_v7  ;;  %v7571_v41 = vmax.f32 %v3741_v21, 0.0  ;;  %v7061_v24 = vmax.f32 %v3854_v9, 0.0 }
 0x2ae   : > { %v3745_v43 = vpop.f32.mrf.mxu1  ;;  %v3858_v23 = vpop.f32.mrf.mxu0  ;;  %9328 = vmatmul.mubr.msk.f32.gmra.mxu1 %vm1254_vm1, %v11933_v47  ;;  %9338 = vmatmul.mubr.msk.f32.gmra.mxu0 %vm1254_vm1, %v12227_v51  ;;  %v1220_v47 = vcvt.s32.f32 %v900_v33  ;;  %v772_v7 = vand.u32 255, %v452_v11  ;;  %v12382_v21 = vand.u32 255, %v389_v1  ;;  %v1156_v54 = vcvt.s32.f32 %v836_v25 }
 0x2af   : > { %v12370_v56 = vadd.f32 %v8607_v32, %v7571_v41  ;;  %v12372_v36 = vadd.f32 %v8089_v40, %v7061_v24  ;;  %v7634_v63 = vmax.f32 %v3745_v43, 0.0  ;;  %v7124_v3 = vmax.f32 %v3858_v23, 0.0  ;;  %4828 = vmatprep.mubr.f32.mxu0 %v9776_v0  ;;  %4941 = vmatprep.mubr.f32.mxu1 %v9776_v0 }
 0x2b0   : > { %v3747_v49 = vpop.f32.mrf.mxu1  ;;  %v3860_v16 = vpop.f32.mrf.mxu0  ;;  %v1093_v32 = vcvt.s32.f32 %v773_v60  ;;  %v325_v40 = vunpack.c.3.s8 %v12242_v4  ;;  %v585_v60 = vunpack.c.3.s8 %v12267_v29 }
 0x2b1   : > { %v8672_v42 = vadd.f32 %v12255_v5, %v7634_v63  ;;  %v8154_v48 = vadd.f32 %v12257_v46, %v7124_v3  ;;  %v7635_v31 = vmax.f32 %v3747_v49, 0.0  ;;  %v7125_v19 = vmax.f32 %v3860_v16, 0.0 }
 0x2b2   : > { %v3864_v39 = vpop.f32.mrf.mxu0  ;;  %v3977_v53 = vpop.f32.mrf.mxu1  ;;  %9339 = vmatmul.mubr.msk.f32.gmra.mxu0 %vm1254_vm1, %v12247_v59  ;;  %9349 = vmatmul.mubr.msk.f32.vlgmr.msra.gmra.mxu1 %vm1254_vm1, %v11957_v38  ;;  %v388_v38 = vunpack.c.2.s8 %v12216_v50  ;;  %v1092_v63 = vcvt.s32.f32 %v772_v7  ;;  %v1029_v50 = vcvt.s32.f32 %v12382_v21  ;;  %v645_v25 = vand.u32 255, %v325_v40 }
 0x2b3   : > { %v12384_v9 = vadd.f32 %v8672_v42, %v7635_v31  ;;  %v12386_v33 = vadd.f32 %v8154_v48, %v7125_v19  ;;  %v7188_v5 = vmax.f32 %v3864_v39, 0.0  ;;  %v6678_v35 = vmax.f32 %v3977_v53, 0.0  ;;  %4834 = vmatprep.mubr.f32.mxu0 %v9776_v0  ;;  %4947 = vmatprep.mubr.f32.mxu1 %v9776_v0 }
 0x2b4   : > { %v3866_v46 = vpop.f32.mrf.mxu0  ;;  %v3979_v44 = vpop.f32.mrf.mxu1  ;;  %9384 = vmatpush1.msk.msra.mxu1 %vm1303_vm0, %v1220_v47 }
 0x2b5   : > { %v8219_v41 = vadd.f32 %v12279_v22, %v7188_v5  ;;  %v7701_v24 = vadd.f32 %v12281_v28, %v6678_v35  ;;  %v7189_v43 = vmax.f32 %v3866_v46, 0.0  ;;  %v6679_v23 = vmax.f32 %v3979_v44, 0.0  ;;  %5223 = vmatprep.subr.mxu1 %v1157_v12 }
 0x2b6   : > { %v3870_v11 = vpop.f32.mrf.mxu0  ;;  %v3983_v1 = vpop.f32.mrf.mxu1  ;;  %9340 = vmatmul.mubr.msk.f32.gmra.mxu0 %vm1254_vm1, %v12272_v2  ;;  %9350 = vmatmul.mubr.msk.f32.gmra.mxu1 %vm1254_vm1, %v11982_v58  ;;  %v708_v12 = vand.u32 255, %v388_v38  ;;  %v324_v58 = vunpack.c.2.s8 %v12242_v4  ;;  %v965_v46 = vcvt.s32.f32 %v645_v25 }
 0x2b7   : > { %v12400_v3 = vadd.f32 %v8219_v41, %v7189_v43  ;;  %v12402_v49 = vadd.f32 %v7701_v24, %v6679_v23  ;;  %v7252_v22 = vmax.f32 %v3870_v11, 0.0  ;;  %v6742_v28 = vmax.f32 %v3983_v1, 0.0  ;;  %4840 = vmatprep.mubr.f32.mxu0 %v9776_v0  ;;  %4953 = vmatprep.mubr.f32.mxu1 %v9776_v0 }
 0x2b8   : > { %v3872_v16 = vpop.f32.mrf.mxu0  ;;  %v3985_v47 = vpop.f32.mrf.mxu1  ;;  %5224 = vmatpush1.msra.mxu1 %v1156_v54  ;;  %v1028_v35 = vcvt.s32.f32 %v708_v12  ;;  %v644_v44 = vand.u32 255, %v324_v58  ;;  %v905_v54 = vand.u32 255, %v585_v60 }
 0x2b9   : > { %v8284_v42 = vadd.f32 %v12298_v13, %v7252_v22  ;;  %v7766_v48 = vadd.f32 %v12300_v57, %v6742_v28  ;;  %v7253_v31 = vmax.f32 %v3872_v16, 0.0  ;;  %v6743_v19 = vmax.f32 %v3985_v47, 0.0  ;;  %5225 = vmatprep.subr.mxu1 %v1093_v32 }
 0x2ba   : > { %v3876_v39 = vpop.f32.mrf.mxu0  ;;  %v3989_v53 = vpop.f32.mrf.mxu1  ;;  %9341 = vmatmul.mubr.msk.f32.gmra.mxu0 %vm1254_vm1, %v12292_v37  ;;  %9351 = vmatmul.mubr.msk.f32.gmra.mxu1 %vm1254_vm1, %v12002_v34 }
 0x2bb   : > { %v12414_v7 = vadd.f32 %v8284_v42, %v7253_v31  ;;  %v12416_v4 = vadd.f32 %v7766_v48, %v6743_v19  ;;  %v7316_v21 = vmax.f32 %v3876_v39, 0.0  ;;  %v6806_v5 = vmax.f32 %v3989_v53, 0.0  ;;  %4846 = vmatprep.mubr.f32.mxu0 %v9776_v0  ;;  %4959 = vmatprep.mubr.f32.mxu1 %v9776_v0 }
 0x2bc   : > { %v3878_v13 = vpop.f32.mrf.mxu0  ;;  %v3991_v57 = vpop.f32.mrf.mxu1  ;;  %5226 = vmatpush1.msra.mxu1 %v1092_v63  ;;  %v964_v63 = vcvt.s32.f32 %v644_v44 }
 0x2bd   : > { %v8349_v32 = vadd.f32 %v12315_v6, %v7316_v21  ;;  %v7831_v34 = vadd.f32 %v12317_v62, %v6806_v5  ;;  %v7317_v38 = vmax.f32 %v3878_v13, 0.0  ;;  %v6807_v40 = vmax.f32 %v3991_v57, 0.0  ;;  %5227 = vmatprep.subr.mxu1 %v1029_v50 }
 0x2be   : > { %v3882_v41 = vpop.f32.mrf.mxu0  ;;  %v3995_v24 = vpop.f32.mrf.mxu1  ;;  %9342 = vmatmul.mubr.msk.f32.gmra.mxu0 %vm1254_vm1, %v12309_v20  ;;  %9352 = vmatmul.mubr.msk.f32.gmra.mxu1 %vm1254_vm1, %v12019_v18  ;;  %v1225_v50 = vcvt.s32.f32 %v905_v54 }
 0x2bf   : > { %v12426_v43 = vadd.f32 %v8349_v32, %v7317_v38  ;;  %v12428_v23 = vadd.f32 %v7831_v34, %v6807_v40  ;;  %v7380_v11 = vmax.f32 %v3882_v41, 0.0  ;;  %v6870_v1 = vmax.f32 %v3995_v24, 0.0  ;;  %4852 = vmatprep.mubr.f32.mxu0 %v9776_v0  ;;  %4965 = vmatprep.mubr.f32.mxu1 %v9776_v0  ;;  %v12465_v32 = vld [vmem:[%s9818_s20 + $0x160] sm:$0xff] }
 0x2c0   : > { %v3884_v6 = vpop.f32.mrf.mxu0  ;;  %v3997_v62 = vpop.f32.mrf.mxu1  ;;  %5228 = vmatpush1.msra.mxu1 %v1028_v35  ;;  %v582_v35 = vunpack.c.0.s8 %v12267_v29 }
 0x2c1   : > { %v8414_v22 = vadd.f32 %v12327_v30, %v7380_v11  ;;  %v7896_v28 = vadd.f32 %v12329_v14, %v6870_v1  ;;  %v7381_v18 = vmax.f32 %v3884_v6, 0.0  ;;  %v6871_v16 = vmax.f32 %v3997_v62, 0.0  ;;  %5229 = vmatprep.subr.mxu1 %v965_v46 }
 0x2c2   : > { %v3888_v47 = vpop.f32.mrf.mxu0  ;;  %v4001_v12 = vpop.f32.mrf.mxu1  ;;  %9343 = vmatmul.mubr.msk.f32.gmra.mxu0 %vm1254_vm1, %v12034_v52  ;;  %9353 = vmatmul.mubr.msk.f32.gmra.mxu1 %vm1254_vm1, %v12041_v8  ;;  %v12447_v8 = vld [vmem:[%s9818_s20 + $0x1e0] sm:$0xff]  ;;  %v902_v6 = vand.u32 255, %v582_v35 }
 0x2c3   : > { %v12438_v25 = vadd.f32 %v8414_v22, %v7381_v18  ;;  %v12440_v58 = vadd.f32 %v7896_v28, %v6871_v16  ;;  %v7444_v60 = vmax.f32 %v3888_v47, 0.0  ;;  %v6934_v30 = vmax.f32 %v4001_v12, 0.0  ;;  %4858 = vmatprep.mubr.f32.mxu0 %v9776_v0  ;;  %4971 = vmatprep.mubr.f32.mxu1 %v9776_v0  ;;  %v12487_v47 = vld [vmem:[%s14378_s1 + $0x78] sm:$0xff] }
 0x2c4   : > { %v3890_v14 = vpop.f32.mrf.mxu0  ;;  %v4003_v42 = vpop.f32.mrf.mxu1  ;;  %5230 = vmatpush1.msra.mxu1 %v964_v63  ;;  %v454_v12 = vunpack.c.0.s8 %v12465_v32 }
 0x2c5   : > { %v8479_v48 = vadd.f32 %v12340_v17, %v7444_v60  ;;  %v7961_v52 = vadd.f32 %v12342_v26, %v6934_v30  ;;  %v7445_v31 = vmax.f32 %v3890_v14, 0.0  ;;  %v6935_v19 = vmax.f32 %v4003_v42, 0.0  ;;  %9419 = vmatprep.subr.msk.mxu1 %vm1303_vm0, %v1225_v50 }
 0x2c6   : > { %v3894_v39 = vpop.f32.mrf.mxu0  ;;  %v4007_v53 = vpop.f32.mrf.mxu1  ;;  %9344 = vmatmul.mubr.msk.f32.gmra.mxu0 %vm1254_vm1, %v12057_v61  ;;  %9354 = vmatmul.mubr.msk.f32.gmra.mxu1 %vm1254_vm1, %v12064_v27  ;;  %v519_v61 = vunpack.c.1.s8 %v12447_v8 }
 0x2c7   : > { %v12454_v21 = vadd.f32 %v8479_v48, %v7445_v31  ;;  %v12456_v17 = vadd.f32 %v7961_v52, %v6935_v19  ;;  %v7508_v26 = vmax.f32 %v3894_v39, 0.0  ;;  %v6998_v5 = vmax.f32 %v4007_v53, 0.0  ;;  %4864 = vmatprep.mubr.f32.mxu0 %v9776_v0  ;;  %4977 = vmatprep.mubr.f32.mxu1 %v9776_v0 }
 0x2c8   : > { %v3896_v13 = vpop.f32.mrf.mxu0  ;;  %v4009_v57 = vpop.f32.mrf.mxu1  ;;  %v839_v62 = vand.u32 255, %v519_v61  ;;  %v1222_v52 = vcvt.s32.f32 %v902_v6 }
 0x2c9   : > { %v8544_v46 = vadd.f32 %v12354_v45, %v7508_v26  ;;  %v8026_v27 = vadd.f32 %v12356_v15, %v6998_v5  ;;  %v7509_v44 = vmax.f32 %v3896_v13, 0.0  ;;  %v6999_v54 = vmax.f32 %v4009_v57, 0.0  ;;  %v12478_v15 = vld [vmem:[%s9818_s20 + $0xe0] sm:$0xff] }
 0x2ca   : > { %v3900_v34 = vpop.f32.mrf.mxu0  ;;  %v4013_v38 = vpop.f32.mrf.mxu1  ;;  %9345 = vmatmul.mubr.msk.f32.gmra.mxu0 %vm1254_vm1, %v12081_v55  ;;  %9355 = vmatmul.mubr.msk.f32.gmra.mxu1 %vm1254_vm1, %v12088_v10  ;;  %v518_v55 = vunpack.c.0.s8 %v12447_v8  ;;  %v455_v10 = vunpack.c.1.s8 %v12465_v32  ;;  %v1159_v31 = vcvt.s32.f32 %v839_v62  ;;  %v12504_v57 = vld [vmem:[%s9818_s20 + $0x60] sm:$0xff] }
 0x2cb   : > { %v12471_v40 = vadd.f32 %v8544_v46, %v7509_v44  ;;  %v12473_v41 = vadd.f32 %v8026_v27, %v6999_v54  ;;  %v7572_v24 = vmax.f32 %v3900_v34, 0.0  ;;  %v7062_v45 = vmax.f32 %v4013_v38, 0.0  ;;  %4870 = vmatprep.mubr.f32.mxu0 %v9776_v0  ;;  %4983 = vmatprep.mubr.f32.mxu1 %v9776_v0  ;;  %v12511_v46 = vld [vmem:[%s14378_s1] sm:$0xff] }
 0x2cc   : > { %v3902_v11 = vpop.f32.mrf.mxu0  ;;  %v4015_v1 = vpop.f32.mrf.mxu1  ;;  %v838_v19 = vand.u32 255, %v518_v55  ;;  %v775_v39 = vand.u32 255, %v455_v10  ;;  %v327_v6 = vunpack.c.1.s8 %v12504_v57 }
 0x2cd   : > { %v8609_v63 = vadd.f32 %v12370_v56, %v7572_v24  ;;  %v8091_v50 = vadd.f32 %v12372_v36, %v7062_v45  ;;  %v7573_v22 = vmax.f32 %v3902_v11, 0.0  ;;  %v7063_v28 = vmax.f32 %v4015_v1, 0.0 }
 0x2ce   : > { %v3906_v18 = vpop.f32.mrf.mxu0  ;;  %v4019_v16 = vpop.f32.mrf.mxu1  ;;  %9346 = vmatmul.mubr.msk.f32.gmra.mxu0 %vm1254_vm1, %v12487_v47  ;;  %9356 = vmatmul.mubr.msk.f32.gmra.mxu1 %vm1254_vm1, %v12227_v51  ;;  %v391_v56 = vunpack.c.1.s8 %v12478_v15  ;;  %v1158_v45 = vcvt.s32.f32 %v838_v19  ;;  %v1095_v11 = vcvt.s32.f32 %v775_v39  ;;  %v390_v1 = vunpack.c.0.s8 %v12478_v15 }
 0x2cf   : > { %v12495_v36 = vadd.f32 %v8609_v63, %v7573_v22  ;;  %v12497_v60 = vadd.f32 %v8091_v50, %v7063_v28  ;;  %v7636_v30 = vmax.f32 %v3906_v18, 0.0  ;;  %v7126_v14 = vmax.f32 %v4019_v16, 0.0  ;;  %4989 = vmatprep.mubr.f32.mxu1 %v9776_v0  ;;  %5102 = vmatprep.mubr.f32.mxu0 %v9776_v0  ;;  %v12529_v50 = vld [vmem:[%s9818_s20 + $0x268] sm:$0x55] }
 0x2d0   : > { %v3908_v42 = vpop.f32.mrf.mxu0  ;;  %v4021_v48 = vpop.f32.mrf.mxu1  ;;  %v12515_v27 = vand.u32 255, %v391_v56  ;;  %v12536_v18 = vld [vmem:[%s14378_s1 + $0x8] sm:$0xff]  ;;  %v587_v19 = vunpack.c.1.s8 %v12529_v50 }
 0x2d1   : > { %v8674_v53 = vadd.f32 %v12384_v9, %v7636_v30  ;;  %v8156_v26 = vadd.f32 %v12386_v33, %v7126_v14  ;;  %v7637_v5 = vmax.f32 %v3908_v42, 0.0  ;;  %v7127_v13 = vmax.f32 %v4021_v48, 0.0 }
 0x2d2   : > { %v4025_v35 = vpop.f32.mrf.mxu1  ;;  %v4138_v61 = vpop.f32.mrf.mxu0  ;;  %9357 = vmatmul.mubr.msk.f32.gmra.mxu1 %vm1254_vm1, %v12247_v59  ;;  %9367 = vmatmul.mubr.msk.f32.vlgmr.msra.gmra.mxu0 %vm1254_vm1, %v12511_v46  ;;  %v774_v9 = vand.u32 255, %v454_v12  ;;  %v710_v48 = vand.u32 255, %v390_v1 }
 0x2d3   : > { %v12517_v33 = vadd.f32 %v8674_v53, %v7637_v5  ;;  %v12519_v44 = vadd.f32 %v8156_v26, %v7127_v13  ;;  %v7190_v54 = vmax.f32 %v4025_v35, 0.0  ;;  %v6680_v34 = vmax.f32 %v4138_v61, 0.0  ;;  %4995 = vmatprep.mubr.f32.mxu1 %v9776_v0  ;;  %5108 = vmatprep.mubr.f32.mxu0 %v9776_v0  ;;  %v12556_v61 = vld [vmem:[%s14378_s1 + $0x10] sm:$0xff] }
 0x2d4   : > { %v4027_v38 = vpop.f32.mrf.mxu1  ;;  %v4140_v24 = vpop.f32.mrf.mxu0  ;;  %9402 = vmatpush1.msk.msra.mxu0 %vm1303_vm0, %v1222_v52  ;;  %v647_v52 = vand.u32 255, %v327_v6 }
 0x2d5   : > { %v8221_v62 = vadd.f32 %v12400_v3, %v7190_v54  ;;  %v7703_v55 = vadd.f32 %v12402_v49, %v6680_v34  ;;  %v7191_v10 = vmax.f32 %v4027_v38, 0.0  ;;  %v6681_v63 = vmax.f32 %v4140_v24, 0.0  ;;  %5384 = vmatprep.subr.mxu0 %v1159_v31 }
 0x2d6   : > { %v4031_v22 = vpop.f32.mrf.mxu1  ;;  %v4144_v28 = vpop.f32.mrf.mxu0  ;;  %9358 = vmatmul.mubr.msk.f32.gmra.mxu1 %vm1254_vm1, %v12272_v2  ;;  %9368 = vmatmul.mubr.msk.f32.gmra.mxu0 %vm1254_vm1, %v12536_v18  ;;  %v1094_v3 = vcvt.s32.f32 %v774_v9  ;;  %v1031_v49 = vcvt.s32.f32 %v12515_v27  ;;  %v326_v31 = vunpack.c.0.s8 %v12504_v57  ;;  %v1030_v38 = vcvt.s32.f32 %v710_v48 }
 0x2d7   : > { %v12541_v16 = vadd.f32 %v8221_v62, %v7191_v10  ;;  %v12543_v12 = vadd.f32 %v7703_v55, %v6681_v63  ;;  %v7254_v56 = vmax.f32 %v4031_v22, 0.0  ;;  %v6744_v30 = vmax.f32 %v4144_v28, 0.0  ;;  %5001 = vmatprep.mubr.f32.mxu1 %v9776_v0  ;;  %5114 = vmatprep.mubr.f32.mxu0 %v9776_v0  ;;  %v12573_v22 = vld [vmem:[%s14378_s1 + $0x18] sm:$0xff] }
 0x2d8   : > { %v4033_v14 = vpop.f32.mrf.mxu1  ;;  %v4146_v42 = vpop.f32.mrf.mxu0  ;;  %5385 = vmatpush1.msra.mxu0 %v1158_v45  ;;  %v967_v24 = vcvt.s32.f32 %v647_v52  ;;  %v646_v45 = vand.u32 255, %v326_v31 }
 0x2d9   : > { %v8286_v39 = vadd.f32 %v12414_v7, %v7254_v56  ;;  %v7768_v53 = vadd.f32 %v12416_v4, %v6744_v30  ;;  %v7255_v26 = vmax.f32 %v4033_v14, 0.0  ;;  %v6745_v5 = vmax.f32 %v4146_v42, 0.0  ;;  %5386 = vmatprep.subr.mxu0 %v1095_v11 }
 0x2da   : > { %v4037_v13 = vpop.f32.mrf.mxu1  ;;  %v4150_v35 = vpop.f32.mrf.mxu0  ;;  %9359 = vmatmul.mubr.msk.f32.gmra.mxu1 %vm1254_vm1, %v12292_v37  ;;  %9369 = vmatmul.mubr.msk.f32.gmra.mxu0 %vm1254_vm1, %v12556_v61  ;;  %v907_v11 = vand.u32 255, %v587_v19  ;;  %v966_v30 = vcvt.s32.f32 %v646_v45 }
 0x2db   : > { %v12560_v9 = vadd.f32 %v8286_v39, %v7255_v26  ;;  %v12562_v7 = vadd.f32 %v7768_v53, %v6745_v5  ;;  %v7318_v4 = vmax.f32 %v4037_v13, 0.0  ;;  %v6808_v27 = vmax.f32 %v4150_v35, 0.0  ;;  %5007 = vmatprep.mubr.f32.mxu1 %v9776_v0  ;;  %5120 = vmatprep.mubr.f32.mxu0 %v9776_v0  ;;  %v12588_v53 = vld [vmem:[%s14378_s1 + $0x60] sm:$0xff] }
 0x2dc   : > { %v4039_v54 = vpop.f32.mrf.mxu1  ;;  %v4152_v34 = vpop.f32.mrf.mxu0  ;;  %5387 = vmatpush1.msra.mxu0 %v1094_v3  ;;  %v1227_v14 = vcvt.s32.f32 %v907_v11  ;;  %v12595_v26 = vld [vmem:[%s14378_s1 + $0x20] sm:$0xff]  ;;  %v12611_v11 = vld [vmem:[%s14378_s1 + $0x68] sm:$0xff] }
 0x2dd   : > { %v8351_v1 = vadd.f32 %v12426_v43, %v7318_v4  ;;  %v7833_v6 = vadd.f32 %v12428_v23, %v6808_v27  ;;  %v7319_v62 = vmax.f32 %v4039_v54, 0.0  ;;  %v6809_v55 = vmax.f32 %v4152_v34, 0.0  ;;  %5388 = vmatprep.subr.mxu0 %v1031_v49 }
 0x2de   : > { %v4043_v10 = vpop.f32.mrf.mxu1  ;;  %v4156_v63 = vpop.f32.mrf.mxu0  ;;  %9360 = vmatmul.mubr.msk.f32.gmra.mxu1 %vm1254_vm1, %v12309_v20  ;;  %9370 = vmatmul.mubr.msk.f32.gmra.mxu0 %vm1254_vm1, %v12573_v22 }
 0x2df   : > { %v12577_v28 = vadd.f32 %v8351_v1, %v7319_v62  ;;  %v12579_v43 = vadd.f32 %v7833_v6, %v6809_v55  ;;  %v7382_v23 = vmax.f32 %v4043_v10, 0.0  ;;  %v6872_v3 = vmax.f32 %v4156_v63, 0.0  ;;  %5013 = vmatprep.mubr.f32.mxu1 %v9776_v0  ;;  %5126 = vmatprep.mubr.f32.mxu0 %v9776_v0 }
 0x2e0   : > { %v4045_v49 = vpop.f32.mrf.mxu1  ;;  %v4158_v56 = vpop.f32.mrf.mxu0  ;;  %5389 = vmatpush1.msra.mxu0 %v1030_v38  ;;  %v584_v63 = vunpack.c.2.s8 %v12267_v29  ;;  %v12642_v29 = vld [vmem:[%s14378_s1 + $0x30] sm:$0xff] }
 0x2e1   : > { %v8416_v42 = vadd.f32 %v12438_v25, %v7382_v23  ;;  %v7898_v48 = vadd.f32 %v12440_v58, %v6872_v3  ;;  %v7383_v52 = vmax.f32 %v4045_v49, 0.0  ;;  %v6873_v31 = vmax.f32 %v4158_v56, 0.0  ;;  %5390 = vmatprep.subr.mxu0 %v967_v24 }
 0x2e2   : > { %v4049_v19 = vpop.f32.mrf.mxu1  ;;  %v4162_v39 = vpop.f32.mrf.mxu0  ;;  %9361 = vmatmul.mubr.msk.f32.gmra.mxu1 %vm1254_vm1, %v12588_v53  ;;  %9371 = vmatmul.mubr.msk.f32.gmra.mxu0 %vm1254_vm1, %v12595_v26  ;;  %v521_v23 = vunpack.c.3.s8 %v12447_v8 }
 0x2e3   : > { %v12599_v25 = vadd.f32 %v8416_v42, %v7383_v52  ;;  %v12601_v58 = vadd.f32 %v7898_v48, %v6873_v31  ;;  %v7446_v5 = vmax.f32 %v4049_v19, 0.0  ;;  %v6936_v13 = vmax.f32 %v4162_v39, 0.0  ;;  %5019 = vmatprep.mubr.f32.mxu1 %v9776_v0  ;;  %5132 = vmatprep.mubr.f32.mxu0 %v9776_v0  ;;  %v12635_v48 = vld [vmem:[%s14378_s1 + $0x70] sm:$0xff] }
 0x2e4   : > { %v4051_v35 = vpop.f32.mrf.mxu1  ;;  %v4164_v4 = vpop.f32.mrf.mxu0  ;;  %5391 = vmatpush1.msra.mxu0 %v966_v30 }
 0x2e5   : > { %v8481_v27 = vadd.f32 %v12454_v21, %v7446_v5  ;;  %v7963_v54 = vadd.f32 %v12456_v17, %v6936_v13  ;;  %v7447_v34 = vmax.f32 %v4051_v35, 0.0  ;;  %v6937_v38 = vmax.f32 %v4164_v4, 0.0  ;;  %9437 = vmatprep.subr.msk.mxu0 %vm1303_vm0, %v1227_v14  ;;  %v12618_v21 = vld [vmem:[%s14378_s1 + $0x28] sm:$0xff] }
 0x2e6   : > { %v4055_v24 = vpop.f32.mrf.mxu1  ;;  %v4168_v45 = vpop.f32.mrf.mxu0  ;;  %9362 = vmatmul.mubr.msk.f32.gmra.mxu1 %vm1254_vm1, %v12611_v11  ;;  %9372 = vmatmul.mubr.msk.f32.gmra.mxu0 %vm1254_vm1, %v12618_v21  ;;  %v904_v5 = vand.u32 255, %v584_v63  ;;  %v841_v13 = vand.u32 255, %v521_v23  ;;  %v520_v35 = vunpack.c.2.s8 %v12447_v8  ;;  %v457_v4 = vunpack.c.3.s8 %v12465_v32 }
 0x2e7   : > { %v12622_v17 = vadd.f32 %v8481_v27, %v7447_v34  ;;  %v12624_v1 = vadd.f32 %v7963_v54, %v6937_v38  ;;  %v7510_v6 = vmax.f32 %v4055_v24, 0.0  ;;  %v7000_v62 = vmax.f32 %v4168_v45, 0.0  ;;  %5025 = vmatprep.mubr.f32.mxu1 %v9776_v0  ;;  %5138 = vmatprep.mubr.f32.mxu0 %v9776_v0 }
 0x2e8   : > { %v4057_v55 = vpop.f32.mrf.mxu1  ;;  %v4170_v10 = vpop.f32.mrf.mxu0  ;;  %v393_v8 = vunpack.c.3.s8 %v12478_v15  ;;  %v1224_v23 = vcvt.s32.f32 %v904_v5 }
 0x2e9   : > { %v8546_v3 = vadd.f32 %v12471_v40, %v7510_v6  ;;  %v8028_v49 = vadd.f32 %v12473_v41, %v7000_v62  ;;  %v7511_v56 = vmax.f32 %v4057_v55, 0.0  ;;  %v7001_v30 = vmax.f32 %v4170_v10, 0.0 }
 0x2ea   : > { %v4061_v14 = vpop.f32.mrf.mxu1  ;;  %v4174_v42 = vpop.f32.mrf.mxu0  ;;  %9363 = vmatmul.mubr.msk.f32.gmra.mxu1 %vm1254_vm1, %v12635_v48  ;;  %9373 = vmatmul.mubr.msk.f32.gmra.mxu0 %vm1254_vm1, %v12642_v29  ;;  %v456_v6 = vunpack.c.2.s8 %v12465_v32 }
 0x2eb   : > { %v12646_v40 = vadd.f32 %v8546_v3, %v7511_v56  ;;  %v12648_v41 = vadd.f32 %v8028_v49, %v7001_v30  ;;  %v7574_v52 = vmax.f32 %v4061_v14, 0.0  ;;  %v7064_v31 = vmax.f32 %v4174_v42, 0.0  ;;  %5031 = vmatprep.mubr.f32.mxu1 %v9776_v0  ;;  %5144 = vmatprep.mubr.f32.mxu0 %v9776_v0 }
 0x2ec   : > { %v4063_v19 = vpop.f32.mrf.mxu1  ;;  %v4176_v39 = vpop.f32.mrf.mxu0  ;;  %v1161_v3 = vcvt.s32.f32 %v841_v13  ;;  %v840_v49 = vand.u32 255, %v520_v35 }
 0x2ed   : > { %v8611_v27 = vadd.f32 %v12495_v36, %v7574_v52  ;;  %v8093_v54 = vadd.f32 %v12497_v60, %v7064_v31  ;;  %v7575_v34 = vmax.f32 %v4063_v19, 0.0  ;;  %v7065_v38 = vmax.f32 %v4176_v39, 0.0 }
 0x2ee   : > { %v4067_v24 = vpop.f32.mrf.mxu1  ;;  %v4180_v45 = vpop.f32.mrf.mxu0  ;;  %9364 = vmatmul.mubr.msk.f32.gmra.mxu1 %vm1254_vm1, %v12487_v47  ;;  %9374 = vmatmul.mubr.msk.f32.gmra.mxu0 %vm1254_vm1, %v12227_v51  ;;  %v777_v51 = vand.u32 255, %v457_v4  ;;  %v776_v31 = vand.u32 255, %v456_v6  ;;  %v12674_v19 = vand.u32 255, %v393_v8 }
 0x2ef   : > { %v12662_v62 = vadd.f32 %v8611_v27, %v7575_v34  ;;  %v12664_v55 = vadd.f32 %v8093_v54, %v7065_v38  ;;  %v7638_v36 = vmax.f32 %v4067_v24, 0.0  ;;  %v7128_v60 = vmax.f32 %v4180_v45, 0.0  ;;  %5150 = vmatprep.mubr.f32.mxu0 %v9776_v0  ;;  %5263 = vmatprep.mubr.f32.mxu1 %v9776_v0 }
 0x2f0   : > { %v4069_v10 = vpop.f32.mrf.mxu1  ;;  %v4182_v63 = vpop.f32.mrf.mxu0  ;;  %v1097_v4 = vcvt.s32.f32 %v777_v51  ;;  %v392_v27 = vunpack.c.2.s8 %v12478_v15  ;;  %v329_v54 = vunpack.c.3.s8 %v12504_v57  ;;  %v1033_v15 = vcvt.s32.f32 %v12674_v19 }
 0x2f1   : > { %v8676_v32 = vadd.f32 %v12517_v33, %v7638_v36  ;;  %v8158_v56 = vadd.f32 %v12519_v44, %v7128_v60  ;;  %v7639_v30 = vmax.f32 %v4069_v10, 0.0  ;;  %v7129_v14 = vmax.f32 %v4182_v63, 0.0 }
 0x2f2   : > { %v4186_v42 = vpop.f32.mrf.mxu0  ;;  %v4299_v52 = vpop.f32.mrf.mxu1  ;;  %9375 = vmatmul.mubr.msk.f32.gmra.mxu0 %vm1254_vm1, %v12247_v59  ;;  %9385 = vmatmul.mubr.msk.f32.vlgmr.msra.gmra.mxu1 %vm1254_vm1, %v12511_v46  ;;  %v1160_v59 = vcvt.s32.f32 %v840_v49  ;;  %v1096_v36 = vcvt.s32.f32 %v776_v31  ;;  %v328_v49 = vunpack.c.2.s8 %v12504_v57  ;;  %v589_v51 = vunpack.c.3.s8 %v12529_v50 }
 0x2f3   : > { %v12676_v39 = vadd.f32 %v8676_v32, %v7639_v30  ;;  %v12678_v5 = vadd.f32 %v8158_v56, %v7129_v14  ;;  %v7192_v33 = vmax.f32 %v4186_v42, 0.0  ;;  %v6682_v13 = vmax.f32 %v4299_v52, 0.0  ;;  %5156 = vmatprep.mubr.f32.mxu0 %v9776_v0  ;;  %5269 = vmatprep.mubr.f32.mxu1 %v9776_v0 }
 0x2f4   : > { %v4188_v44 = vpop.f32.mrf.mxu0  ;;  %v4301_v35 = vpop.f32.mrf.mxu1  ;;  %9420 = vmatpush1.msk.msra.mxu1 %vm1303_vm0, %v1224_v23 }
 0x2f5   : > { %v8223_v34 = vadd.f32 %v12541_v16, %v7192_v33  ;;  %v7705_v38 = vadd.f32 %v12543_v12, %v6682_v13  ;;  %v7193_v24 = vmax.f32 %v4188_v44, 0.0  ;;  %v6683_v45 = vmax.f32 %v4301_v35, 0.0  ;;  %5545 = vmatprep.subr.mxu1 %v1161_v3 }
 0x2f6   : > { %v4192_v6 = vpop.f32.mrf.mxu0  ;;  %v4305_v8 = vpop.f32.mrf.mxu1  ;;  %9376 = vmatmul.mubr.msk.f32.gmra.mxu0 %vm1254_vm1, %v12272_v2  ;;  %9386 = vmatmul.mubr.msk.f32.gmra.mxu1 %vm1254_vm1, %v12536_v18  ;;  %v712_v2 = vand.u32 255, %v392_v27  ;;  %v649_v3 = vand.u32 255, %v329_v54  ;;  %v648_v35 = vand.u32 255, %v328_v49 }
 0x2f7   : > { %v12692_v60 = vadd.f32 %v8223_v34, %v7193_v24  ;;  %v12694_v10 = vadd.f32 %v7705_v38, %v6683_v45  ;;  %v7256_v16 = vmax.f32 %v4192_v6, 0.0  ;;  %v6746_v12 = vmax.f32 %v4305_v8, 0.0  ;;  %5162 = vmatprep.mubr.f32.mxu0 %v9776_v0  ;;  %5275 = vmatprep.mubr.f32.mxu1 %v9776_v0 }
 0x2f8   : > { %v4194_v63 = vpop.f32.mrf.mxu0  ;;  %v4307_v23 = vpop.f32.mrf.mxu1  ;;  %5546 = vmatpush1.msra.mxu1 %v1160_v59  ;;  %v1032_v13 = vcvt.s32.f32 %v712_v2  ;;  %v969_v44 = vcvt.s32.f32 %v649_v3 }
 0x2f9   : > { %v8288_v32 = vadd.f32 %v12560_v9, %v7256_v16  ;;  %v7770_v56 = vadd.f32 %v12562_v7, %v6746_v12  ;;  %v7257_v30 = vmax.f32 %v4194_v63, 0.0  ;;  %v6747_v14 = vmax.f32 %v4307_v23, 0.0  ;;  %5547 = vmatprep.subr.mxu1 %v1097_v4 }
 0x2fa   : > { %v4198_v42 = vpop.f32.mrf.mxu0  ;;  %v4311_v52 = vpop.f32.mrf.mxu1  ;;  %9377 = vmatmul.mubr.msk.f32.gmra.mxu0 %vm1254_vm1, %v12292_v37  ;;  %9387 = vmatmul.mubr.msk.f32.gmra.mxu1 %vm1254_vm1, %v12556_v61  ;;  %v909_v37 = vand.u32 255, %v589_v51 }
 0x2fb   : > { %v12706_v31 = vadd.f32 %v8288_v32, %v7257_v30  ;;  %v12708_v57 = vadd.f32 %v7770_v56, %v6747_v14  ;;  %v7320_v19 = vmax.f32 %v4198_v42, 0.0  ;;  %v6810_v33 = vmax.f32 %v4311_v52, 0.0  ;;  %5168 = vmatprep.mubr.f32.mxu0 %v9776_v0  ;;  %5281 = vmatprep.mubr.f32.mxu1 %v9776_v0  ;;  %v12739_v52 = vld [vmem:[%s9818_s20 + $0x1e8] sm:$0xff] }
 0x2fc   : > { %v4200_v9 = vpop.f32.mrf.mxu0  ;;  %v4313_v7 = vpop.f32.mrf.mxu1  ;;  %5548 = vmatpush1.msra.mxu1 %v1096_v36  ;;  %v968_v36 = vcvt.s32.f32 %v648_v35  ;;  %v586_v35 = vunpack.c.0.s8 %v12529_v50 }
 0x2fd   : > { %v8353_v59 = vadd.f32 %v12577_v28, %v7320_v19  ;;  %v7835_v4 = vadd.f32 %v12579_v43, %v6810_v33  ;;  %v7321_v27 = vmax.f32 %v4200_v9, 0.0  ;;  %v6811_v54 = vmax.f32 %v4313_v7, 0.0  ;;  %5549 = vmatprep.subr.mxu1 %v1033_v15 }
 0x2fe   : > { %v4204_v34 = vpop.f32.mrf.mxu0  ;;  %v4317_v38 = vpop.f32.mrf.mxu1  ;;  %9378 = vmatmul.mubr.msk.f32.gmra.mxu0 %vm1254_vm1, %v12309_v20  ;;  %9388 = vmatmul.mubr.msk.f32.gmra.mxu1 %vm1254_vm1, %v12573_v22  ;;  %v1229_v15 = vcvt.s32.f32 %v909_v37  ;;  %v523_v37 = vunpack.c.1.s8 %v12739_v52 }
 0x2ff   : > { %v12718_v24 = vadd.f32 %v8353_v59, %v7321_v27  ;;  %v12720_v45 = vadd.f32 %v7835_v4, %v6811_v54  ;;  %v7384_v6 = vmax.f32 %v4204_v34, 0.0  ;;  %v6874_v8 = vmax.f32 %v4317_v38, 0.0  ;;  %5174 = vmatprep.mubr.f32.mxu0 %v9776_v0  ;;  %5287 = vmatprep.mubr.f32.mxu1 %v9776_v0  ;;  %v12757_v34 = vld [vmem:[%s9818_s20 + $0x168] sm:$0xff] }
 0x300   : > { %v4206_v28 = vpop.f32.mrf.mxu0  ;;  %v4319_v43 = vpop.f32.mrf.mxu1  ;;  %5550 = vmatpush1.msra.mxu1 %v1032_v13 }
 0x301   : > { %v8418_v20 = vadd.f32 %v12599_v25, %v7384_v6  ;;  %v7900_v16 = vadd.f32 %v12601_v58, %v6874_v8  ;;  %v7385_v12 = vmax.f32 %v4206_v28, 0.0  ;;  %v6875_v63 = vmax.f32 %v4319_v43, 0.0  ;;  %5551 = vmatprep.subr.mxu1 %v969_v44 }
 0x302   : > { %v4210_v23 = vpop.f32.mrf.mxu0  ;;  %v4323_v2 = vpop.f32.mrf.mxu1  ;;  %9379 = vmatmul.mubr.msk.f32.gmra.mxu0 %vm1254_vm1, %v12588_v53  ;;  %9389 = vmatmul.mubr.msk.f32.gmra.mxu1 %vm1254_vm1, %v12595_v26 }
 0x303   : > { %v12730_v3 = vadd.f32 %v8418_v20, %v7385_v12  ;;  %v12732_v49 = vadd.f32 %v7900_v16, %v6875_v63  ;;  %v7448_v51 = vmax.f32 %v4210_v23, 0.0  ;;  %v6938_v25 = vmax.f32 %v4323_v2, 0.0  ;;  %5180 = vmatprep.mubr.f32.mxu0 %v9776_v0  ;;  %5293 = vmatprep.mubr.f32.mxu1 %v9776_v0 }
 0x304   : > { %v4212_v58 = vpop.f32.mrf.mxu0  ;;  %v4325_v32 = vpop.f32.mrf.mxu1  ;;  %5552 = vmatpush1.msra.mxu1 %v968_v36  ;;  %v906_v20 = vand.u32 255, %v586_v35  ;;  %v843_v16 = vand.u32 255, %v523_v37  ;;  %v522_v12 = vunpack.c.0.s8 %v12739_v52  ;;  %v459_v63 = vunpack.c.1.s8 %v12757_v34 }
 0x305   : > { %v8483_v56 = vadd.f32 %v12622_v17, %v7448_v51  ;;  %v7965_v30 = vadd.f32 %v12624_v1, %v6938_v25  ;;  %v7449_v14 = vmax.f32 %v4212_v58, 0.0  ;;  %v6939_v42 = vmax.f32 %v4325_v32, 0.0  ;;  %9455 = vmatprep.subr.msk.mxu1 %vm1303_vm0, %v1229_v15 }
 0x306   : > { %v4216_v19 = vpop.f32.mrf.mxu0  ;;  %v4329_v33 = vpop.f32.mrf.mxu1  ;;  %9380 = vmatmul.mubr.msk.f32.gmra.mxu0 %vm1254_vm1, %v12611_v11  ;;  %9390 = vmatmul.mubr.msk.f32.gmra.mxu1 %vm1254_vm1, %v12618_v21  ;;  %v779_v35 = vand.u32 255, %v459_v63 }
 0x307   : > { %v12746_v9 = vadd.f32 %v8483_v56, %v7449_v14  ;;  %v12748_v17 = vadd.f32 %v7965_v30, %v6939_v42  ;;  %v7512_v1 = vmax.f32 %v4216_v19, 0.0  ;;  %v7002_v7 = vmax.f32 %v4329_v33, 0.0  ;;  %5186 = vmatprep.mubr.f32.mxu0 %v9776_v0  ;;  %5299 = vmatprep.mubr.f32.mxu1 %v9776_v0  ;;  %v12781_v56 = vld [vmem:[%s14378_s1 + $0x38] sm:$0xff] }
 0x308   : > { %v4218_v13 = vpop.f32.mrf.mxu0  ;;  %v4331_v44 = vpop.f32.mrf.mxu1  ;;  %v458_v30 = vunpack.c.0.s8 %v12757_v34 }
 0x309   : > { %v8548_v59 = vadd.f32 %v12646_v40, %v7512_v1  ;;  %v8030_v4 = vadd.f32 %v12648_v41, %v7002_v7  ;;  %v7513_v27 = vmax.f32 %v4218_v13, 0.0  ;;  %v7003_v54 = vmax.f32 %v4331_v44, 0.0  ;;  %v12770_v41 = vld [vmem:[%s9818_s20 + $0xe8] sm:$0xff] }
 0x30a   : > { %v4222_v38 = vpop.f32.mrf.mxu0  ;;  %v4335_v6 = vpop.f32.mrf.mxu1  ;;  %9381 = vmatmul.mubr.msk.f32.gmra.mxu0 %vm1254_vm1, %v12635_v48  ;;  %9391 = vmatmul.mubr.msk.f32.gmra.mxu1 %vm1254_vm1, %v12642_v29  ;;  %v1226_v7 = vcvt.s32.f32 %v906_v20  ;;  %v1163_v13 = vcvt.s32.f32 %v843_v16  ;;  %v842_v44 = vand.u32 255, %v522_v12 }
 0x30b   : > { %v12763_v8 = vadd.f32 %v8548_v59, %v7513_v27  ;;  %v12765_v28 = vadd.f32 %v8030_v4, %v7003_v54  ;;  %v7576_v43 = vmax.f32 %v4222_v38, 0.0  ;;  %v7066_v40 = vmax.f32 %v4335_v6, 0.0  ;;  %5192 = vmatprep.mubr.f32.mxu0 %v9776_v0  ;;  %5305 = vmatprep.mubr.f32.mxu1 %v9776_v0  ;;  %v12796_v54 = vld [vmem:[%s9818_s20 + $0x68] sm:$0xff] }
 0x30c   : > { %v4224_v36 = vpop.f32.mrf.mxu0  ;;  %v4337_v15 = vpop.f32.mrf.mxu1  ;;  %v1162_v63 = vcvt.s32.f32 %v842_v44 }
 0x30d   : > { %v8613_v23 = vadd.f32 %v12662_v62, %v7576_v43  ;;  %v8095_v2 = vadd.f32 %v12664_v55, %v7066_v40  ;;  %v7577_v51 = vmax.f32 %v4224_v36, 0.0  ;;  %v7067_v25 = vmax.f32 %v4337_v15, 0.0  ;;  %v12801_v43 = vld [vmem:[%s14378_s1 + $0x40] sm:$0xff] }
 0x30e   : > { %v4228_v58 = vpop.f32.mrf.mxu0  ;;  %v4341_v32 = vpop.f32.mrf.mxu1  ;;  %9382 = vmatmul.mubr.msk.f32.gmra.mxu0 %vm1254_vm1, %v12487_v47  ;;  %9392 = vmatmul.mubr.msk.f32.gmra.mxu1 %vm1254_vm1, %v12781_v56  ;;  %v395_v62 = vunpack.c.1.s8 %v12770_v41 }
 0x30f   : > { %v12787_v55 = vadd.f32 %v8613_v23, %v7577_v51  ;;  %v12789_v14 = vadd.f32 %v8095_v2, %v7067_v25  ;;  %v7640_v42 = vmax.f32 %v4228_v58, 0.0  ;;  %v7130_v19 = vmax.f32 %v4341_v32, 0.0  ;;  %5311 = vmatprep.mubr.f32.mxu1 %v9776_v0  ;;  %5424 = vmatprep.mubr.f32.mxu0 %v9776_v0 }
 0x310   : > { %v4230_v33 = vpop.f32.mrf.mxu0  ;;  %v4343_v1 = vpop.f32.mrf.mxu1  ;;  %v12807_v40 = vand.u32 255, %v395_v62  ;;  %v1099_v23 = vcvt.s32.f32 %v779_v35  ;;  %v394_v2 = vunpack.c.0.s8 %v12770_v41  ;;  %v331_v51 = vunpack.c.1.s8 %v12796_v54  ;;  %v12821_v62 = vld [vmem:[%s9818_s20 + $0x270] sm:$0x55] }
 0x311   : > { %v8678_v37 = vadd.f32 %v12676_v39, %v7640_v42  ;;  %v8160_v59 = vadd.f32 %v12678_v5, %v7130_v19  ;;  %v7641_v4 = vmax.f32 %v4230_v33, 0.0  ;;  %v7131_v27 = vmax.f32 %v4343_v1, 0.0  ;;  %v12826_v33 = vld [vmem:[%s14378_s1 + $0x48] sm:$0xff] }
 0x312   : > { %v4347_v38 = vpop.f32.mrf.mxu1  ;;  %v4460_v6 = vpop.f32.mrf.mxu0  ;;  %9393 = vmatmul.mubr.msk.f32.gmra.mxu1 %vm1254_vm1, %v12801_v43  ;;  %9403 = vmatmul.mubr.msk.f32.vlgmr.msra.gmra.mxu0 %vm1254_vm1, %v12511_v46  ;;  %v778_v39 = vand.u32 255, %v458_v30 }
 0x313   : > { %v12809_v5 = vadd.f32 %v8678_v37, %v7641_v4  ;;  %v12811_v36 = vadd.f32 %v8160_v59, %v7131_v27  ;;  %v7194_v15 = vmax.f32 %v4347_v38, 0.0  ;;  %v6684_v20 = vmax.f32 %v4460_v6, 0.0  ;;  %5317 = vmatprep.mubr.f32.mxu1 %v9776_v0  ;;  %5430 = vmatprep.mubr.f32.mxu0 %v9776_v0 }
 0x314   : > { %v4349_v16 = vpop.f32.mrf.mxu1  ;;  %v4462_v12 = vpop.f32.mrf.mxu0  ;;  %9438 = vmatpush1.msk.msra.mxu0 %vm1303_vm0, %v1226_v7  ;;  %v714_v59 = vand.u32 255, %v394_v2  ;;  %v651_v4 = vand.u32 255, %v331_v51  ;;  %v330_v27 = vunpack.c.0.s8 %v12796_v54  ;;  %v591_v38 = vunpack.c.1.s8 %v12821_v62 }
 0x315   : > { %v8225_v25 = vadd.f32 %v12692_v60, %v7194_v15  ;;  %v7707_v58 = vadd.f32 %v12694_v10, %v6684_v20  ;;  %v7195_v32 = vmax.f32 %v4349_v16, 0.0  ;;  %v6685_v30 = vmax.f32 %v4462_v12, 0.0  ;;  %5706 = vmatprep.subr.mxu0 %v1163_v13  ;;  %v12846_v12 = vld [vmem:[%s14378_s1 + $0x50] sm:$0xff] }
 0x316   : > { %v4353_v42 = vpop.f32.mrf.mxu1  ;;  %v4466_v19 = vpop.f32.mrf.mxu0  ;;  %9394 = vmatmul.mubr.msk.f32.gmra.mxu1 %vm1254_vm1, %v12826_v33  ;;  %9404 = vmatmul.mubr.msk.f32.gmra.mxu0 %vm1254_vm1, %v12536_v18  ;;  %v1098_v60 = vcvt.s32.f32 %v778_v39  ;;  %v1035_v10 = vcvt.s32.f32 %v12807_v40 }
 0x317   : > { %v12833_v1 = vadd.f32 %v8225_v25, %v7195_v32  ;;  %v12835_v7 = vadd.f32 %v7707_v58, %v6685_v30  ;;  %v7258_v13 = vmax.f32 %v4353_v42, 0.0  ;;  %v6748_v44 = vmax.f32 %v4466_v19, 0.0  ;;  %5323 = vmatprep.mubr.f32.mxu1 %v9776_v0  ;;  %5436 = vmatprep.mubr.f32.mxu0 %v9776_v0 }
 0x318   : > { %v4355_v35 = vpop.f32.mrf.mxu1  ;;  %v4468_v37 = vpop.f32.mrf.mxu0  ;;  %5707 = vmatpush1.msra.mxu0 %v1162_v63  ;;  %v1034_v25 = vcvt.s32.f32 %v714_v59  ;;  %v971_v58 = vcvt.s32.f32 %v651_v4  ;;  %v650_v32 = vand.u32 255, %v330_v27  ;;  %v911_v30 = vand.u32 255, %v591_v38 }
 0x319   : > { %v8290_v6 = vadd.f32 %v12706_v31, %v7258_v13  ;;  %v7772_v39 = vadd.f32 %v12708_v57, %v6748_v44  ;;  %v7259_v40 = vmax.f32 %v4355_v35, 0.0  ;;  %v6749_v15 = vmax.f32 %v4468_v37, 0.0  ;;  %5708 = vmatprep.subr.mxu0 %v1099_v23 }
 0x31a   : > { %v4359_v20 = vpop.f32.mrf.mxu1  ;;  %v4472_v16 = vpop.f32.mrf.mxu0  ;;  %9395 = vmatmul.mubr.msk.f32.gmra.mxu1 %vm1254_vm1, %v12846_v12  ;;  %9405 = vmatmul.mubr.msk.f32.gmra.mxu0 %vm1254_vm1, %v12556_v61  ;;  %v970_v27 = vcvt.s32.f32 %v650_v32  ;;  %v1231_v38 = vcvt.s32.f32 %v911_v30 }
 0x31b   : > { %v12852_v63 = vadd.f32 %v8290_v6, %v7259_v40  ;;  %v12854_v31 = vadd.f32 %v7772_v39, %v6749_v15  ;;  %v7322_v57 = vmax.f32 %v4359_v20, 0.0  ;;  %v6812_v2 = vmax.f32 %v4472_v16, 0.0  ;;  %5329 = vmatprep.mubr.f32.mxu1 %v9776_v0  ;;  %5442 = vmatprep.mubr.f32.mxu0 %v9776_v0  ;;  %v12863_v6 = vld [vmem:[%s14378_s1 + $0x58] sm:$0xff] }
 0x31c   : > { %v4361_v23 = vpop.f32.mrf.mxu1  ;;  %v4474_v51 = vpop.f32.mrf.mxu0  ;;  %5709 = vmatpush1.msra.mxu0 %v1098_v60 }
 0x31d   : > { %v8355_v42 = vadd.f32 %v12718_v24, %v7322_v57  ;;  %v7837_v19 = vadd.f32 %v12720_v45, %v6812_v2  ;;  %v7323_v13 = vmax.f32 %v4361_v23, 0.0  ;;  %v6813_v44 = vmax.f32 %v4474_v51, 0.0  ;;  %5710 = vmatprep.subr.mxu0 %v1035_v10 }
 0x31e   : > { %v4365_v35 = vpop.f32.mrf.mxu1  ;;  %v4478_v37 = vpop.f32.mrf.mxu0  ;;  %9396 = vmatmul.mubr.msk.f32.gmra.mxu1 %vm1254_vm1, %v12863_v6  ;;  %9406 = vmatmul.mubr.msk.f32.gmra.mxu0 %vm1254_vm1, %v12573_v22 }
 0x31f   : > { %v12869_v60 = vadd.f32 %v8355_v42, %v7323_v13  ;;  %v12871_v24 = vadd.f32 %v7837_v19, %v6813_v44  ;;  %v7386_v45 = vmax.f32 %v4365_v35, 0.0  ;;  %v6876_v59 = vmax.f32 %v4478_v37, 0.0  ;;  %5335 = vmatprep.mubr.f32.mxu1 %v9776_v0  ;;  %5448 = vmatprep.mubr.f32.mxu0 %v9776_v0 }
 0x320   : > { %v4367_v10 = vpop.f32.mrf.mxu1  ;;  %v4480_v4 = vpop.f32.mrf.mxu0  ;;  %5711 = vmatpush1.msra.mxu0 %v1034_v25 }
 0x321   : > { %v8420_v39 = vadd.f32 %v12730_v3, %v7386_v45  ;;  %v7902_v40 = vadd.f32 %v12732_v49, %v6876_v59  ;;  %v7387_v15 = vmax.f32 %v4367_v10, 0.0  ;;  %v6877_v20 = vmax.f32 %v4480_v4, 0.0  ;;  %5712 = vmatprep.subr.mxu0 %v971_v58 }
 0x322   : > { %v4371_v16 = vpop.f32.mrf.mxu1  ;;  %v4484_v57 = vpop.f32.mrf.mxu0  ;;  %9397 = vmatmul.mubr.msk.f32.gmra.mxu1 %vm1254_vm1, %v12588_v53  ;;  %9407 = vmatmul.mubr.msk.f32.gmra.mxu0 %vm1254_vm1, %v12595_v26  ;;  %v588_v59 = vunpack.c.2.s8 %v12529_v50  ;;  %v525_v10 = vunpack.c.3.s8 %v12739_v52 }
 0x323   : > { %v12881_v2 = vadd.f32 %v8420_v39, %v7387_v15  ;;  %v12883_v23 = vadd.f32 %v7902_v40, %v6877_v20  ;;  %v7450_v51 = vmax.f32 %v4371_v16, 0.0  ;;  %v6940_v25 = vmax.f32 %v4484_v57, 0.0  ;;  %5341 = vmatprep.mubr.f32.mxu1 %v9776_v0  ;;  %5454 = vmatprep.mubr.f32.mxu0 %v9776_v0 }
 0x324   : > { %v4373_v3 = vpop.f32.mrf.mxu1  ;;  %v4486_v49 = vpop.f32.mrf.mxu0  ;;  %5713 = vmatpush1.msra.mxu0 %v970_v27 }
 0x325   : > { %v8485_v58 = vadd.f32 %v12746_v9, %v7450_v51  ;;  %v7967_v32 = vadd.f32 %v12748_v17, %v6940_v25  ;;  %v7451_v30 = vmax.f32 %v4373_v3, 0.0  ;;  %v6941_v42 = vmax.f32 %v4486_v49, 0.0  ;;  %9473 = vmatprep.subr.msk.mxu0 %vm1303_vm0, %v1231_v38 }
 0x326   : > { %v4377_v19 = vpop.f32.mrf.mxu1  ;;  %v4490_v13 = vpop.f32.mrf.mxu0  ;;  %9398 = vmatmul.mubr.msk.f32.gmra.mxu1 %vm1254_vm1, %v12611_v11  ;;  %9408 = vmatmul.mubr.msk.f32.gmra.mxu0 %vm1254_vm1, %v12618_v21  ;;  %v908_v51 = vand.u32 255, %v588_v59  ;;  %v845_v25 = vand.u32 255, %v525_v10  ;;  %v524_v3 = vunpack.c.2.s8 %v12739_v52  ;;  %v461_v49 = vunpack.c.3.s8 %v12757_v34 }
 0x327   : > { %v12894_v44 = vadd.f32 %v8485_v58, %v7451_v30  ;;  %v12896_v35 = vadd.f32 %v7967_v32, %v6941_v42  ;;  %v7514_v37 = vmax.f32 %v4377_v19, 0.0  ;;  %v7004_v9 = vmax.f32 %v4490_v13, 0.0  ;;  %5347 = vmatprep.mubr.f32.mxu1 %v9776_v0  ;;  %5460 = vmatprep.mubr.f32.mxu0 %v9776_v0 }
 0x328   : > { %v4379_v17 = vpop.f32.mrf.mxu1  ;;  %v4492_v45 = vpop.f32.mrf.mxu0  ;;  %v397_v52 = vunpack.c.3.s8 %v12770_v41  ;;  %v1165_v10 = vcvt.s32.f32 %v845_v25 }
 0x329   : > { %v8550_v4 = vadd.f32 %v12763_v8, %v7514_v37  ;;  %v8032_v27 = vadd.f32 %v12765_v28, %v7004_v9  ;;  %v7515_v38 = vmax.f32 %v4379_v17, 0.0  ;;  %v7005_v39 = vmax.f32 %v4492_v45, 0.0 }
 0x32a   : > { %v4383_v40 = vpop.f32.mrf.mxu1  ;;  %v4496_v15 = vpop.f32.mrf.mxu0  ;;  %9399 = vmatmul.mubr.msk.f32.gmra.mxu1 %vm1254_vm1, %v12635_v48  ;;  %9409 = vmatmul.mubr.msk.f32.gmra.mxu0 %vm1254_vm1, %v12642_v29  ;;  %v460_v37 = vunpack.c.2.s8 %v12757_v34 }
 0x32b   : > { %v12908_v20 = vadd.f32 %v8550_v4, %v7515_v38  ;;  %v12910_v16 = vadd.f32 %v8032_v27, %v7005_v39  ;;  %v7578_v50 = vmax.f32 %v4383_v40, 0.0  ;;  %v7068_v57 = vmax.f32 %v4496_v15, 0.0  ;;  %5353 = vmatprep.mubr.f32.mxu1 %v9776_v0  ;;  %5466 = vmatprep.mubr.f32.mxu0 %v9776_v0 }
 0x32c   : > { %v4385_v8 = vpop.f32.mrf.mxu1  ;;  %v4498_v28 = vpop.f32.mrf.mxu0  ;;  %v844_v4 = vand.u32 255, %v524_v3  ;;  %v781_v27 = vand.u32 255, %v461_v49 }
 0x32d   : > { %v8615_v58 = vadd.f32 %v12787_v55, %v7578_v50  ;;  %v8097_v32 = vadd.f32 %v12789_v14, %v7068_v57  ;;  %v7579_v30 = vmax.f32 %v4385_v8, 0.0  ;;  %v7069_v42 = vmax.f32 %v4498_v28, 0.0 }
 0x32e   : > { %v4389_v19 = vpop.f32.mrf.mxu1  ;;  %v4502_v13 = vpop.f32.mrf.mxu0  ;;  %9400 = vmatmul.mubr.msk.f32.gmra.mxu1 %vm1254_vm1, %v12487_v47  ;;  %9410 = vmatmul.mubr.msk.f32.gmra.mxu0 %vm1254_vm1, %v12781_v56  ;;  %v1228_v47 = vcvt.s32.f32 %v908_v51  ;;  %v780_v57 = vand.u32 255, %v460_v37  ;;  %v12936_v8 = vand.u32 255, %v397_v52  ;;  %v1164_v49 = vcvt.s32.f32 %v844_v4 }
 0x32f   : > { %v12924_v9 = vadd.f32 %v8615_v58, %v7579_v30  ;;  %v12926_v17 = vadd.f32 %v8097_v32, %v7069_v42  ;;  %v7642_v55 = vmax.f32 %v4389_v19, 0.0  ;;  %v7132_v14 = vmax.f32 %v4502_v13, 0.0  ;;  %5472 = vmatprep.mubr.f32.mxu0 %v9776_v0  ;;  %5585 = vmatprep.mubr.f32.mxu1 %v9776_v0 }
 0x330   : > { %v4391_v45 = vpop.f32.mrf.mxu1  ;;  %v4504_v59 = vpop.f32.mrf.mxu0  ;;  %v1101_v58 = vcvt.s32.f32 %v781_v27  ;;  %v333_v32 = vunpack.c.3.s8 %v12796_v54  ;;  %v593_v27 = vunpack.c.3.s8 %v12821_v62 }
 0x331   : > { %v8680_v34 = vadd.f32 %v12809_v5, %v7642_v55  ;;  %v8162_v38 = vadd.f32 %v12811_v36, %v7132_v14  ;;  %v7643_v39 = vmax.f32 %v4391_v45, 0.0  ;;  %v7133_v40 = vmax.f32 %v4504_v59, 0.0 }
 0x332   : > { %v4508_v15 = vpop.f32.mrf.mxu0  ;;  %v4621_v50 = vpop.f32.mrf.mxu1  ;;  %9411 = vmatmul.mubr.msk.f32.gmra.mxu0 %vm1254_vm1, %v12801_v43  ;;  %9421 = vmatmul.mubr.msk.f32.vlgmr.msra.gmra.mxu1 %vm1254_vm1, %v12511_v46  ;;  %v396_v46 = vunpack.c.2.s8 %v12770_v41  ;;  %v1100_v55 = vcvt.s32.f32 %v780_v57  ;;  %v1037_v41 = vcvt.s32.f32 %v12936_v8  ;;  %v653_v4 = vand.u32 255, %v333_v32 }
 0x333   : > { %v12938_v28 = vadd.f32 %v8680_v34, %v7643_v39  ;;  %v12940_v51 = vadd.f32 %v8162_v38, %v7133_v40  ;;  %v7196_v5 = vmax.f32 %v4508_v15, 0.0  ;;  %v6686_v25 = vmax.f32 %v4621_v50, 0.0  ;;  %5478 = vmatprep.mubr.f32.mxu0 %v9776_v0  ;;  %5591 = vmatprep.mubr.f32.mxu1 %v9776_v0 }
 0x334   : > { %v4510_v36 = vpop.f32.mrf.mxu0  ;;  %v4623_v3 = vpop.f32.mrf.mxu1  ;;  %9456 = vmatpush1.msk.msra.mxu1 %vm1303_vm0, %v1228_v47 }
 0x335   : > { %v8227_v30 = vadd.f32 %v12833_v1, %v7196_v5  ;;  %v7709_v42 = vadd.f32 %v12835_v7, %v6686_v25  ;;  %v7197_v19 = vmax.f32 %v4510_v36, 0.0  ;;  %v6687_v13 = vmax.f32 %v4623_v3, 0.0  ;;  %5867 = vmatprep.subr.mxu1 %v1165_v10 }
 0x336   : > { %v4514_v37 = vpop.f32.mrf.mxu0  ;;  %v4627_v52 = vpop.f32.mrf.mxu1  ;;  %9412 = vmatmul.mubr.msk.f32.gmra.mxu0 %vm1254_vm1, %v12826_v33  ;;  %9422 = vmatmul.mubr.msk.f32.gmra.mxu1 %vm1254_vm1, %v12536_v18  ;;  %v716_v10 = vand.u32 255, %v396_v46  ;;  %v332_v18 = vunpack.c.2.s8 %v12796_v54  ;;  %v973_v36 = vcvt.s32.f32 %v653_v4 }
 0x337   : > { %v12954_v14 = vadd.f32 %v8227_v30, %v7197_v19  ;;  %v12956_v45 = vadd.f32 %v7709_v42, %v6687_v13  ;;  %v7260_v1 = vmax.f32 %v4514_v37, 0.0  ;;  %v6750_v7 = vmax.f32 %v4627_v52, 0.0  ;;  %5484 = vmatprep.mubr.f32.mxu0 %v9776_v0  ;;  %5597 = vmatprep.mubr.f32.mxu1 %v9776_v0 }
 0x338   : > { %v4516_v59 = vpop.f32.mrf.mxu0  ;;  %v4629_v47 = vpop.f32.mrf.mxu1  ;;  %5868 = vmatpush1.msra.mxu1 %v1164_v49  ;;  %v1036_v25 = vcvt.s32.f32 %v716_v10  ;;  %v652_v3 = vand.u32 255, %v332_v18  ;;  %v913_v49 = vand.u32 255, %v593_v27 }
 0x339   : > { %v8292_v34 = vadd.f32 %v12852_v63, %v7260_v1  ;;  %v7774_v38 = vadd.f32 %v12854_v31, %v6750_v7  ;;  %v7261_v39 = vmax.f32 %v4516_v59, 0.0  ;;  %v6751_v40 = vmax.f32 %v4629_v47, 0.0  ;;  %5869 = vmatprep.subr.mxu1 %v1101_v58 }
 0x33a   : > { %v4520_v15 = vpop.f32.mrf.mxu0  ;;  %v4633_v50 = vpop.f32.mrf.mxu1  ;;  %9413 = vmatmul.mubr.msk.f32.gmra.mxu0 %vm1254_vm1, %v12846_v12  ;;  %9423 = vmatmul.mubr.msk.f32.gmra.mxu1 %vm1254_vm1, %v12556_v61 }
 0x33b   : > { %v12968_v57 = vadd.f32 %v8292_v34, %v7261_v39  ;;  %v12970_v54 = vadd.f32 %v7774_v38, %v6751_v40  ;;  %v7324_v8 = vmax.f32 %v4520_v15, 0.0  ;;  %v6814_v5 = vmax.f32 %v4633_v50, 0.0  ;;  %5490 = vmatprep.mubr.f32.mxu0 %v9776_v0  ;;  %5603 = vmatprep.mubr.f32.mxu1 %v9776_v0 }
 0x33c   : > { %v4522_v63 = vpop.f32.mrf.mxu0  ;;  %v4635_v31 = vpop.f32.mrf.mxu1  ;;  %5870 = vmatpush1.msra.mxu1 %v1100_v55  ;;  %v972_v55 = vcvt.s32.f32 %v652_v3 }
 0x33d   : > { %v8357_v58 = vadd.f32 %v12869_v60, %v7324_v8  ;;  %v7839_v61 = vadd.f32 %v12871_v24, %v6814_v5  ;;  %v7325_v46 = vmax.f32 %v4522_v63, 0.0  ;;  %v6815_v32 = vmax.f32 %v4635_v31, 0.0  ;;  %5871 = vmatprep.subr.mxu1 %v1037_v41 }
 0x33e   : > { %v4526_v30 = vpop.f32.mrf.mxu0  ;;  %v4639_v42 = vpop.f32.mrf.mxu1  ;;  %9414 = vmatmul.mubr.msk.f32.gmra.mxu0 %vm1254_vm1, %v12863_v6  ;;  %9424 = vmatmul.mubr.msk.f32.gmra.mxu1 %vm1254_vm1, %v12573_v22  ;;  %v1233_v41 = vcvt.s32.f32 %v913_v49 }
 0x33f   : > { %v12980_v19 = vadd.f32 %v8357_v58, %v7325_v46  ;;  %v12982_v13 = vadd.f32 %v7839_v61, %v6815_v32  ;;  %v7388_v37 = vmax.f32 %v4526_v30, 0.0  ;;  %v6878_v52 = vmax.f32 %v4639_v42, 0.0  ;;  %5496 = vmatprep.mubr.f32.mxu0 %v9776_v0  ;;  %5609 = vmatprep.mubr.f32.mxu1 %v9776_v0  ;;  %v13019_v58 = vld [vmem:[%s9818_s20 + $0x170] sm:$0xff] }
 0x340   : > { %v4528_v60 = vpop.f32.mrf.mxu0  ;;  %v4641_v24 = vpop.f32.mrf.mxu1  ;;  %5872 = vmatpush1.msra.mxu1 %v1036_v25  ;;  %v590_v25 = vunpack.c.0.s8 %v12821_v62 }
 0x341   : > { %v8422_v1 = vadd.f32 %v12881_v2, %v7388_v37  ;;  %v7904_v7 = vadd.f32 %v12883_v23, %v6878_v52  ;;  %v7389_v22 = vmax.f32 %v4528_v60, 0.0  ;;  %v6879_v59 = vmax.f32 %v4641_v24, 0.0  ;;  %5873 = vmatprep.subr.mxu1 %v973_v36 }
 0x342   : > { %v4532_v47 = vpop.f32.mrf.mxu0  ;;  %v4645_v10 = vpop.f32.mrf.mxu1  ;;  %9415 = vmatmul.mubr.msk.f32.gmra.mxu0 %vm1254_vm1, %v12588_v53  ;;  %9425 = vmatmul.mubr.msk.f32.gmra.mxu1 %vm1254_vm1, %v12595_v26  ;;  %v13001_v26 = vld [vmem:[%s9818_s20 + $0x1f0] sm:$0xff]  ;;  %v910_v60 = vand.u32 255, %v590_v25 }
 0x343   : > { %v12992_v4 = vadd.f32 %v8422_v1, %v7389_v22  ;;  %v12994_v18 = vadd.f32 %v7904_v7, %v6879_v59  ;;  %v7452_v27 = vmax.f32 %v4532_v47, 0.0  ;;  %v6942_v2 = vmax.f32 %v4645_v10, 0.0  ;;  %5502 = vmatprep.mubr.f32.mxu0 %v9776_v0  ;;  %5615 = vmatprep.mubr.f32.mxu1 %v9776_v0  ;;  %v13041_v47 = vld [vmem:[%s14378_s1 + $0x78] sm:$0xff] }
 0x344   : > { %v4534_v23 = vpop.f32.mrf.mxu0  ;;  %v4647_v34 = vpop.f32.mrf.mxu1  ;;  %5874 = vmatpush1.msra.mxu1 %v972_v55  ;;  %v462_v10 = vunpack.c.0.s8 %v13019_v58 }
 0x345   : > { %v8487_v38 = vadd.f32 %v12894_v44, %v7452_v27  ;;  %v7969_v53 = vadd.f32 %v12896_v35, %v6942_v2  ;;  %v7453_v39 = vmax.f32 %v4534_v23, 0.0  ;;  %v6943_v40 = vmax.f32 %v4647_v34, 0.0  ;;  %9491 = vmatprep.subr.msk.mxu1 %vm1303_vm0, %v1233_v41 }
 0x346   : > { %v4538_v15 = vpop.f32.mrf.mxu0  ;;  %v4651_v50 = vpop.f32.mrf.mxu1  ;;  %9416 = vmatmul.mubr.msk.f32.gmra.mxu0 %vm1254_vm1, %v12611_v11  ;;  %9426 = vmatmul.mubr.msk.f32.gmra.mxu1 %vm1254_vm1, %v12618_v21  ;;  %v527_v11 = vunpack.c.1.s8 %v13001_v26 }
 0x347   : > { %v13008_v8 = vadd.f32 %v8487_v38, %v7453_v39  ;;  %v13010_v44 = vadd.f32 %v7969_v53, %v6943_v40  ;;  %v7516_v35 = vmax.f32 %v4538_v15, 0.0  ;;  %v7006_v5 = vmax.f32 %v4651_v50, 0.0  ;;  %5508 = vmatprep.mubr.f32.mxu0 %v9776_v0  ;;  %5621 = vmatprep.mubr.f32.mxu1 %v9776_v0 }
 0x348   : > { %v4540_v63 = vpop.f32.mrf.mxu0  ;;  %v4653_v31 = vpop.f32.mrf.mxu1  ;;  %v847_v24 = vand.u32 255, %v527_v11  ;;  %v1230_v53 = vcvt.s32.f32 %v910_v60 }
 0x349   : > { %v8552_v36 = vadd.f32 %v12908_v20, %v7516_v35  ;;  %v8034_v21 = vadd.f32 %v12910_v16, %v7006_v5  ;;  %v7517_v3 = vmax.f32 %v4540_v63, 0.0  ;;  %v7007_v49 = vmax.f32 %v4653_v31, 0.0  ;;  %v13032_v16 = vld [vmem:[%s9818_s20 + $0xf0] sm:$0xff] }
 0x34a   : > { %v4544_v61 = vpop.f32.mrf.mxu0  ;;  %v4657_v46 = vpop.f32.mrf.mxu1  ;;  %9417 = vmatmul.mubr.msk.f32.gmra.mxu0 %vm1254_vm1, %v12635_v48  ;;  %9427 = vmatmul.mubr.msk.f32.gmra.mxu1 %vm1254_vm1, %v12642_v29  ;;  %v526_v48 = vunpack.c.0.s8 %v13001_v26  ;;  %v463_v29 = vunpack.c.1.s8 %v13019_v58  ;;  %v1167_v39 = vcvt.s32.f32 %v847_v24  ;;  %v13058_v31 = vld [vmem:[%s9818_s20 + $0x70] sm:$0xff] }
 0x34b   : > { %v13025_v32 = vadd.f32 %v8552_v36, %v7517_v3  ;;  %v13027_v30 = vadd.f32 %v8034_v21, %v7007_v49  ;;  %v7580_v42 = vmax.f32 %v4544_v61, 0.0  ;;  %v7070_v20 = vmax.f32 %v4657_v46, 0.0  ;;  %5514 = vmatprep.mubr.f32.mxu0 %v9776_v0  ;;  %5627 = vmatprep.mubr.f32.mxu1 %v9776_v0  ;;  %v13065_v36 = vld [vmem:[%s14378_s1] sm:$0xff] }
 0x34c   : > { %v4546_v37 = vpop.f32.mrf.mxu0  ;;  %v4659_v52 = vpop.f32.mrf.mxu1  ;;  %v846_v40 = vand.u32 255, %v526_v48  ;;  %v783_v15 = vand.u32 255, %v463_v29  ;;  %v335_v60 = vunpack.c.1.s8 %v13058_v31 }
 0x34d   : > { %v8617_v55 = vadd.f32 %v12924_v9, %v7580_v42  ;;  %v8099_v41 = vadd.f32 %v12926_v17, %v7070_v20  ;;  %v7581_v1 = vmax.f32 %v4546_v37, 0.0  ;;  %v7071_v7 = vmax.f32 %v4659_v52, 0.0 }
 0x34e   : > { %v4550_v22 = vpop.f32.mrf.mxu0  ;;  %v4663_v59 = vpop.f32.mrf.mxu1  ;;  %9418 = vmatmul.mubr.msk.f32.gmra.mxu0 %vm1254_vm1, %v13041_v47  ;;  %9428 = vmatmul.mubr.msk.f32.gmra.mxu1 %vm1254_vm1, %v12781_v56  ;;  %v399_v9 = vunpack.c.1.s8 %v13032_v16  ;;  %v1166_v20 = vcvt.s32.f32 %v846_v40  ;;  %v1103_v37 = vcvt.s32.f32 %v783_v15  ;;  %v398_v52 = vunpack.c.0.s8 %v13032_v16 }
 0x34f   : > { %v13049_v17 = vadd.f32 %v8617_v55, %v7581_v1  ;;  %v13051_v27 = vadd.f32 %v8099_v41, %v7071_v7  ;;  %v7644_v2 = vmax.f32 %v4550_v22, 0.0  ;;  %v7134_v23 = vmax.f32 %v4663_v59, 0.0  ;;  %5633 = vmatprep.mubr.f32.mxu1 %v9776_v0  ;;  %5746 = vmatprep.mubr.f32.mxu0 %v9776_v0  ;;  %v13083_v41 = vld [vmem:[%s9818_s20 + $0x278] sm:$0x55]  ;;  %v13090_v22 = vld [vmem:[%s14378_s1 + $0x8] sm:$0xff] }
 0x350   : > { %v4552_v34 = vpop.f32.mrf.mxu0  ;;  %v4665_v38 = vpop.f32.mrf.mxu1  ;;  %v13069_v21 = vand.u32 255, %v399_v9  ;;  %v595_v40 = vunpack.c.1.s8 %v13083_v41 }
 0x351   : > { %v8682_v50 = vadd.f32 %v12938_v28, %v7644_v2  ;;  %v8164_v35 = vadd.f32 %v12940_v51, %v7134_v23  ;;  %v7645_v5 = vmax.f32 %v4552_v34, 0.0  ;;  %v7135_v63 = vmax.f32 %v4665_v38, 0.0 }
 0x352   : > { %v4669_v25 = vpop.f32.mrf.mxu1  ;;  %v4782_v11 = vpop.f32.mrf.mxu0  ;;  %9429 = vmatmul.mubr.msk.f32.gmra.mxu1 %vm1254_vm1, %v12801_v43  ;;  %9439 = vmatmul.mubr.msk.f32.vlgmr.msra.gmra.mxu0 %vm1254_vm1, %v13065_v36  ;;  %v782_v28 = vand.u32 255, %v462_v10  ;;  %v718_v38 = vand.u32 255, %v398_v52 }
 0x353   : > { %v13071_v51 = vadd.f32 %v8682_v50, %v7645_v5  ;;  %v13073_v3 = vadd.f32 %v8164_v35, %v7135_v63  ;;  %v7198_v49 = vmax.f32 %v4669_v25, 0.0  ;;  %v6688_v61 = vmax.f32 %v4782_v11, 0.0  ;;  %5639 = vmatprep.mubr.f32.mxu1 %v9776_v0  ;;  %5752 = vmatprep.mubr.f32.mxu0 %v9776_v0  ;;  %v13110_v11 = vld [vmem:[%s14378_s1 + $0x10] sm:$0xff] }
 0x354   : > { %v4671_v46 = vpop.f32.mrf.mxu1  ;;  %v4784_v42 = vpop.f32.mrf.mxu0  ;;  %9474 = vmatpush1.msk.msra.mxu0 %vm1303_vm0, %v1230_v53  ;;  %v655_v53 = vand.u32 255, %v335_v60 }
 0x355   : > { %v8229_v24 = vadd.f32 %v12954_v14, %v7198_v49  ;;  %v7711_v48 = vadd.f32 %v12956_v45, %v6688_v61  ;;  %v7199_v29 = vmax.f32 %v4671_v46, 0.0  ;;  %v6689_v55 = vmax.f32 %v4784_v42, 0.0  ;;  %6028 = vmatprep.subr.mxu0 %v1167_v39 }
 0x356   : > { %v4675_v1 = vpop.f32.mrf.mxu1  ;;  %v4788_v7 = vpop.f32.mrf.mxu0  ;;  %9430 = vmatmul.mubr.msk.f32.gmra.mxu1 %vm1254_vm1, %v12826_v33  ;;  %9440 = vmatmul.mubr.msk.f32.gmra.mxu0 %vm1254_vm1, %v13090_v22  ;;  %v1102_v14 = vcvt.s32.f32 %v782_v28  ;;  %v1039_v45 = vcvt.s32.f32 %v13069_v21  ;;  %v334_v39 = vunpack.c.0.s8 %v13058_v31  ;;  %v1038_v46 = vcvt.s32.f32 %v718_v38 }
 0x357   : > { %v13095_v59 = vadd.f32 %v8229_v24, %v7199_v29  ;;  %v13097_v10 = vadd.f32 %v7711_v48, %v6689_v55  ;;  %v7262_v9 = vmax.f32 %v4675_v1, 0.0  ;;  %v6752_v2 = vmax.f32 %v4788_v7, 0.0  ;;  %5645 = vmatprep.mubr.f32.mxu1 %v9776_v0  ;;  %5758 = vmatprep.mubr.f32.mxu0 %v9776_v0  ;;  %v13127_v1 = vld [vmem:[%s14378_s1 + $0x18] sm:$0xff] }
 0x358   : > { %v4677_v23 = vpop.f32.mrf.mxu1  ;;  %v4790_v34 = vpop.f32.mrf.mxu0  ;;  %6029 = vmatpush1.msra.mxu0 %v1166_v20  ;;  %v975_v42 = vcvt.s32.f32 %v655_v53  ;;  %v654_v20 = vand.u32 255, %v334_v39 }
 0x359   : > { %v8294_v15 = vadd.f32 %v12968_v57, %v7262_v9  ;;  %v7776_v50 = vadd.f32 %v12970_v54, %v6752_v2  ;;  %v7263_v35 = vmax.f32 %v4677_v23, 0.0  ;;  %v6753_v5 = vmax.f32 %v4790_v34, 0.0  ;;  %6030 = vmatprep.subr.mxu0 %v1103_v37 }
 0x35a   : > { %v4681_v63 = vpop.f32.mrf.mxu1  ;;  %v4794_v25 = vpop.f32.mrf.mxu0  ;;  %9431 = vmatmul.mubr.msk.f32.gmra.mxu1 %vm1254_vm1, %v12846_v12  ;;  %9441 = vmatmul.mubr.msk.f32.gmra.mxu0 %vm1254_vm1, %v13110_v11  ;;  %v915_v37 = vand.u32 255, %v595_v40  ;;  %v974_v2 = vcvt.s32.f32 %v654_v20 }
 0x35b   : > { %v13114_v28 = vadd.f32 %v8294_v15, %v7263_v35  ;;  %v13116_v57 = vadd.f32 %v7776_v50, %v6753_v5  ;;  %v7326_v54 = vmax.f32 %v4681_v63, 0.0  ;;  %v6816_v21 = vmax.f32 %v4794_v25, 0.0  ;;  %5651 = vmatprep.mubr.f32.mxu1 %v9776_v0  ;;  %5764 = vmatprep.mubr.f32.mxu0 %v9776_v0  ;;  %v13142_v50 = vld [vmem:[%s14378_s1 + $0x60] sm:$0xff] }
 0x35c   : > { %v4683_v49 = vpop.f32.mrf.mxu1  ;;  %v4796_v61 = vpop.f32.mrf.mxu0  ;;  %6031 = vmatpush1.msra.mxu0 %v1102_v14  ;;  %v1235_v23 = vcvt.s32.f32 %v915_v37  ;;  %v13149_v35 = vld [vmem:[%s14378_s1 + $0x20] sm:$0xff]  ;;  %v13165_v37 = vld [vmem:[%s14378_s1 + $0x68] sm:$0xff] }
 0x35d   : > { %v8359_v52 = vadd.f32 %v12980_v19, %v7326_v54  ;;  %v7841_v60 = vadd.f32 %v12982_v13, %v6816_v21  ;;  %v7327_v24 = vmax.f32 %v4683_v49, 0.0  ;;  %v6817_v48 = vmax.f32 %v4796_v61, 0.0  ;;  %6032 = vmatprep.subr.mxu0 %v1039_v45 }
 0x35e   : > { %v4687_v29 = vpop.f32.mrf.mxu1  ;;  %v4800_v55 = vpop.f32.mrf.mxu0  ;;  %9432 = vmatmul.mubr.msk.f32.gmra.mxu1 %vm1254_vm1, %v12863_v6  ;;  %9442 = vmatmul.mubr.msk.f32.gmra.mxu0 %vm1254_vm1, %v13127_v1 }
 0x35f   : > { %v13131_v7 = vadd.f32 %v8359_v52, %v7327_v24  ;;  %v13133_v19 = vadd.f32 %v7841_v60, %v6817_v48  ;;  %v7390_v13 = vmax.f32 %v4687_v29, 0.0  ;;  %v6880_v14 = vmax.f32 %v4800_v55, 0.0  ;;  %5657 = vmatprep.mubr.f32.mxu1 %v9776_v0  ;;  %5770 = vmatprep.mubr.f32.mxu0 %v9776_v0 }
 0x360   : > { %v4689_v45 = vpop.f32.mrf.mxu1  ;;  %v4802_v9 = vpop.f32.mrf.mxu0  ;;  %6033 = vmatpush1.msra.mxu0 %v1038_v46  ;;  %v592_v55 = vunpack.c.2.s8 %v12821_v62  ;;  %v13196_v62 = vld [vmem:[%s14378_s1 + $0x30] sm:$0xff] }
 0x361   : > { %v8424_v34 = vadd.f32 %v12992_v4, %v7390_v13  ;;  %v7906_v38 = vadd.f32 %v12994_v18, %v6880_v14  ;;  %v7391_v53 = vmax.f32 %v4689_v45, 0.0  ;;  %v6881_v39 = vmax.f32 %v4802_v9, 0.0  ;;  %6034 = vmatprep.subr.mxu0 %v975_v42 }
 0x362   : > { %v4693_v40 = vpop.f32.mrf.mxu1  ;;  %v4806_v15 = vpop.f32.mrf.mxu0  ;;  %9433 = vmatmul.mubr.msk.f32.gmra.mxu1 %vm1254_vm1, %v13142_v50  ;;  %9443 = vmatmul.mubr.msk.f32.gmra.mxu0 %vm1254_vm1, %v13149_v35  ;;  %v529_v13 = vunpack.c.3.s8 %v13001_v26 }
 0x363   : > { %v13153_v4 = vadd.f32 %v8424_v34, %v7391_v53  ;;  %v13155_v18 = vadd.f32 %v7906_v38, %v6881_v39  ;;  %v7454_v5 = vmax.f32 %v4693_v40, 0.0  ;;  %v6944_v63 = vmax.f32 %v4806_v15, 0.0  ;;  %5663 = vmatprep.mubr.f32.mxu1 %v9776_v0  ;;  %5776 = vmatprep.mubr.f32.mxu0 %v9776_v0  ;;  %v13189_v38 = vld [vmem:[%s14378_s1 + $0x70] sm:$0xff] }
 0x364   : > { %v4695_v25 = vpop.f32.mrf.mxu1  ;;  %v4808_v54 = vpop.f32.mrf.mxu0  ;;  %6035 = vmatpush1.msra.mxu0 %v974_v2 }
 0x365   : > { %v8489_v21 = vadd.f32 %v13008_v8, %v7454_v5  ;;  %v7971_v49 = vadd.f32 %v13010_v44, %v6944_v63  ;;  %v7455_v61 = vmax.f32 %v4695_v25, 0.0  ;;  %v6945_v46 = vmax.f32 %v4808_v54, 0.0  ;;  %9509 = vmatprep.subr.msk.mxu0 %vm1303_vm0, %v1235_v23  ;;  %v13172_v8 = vld [vmem:[%s14378_s1 + $0x28] sm:$0xff] }
 0x366   : > { %v4699_v42 = vpop.f32.mrf.mxu1  ;;  %v4812_v20 = vpop.f32.mrf.mxu0  ;;  %9434 = vmatmul.mubr.msk.f32.gmra.mxu1 %vm1254_vm1, %v13165_v37  ;;  %9444 = vmatmul.mubr.msk.f32.gmra.mxu0 %vm1254_vm1, %v13172_v8  ;;  %v912_v5 = vand.u32 255, %v592_v55  ;;  %v849_v63 = vand.u32 255, %v529_v13  ;;  %v528_v25 = vunpack.c.2.s8 %v13001_v26  ;;  %v465_v54 = vunpack.c.3.s8 %v13019_v58 }
 0x367   : > { %v13176_v44 = vadd.f32 %v8489_v21, %v7455_v61  ;;  %v13178_v52 = vadd.f32 %v7971_v49, %v6945_v46  ;;  %v7518_v60 = vmax.f32 %v4699_v42, 0.0  ;;  %v7008_v24 = vmax.f32 %v4812_v20, 0.0  ;;  %5669 = vmatprep.mubr.f32.mxu1 %v9776_v0  ;;  %5782 = vmatprep.mubr.f32.mxu0 %v9776_v0 }
 0x368   : > { %v4701_v48 = vpop.f32.mrf.mxu1  ;;  %v4814_v29 = vpop.f32.mrf.mxu0  ;;  %v401_v26 = vunpack.c.3.s8 %v13032_v16  ;;  %v1232_v13 = vcvt.s32.f32 %v912_v5 }
 0x369   : > { %v8554_v14 = vadd.f32 %v13025_v32, %v7518_v60  ;;  %v8036_v45 = vadd.f32 %v13027_v30, %v7008_v24  ;;  %v7519_v9 = vmax.f32 %v4701_v48, 0.0  ;;  %v7009_v2 = vmax.f32 %v4814_v29, 0.0 }
 0x36a   : > { %v4705_v23 = vpop.f32.mrf.mxu1  ;;  %v4818_v34 = vpop.f32.mrf.mxu0  ;;  %9435 = vmatmul.mubr.msk.f32.gmra.mxu1 %vm1254_vm1, %v13189_v38  ;;  %9445 = vmatmul.mubr.msk.f32.gmra.mxu0 %vm1254_vm1, %v13196_v62  ;;  %v464_v60 = vunpack.c.2.s8 %v13019_v58 }
 0x36b   : > { %v13200_v32 = vadd.f32 %v8554_v14, %v7519_v9  ;;  %v13202_v30 = vadd.f32 %v8036_v45, %v7009_v2  ;;  %v7582_v53 = vmax.f32 %v4705_v23, 0.0  ;;  %v7072_v39 = vmax.f32 %v4818_v34, 0.0  ;;  %5675 = vmatprep.mubr.f32.mxu1 %v9776_v0  ;;  %5788 = vmatprep.mubr.f32.mxu0 %v9776_v0 }
 0x36c   : > { %v4707_v40 = vpop.f32.mrf.mxu1  ;;  %v4820_v15 = vpop.f32.mrf.mxu0  ;;  %v1169_v14 = vcvt.s32.f32 %v849_v63  ;;  %v848_v45 = vand.u32 255, %v528_v25 }
 0x36d   : > { %v8619_v21 = vadd.f32 %v13049_v17, %v7582_v53  ;;  %v8101_v49 = vadd.f32 %v13051_v27, %v7072_v39  ;;  %v7583_v61 = vmax.f32 %v4707_v40, 0.0  ;;  %v7073_v46 = vmax.f32 %v4820_v15, 0.0 }
 0x36e   : > { %v4711_v42 = vpop.f32.mrf.mxu1  ;;  %v4824_v20 = vpop.f32.mrf.mxu0  ;;  %9436 = vmatmul.mubr.msk.f32.gmra.mxu1 %vm1254_vm1, %v13041_v47  ;;  %9446 = vmatmul.mubr.msk.f32.gmra.mxu0 %vm1254_vm1, %v12781_v56  ;;  %v785_v56 = vand.u32 255, %v465_v54  ;;  %v784_v39 = vand.u32 255, %v464_v60  ;;  %v13228_v40 = vand.u32 255, %v401_v26 }
 0x36f   : > { %v13216_v24 = vadd.f32 %v8619_v21, %v7583_v61  ;;  %v13218_v48 = vadd.f32 %v8101_v49, %v7073_v46  ;;  %v7646_v17 = vmax.f32 %v4711_v42, 0.0  ;;  %v7136_v27 = vmax.f32 %v4824_v20, 0.0  ;;  %5794 = vmatprep.mubr.f32.mxu0 %v9776_v0  ;;  %5907 = vmatprep.mubr.f32.mxu1 %v9776_v0 }
 0x370   : > { %v4713_v29 = vpop.f32.mrf.mxu1  ;;  %v4826_v55 = vpop.f32.mrf.mxu0  ;;  %v1105_v54 = vcvt.s32.f32 %v785_v56  ;;  %v400_v21 = vunpack.c.2.s8 %v13032_v16  ;;  %v337_v49 = vunpack.c.3.s8 %v13058_v31  ;;  %v1041_v16 = vcvt.s32.f32 %v13228_v40 }
 0x371   : > { %v8684_v58 = vadd.f32 %v13071_v51, %v7646_v17  ;;  %v8166_v9 = vadd.f32 %v13073_v3, %v7136_v27  ;;  %v7647_v2 = vmax.f32 %v4713_v29, 0.0  ;;  %v7137_v23 = vmax.f32 %v4826_v55, 0.0 }
 0x372   : > { %v4830_v34 = vpop.f32.mrf.mxu0  ;;  %v4943_v53 = vpop.f32.mrf.mxu1  ;;  %9447 = vmatmul.mubr.msk.f32.gmra.mxu0 %vm1254_vm1, %v12801_v43  ;;  %9457 = vmatmul.mubr.msk.f32.vlgmr.msra.gmra.mxu1 %vm1254_vm1, %v13065_v36  ;;  %v1168_v43 = vcvt.s32.f32 %v848_v45  ;;  %v1104_v17 = vcvt.s32.f32 %v784_v39  ;;  %v336_v45 = vunpack.c.2.s8 %v13058_v31  ;;  %v597_v56 = vunpack.c.3.s8 %v13083_v41 }
 0x373   : > { %v13230_v15 = vadd.f32 %v8684_v58, %v7647_v2  ;;  %v13232_v5 = vadd.f32 %v8166_v9, %v7137_v23  ;;  %v7200_v51 = vmax.f32 %v4830_v34, 0.0  ;;  %v6690_v63 = vmax.f32 %v4943_v53, 0.0  ;;  %5800 = vmatprep.mubr.f32.mxu0 %v9776_v0  ;;  %5913 = vmatprep.mubr.f32.mxu1 %v9776_v0 }
 0x374   : > { %v4832_v3 = vpop.f32.mrf.mxu0  ;;  %v4945_v25 = vpop.f32.mrf.mxu1  ;;  %9492 = vmatpush1.msk.msra.mxu1 %vm1303_vm0, %v1232_v13 }
 0x375   : > { %v8231_v61 = vadd.f32 %v13095_v59, %v7200_v51  ;;  %v7713_v46 = vadd.f32 %v13097_v10, %v6690_v63  ;;  %v7201_v42 = vmax.f32 %v4832_v3, 0.0  ;;  %v6691_v20 = vmax.f32 %v4945_v25, 0.0  ;;  %6189 = vmatprep.subr.mxu1 %v1169_v14 }
 0x376   : > { %v4836_v60 = vpop.f32.mrf.mxu0  ;;  %v4949_v26 = vpop.f32.mrf.mxu1  ;;  %9448 = vmatmul.mubr.msk.f32.gmra.mxu0 %vm1254_vm1, %v12826_v33  ;;  %9458 = vmatmul.mubr.msk.f32.gmra.mxu1 %vm1254_vm1, %v13090_v22  ;;  %v720_v33 = vand.u32 255, %v400_v21  ;;  %v657_v14 = vand.u32 255, %v337_v49  ;;  %v656_v25 = vand.u32 255, %v336_v45 }
 0x377   : > { %v13246_v27 = vadd.f32 %v8231_v61, %v7201_v42  ;;  %v13248_v29 = vadd.f32 %v7713_v46, %v6691_v20  ;;  %v7264_v59 = vmax.f32 %v4836_v60, 0.0  ;;  %v6754_v10 = vmax.f32 %v4949_v26, 0.0  ;;  %5806 = vmatprep.mubr.f32.mxu0 %v9776_v0  ;;  %5919 = vmatprep.mubr.f32.mxu1 %v9776_v0 }
 0x378   : > { %v4838_v55 = vpop.f32.mrf.mxu0  ;;  %v4951_v13 = vpop.f32.mrf.mxu1  ;;  %6190 = vmatpush1.msra.mxu1 %v1168_v43  ;;  %v1040_v63 = vcvt.s32.f32 %v720_v33  ;;  %v977_v3 = vcvt.s32.f32 %v657_v14 }
 0x379   : > { %v8296_v58 = vadd.f32 %v13114_v28, %v7264_v59  ;;  %v7778_v9 = vadd.f32 %v13116_v57, %v6754_v10  ;;  %v7265_v2 = vmax.f32 %v4838_v55, 0.0  ;;  %v6755_v23 = vmax.f32 %v4951_v13, 0.0  ;;  %6191 = vmatprep.subr.mxu1 %v1105_v54 }
 0x37a   : > { %v4842_v34 = vpop.f32.mrf.mxu0  ;;  %v4955_v53 = vpop.f32.mrf.mxu1  ;;  %9449 = vmatmul.mubr.msk.f32.gmra.mxu0 %vm1254_vm1, %v12846_v12  ;;  %9459 = vmatmul.mubr.msk.f32.gmra.mxu1 %vm1254_vm1, %v13110_v11  ;;  %v917_v12 = vand.u32 255, %v597_v56 }
 0x37b   : > { %v13260_v39 = vadd.f32 %v8296_v58, %v7265_v2  ;;  %v13262_v31 = vadd.f32 %v7778_v9, %v6755_v23  ;;  %v7328_v40 = vmax.f32 %v4842_v34, 0.0  ;;  %v6818_v51 = vmax.f32 %v4955_v53, 0.0  ;;  %5812 = vmatprep.mubr.f32.mxu0 %v9776_v0  ;;  %5925 = vmatprep.mubr.f32.mxu1 %v9776_v0  ;;  %v13293_v53 = vld [vmem:[%s9818_s20 + $0x1f8] sm:$0xff] }
 0x37c   : > { %v4844_v28 = vpop.f32.mrf.mxu0  ;;  %v4957_v57 = vpop.f32.mrf.mxu1  ;;  %6192 = vmatpush1.msra.mxu1 %v1104_v17  ;;  %v976_v17 = vcvt.s32.f32 %v656_v25  ;;  %v594_v25 = vunpack.c.0.s8 %v13083_v41 }
 0x37d   : > { %v8361_v43 = vadd.f32 %v13131_v7, %v7328_v40  ;;  %v7843_v54 = vadd.f32 %v13133_v19, %v6818_v51  ;;  %v7329_v21 = vmax.f32 %v4844_v28, 0.0  ;;  %v6819_v49 = vmax.f32 %v4957_v57, 0.0  ;;  %6193 = vmatprep.subr.mxu1 %v1041_v16 }
 0x37e   : > { %v4848_v61 = vpop.f32.mrf.mxu0  ;;  %v4961_v46 = vpop.f32.mrf.mxu1  ;;  %9450 = vmatmul.mubr.msk.f32.gmra.mxu0 %vm1254_vm1, %v12863_v6  ;;  %9460 = vmatmul.mubr.msk.f32.gmra.mxu1 %vm1254_vm1, %v13127_v1  ;;  %v1237_v16 = vcvt.s32.f32 %v917_v12  ;;  %v531_v12 = vunpack.c.1.s8 %v13293_v53 }
 0x37f   : > { %v13272_v42 = vadd.f32 %v8361_v43, %v7329_v21  ;;  %v13274_v20 = vadd.f32 %v7843_v54, %v6819_v49  ;;  %v7392_v60 = vmax.f32 %v4848_v61, 0.0  ;;  %v6882_v26 = vmax.f32 %v4961_v46, 0.0  ;;  %5818 = vmatprep.mubr.f32.mxu0 %v9776_v0  ;;  %5931 = vmatprep.mubr.f32.mxu1 %v9776_v0  ;;  %v13311_v61 = vld [vmem:[%s9818_s20 + $0x178] sm:$0xff] }
 0x380   : > { %v4850_v7 = vpop.f32.mrf.mxu0  ;;  %v4963_v19 = vpop.f32.mrf.mxu1  ;;  %6194 = vmatpush1.msra.mxu1 %v1040_v63 }
 0x381   : > { %v8426_v6 = vadd.f32 %v13153_v4, %v7392_v60  ;;  %v7908_v59 = vadd.f32 %v13155_v18, %v6882_v26  ;;  %v7393_v10 = vmax.f32 %v4850_v7, 0.0  ;;  %v6883_v55 = vmax.f32 %v4963_v19, 0.0  ;;  %6195 = vmatprep.subr.mxu1 %v977_v3 }
 0x382   : > { %v4854_v13 = vpop.f32.mrf.mxu0  ;;  %v4967_v33 = vpop.f32.mrf.mxu1  ;;  %9451 = vmatmul.mubr.msk.f32.gmra.mxu0 %vm1254_vm1, %v13142_v50  ;;  %9461 = vmatmul.mubr.msk.f32.gmra.mxu1 %vm1254_vm1, %v13149_v35  ;;  %v530_v26 = vunpack.c.0.s8 %v13293_v53 }
 0x383   : > { %v13284_v14 = vadd.f32 %v8426_v6, %v7393_v10  ;;  %v13286_v45 = vadd.f32 %v7908_v59, %v6883_v55  ;;  %v7456_v56 = vmax.f32 %v4854_v13, 0.0  ;;  %v6946_v4 = vmax.f32 %v4967_v33, 0.0  ;;  %5824 = vmatprep.mubr.f32.mxu0 %v9776_v0  ;;  %5937 = vmatprep.mubr.f32.mxu1 %v9776_v0 }
 0x384   : > { %v4856_v18 = vpop.f32.mrf.mxu0  ;;  %v4969_v58 = vpop.f32.mrf.mxu1  ;;  %6196 = vmatpush1.msra.mxu1 %v976_v17  ;;  %v914_v6 = vand.u32 255, %v594_v25  ;;  %v851_v59 = vand.u32 255, %v531_v12  ;;  %v467_v10 = vunpack.c.1.s8 %v13311_v61 }
 0x385   : > { %v8491_v9 = vadd.f32 %v13176_v44, %v7456_v56  ;;  %v7973_v2 = vadd.f32 %v13178_v52, %v6946_v4  ;;  %v7457_v23 = vmax.f32 %v4856_v18, 0.0  ;;  %v6947_v34 = vmax.f32 %v4969_v58, 0.0  ;;  %9527 = vmatprep.subr.msk.mxu1 %vm1303_vm0, %v1237_v16  ;;  %v13328_v4 = vld [vmem:[%s9818_s20 + $0xf8] sm:$0xff] }
 0x386   : > { %v4860_v40 = vpop.f32.mrf.mxu0  ;;  %v4973_v51 = vpop.f32.mrf.mxu1  ;;  %9452 = vmatmul.mubr.msk.f32.gmra.mxu0 %vm1254_vm1, %v13165_v37  ;;  %9462 = vmatmul.mubr.msk.f32.gmra.mxu1 %vm1254_vm1, %v13172_v8  ;;  %v403_v25 = vunpack.c.1.s8 %v13328_v4 }
 0x387   : > { %v13300_v28 = vadd.f32 %v8491_v9, %v7457_v23  ;;  %v13302_v44 = vadd.f32 %v7973_v2, %v6947_v34  ;;  %v7520_v52 = vmax.f32 %v4860_v40, 0.0  ;;  %v7010_v57 = vmax.f32 %v4973_v51, 0.0  ;;  %5830 = vmatprep.mubr.f32.mxu0 %v9776_v0  ;;  %5943 = vmatprep.mubr.f32.mxu1 %v9776_v0  ;;  %v13335_v9 = vld [vmem:[%s14378_s1 + $0x38] sm:$0xff] }
 0x388   : > { %v4862_v63 = vpop.f32.mrf.mxu0  ;;  %v4975_v3 = vpop.f32.mrf.mxu1 }
 0x389   : > { %v8556_v43 = vadd.f32 %v13200_v32, %v7520_v52  ;;  %v8038_v54 = vadd.f32 %v13202_v30, %v7010_v57  ;;  %v7521_v21 = vmax.f32 %v4862_v63, 0.0  ;;  %v7011_v49 = vmax.f32 %v4975_v3, 0.0 }
 0x38a   : > { %v4866_v46 = vpop.f32.mrf.mxu0  ;;  %v4979_v60 = vpop.f32.mrf.mxu1  ;;  %9453 = vmatmul.mubr.msk.f32.gmra.mxu0 %vm1254_vm1, %v13189_v38  ;;  %9463 = vmatmul.mubr.msk.f32.gmra.mxu1 %vm1254_vm1, %v13196_v62  ;;  %v1234_v57 = vcvt.s32.f32 %v914_v6  ;;  %v1171_v63 = vcvt.s32.f32 %v851_v59  ;;  %v787_v3 = vand.u32 255, %v467_v10 }
 0x38b   : > { %v13318_v7 = vadd.f32 %v8556_v43, %v7521_v21  ;;  %v13320_v32 = vadd.f32 %v8038_v54, %v7011_v49  ;;  %v7584_v30 = vmax.f32 %v4866_v46, 0.0  ;;  %v7074_v19 = vmax.f32 %v4979_v60, 0.0  ;;  %5836 = vmatprep.mubr.f32.mxu0 %v9776_v0  ;;  %5949 = vmatprep.mubr.f32.mxu1 %v9776_v0  ;;  %v13350_v49 = vld [vmem:[%s9818_s20 + $0x78] sm:$0xff] }
 0x38c   : > { %v4868_v17 = vpop.f32.mrf.mxu0  ;;  %v4981_v16 = vpop.f32.mrf.mxu1  ;;  %v1107_v10 = vcvt.s32.f32 %v787_v3 }
 0x38d   : > { %v8621_v55 = vadd.f32 %v13216_v24, %v7584_v30  ;;  %v8103_v13 = vadd.f32 %v13218_v48, %v7074_v19  ;;  %v7585_v33 = vmax.f32 %v4868_v17, 0.0  ;;  %v7075_v56 = vmax.f32 %v4981_v16, 0.0 }
 0x38e   : > { %v4872_v18 = vpop.f32.mrf.mxu0  ;;  %v4985_v58 = vpop.f32.mrf.mxu1  ;;  %9454 = vmatmul.mubr.msk.f32.gmra.mxu0 %vm1254_vm1, %v13041_v47  ;;  %9464 = vmatmul.mubr.msk.f32.gmra.mxu1 %vm1254_vm1, %v13335_v9  ;;  %v850_v24 = vand.u32 255, %v530_v26  ;;  %v466_v48 = vunpack.c.0.s8 %v13311_v61  ;;  %v13355_v26 = vld [vmem:[%s14378_s1 + $0x40] sm:$0xff] }
 0x38f   : > { %v13340_v2 = vadd.f32 %v8621_v55, %v7585_v33  ;;  %v13342_v23 = vadd.f32 %v8103_v13, %v7075_v56  ;;  %v7648_v34 = vmax.f32 %v4872_v18, 0.0  ;;  %v7138_v40 = vmax.f32 %v4985_v58, 0.0  ;;  %5955 = vmatprep.mubr.f32.mxu1 %v9776_v0  ;;  %6068 = vmatprep.mubr.f32.mxu0 %v9776_v0 }
 0x390   : > { %v4874_v51 = vpop.f32.mrf.mxu0  ;;  %v4987_v52 = vpop.f32.mrf.mxu1  ;;  %v786_v30 = vand.u32 255, %v466_v48  ;;  %v723_v55 = vand.u32 255, %v403_v25  ;;  %v402_v13 = vunpack.c.0.s8 %v13328_v4  ;;  %v339_v33 = vunpack.c.1.s8 %v13350_v49 }
 0x391   : > { %v8686_v12 = vadd.f32 %v13230_v15, %v7648_v34  ;;  %v8168_v43 = vadd.f32 %v13232_v5, %v7138_v40  ;;  %v7649_v54 = vmax.f32 %v4874_v51, 0.0  ;;  %v7139_v21 = vmax.f32 %v4987_v52, 0.0  ;;  %v13375_v40 = vld [vmem:[%s14378_s1 + $0x48] sm:$0xff] }
 0x392   : > { %v4991_v46 = vpop.f32.mrf.mxu1  ;;  %v5104_v60 = vpop.f32.mrf.mxu0  ;;  %9465 = vmatmul.mubr.msk.f32.gmra.mxu1 %vm1254_vm1, %v13355_v26  ;;  %9475 = vmatmul.mubr.msk.f32.vlgmr.msra.gmra.mxu0 %vm1254_vm1, %v13065_v36  ;;  %v1170_v15 = vcvt.s32.f32 %v850_v24  ;;  %v1106_v51 = vcvt.s32.f32 %v786_v30  ;;  %v1043_v25 = vcvt.s32.f32 %v723_v55 }
 0x393   : > { %v13361_v5 = vadd.f32 %v8686_v12, %v7649_v54  ;;  %v13363_v19 = vadd.f32 %v8168_v43, %v7139_v21  ;;  %v7202_v17 = vmax.f32 %v4991_v46, 0.0  ;;  %v6692_v16 = vmax.f32 %v5104_v60, 0.0  ;;  %5961 = vmatprep.mubr.f32.mxu1 %v9776_v0  ;;  %6074 = vmatprep.mubr.f32.mxu0 %v9776_v0 }
 0x394   : > { %v4993_v6 = vpop.f32.mrf.mxu1  ;;  %v5106_v59 = vpop.f32.mrf.mxu0  ;;  %9510 = vmatpush1.msk.msra.mxu0 %vm1303_vm0, %v1234_v57  ;;  %v722_v12 = vand.u32 255, %v402_v13  ;;  %v659_v43 = vand.u32 255, %v339_v33  ;;  %v338_v54 = vunpack.c.0.s8 %v13350_v49 }
 0x395   : > { %v8233_v56 = vadd.f32 %v13246_v27, %v7202_v17  ;;  %v7715_v18 = vadd.f32 %v13248_v29, %v6692_v16  ;;  %v7203_v58 = vmax.f32 %v4993_v6, 0.0  ;;  %v6693_v24 = vmax.f32 %v5106_v59, 0.0  ;;  %6350 = vmatprep.subr.mxu0 %v1171_v63  ;;  %v13393_v6 = vld [vmem:[%s14378_s1 + $0x50] sm:$0xff] }
 0x396   : > { %v4997_v48 = vpop.f32.mrf.mxu1  ;;  %v5110_v34 = vpop.f32.mrf.mxu0  ;;  %9466 = vmatmul.mubr.msk.f32.gmra.mxu1 %vm1254_vm1, %v13375_v40  ;;  %9476 = vmatmul.mubr.msk.f32.gmra.mxu0 %vm1254_vm1, %v13090_v22  ;;  %v1042_v13 = vcvt.s32.f32 %v722_v12  ;;  %v979_v33 = vcvt.s32.f32 %v659_v43 }
 0x397   : > { %v13381_v27 = vadd.f32 %v8233_v56, %v7203_v58  ;;  %v13383_v29 = vadd.f32 %v7715_v18, %v6693_v24  ;;  %v7266_v52 = vmax.f32 %v4997_v48, 0.0  ;;  %v6756_v57 = vmax.f32 %v5110_v34, 0.0  ;;  %5967 = vmatprep.mubr.f32.mxu1 %v9776_v0  ;;  %6080 = vmatprep.mubr.f32.mxu0 %v9776_v0 }
 0x398   : > { %v4999_v63 = vpop.f32.mrf.mxu1  ;;  %v5112_v3 = vpop.f32.mrf.mxu0  ;;  %6351 = vmatpush1.msra.mxu0 %v1170_v15  ;;  %v658_v56 = vand.u32 255, %v338_v54 }
 0x399   : > { %v8298_v21 = vadd.f32 %v13260_v39, %v7266_v52  ;;  %v7780_v46 = vadd.f32 %v13262_v31, %v6756_v57  ;;  %v7267_v60 = vmax.f32 %v4999_v63, 0.0  ;;  %v6757_v30 = vmax.f32 %v5112_v3, 0.0  ;;  %6352 = vmatprep.subr.mxu0 %v1107_v10  ;;  %v13410_v57 = vld [vmem:[%s14378_s1 + $0x58] sm:$0xff] }
 0x39a   : > { %v5003_v17 = vpop.f32.mrf.mxu1  ;;  %v5116_v16 = vpop.f32.mrf.mxu0  ;;  %9467 = vmatmul.mubr.msk.f32.gmra.mxu1 %vm1254_vm1, %v13393_v6  ;;  %9477 = vmatmul.mubr.msk.f32.gmra.mxu0 %vm1254_vm1, %v13110_v11  ;;  %v978_v12 = vcvt.s32.f32 %v658_v56 }
 0x39b   : > { %v13399_v15 = vadd.f32 %v8298_v21, %v7267_v60  ;;  %v13401_v39 = vadd.f32 %v7780_v46, %v6757_v30  ;;  %v7330_v31 = vmax.f32 %v5003_v17, 0.0  ;;  %v6820_v59 = vmax.f32 %v5116_v16, 0.0  ;;  %5973 = vmatprep.mubr.f32.mxu1 %v9776_v0  ;;  %6086 = vmatprep.mubr.f32.mxu0 %v9776_v0 }
 0x39c   : > { %v5005_v10 = vpop.f32.mrf.mxu1  ;;  %v5118_v55 = vpop.f32.mrf.mxu0  ;;  %6353 = vmatpush1.msra.mxu0 %v1106_v51 }
 0x39d   : > { %v8363_v18 = vadd.f32 %v13272_v42, %v7330_v31  ;;  %v7845_v58 = vadd.f32 %v13274_v20, %v6820_v59  ;;  %v7331_v24 = vmax.f32 %v5005_v10, 0.0  ;;  %v6821_v48 = vmax.f32 %v5118_v55, 0.0  ;;  %6354 = vmatprep.subr.mxu0 %v1043_v25 }
 0x39e   : > { %v5009_v34 = vpop.f32.mrf.mxu1  ;;  %v5122_v52 = vpop.f32.mrf.mxu0  ;;  %9468 = vmatmul.mubr.msk.f32.gmra.mxu1 %vm1254_vm1, %v13410_v57  ;;  %9478 = vmatmul.mubr.msk.f32.gmra.mxu0 %vm1254_vm1, %v13127_v1 }
 0x39f   : > { %v13416_v51 = vadd.f32 %v8363_v18, %v7331_v24  ;;  %v13418_v42 = vadd.f32 %v7845_v58, %v6821_v48  ;;  %v7394_v20 = vmax.f32 %v5009_v34, 0.0  ;;  %v6884_v63 = vmax.f32 %v5122_v52, 0.0  ;;  %5979 = vmatprep.mubr.f32.mxu1 %v9776_v0  ;;  %6092 = vmatprep.mubr.f32.mxu0 %v9776_v0 }
 0x3a0   : > { %v5011_v3 = vpop.f32.mrf.mxu1  ;;  %v5124_v25 = vpop.f32.mrf.mxu0  ;;  %6355 = vmatpush1.msra.mxu0 %v1042_v13  ;;  %v596_v52 = vunpack.c.2.s8 %v13083_v41 }
 0x3a1   : > { %v8428_v43 = vadd.f32 %v13284_v14, %v7394_v20  ;;  %v7910_v54 = vadd.f32 %v13286_v45, %v6884_v63  ;;  %v7395_v21 = vmax.f32 %v5011_v3, 0.0  ;;  %v6885_v46 = vmax.f32 %v5124_v25, 0.0  ;;  %6356 = vmatprep.subr.mxu0 %v979_v33 }
 0x3a2   : > { %v5015_v60 = vpop.f32.mrf.mxu1  ;;  %v5128_v30 = vpop.f32.mrf.mxu0  ;;  %9469 = vmatmul.mubr.msk.f32.gmra.mxu1 %vm1254_vm1, %v13142_v50  ;;  %9479 = vmatmul.mubr.msk.f32.gmra.mxu0 %vm1254_vm1, %v13149_v35  ;;  %v533_v20 = vunpack.c.3.s8 %v13293_v53 }
 0x3a3   : > { %v13428_v17 = vadd.f32 %v8428_v43, %v7395_v21  ;;  %v13430_v16 = vadd.f32 %v7910_v54, %v6885_v46  ;;  %v7458_v31 = vmax.f32 %v5015_v60, 0.0  ;;  %v6948_v59 = vmax.f32 %v5128_v30, 0.0  ;;  %5985 = vmatprep.mubr.f32.mxu1 %v9776_v0  ;;  %6098 = vmatprep.mubr.f32.mxu0 %v9776_v0 }
 0x3a4   : > { %v5017_v14 = vpop.f32.mrf.mxu1  ;;  %v5130_v45 = vpop.f32.mrf.mxu0  ;;  %6357 = vmatpush1.msra.mxu0 %v978_v12  ;;  %v532_v21 = vunpack.c.2.s8 %v13293_v53 }
 0x3a5   : > { %v8493_v10 = vadd.f32 %v13300_v28, %v7458_v31  ;;  %v7975_v55 = vadd.f32 %v13302_v44, %v6948_v59  ;;  %v7459_v13 = vmax.f32 %v5017_v14, 0.0  ;;  %v6949_v33 = vmax.f32 %v5130_v45, 0.0 }
 0x3a6   : > { %v5021_v56 = vpop.f32.mrf.mxu1  ;;  %v5134_v18 = vpop.f32.mrf.mxu0  ;;  %9470 = vmatmul.mubr.msk.f32.gmra.mxu1 %vm1254_vm1, %v13165_v37  ;;  %9480 = vmatmul.mubr.msk.f32.gmra.mxu0 %vm1254_vm1, %v13172_v8  ;;  %v916_v31 = vand.u32 255, %v596_v52  ;;  %v853_v59 = vand.u32 255, %v533_v20  ;;  %v469_v14 = vunpack.c.3.s8 %v13311_v61 }
 0x3a7   : > { %v13440_v58 = vadd.f32 %v8493_v10, %v7459_v13  ;;  %v13442_v24 = vadd.f32 %v7975_v55, %v6949_v33  ;;  %v7522_v48 = vmax.f32 %v5021_v56, 0.0  ;;  %v7012_v34 = vmax.f32 %v5134_v18, 0.0  ;;  %5991 = vmatprep.mubr.f32.mxu1 %v9776_v0  ;;  %6104 = vmatprep.mubr.f32.mxu0 %v9776_v0 }
 0x3a8   : > { %v5023_v28 = vpop.f32.mrf.mxu1  ;;  %v5136_v44 = vpop.f32.mrf.mxu0  ;;  %v852_v56 = vand.u32 255, %v532_v21  ;;  %v468_v18 = vunpack.c.2.s8 %v13311_v61  ;;  %v1236_v52 = vcvt.s32.f32 %v916_v31  ;;  %v789_v20 = vand.u32 255, %v469_v14 }
 0x3a9   : > { %v8558_v63 = vadd.f32 %v13318_v7, %v7522_v48  ;;  %v8040_v3 = vadd.f32 %v13320_v32, %v7012_v34  ;;  %v7523_v25 = vmax.f32 %v5023_v28, 0.0  ;;  %v7013_v12 = vmax.f32 %v5136_v44, 0.0 }
 0x3aa   : > { %v5027_v43 = vpop.f32.mrf.mxu1  ;;  %v5140_v54 = vpop.f32.mrf.mxu0  ;;  %9471 = vmatmul.mubr.msk.f32.gmra.mxu1 %vm1254_vm1, %v13189_v38  ;;  %9481 = vmatmul.mubr.msk.f32.gmra.mxu0 %vm1254_vm1, %v13196_v62  ;;  %v1172_v21 = vcvt.s32.f32 %v852_v56 }
 0x3ab   : > { %v13455_v46 = vadd.f32 %v8558_v63, %v7523_v25  ;;  %v13457_v41 = vadd.f32 %v8040_v3, %v7013_v12  ;;  %v7586_v60 = vmax.f32 %v5027_v43, 0.0  ;;  %v7076_v7 = vmax.f32 %v5140_v54, 0.0  ;;  %5997 = vmatprep.mubr.f32.mxu1 %v9776_v0  ;;  %6110 = vmatprep.mubr.f32.mxu0 %v9776_v0 }
 0x3ac   : > { %v5029_v32 = vpop.f32.mrf.mxu1  ;;  %v5142_v30 = vpop.f32.mrf.mxu0  ;;  %v405_v63 = vunpack.c.3.s8 %v13328_v4 }
 0x3ad   : > { %v8623_v45 = vadd.f32 %v13340_v2, %v7586_v60  ;;  %v8105_v53 = vadd.f32 %v13342_v23, %v7076_v7  ;;  %v7587_v10 = vmax.f32 %v5029_v32, 0.0  ;;  %v7077_v55 = vmax.f32 %v5142_v30, 0.0 }
 0x3ae   : > { %v5033_v13 = vpop.f32.mrf.mxu1  ;;  %v5146_v33 = vpop.f32.mrf.mxu0  ;;  %9472 = vmatmul.mubr.msk.f32.gmra.mxu1 %vm1254_vm1, %v13041_v47  ;;  %9482 = vmatmul.mubr.msk.f32.gmra.mxu0 %vm1254_vm1, %v13335_v9  ;;  %v1173_v47 = vcvt.s32.f32 %v853_v59  ;;  %v788_v60 = vand.u32 255, %v468_v18  ;;  %v1109_v59 = vcvt.s32.f32 %v789_v20  ;;  %v725_v14 = vand.u32 255, %v405_v63 }
 0x3af   : > { %v13469_v48 = vadd.f32 %v8623_v45, %v7587_v10  ;;  %v13471_v34 = vadd.f32 %v8105_v53, %v7077_v55  ;;  %v7650_v2 = vmax.f32 %v5033_v13, 0.0  ;;  %v7140_v28 = vmax.f32 %v5146_v33, 0.0  ;;  %6116 = vmatprep.mubr.f32.mxu0 %v9776_v0  ;;  %6229 = vmatprep.mubr.f32.mxu1 %v9776_v0 }
 0x3b0   : > { %v5035_v23 = vpop.f32.mrf.mxu1  ;;  %v5148_v44 = vpop.f32.mrf.mxu0  ;;  %v341_v45 = vunpack.c.3.s8 %v13350_v49  ;;  %v1108_v18 = vcvt.s32.f32 %v788_v60  ;;  %v340_v20 = vunpack.c.2.s8 %v13350_v49 }
 0x3b1   : > { %v8688_v3 = vadd.f32 %v13361_v5, %v7650_v2  ;;  %v8170_v61 = vadd.f32 %v13363_v19, %v7140_v28  ;;  %v7651_v25 = vmax.f32 %v5035_v23, 0.0  ;;  %v7141_v12 = vmax.f32 %v5148_v44, 0.0 }
 0x3b2   : > { %v5152_v43 = vpop.f32.mrf.mxu0  ;;  %v5265_v54 = vpop.f32.mrf.mxu1  ;;  %9483 = vmatmul.mubr.msk.f32.gmra.mxu0 %vm1254_vm1, %v13355_v26  ;;  %9493 = vmatmul.mubr.msk.f32.vlgmr.msra.gmra.mxu1 %vm1254_vm1, %v13065_v36  ;;  %v404_v36 = vunpack.c.2.s8 %v13328_v4  ;;  %v1045_v44 = vcvt.s32.f32 %v725_v14 }
 0x3b3   : > { %v13482_v7 = vadd.f32 %v8688_v3, %v7651_v25  ;;  %v13484_v32 = vadd.f32 %v8170_v61, %v7141_v12  ;;  %v7204_v30 = vmax.f32 %v5152_v43, 0.0  ;;  %v6694_v5 = vmax.f32 %v5265_v54, 0.0  ;;  %6122 = vmatprep.mubr.f32.mxu0 %v9776_v0  ;;  %6235 = vmatprep.mubr.f32.mxu1 %v9776_v0 }
 0x3b4   : > { %v5154_v19 = vpop.f32.mrf.mxu0  ;;  %v5267_v31 = vpop.f32.mrf.mxu1  ;;  %9528 = vmatpush1.msk.msra.mxu1 %vm1303_vm0, %v1236_v52  ;;  %v724_v52 = vand.u32 255, %v404_v36 }
 0x3b5   : > { %v8235_v53 = vadd.f32 %v13381_v27, %v7204_v30  ;;  %v7717_v10 = vadd.f32 %v13383_v29, %v6694_v5  ;;  %v7205_v55 = vmax.f32 %v5154_v19, 0.0  ;;  %v6695_v13 = vmax.f32 %v5267_v31, 0.0  ;;  %6511 = vmatprep.subr.mxu1 %v1173_v47 }
 0x3b6   : > { %v5158_v33 = vpop.f32.mrf.mxu0  ;;  %v5271_v56 = vpop.f32.mrf.mxu1  ;;  %9484 = vmatmul.mubr.msk.f32.gmra.mxu0 %vm1254_vm1, %v13375_v40  ;;  %9494 = vmatmul.mubr.msk.f32.gmra.mxu1 %vm1254_vm1, %v13090_v22  ;;  %v661_v47 = vand.u32 255, %v341_v45  ;;  %v1044_v60 = vcvt.s32.f32 %v724_v52  ;;  %v660_v5 = vand.u32 255, %v340_v20 }
 0x3b7   : > { %v13497_v2 = vadd.f32 %v8235_v53, %v7205_v55  ;;  %v13499_v4 = vadd.f32 %v7717_v10, %v6695_v13  ;;  %v7268_v28 = vmax.f32 %v5158_v33, 0.0  ;;  %v6758_v27 = vmax.f32 %v5271_v56, 0.0  ;;  %6128 = vmatprep.mubr.f32.mxu0 %v9776_v0  ;;  %6241 = vmatprep.mubr.f32.mxu1 %v9776_v0 }
 0x3b8   : > { %v5160_v29 = vpop.f32.mrf.mxu0  ;;  %v5273_v23 = vpop.f32.mrf.mxu1  ;;  %6512 = vmatpush1.msra.mxu1 %v1172_v21  ;;  %v981_v30 = vcvt.s32.f32 %v661_v47  ;;  %v980_v13 = vcvt.s32.f32 %v660_v5 }
 0x3b9   : > { %v8300_v22 = vadd.f32 %v13399_v15, %v7268_v28  ;;  %v7782_v63 = vadd.f32 %v13401_v39, %v6758_v27  ;;  %v7269_v3 = vmax.f32 %v5160_v29, 0.0  ;;  %v6759_v61 = vmax.f32 %v5273_v23, 0.0  ;;  %6513 = vmatprep.subr.mxu1 %v1109_v59 }
 0x3ba   : > { %v5164_v25 = vpop.f32.mrf.mxu0  ;;  %v5277_v12 = vpop.f32.mrf.mxu1  ;;  %9485 = vmatmul.mubr.msk.f32.gmra.mxu0 %vm1254_vm1, %v13393_v6  ;;  %9495 = vmatmul.mubr.msk.f32.gmra.mxu1 %vm1254_vm1, %v13110_v11 }
 0x3bb   : > { %v13510_v43 = vadd.f32 %v8300_v22, %v7269_v3  ;;  %v13512_v54 = vadd.f32 %v7782_v63, %v6759_v61  ;;  %v7332_v49 = vmax.f32 %v5164_v25, 0.0  ;;  %v6822_v21 = vmax.f32 %v5277_v12, 0.0  ;;  %6134 = vmatprep.mubr.f32.mxu0 %v9776_v0  ;;  %6247 = vmatprep.mubr.f32.mxu1 %v9776_v0 }
 0x3bc   : > { %v5166_v15 = vpop.f32.mrf.mxu0  ;;  %v5279_v39 = vpop.f32.mrf.mxu1  ;;  %6514 = vmatpush1.msra.mxu1 %v1108_v18 }
 0x3bd   : > { %v8365_v19 = vadd.f32 %v13416_v51, %v7332_v49  ;;  %v7847_v11 = vadd.f32 %v13418_v42, %v6822_v21  ;;  %v7333_v31 = vmax.f32 %v5166_v15, 0.0  ;;  %v6823_v59 = vmax.f32 %v5279_v39, 0.0  ;;  %6515 = vmatprep.subr.mxu1 %v1045_v44 }
 0x3be   : > { %v5170_v14 = vpop.f32.mrf.mxu0  ;;  %v5283_v36 = vpop.f32.mrf.mxu1  ;;  %9486 = vmatmul.mubr.msk.f32.gmra.mxu0 %vm1254_vm1, %v13410_v57  ;;  %9496 = vmatmul.mubr.msk.f32.gmra.mxu1 %vm1254_vm1, %v13127_v1 }
 0x3bf   : > { %v13522_v45 = vadd.f32 %v8365_v19, %v7333_v31  ;;  %v13524_v53 = vadd.f32 %v7847_v11, %v6823_v59  ;;  %v7396_v10 = vmax.f32 %v5170_v14, 0.0  ;;  %v6886_v55 = vmax.f32 %v5283_v36, 0.0  ;;  %6140 = vmatprep.mubr.f32.mxu0 %v9776_v0  ;;  %6253 = vmatprep.mubr.f32.mxu1 %v9776_v0  ;;  %v13569_v36 = vld [vmem:[%s14378_s1 + $0x78] sm:$0xff] }
 0x3c0   : > { %v5172_v51 = vpop.f32.mrf.mxu0  ;;  %v5285_v42 = vpop.f32.mrf.mxu1  ;;  %6516 = vmatpush1.msra.mxu1 %v1044_v60 }
 0x3c1   : > { %v8430_v33 = vadd.f32 %v13428_v17, %v7396_v10  ;;  %v7912_v56 = vadd.f32 %v13430_v16, %v6886_v55  ;;  %v7397_v18 = vmax.f32 %v5172_v51, 0.0  ;;  %v6887_v1 = vmax.f32 %v5285_v42, 0.0  ;;  %6517 = vmatprep.subr.mxu1 %v981_v30 }
 0x3c2   : > { %v5176_v28 = vpop.f32.mrf.mxu0  ;;  %v5289_v27 = vpop.f32.mrf.mxu1  ;;  %9487 = vmatmul.mubr.msk.f32.gmra.mxu0 %vm1254_vm1, %v13142_v50  ;;  %9497 = vmatmul.mubr.msk.f32.gmra.mxu1 %vm1254_vm1, %v13149_v35 }
 0x3c3   : > { %v13534_v29 = vadd.f32 %v8430_v33, %v7397_v18  ;;  %v13536_v23 = vadd.f32 %v7912_v56, %v6887_v1  ;;  %v7460_v44 = vmax.f32 %v5176_v28, 0.0  ;;  %v6950_v52 = vmax.f32 %v5289_v27, 0.0  ;;  %6146 = vmatprep.mubr.f32.mxu0 %v9776_v0  ;;  %6259 = vmatprep.mubr.f32.mxu1 %v9776_v0  ;;  %v13588_v27 = vld [vmem:[%s14378_s1] sm:$0xff] }
 0x3c4   : > { %v5178_v17 = vpop.f32.mrf.mxu0  ;;  %v5291_v16 = vpop.f32.mrf.mxu1  ;;  %6518 = vmatpush1.msra.mxu1 %v980_v13 }
 0x3c5   : > { %v8495_v47 = vadd.f32 %v13440_v58, %v7460_v44  ;;  %v7977_v50 = vadd.f32 %v13442_v24, %v6950_v52  ;;  %v7461_v20 = vmax.f32 %v5178_v17, 0.0  ;;  %v6951_v22 = vmax.f32 %v5291_v16, 0.0 }
 0x3c6   : > { %v5182_v35 = vpop.f32.mrf.mxu0  ;;  %v5295_v63 = vpop.f32.mrf.mxu1  ;;  %9488 = vmatmul.mubr.msk.f32.gmra.mxu0 %vm1254_vm1, %v13165_v37  ;;  %9498 = vmatmul.mubr.msk.f32.gmra.mxu1 %vm1254_vm1, %v13172_v8 }
 0x3c7   : > { %v13546_v3 = vadd.f32 %v8495_v47, %v7461_v20  ;;  %v13548_v61 = vadd.f32 %v7977_v50, %v6951_v22  ;;  %v7524_v25 = vmax.f32 %v5182_v35, 0.0  ;;  %v7014_v12 = vmax.f32 %v5295_v63, 0.0  ;;  %6152 = vmatprep.mubr.f32.mxu0 %v9776_v0  ;;  %6265 = vmatprep.mubr.f32.mxu1 %v9776_v0 }
 0x3c8   : > { %v5184_v58 = vpop.f32.mrf.mxu0  ;;  %v5297_v24 = vpop.f32.mrf.mxu1 }
 0x3c9   : > { %v8560_v49 = vadd.f32 %v13455_v46, %v7524_v25  ;;  %v8042_v21 = vadd.f32 %v13457_v41, %v7014_v12  ;;  %v7525_v37 = vmax.f32 %v5184_v58, 0.0  ;;  %v7015_v15 = vmax.f32 %v5297_v24, 0.0  ;;  %v13605_v25 = vld [vmem:[%s14378_s1 + $0x8] sm:$0xff] }
 0x3ca   : > { %v5188_v39 = vpop.f32.mrf.mxu0  ;;  %v5301_v8 = vpop.f32.mrf.mxu1  ;;  %9489 = vmatmul.mubr.msk.f32.gmra.mxu0 %vm1254_vm1, %v13189_v38  ;;  %9499 = vmatmul.mubr.msk.f32.gmra.mxu1 %vm1254_vm1, %v13196_v62 }
 0x3cb   : > { %v13558_v60 = vadd.f32 %v8560_v49, %v7525_v37  ;;  %v13560_v30 = vadd.f32 %v8042_v21, %v7015_v15  ;;  %v7588_v5 = vmax.f32 %v5188_v39, 0.0  ;;  %v7078_v19 = vmax.f32 %v5301_v8, 0.0  ;;  %6158 = vmatprep.mubr.f32.mxu0 %v9776_v0  ;;  %6271 = vmatprep.mubr.f32.mxu1 %v9776_v0 }
 0x3cc   : > { %v5190_v46 = vpop.f32.mrf.mxu0  ;;  %v5303_v41 = vpop.f32.mrf.mxu1 }
 0x3cd   : > { %v8625_v11 = vadd.f32 %v13469_v48, %v7588_v5  ;;  %v8107_v31 = vadd.f32 %v13471_v34, %v7078_v19  ;;  %v7589_v38 = vmax.f32 %v5190_v46, 0.0  ;;  %v7079_v59 = vmax.f32 %v5303_v41, 0.0  ;;  %v13622_v19 = vld [vmem:[%s14378_s1 + $0x10] sm:$0xff] }
 0x3ce   : > { %v5194_v14 = vpop.f32.mrf.mxu0  ;;  %v5307_v62 = vpop.f32.mrf.mxu1  ;;  %9490 = vmatmul.mubr.msk.f32.gmra.mxu0 %vm1254_vm1, %v13569_v36  ;;  %9500 = vmatmul.mubr.msk.f32.gmra.mxu1 %vm1254_vm1, %v13335_v9 }
 0x3cf   : > { %v13575_v10 = vadd.f32 %v8625_v11, %v7589_v38  ;;  %v13577_v48 = vadd.f32 %v8107_v31, %v7079_v59  ;;  %v7652_v34 = vmax.f32 %v5194_v14, 0.0  ;;  %v7142_v55 = vmax.f32 %v5307_v62, 0.0  ;;  %6277 = vmatprep.mubr.f32.mxu1 %v9776_v0  ;;  %6390 = vmatprep.mubr.f32.mxu0 %v9776_v0 }
 0x3d0   : > { %v5196_v51 = vpop.f32.mrf.mxu0  ;;  %v5309_v42 = vpop.f32.mrf.mxu1 }
 0x3d1   : > { %v8690_v13 = vadd.f32 %v13482_v7, %v7652_v34  ;;  %v8172_v33 = vadd.f32 %v13484_v32, %v7142_v55  ;;  %v7653_v56 = vmax.f32 %v5196_v51, 0.0  ;;  %v7143_v18 = vmax.f32 %v5309_v42, 0.0  ;;  %v13639_v51 = vld [vmem:[%s14378_s1 + $0x18] sm:$0xff] }
 0x3d2   : > { %v5313_v1 = vpop.f32.mrf.mxu1  ;;  %v5426_v28 = vpop.f32.mrf.mxu0  ;;  %9501 = vmatmul.mubr.msk.f32.gmra.mxu1 %vm1254_vm1, %v13355_v26  ;;  %9511 = vmatmul.mubr.msk.f32.vlgmr.msra.gmra.mxu0 %vm1254_vm1, %v13588_v27 }
 0x3d3   : > { %v13592_v44 = vadd.f32 %v8690_v13, %v7653_v56  ;;  %v13594_v7 = vadd.f32 %v8172_v33, %v7143_v18  ;;  %v7206_v32 = vmax.f32 %v5313_v1, 0.0  ;;  %v6696_v52 = vmax.f32 %v5426_v28, 0.0  ;;  %6283 = vmatprep.mubr.f32.mxu1 %v9776_v0  ;;  %6396 = vmatprep.mubr.f32.mxu0 %v9776_v0 }
 0x3d4   : > { %v5315_v17 = vpop.f32.mrf.mxu1  ;;  %v5428_v16 = vpop.f32.mrf.mxu0 }
 0x3d5   : > { %v8237_v47 = vadd.f32 %v13497_v2, %v7206_v32  ;;  %v7719_v50 = vadd.f32 %v13499_v4, %v6696_v52  ;;  %v7207_v20 = vmax.f32 %v5315_v17, 0.0  ;;  %v6697_v22 = vmax.f32 %v5428_v16, 0.0  ;;  %v13654_v16 = vld [vmem:[%s14378_s1 + $0x60] sm:$0xff] }
 0x3d6   : > { %v5319_v35 = vpop.f32.mrf.mxu1  ;;  %v5432_v63 = vpop.f32.mrf.mxu0  ;;  %9502 = vmatmul.mubr.msk.f32.gmra.mxu1 %vm1254_vm1, %v13375_v40  ;;  %9512 = vmatmul.mubr.msk.f32.gmra.mxu0 %vm1254_vm1, %v13605_v25 }
 0x3d7   : > { %v13609_v12 = vadd.f32 %v8237_v47, %v7207_v20  ;;  %v13611_v2 = vadd.f32 %v7719_v50, %v6697_v22  ;;  %v7270_v4 = vmax.f32 %v5319_v35, 0.0  ;;  %v6760_v58 = vmax.f32 %v5432_v63, 0.0  ;;  %6289 = vmatprep.mubr.f32.mxu1 %v9776_v0  ;;  %6402 = vmatprep.mubr.f32.mxu0 %v9776_v0  ;;  %v13661_v47 = vld [vmem:[%s14378_s1 + $0x20] sm:$0xff] }
 0x3d8   : > { %v5321_v24 = vpop.f32.mrf.mxu1  ;;  %v5434_v49 = vpop.f32.mrf.mxu0 }
 0x3d9   : > { %v8302_v21 = vadd.f32 %v13510_v43, %v7270_v4  ;;  %v7784_v37 = vadd.f32 %v13512_v54, %v6760_v58  ;;  %v7271_v15 = vmax.f32 %v5321_v24, 0.0  ;;  %v6761_v39 = vmax.f32 %v5434_v49, 0.0 }
 0x3da   : > { %v5325_v8 = vpop.f32.mrf.mxu1  ;;  %v5438_v5 = vpop.f32.mrf.mxu0  ;;  %9503 = vmatmul.mubr.msk.f32.gmra.mxu1 %vm1254_vm1, %v13393_v6  ;;  %9513 = vmatmul.mubr.msk.f32.gmra.mxu0 %vm1254_vm1, %v13622_v19 }
 0x3db   : > { %v13626_v46 = vadd.f32 %v8302_v21, %v7271_v15  ;;  %v13628_v43 = vadd.f32 %v7784_v37, %v6761_v39  ;;  %v7334_v54 = vmax.f32 %v5325_v8, 0.0  ;;  %v6824_v41 = vmax.f32 %v5438_v5, 0.0  ;;  %6295 = vmatprep.mubr.f32.mxu1 %v9776_v0  ;;  %6408 = vmatprep.mubr.f32.mxu0 %v9776_v0  ;;  %v13676_v37 = vld [vmem:[%s14378_s1 + $0x68] sm:$0xff] }
 0x3dc   : > { %v5327_v11 = vpop.f32.mrf.mxu1  ;;  %v5440_v31 = vpop.f32.mrf.mxu0  ;;  %v13683_v15 = vld [vmem:[%s14378_s1 + $0x28] sm:$0xff] }
 0x3dd   : > { %v8367_v38 = vadd.f32 %v13522_v45, %v7334_v54  ;;  %v7849_v59 = vadd.f32 %v13524_v53, %v6824_v41  ;;  %v7335_v14 = vmax.f32 %v5327_v11, 0.0  ;;  %v6825_v62 = vmax.f32 %v5440_v31, 0.0 }
 0x3de   : > { %v5331_v34 = vpop.f32.mrf.mxu1  ;;  %v5444_v55 = vpop.f32.mrf.mxu0  ;;  %9504 = vmatmul.mubr.msk.f32.gmra.mxu1 %vm1254_vm1, %v13410_v57  ;;  %9514 = vmatmul.mubr.msk.f32.gmra.mxu0 %vm1254_vm1, %v13639_v51 }
 0x3df   : > { %v13643_v42 = vadd.f32 %v8367_v38, %v7335_v14  ;;  %v13645_v45 = vadd.f32 %v7849_v59, %v6825_v62  ;;  %v7398_v53 = vmax.f32 %v5331_v34, 0.0  ;;  %v6888_v13 = vmax.f32 %v5444_v55, 0.0  ;;  %6301 = vmatprep.mubr.f32.mxu1 %v9776_v0  ;;  %6414 = vmatprep.mubr.f32.mxu0 %v9776_v0  ;;  %v13698_v62 = vld [vmem:[%s14378_s1 + $0x70] sm:$0xff] }
 0x3e0   : > { %v5333_v33 = vpop.f32.mrf.mxu1  ;;  %v5446_v56 = vpop.f32.mrf.mxu0  ;;  %v13705_v34 = vld [vmem:[%s14378_s1 + $0x30] sm:$0xff] }
 0x3e1   : > { %v8432_v18 = vadd.f32 %v13534_v29, %v7398_v53  ;;  %v7914_v1 = vadd.f32 %v13536_v23, %v6888_v13  ;;  %v7399_v28 = vmax.f32 %v5333_v33, 0.0  ;;  %v6889_v32 = vmax.f32 %v5446_v56, 0.0 }
 0x3e2   : > { %v5337_v52 = vpop.f32.mrf.mxu1  ;;  %v5450_v17 = vpop.f32.mrf.mxu0  ;;  %9505 = vmatmul.mubr.msk.f32.gmra.mxu1 %vm1254_vm1, %v13654_v16  ;;  %9515 = vmatmul.mubr.msk.f32.gmra.mxu0 %vm1254_vm1, %v13661_v47 }
 0x3e3   : > { %v13665_v29 = vadd.f32 %v8432_v18, %v7399_v28  ;;  %v13667_v23 = vadd.f32 %v7914_v1, %v6889_v32  ;;  %v7462_v50 = vmax.f32 %v5337_v52, 0.0  ;;  %v6952_v20 = vmax.f32 %v5450_v17, 0.0  ;;  %6307 = vmatprep.mubr.f32.mxu1 %v9776_v0  ;;  %6420 = vmatprep.mubr.f32.mxu0 %v9776_v0 }
 0x3e4   : > { %v5339_v22 = vpop.f32.mrf.mxu1  ;;  %v5452_v35 = vpop.f32.mrf.mxu0 }
 0x3e5   : > { %v8497_v63 = vadd.f32 %v13546_v3, %v7462_v50  ;;  %v7979_v4 = vadd.f32 %v13548_v61, %v6952_v20  ;;  %v7463_v58 = vmax.f32 %v5339_v22, 0.0  ;;  %v6953_v24 = vmax.f32 %v5452_v35, 0.0 }
 0x3e6   : > { %v5343_v49 = vpop.f32.mrf.mxu1  ;;  %v5456_v21 = vpop.f32.mrf.mxu0  ;;  %9506 = vmatmul.mubr.msk.f32.gmra.mxu1 %vm1254_vm1, %v13676_v37  ;;  %9516 = vmatmul.mubr.msk.f32.gmra.mxu0 %vm1254_vm1, %v13683_v15 }
 0x3e7   : > { %v13687_v3 = vadd.f32 %v8497_v63, %v7463_v58  ;;  %v13689_v61 = vadd.f32 %v7979_v4, %v6953_v24  ;;  %v7526_v39 = vmax.f32 %v5343_v49, 0.0  ;;  %v7016_v8 = vmax.f32 %v5456_v21, 0.0  ;;  %6313 = vmatprep.mubr.f32.mxu1 %v9776_v0  ;;  %6426 = vmatprep.mubr.f32.mxu0 %v9776_v0 }
 0x3e8   : > { %v5345_v5 = vpop.f32.mrf.mxu1  ;;  %v5458_v54 = vpop.f32.mrf.mxu0 }
 0x3e9   : > { %v8562_v41 = vadd.f32 %v13558_v60, %v7526_v39  ;;  %v8044_v11 = vadd.f32 %v13560_v30, %v7016_v8  ;;  %v7527_v31 = vmax.f32 %v5345_v5, 0.0  ;;  %v7017_v38 = vmax.f32 %v5458_v54, 0.0 }
 0x3ea   : > { %v5349_v59 = vpop.f32.mrf.mxu1  ;;  %v5462_v14 = vpop.f32.mrf.mxu0  ;;  %9507 = vmatmul.mubr.msk.f32.gmra.mxu1 %vm1254_vm1, %v13698_v62  ;;  %9517 = vmatmul.mubr.msk.f32.gmra.mxu0 %vm1254_vm1, %v13705_v34 }
 0x3eb   : > { %v13709_v60 = vadd.f32 %v8562_v41, %v7527_v31  ;;  %v13711_v30 = vadd.f32 %v8044_v11, %v7017_v38  ;;  %v7590_v55 = vmax.f32 %v5349_v59, 0.0  ;;  %v7080_v53 = vmax.f32 %v5462_v14, 0.0  ;;  %6319 = vmatprep.mubr.f32.mxu1 %v9776_v0  ;;  %6432 = vmatprep.mubr.f32.mxu0 %v9776_v0 }
 0x3ec   : > { %v5351_v13 = vpop.f32.mrf.mxu1  ;;  %v5464_v33 = vpop.f32.mrf.mxu0 }
 0x3ed   : > { %v8627_v56 = vadd.f32 %v13575_v10, %v7590_v55  ;;  %v8109_v18 = vadd.f32 %v13577_v48, %v7080_v53  ;;  %v7591_v1 = vmax.f32 %v5351_v13, 0.0  ;;  %v7081_v28 = vmax.f32 %v5464_v33, 0.0 }
 0x3ee   : > { %v5355_v32 = vpop.f32.mrf.mxu1  ;;  %v5468_v52 = vpop.f32.mrf.mxu0  ;;  %9508 = vmatmul.mubr.msk.f32.gmra.mxu1 %vm1254_vm1, %v13569_v36  ;;  %9518 = vmatmul.mubr.msk.f32.gmra.mxu0 %vm1254_vm1, %v13335_v9 }
 0x3ef   : > { %v13721_v17 = vadd.f32 %v8627_v56, %v7591_v1  ;;  %v13723_v50 = vadd.f32 %v8109_v18, %v7081_v28  ;;  %v7654_v20 = vmax.f32 %v5355_v32, 0.0  ;;  %v7144_v22 = vmax.f32 %v5468_v52, 0.0  ;;  %6438 = vmatprep.mubr.f32.mxu0 %v9776_v0  ;;  %6551 = vmatprep.mubr.f32.mxu1 %v9776_v0 }
 0x3f0   : > { %v5357_v10 = vpop.f32.mrf.mxu1  ;;  %v5470_v48 = vpop.f32.mrf.mxu0 }
 0x3f1   : > { %v8692_v35 = vadd.f32 %v13592_v44, %v7654_v20  ;;  %v8174_v63 = vadd.f32 %v13594_v7, %v7144_v22  ;;  %v7655_v4 = vmax.f32 %v5357_v10, 0.0  ;;  %v7145_v58 = vmax.f32 %v5470_v48, 0.0 }
 0x3f2   : > { %v5474_v24 = vpop.f32.mrf.mxu0  ;;  %v5587_v9 = vpop.f32.mrf.mxu1  ;;  %9519 = vmatmul.mubr.msk.f32.gmra.mxu0 %vm1254_vm1, %v13355_v26  ;;  %9529 = vmatmul.mubr.msk.f32.vlgmr.msra.gmra.mxu1 %vm1254_vm1, %v13588_v27 }
 0x3f3   : > { %v13733_v49 = vadd.f32 %v8692_v35, %v7655_v4  ;;  %v13735_v21 = vadd.f32 %v8174_v63, %v7145_v58  ;;  %v7208_v39 = vmax.f32 %v5474_v24, 0.0  ;;  %v6698_v8 = vmax.f32 %v5587_v9, 0.0  ;;  %6444 = vmatprep.mubr.f32.mxu0 %v9776_v0  ;;  %6557 = vmatprep.mubr.f32.mxu1 %v9776_v0 }
 0x3f4   : > { %v13739_v44 = vpop.f32.mrf.mxu0  ;;  %v5589_v7 = vpop.f32.mrf.mxu1 }
 0x3f5   : > { %v13742_v5 = vadd.f32 %v13609_v12, %v7208_v39  ;;  %v7721_v26 = vadd.f32 %v13611_v2, %v6698_v8  ;;  %v6699_v54 = vmax.f32 %v5589_v7, 0.0 }
 0x3f6   : > { %v5480_v27 = vpop.f32.mrf.mxu0  ;;  %v5593_v41 = vpop.f32.mrf.mxu1  ;;  %9520 = vmatmul.mubr.msk.f32.gmra.mxu0 %vm1254_vm1, %v13375_v40  ;;  %9530 = vmatmul.mubr.msk.f32.gmra.mxu1 %vm1254_vm1, %v13605_v25 }
 0x3f7   : > { %v13749_v11 = vadd.f32 %v7721_v26, %v6699_v54  ;;  %v7272_v31 = vmax.f32 %v5480_v27, 0.0  ;;  %v6762_v38 = vmax.f32 %v5593_v41, 0.0  ;;  %6450 = vmatprep.mubr.f32.mxu0 %v9776_v0  ;;  %6563 = vmatprep.mubr.f32.mxu1 %v9776_v0 }
 0x3f8   : > { %v13753_v12 = vpop.f32.mrf.mxu0  ;;  %v5595_v2 = vpop.f32.mrf.mxu1 }
 0x3f9   : > { %v13756_v59 = vadd.f32 %v13626_v46, %v7272_v31  ;;  %v7786_v14 = vadd.f32 %v13628_v43, %v6762_v38  ;;  %v6763_v40 = vmax.f32 %v5595_v2, 0.0 }
 0x3fa   : > { %v5486_v55 = vpop.f32.mrf.mxu0  ;;  %v5599_v53 = vpop.f32.mrf.mxu1  ;;  %9521 = vmatmul.mubr.msk.f32.gmra.mxu0 %vm1254_vm1, %v13393_v6  ;;  %9531 = vmatmul.mubr.msk.f32.gmra.mxu1 %vm1254_vm1, %v13622_v19 }
 0x3fb   : > { %v13763_v25 = vadd.f32 %v7786_v14, %v6763_v40  ;;  %v7336_v13 = vmax.f32 %v5486_v55, 0.0  ;;  %v6826_v33 = vmax.f32 %v5599_v53, 0.0  ;;  %6456 = vmatprep.mubr.f32.mxu0 %v9776_v0  ;;  %6569 = vmatprep.mubr.f32.mxu1 %v9776_v0 }
 0x3fc   : > { %v13767_v46 = vpop.f32.mrf.mxu0  ;;  %v5601_v43 = vpop.f32.mrf.mxu1 }
 0x3fd   : > { %v13770_v56 = vadd.f32 %v13643_v42, %v7336_v13  ;;  %v7851_v18 = vadd.f32 %v13645_v45, %v6826_v33  ;;  %v6827_v6 = vmax.f32 %v5601_v43, 0.0  ;;  %v7209_v33 = vmax.f32 %v13739_v44, 0.0  ;;  %v9764_v44 = vld [vmem:[%s14378_s1 + $0x40] sm:$0xff] }
 0x3fe   : > { %v5492_v1 = vpop.f32.mrf.mxu0  ;;  %v5605_v28 = vpop.f32.mrf.mxu1  ;;  %9522 = vmatmul.mubr.msk.f32.gmra.mxu0 %vm1254_vm1, %v13410_v57  ;;  %9532 = vmatmul.mubr.msk.f32.gmra.mxu1 %vm1254_vm1, %v13639_v51 }
 0x3ff   : > { %v13777_v19 = vadd.f32 %v7851_v18, %v6827_v6  ;;  %v7400_v32 = vmax.f32 %v5492_v1, 0.0  ;;  %v6890_v52 = vmax.f32 %v5605_v28, 0.0  ;;  %6462 = vmatprep.mubr.f32.mxu0 %v9776_v0  ;;  %6575 = vmatprep.mubr.f32.mxu1 %v9776_v0 }
 0x400   : > { %v13781_v42 = vpop.f32.mrf.mxu0  ;;  %v5607_v45 = vpop.f32.mrf.mxu1 }
 0x401   : > { %v13784_v20 = vadd.f32 %v13665_v29, %v7400_v32  ;;  %v7916_v22 = vadd.f32 %v13667_v23, %v6890_v52  ;;  %v6891_v57 = vmax.f32 %v5607_v45, 0.0  ;;  %v7273_v52 = vmax.f32 %v13753_v12, 0.0 }
 0x402   : > { %v5498_v10 = vpop.f32.mrf.mxu0  ;;  %v5611_v48 = vpop.f32.mrf.mxu1  ;;  %9523 = vmatmul.mubr.msk.f32.gmra.mxu0 %vm1254_vm1, %v13654_v16  ;;  %9533 = vmatmul.mubr.msk.f32.gmra.mxu1 %vm1254_vm1, %v13661_v47 }
 0x403   : > { %v13791_v51 = vadd.f32 %v7916_v22, %v6891_v57  ;;  %v7464_v35 = vmax.f32 %v5498_v10, 0.0  ;;  %v6954_v63 = vmax.f32 %v5611_v48, 0.0  ;;  %6468 = vmatprep.mubr.f32.mxu0 %v9776_v0  ;;  %6581 = vmatprep.mubr.f32.mxu1 %v9776_v0  ;;  %v8240_v57 = vadd.f32 %v13742_v5, %v7209_v33  ;;  %v9765_v5 = vld [vmem:[%s14378_s1 + $0x48] sm:$0xff] }
 0x404   : > { %v13795_v29 = vpop.f32.mrf.mxu0  ;;  %v5613_v23 = vpop.f32.mrf.mxu1 }
 0x405   : > { %v13798_v4 = vadd.f32 %v13687_v3, %v7464_v35  ;;  %v7981_v58 = vadd.f32 %v13689_v61, %v6954_v63  ;;  %v6955_v24 = vmax.f32 %v5613_v23, 0.0 }
 0x406   : > { %v5504_v9 = vpop.f32.mrf.mxu0  ;;  %v5617_v39 = vpop.f32.mrf.mxu1  ;;  %9524 = vmatmul.mubr.msk.f32.gmra.mxu0 %vm1254_vm1, %v13676_v37  ;;  %9534 = vmatmul.mubr.msk.f32.gmra.mxu1 %vm1254_vm1, %v13683_v15 }
 0x407   : > { %v13805_v47 = vadd.f32 %v7981_v58, %v6955_v24  ;;  %v7528_v8 = vmax.f32 %v5504_v9, 0.0  ;;  %v7018_v7 = vmax.f32 %v5617_v39, 0.0  ;;  %6474 = vmatprep.mubr.f32.mxu0 %v9776_v0  ;;  %6587 = vmatprep.mubr.f32.mxu1 %v9776_v0  ;;  %v8305_v24 = vadd.f32 %v13756_v59, %v7273_v52 }
 0x408   : > { %v13809_v3 = vpop.f32.mrf.mxu0  ;;  %v5619_v61 = vpop.f32.mrf.mxu1  ;;  %v7337_v9 = vmax.f32 %v13767_v46, 0.0  ;;  %v7465_v52 = vmax.f32 %v13795_v29, 0.0 }
 0x409   : > { %v13812_v26 = vadd.f32 %v13709_v60, %v7528_v8  ;;  %v8046_v54 = vadd.f32 %v13711_v30, %v7018_v7  ;;  %v7019_v27 = vmax.f32 %v5619_v61, 0.0 }
 0x40a   : > { %v5510_v41 = vpop.f32.mrf.mxu0  ;;  %v5623_v31 = vpop.f32.mrf.mxu1  ;;  %9525 = vmatmul.mubr.msk.f32.gmra.mxu0 %vm1254_vm1, %v13698_v62  ;;  %9535 = vmatmul.mubr.msk.f32.gmra.mxu1 %vm1254_vm1, %v13705_v34  ;;  %v9763_v34 = vld [vmem:[%s14378_s1 + $0x38] sm:$0xff] }
 0x40b   : > { %v13819_v15 = vadd.f32 %v8046_v54, %v7019_v27  ;;  %v7592_v38 = vmax.f32 %v5510_v41, 0.0  ;;  %v7082_v2 = vmax.f32 %v5623_v31, 0.0  ;;  %6480 = vmatprep.mubr.f32.mxu0 %v9776_v0  ;;  %6593 = vmatprep.mubr.f32.mxu1 %v9776_v0 }
 0x40c   : > { %v13823_v60 = vpop.f32.mrf.mxu0  ;;  %v5625_v30 = vpop.f32.mrf.mxu1 }
 0x40d   : > { %v13826_v14 = vadd.f32 %v13721_v17, %v7592_v38  ;;  %v8111_v40 = vadd.f32 %v13723_v50, %v7082_v2  ;;  %v7083_v55 = vmax.f32 %v5625_v30, 0.0  ;;  %v8370_v2 = vadd.f32 %v13770_v56, %v7337_v9 }
 0x40e   : > { %v5516_v53 = vpop.f32.mrf.mxu0  ;;  %v5629_v13 = vpop.f32.mrf.mxu1  ;;  %9526 = vmatmul.mubr.msk.f32.gmra.mxu0 %vm1254_vm1, %v13569_v36  ;;  %9536 = vmatmul.mubr.msk.f32.gmra.mxu1 %vm1254_vm1, %v9763_v34  ;;  %v7401_v30 = vmax.f32 %v13781_v42, 0.0 }
 0x40f   : > { %v13836_v43 = vadd.f32 %v8111_v40, %v7083_v55  ;;  %v7656_v17 = vmax.f32 %v5516_v53, 0.0  ;;  %v7146_v18 = vmax.f32 %v5629_v13, 0.0  ;;  %6599 = vmatprep.mubr.f32.mxu1 %v9776_v0  ;;  %v9766_v53 = vld [vmem:[%s14378_s1 + $0x50] sm:$0xff] }
 0x410   : > { %v13839_v50 = vpop.f32.mrf.mxu0  ;;  %v5631_v6 = vpop.f32.mrf.mxu1 }
 0x411   : > { %v13842_v1 = vadd.f32 %v13733_v49, %v7656_v17  ;;  %v8176_v28 = vadd.f32 %v13735_v21, %v7146_v18  ;;  %v7147_v32 = vmax.f32 %v5631_v6, 0.0 }
 0x412   : > { %v5635_v45 = vpop.f32.mrf.mxu1  ;;  %v5748_v22 = vpop.f32.mrf.mxu0  ;;  %9537 = vmatmul.mubr.msk.f32.gmra.mxu1 %vm1254_vm1, %v9764_v44  ;;  %v9767_v44 = vld [vmem:[%s14378_s1 + $0x58] sm:$0xff] }
 0x413   : > { %v13851_v10 = vadd.f32 %v8176_v28, %v7147_v32  ;;  %v7210_v48 = vmax.f32 %v5635_v45, 0.0  ;;  %v6700_v49 = vmax.f32 %v5748_v22, 0.0  ;;  %6605 = vmatprep.mubr.f32.mxu1 %v9776_v0  ;;  %v8435_v32 = vadd.f32 %v13784_v20, %v7401_v30 }
 0x414   : > { %v5637_v21 = vpop.f32.mrf.mxu1  ;;  %v5750_v35 = vpop.f32.mrf.mxu0 }
 0x415   : > { %v8241_v63 = vadd.f32 %v8240_v57, %v7210_v48  ;;  %v7723_v12 = vadd.f32 %v13749_v11, %v6700_v49  ;;  %v7211_v23 = vmax.f32 %v5637_v21, 0.0  ;;  %v6701_v58 = vmax.f32 %v5750_v35, 0.0 }
 0x416   : > { %v5641_v39 = vpop.f32.mrf.mxu1  ;;  %v5754_v8 = vpop.f32.mrf.mxu0  ;;  %9538 = vmatmul.mubr.msk.f32.gmra.mxu1 %vm1254_vm1, %v9765_v5 }
 0x417   : > { %v13861_v7 = vadd.f32 %v8241_v63, %v7211_v23  ;;  %v13863_v61 = vadd.f32 %v7723_v12, %v6701_v58  ;;  %v7274_v54 = vmax.f32 %v5641_v39, 0.0  ;;  %v6764_v11 = vmax.f32 %v5754_v8, 0.0  ;;  %6611 = vmatprep.mubr.f32.mxu1 %v9776_v0 }
 0x418   : > { %v5643_v27 = vpop.f32.mrf.mxu1  ;;  %v5756_v59 = vpop.f32.mrf.mxu0  ;;  %v8500_v23 = vadd.f32 %v13798_v4, %v7465_v52  ;;  %v7529_v58 = vmax.f32 %v13809_v3, 0.0 }
 0x419   : > { %v8306_v41 = vadd.f32 %v8305_v24, %v7274_v54  ;;  %v7788_v46 = vadd.f32 %v13763_v25, %v6764_v11  ;;  %v7275_v31 = vmax.f32 %v5643_v27, 0.0  ;;  %v6765_v38 = vmax.f32 %v5756_v59, 0.0 }
 0x41a   : > { %v5647_v40 = vpop.f32.mrf.mxu1  ;;  %v5760_v55 = vpop.f32.mrf.mxu0  ;;  %9539 = vmatmul.mubr.msk.f32.gmra.mxu1 %vm1254_vm1, %v9766_v53 }
 0x41b   : > { %v13873_v13 = vadd.f32 %v8306_v41, %v7275_v31  ;;  %v13875_v34 = vadd.f32 %v7788_v46, %v6765_v38  ;;  %v7338_v33 = vmax.f32 %v5647_v40, 0.0  ;;  %v6828_v25 = vmax.f32 %v5760_v55, 0.0  ;;  %6617 = vmatprep.mubr.f32.mxu1 %v9776_v0 }
 0x41c   : > { %v5649_v17 = vpop.f32.mrf.mxu1  ;;  %v5762_v56 = vpop.f32.mrf.mxu0  ;;  %v8565_v41 = vadd.f32 %v13812_v26, %v7529_v58  ;;  %v7593_v46 = vmax.f32 %v13823_v60, 0.0 }
 0x41d   : > { %v8371_v18 = vadd.f32 %v8370_v2, %v7338_v33  ;;  %v7853_v42 = vadd.f32 %v13777_v19, %v6828_v25  ;;  %v7339_v6 = vmax.f32 %v5649_v17, 0.0  ;;  %v6829_v28 = vmax.f32 %v5762_v56, 0.0 }
 0x41e   : > { %v5653_v45 = vpop.f32.mrf.mxu1  ;;  %v5766_v22 = vpop.f32.mrf.mxu0  ;;  %9540 = vmatmul.mubr.msk.f32.gmra.mxu1 %vm1254_vm1, %v9767_v44  ;;  %v8630_v25 = vadd.f32 %v13826_v14, %v7593_v46  ;;  %v7657_v17 = vmax.f32 %v13839_v50, 0.0 }
 0x41f   : > { %v13885_v57 = vadd.f32 %v8371_v18, %v7339_v6  ;;  %v13887_v48 = vadd.f32 %v7853_v42, %v6829_v28  ;;  %v7402_v49 = vmax.f32 %v5653_v45, 0.0  ;;  %v6892_v19 = vmax.f32 %v5766_v22, 0.0  ;;  %6623 = vmatprep.mubr.f32.mxu1 %v9776_v0 }
 0x420   : > { %v5655_v21 = vpop.f32.mrf.mxu1  ;;  %v5768_v20 = vpop.f32.mrf.mxu0  ;;  %v8695_v22 = vadd.f32 %v13842_v1, %v7657_v17 }
 0x421   : > { %v8436_v35 = vadd.f32 %v8435_v32, %v7402_v49  ;;  %v7918_v29 = vadd.f32 %v13791_v51, %v6892_v19  ;;  %v7403_v63 = vmax.f32 %v5655_v21, 0.0  ;;  %v6893_v12 = vmax.f32 %v5768_v20, 0.0 }
 0x422   : > { %v5659_v24 = vpop.f32.mrf.mxu1  ;;  %v5772_v9 = vpop.f32.mrf.mxu0  ;;  %9541 = vmatmul.mubr.msk.f32.gmra.mxu1 %vm1254_vm1, %v13654_v16 }
 0x423   : > { %v13895_v39 = vadd.f32 %v8436_v35, %v7403_v63  ;;  %v13897_v8 = vadd.f32 %v7918_v29, %v6893_v12  ;;  %v7466_v5 = vmax.f32 %v5659_v24, 0.0  ;;  %v6956_v54 = vmax.f32 %v5772_v9, 0.0  ;;  %6629 = vmatprep.mubr.f32.mxu1 %v9776_v0 }
 0x424   : > { %v5661_v51 = vpop.f32.mrf.mxu1  ;;  %v5774_v11 = vpop.f32.mrf.mxu0 }
 0x425   : > { %v8501_v27 = vadd.f32 %v8500_v23, %v7466_v5  ;;  %v7983_v4 = vadd.f32 %v13805_v47, %v6956_v54  ;;  %v7467_v59 = vmax.f32 %v5661_v51, 0.0  ;;  %v6957_v3 = vmax.f32 %v5774_v11, 0.0 }
 0x426   : > { %v5665_v16 = vpop.f32.mrf.mxu1  ;;  %v5778_v31 = vpop.f32.mrf.mxu0  ;;  %9542 = vmatmul.mubr.msk.f32.gmra.mxu1 %vm1254_vm1, %v13676_v37 }
 0x427   : > { %v13905_v38 = vadd.f32 %v8501_v27, %v7467_v59  ;;  %v13907_v2 = vadd.f32 %v7983_v4, %v6957_v3  ;;  %v7530_v30 = vmax.f32 %v5665_v16, 0.0  ;;  %v7020_v40 = vmax.f32 %v5778_v31, 0.0  ;;  %6635 = vmatprep.mubr.f32.mxu1 %v9776_v0 }
 0x428   : > { %v5667_v47 = vpop.f32.mrf.mxu1  ;;  %v5780_v55 = vpop.f32.mrf.mxu0 }
 0x429   : > { %v8566_v53 = vadd.f32 %v8565_v41, %v7530_v30  ;;  %v8048_v26 = vadd.f32 %v13819_v15, %v7020_v40  ;;  %v7531_v33 = vmax.f32 %v5667_v47, 0.0  ;;  %v7021_v60 = vmax.f32 %v5780_v55, 0.0 }
 0x42a   : > { %v5671_v37 = vpop.f32.mrf.mxu1  ;;  %v5784_v56 = vpop.f32.mrf.mxu0  ;;  %9543 = vmatmul.mubr.msk.f32.gmra.mxu1 %vm1254_vm1, %v13698_v62 }
 0x42b   : > { %v13915_v18 = vadd.f32 %v8566_v53, %v7531_v33  ;;  %v13917_v42 = vadd.f32 %v8048_v26, %v7021_v60  ;;  %v7594_v6 = vmax.f32 %v5671_v37, 0.0  ;;  %v7084_v28 = vmax.f32 %v5784_v56, 0.0  ;;  %6641 = vmatprep.mubr.f32.mxu1 %v9776_v0 }
 0x42c   : > { %v5673_v15 = vpop.f32.mrf.mxu1  ;;  %v5786_v32 = vpop.f32.mrf.mxu0 }
 0x42d   : > { %v8631_v52 = vadd.f32 %v8630_v25, %v7594_v6  ;;  %v8113_v14 = vadd.f32 %v13836_v43, %v7084_v28  ;;  %v7595_v45 = vmax.f32 %v5673_v15, 0.0  ;;  %v7085_v50 = vmax.f32 %v5786_v32, 0.0 }
 0x42e   : > { %v5677_v44 = vpop.f32.mrf.mxu1  ;;  %v5790_v49 = vpop.f32.mrf.mxu0  ;;  %9544 = vmatmul.mubr.msk.f32.gmra.mxu1 %vm1254_vm1, %v13569_v36 }
 0x42f   : > { %v13924_v62 = vadd.f32 %v8631_v52, %v7595_v45  ;;  %v13926_v19 = vadd.f32 %v8113_v14, %v7085_v50  ;;  %v7658_v21 = vmax.f32 %v5677_v44, 0.0  ;;  %v7148_v0 = vmax.f32 %v5790_v49, 0.0 }
 0x430   : > { %v5679_v20 = vpop.f32.mrf.mxu1  ;;  %v5792_v35 = vpop.f32.mrf.mxu0 }
 0x431   : > { %v8696_v29 = vadd.f32 %v8695_v22, %v7658_v21  ;;  %v8178_v43 = vadd.f32 %v13851_v10, %v7148_v0  ;;  %v7659_v63 = vmax.f32 %v5679_v20, 0.0  ;;  %v7149_v12 = vmax.f32 %v5792_v35, 0.0 }
 0x432   : > { %v5796_v23 = vpop.f32.mrf.mxu0  ;;  %v5909_v1 = vpop.f32.mrf.mxu1 }
 0x433   : > { %v13929_v58 = vadd.f32 %v8696_v29, %v7659_v63  ;;  %v13931_v24 = vadd.f32 %v8178_v43, %v7149_v12  ;;  %v7212_v36 = vmax.f32 %v5796_v23, 0.0  ;;  %v6702_v9 = vmax.f32 %v5909_v1, 0.0 }
 0x434   : > { %v5798_v5 = vpop.f32.mrf.mxu0  ;;  %v5911_v54 = vpop.f32.mrf.mxu1 }
 0x435   : > { %v8243_v51 = vadd.f32 %v13861_v7, %v7212_v36  ;;  %v7725_v11 = vadd.f32 %v13863_v61, %v6702_v9  ;;  %v7213_v27 = vmax.f32 %v5798_v5, 0.0  ;;  %v6703_v4 = vmax.f32 %v5911_v54, 0.0 }
 0x436   : > { %v5802_v59 = vpop.f32.mrf.mxu0  ;;  %v5915_v10 = vpop.f32.mrf.mxu1 }
 0x437   : > { %v13935_v3 = vadd.f32 %v8243_v51, %v7213_v27  ;;  %v13937_v41 = vadd.f32 %v7725_v11, %v6703_v4  ;;  %v7276_v46 = vmax.f32 %v5802_v59, 0.0  ;;  %v6766_v16 = vmax.f32 %v5915_v10, 0.0 }
 0x438   : > { %v5804_v31 = vpop.f32.mrf.mxu0  ;;  %v5917_v30 = vpop.f32.mrf.mxu1 }
 0x439   : > { %v8308_v40 = vadd.f32 %v13873_v13, %v7276_v46  ;;  %v7790_v47 = vadd.f32 %v13875_v34, %v6766_v16  ;;  %v7277_v55 = vmax.f32 %v5804_v31, 0.0  ;;  %v6767_v7 = vmax.f32 %v5917_v30, 0.0 }
 0x43a   : > { %v5808_v53 = vpop.f32.mrf.mxu0  ;;  %v5921_v61 = vpop.f32.mrf.mxu1 }
 0x43b   : > { %v13941_v26 = vadd.f32 %v8308_v40, %v7277_v55  ;;  %v13943_v33 = vadd.f32 %v7790_v47, %v6767_v7  ;;  %v7340_v60 = vmax.f32 %v5808_v53, 0.0  ;;  %v6830_v25 = vmax.f32 %v5921_v61, 0.0 }
 0x43c   : > { %v5810_v17 = vpop.f32.mrf.mxu0  ;;  %v5923_v37 = vpop.f32.mrf.mxu1 }
 0x43d   : > { %v8373_v56 = vadd.f32 %v13885_v57, %v7340_v60  ;;  %v7855_v6 = vadd.f32 %v13887_v48, %v6830_v25  ;;  %v7341_v28 = vmax.f32 %v5810_v17, 0.0  ;;  %v6831_v13 = vmax.f32 %v5923_v37, 0.0 }
 0x43e   : > { %v5814_v15 = vpop.f32.mrf.mxu0  ;;  %v5927_v34 = vpop.f32.mrf.mxu1 }
 0x43f   : > { %v13947_v32 = vadd.f32 %v8373_v56, %v7341_v28  ;;  %v13949_v52 = vadd.f32 %v7855_v6, %v6831_v13  ;;  %v7404_v14 = vmax.f32 %v5814_v15, 0.0  ;;  %v6894_v45 = vmax.f32 %v5927_v34, 0.0 }
 0x440   : > { %v5816_v50 = vpop.f32.mrf.mxu0  ;;  %v5929_v22 = vpop.f32.mrf.mxu1 }
 0x441   : > { %v8438_v44 = vadd.f32 %v13895_v39, %v7404_v14  ;;  %v7920_v49 = vadd.f32 %v13897_v8, %v6894_v45  ;;  %v7405_v21 = vmax.f32 %v5816_v50, 0.0  ;;  %v6895_v57 = vmax.f32 %v5929_v22, 0.0 }
 0x442   : > { %v5820_v0 = vpop.f32.mrf.mxu0  ;;  %v5933_v48 = vpop.f32.mrf.mxu1 }
 0x443   : > { %v13953_v20 = vadd.f32 %v8438_v44, %v7405_v21  ;;  %v13955_v35 = vadd.f32 %v7920_v49, %v6895_v57  ;;  %v7468_v29 = vmax.f32 %v5820_v0, 0.0  ;;  %v6958_v43 = vmax.f32 %v5933_v48, 0.0 }
 0x444   : > { %v5822_v63 = vpop.f32.mrf.mxu0  ;;  %v5935_v12 = vpop.f32.mrf.mxu1 }
 0x445   : > { %v8503_v23 = vadd.f32 %v13905_v38, %v7468_v29  ;;  %v7985_v1 = vadd.f32 %v13907_v2, %v6958_v43  ;;  %v7469_v36 = vmax.f32 %v5822_v63, 0.0  ;;  %v6959_v39 = vmax.f32 %v5935_v12, 0.0 }
 0x446   : > { %v5826_v9 = vpop.f32.mrf.mxu0  ;;  %v5939_v8 = vpop.f32.mrf.mxu1 }
 0x447   : > { %v13959_v5 = vadd.f32 %v8503_v23, %v7469_v36  ;;  %v13961_v54 = vadd.f32 %v7985_v1, %v6959_v39  ;;  %v7532_v51 = vmax.f32 %v5826_v9, 0.0  ;;  %v7022_v11 = vmax.f32 %v5939_v8, 0.0 }
 0x448   : > { %v5828_v27 = vpop.f32.mrf.mxu0  ;;  %v5941_v4 = vpop.f32.mrf.mxu1 }
 0x449   : > { %v8568_v59 = vadd.f32 %v13915_v18, %v7532_v51  ;;  %v8050_v10 = vadd.f32 %v13917_v42, %v7022_v11  ;;  %v7533_v46 = vmax.f32 %v5828_v27, 0.0  ;;  %v7023_v38 = vmax.f32 %v5941_v4, 0.0 }
 0x44a   : > { %v5832_v16 = vpop.f32.mrf.mxu0  ;;  %v5945_v2 = vpop.f32.mrf.mxu1 }
 0x44b   : > { %v13965_v31 = vadd.f32 %v8568_v59, %v7533_v46  ;;  %v13967_v30 = vadd.f32 %v8050_v10, %v7023_v38  ;;  %v7596_v40 = vmax.f32 %v5832_v16, 0.0  ;;  %v7086_v47 = vmax.f32 %v5945_v2, 0.0 }
 0x44c   : > { %v5834_v55 = vpop.f32.mrf.mxu0  ;;  %v5947_v7 = vpop.f32.mrf.mxu1 }
 0x44d   : > { %v8633_v53 = vadd.f32 %v13924_v62, %v7596_v40  ;;  %v8115_v61 = vadd.f32 %v13926_v19, %v7086_v47  ;;  %v7597_v60 = vmax.f32 %v5834_v55, 0.0  ;;  %v7087_v18 = vmax.f32 %v5947_v7, 0.0 }
 0x44e   : > { %v5838_v25 = vpop.f32.mrf.mxu0  ;;  %v5951_v42 = vpop.f32.mrf.mxu1 }
 0x44f   : > { %v13971_v17 = vadd.f32 %v8633_v53, %v7597_v60  ;;  %v13973_v37 = vadd.f32 %v8115_v61, %v7087_v18  ;;  %v7660_v56 = vmax.f32 %v5838_v25, 0.0  ;;  %v7150_v6 = vmax.f32 %v5951_v42, 0.0 }
 0x450   : > { %v5840_v28 = vpop.f32.mrf.mxu0  ;;  %v5953_v13 = vpop.f32.mrf.mxu1 }
 0x451   : > { %v8698_v15 = vadd.f32 %v13929_v58, %v7660_v56  ;;  %v8180_v34 = vadd.f32 %v13931_v24, %v7150_v6  ;;  %v7661_v14 = vmax.f32 %v5840_v28, 0.0  ;;  %v7151_v62 = vmax.f32 %v5953_v13, 0.0 }
 0x452   : > { %v5957_v45 = vpop.f32.mrf.mxu1  ;;  %v6070_v19 = vpop.f32.mrf.mxu0 }
 0x453   : > { %v13977_v50 = vadd.f32 %v8698_v15, %v7661_v14  ;;  %v13979_v22 = vadd.f32 %v8180_v34, %v7151_v62  ;;  %v7214_v44 = vmax.f32 %v5957_v45, 0.0  ;;  %v6704_v49 = vmax.f32 %v6070_v19, 0.0 }
 0x454   : > { %v5959_v21 = vpop.f32.mrf.mxu1  ;;  %v6072_v57 = vpop.f32.mrf.mxu0 }
 0x455   : > { %v8245_v0 = vadd.f32 %v13935_v3, %v7214_v44  ;;  %v7727_v48 = vadd.f32 %v13937_v41, %v6704_v49  ;;  %v7215_v29 = vmax.f32 %v5959_v21, 0.0  ;;  %v6705_v58 = vmax.f32 %v6072_v57, 0.0 }
 0x456   : > { %v5963_v43 = vpop.f32.mrf.mxu1  ;;  %v6076_v24 = vpop.f32.mrf.mxu0 }
 0x457   : > { %v13983_v63 = vadd.f32 %v8245_v0, %v7215_v29  ;;  %v13985_v12 = vadd.f32 %v7727_v48, %v6705_v58  ;;  %v7278_v23 = vmax.f32 %v5963_v43, 0.0  ;;  %v6768_v1 = vmax.f32 %v6076_v24, 0.0 }
 0x458   : > { %v5965_v36 = vpop.f32.mrf.mxu1  ;;  %v6078_v39 = vpop.f32.mrf.mxu0 }
 0x459   : > { %v8310_v9 = vadd.f32 %v13941_v26, %v7278_v23  ;;  %v7792_v8 = vadd.f32 %v13943_v33, %v6768_v1  ;;  %v7279_v51 = vmax.f32 %v5965_v36, 0.0  ;;  %v6769_v3 = vmax.f32 %v6078_v39, 0.0 }
 0x45a   : > { %v5969_v11 = vpop.f32.mrf.mxu1  ;;  %v6082_v41 = vpop.f32.mrf.mxu0 }
 0x45b   : > { %v13989_v27 = vadd.f32 %v8310_v9, %v7279_v51  ;;  %v13991_v4 = vadd.f32 %v7792_v8, %v6769_v3  ;;  %v7342_v59 = vmax.f32 %v5969_v11, 0.0  ;;  %v6832_v10 = vmax.f32 %v6082_v41, 0.0 }
 0x45c   : > { %v5971_v46 = vpop.f32.mrf.mxu1  ;;  %v6084_v38 = vpop.f32.mrf.mxu0 }
 0x45d   : > { %v8375_v16 = vadd.f32 %v13947_v32, %v7342_v59  ;;  %v7857_v2 = vadd.f32 %v13949_v52, %v6832_v10  ;;  %v7343_v40 = vmax.f32 %v5971_v46, 0.0  ;;  %v6833_v26 = vmax.f32 %v6084_v38, 0.0 }
 0x45e   : > { %v5975_v47 = vpop.f32.mrf.mxu1  ;;  %v6088_v33 = vpop.f32.mrf.mxu0 }
 0x45f   : > { %v13995_v55 = vadd.f32 %v8375_v16, %v7343_v40  ;;  %v13997_v7 = vadd.f32 %v7857_v2, %v6833_v26  ;;  %v7406_v53 = vmax.f32 %v5975_v47, 0.0  ;;  %v6896_v61 = vmax.f32 %v6088_v33, 0.0 }
 0x460   : > { %v5977_v60 = vpop.f32.mrf.mxu1  ;;  %v6090_v18 = vpop.f32.mrf.mxu0 }
 0x461   : > { %v8440_v25 = vadd.f32 %v13953_v20, %v7406_v53  ;;  %v7922_v42 = vadd.f32 %v13955_v35, %v6896_v61  ;;  %v7407_v56 = vmax.f32 %v5977_v60, 0.0  ;;  %v6897_v32 = vmax.f32 %v6090_v18, 0.0 }
 0x462   : > { %v5981_v6 = vpop.f32.mrf.mxu1  ;;  %v6094_v52 = vpop.f32.mrf.mxu0 }
 0x463   : > { %v14001_v28 = vadd.f32 %v8440_v25, %v7407_v56  ;;  %v14003_v13 = vadd.f32 %v7922_v42, %v6897_v32  ;;  %v7470_v15 = vmax.f32 %v5981_v6, 0.0  ;;  %v6960_v34 = vmax.f32 %v6094_v52, 0.0 }
 0x464   : > { %v5983_v14 = vpop.f32.mrf.mxu1  ;;  %v6096_v62 = vpop.f32.mrf.mxu0 }
 0x465   : > { %v8505_v45 = vadd.f32 %v13959_v5, %v7470_v15  ;;  %v7987_v19 = vadd.f32 %v13961_v54, %v6960_v34  ;;  %v7471_v44 = vmax.f32 %v5983_v14, 0.0  ;;  %v6961_v20 = vmax.f32 %v6096_v62, 0.0 }
 0x466   : > { %v5987_v49 = vpop.f32.mrf.mxu1  ;;  %v6100_v35 = vpop.f32.mrf.mxu0 }
 0x467   : > { %v14007_v21 = vadd.f32 %v8505_v45, %v7471_v44  ;;  %v14009_v57 = vadd.f32 %v7987_v19, %v6961_v20  ;;  %v7534_v0 = vmax.f32 %v5987_v49, 0.0  ;;  %v7024_v48 = vmax.f32 %v6100_v35, 0.0 }
 0x468   : > { %v5989_v29 = vpop.f32.mrf.mxu1  ;;  %v6102_v58 = vpop.f32.mrf.mxu0 }
 0x469   : > { %v8570_v43 = vadd.f32 %v13965_v31, %v7534_v0  ;;  %v8052_v24 = vadd.f32 %v13967_v30, %v7024_v48  ;;  %v7535_v23 = vmax.f32 %v5989_v29, 0.0  ;;  %v7025_v5 = vmax.f32 %v6102_v58, 0.0 }
 0x46a   : > { %v5993_v1 = vpop.f32.mrf.mxu1  ;;  %v6106_v54 = vpop.f32.mrf.mxu0 }
 0x46b   : > { %v14013_v36 = vadd.f32 %v8570_v43, %v7535_v23  ;;  %v14015_v39 = vadd.f32 %v8052_v24, %v7025_v5  ;;  %v7598_v9 = vmax.f32 %v5993_v1, 0.0  ;;  %v7088_v8 = vmax.f32 %v6106_v54, 0.0 }
 0x46c   : > { %v5995_v51 = vpop.f32.mrf.mxu1  ;;  %v6108_v3 = vpop.f32.mrf.mxu0 }
 0x46d   : > { %v8635_v11 = vadd.f32 %v13971_v17, %v7598_v9  ;;  %v8117_v41 = vadd.f32 %v13973_v37, %v7088_v8  ;;  %v7599_v59 = vmax.f32 %v5995_v51, 0.0  ;;  %v7089_v31 = vmax.f32 %v6108_v3, 0.0 }
 0x46e   : > { %v5999_v10 = vpop.f32.mrf.mxu1  ;;  %v6112_v30 = vpop.f32.mrf.mxu0 }
 0x46f   : > { %v14019_v46 = vadd.f32 %v8635_v11, %v7599_v59  ;;  %v14021_v38 = vadd.f32 %v8117_v41, %v7089_v31  ;;  %v7662_v16 = vmax.f32 %v5999_v10, 0.0  ;;  %v7152_v2 = vmax.f32 %v6112_v30, 0.0 }
 0x470   : > { %v6001_v40 = vpop.f32.mrf.mxu1  ;;  %v6114_v26 = vpop.f32.mrf.mxu0 }
 0x471   : > { %v8700_v47 = vadd.f32 %v13977_v50, %v7662_v16  ;;  %v8182_v33 = vadd.f32 %v13979_v22, %v7152_v2  ;;  %v7663_v53 = vmax.f32 %v6001_v40, 0.0  ;;  %v7153_v17 = vmax.f32 %v6114_v26, 0.0 }
 0x472   : > { %v6118_v61 = vpop.f32.mrf.mxu0  ;;  %v6231_v37 = vpop.f32.mrf.mxu1 }
 0x473   : > { %v14025_v60 = vadd.f32 %v8700_v47, %v7663_v53  ;;  %v14027_v18 = vadd.f32 %v8182_v33, %v7153_v17  ;;  %v7216_v25 = vmax.f32 %v6118_v61, 0.0  ;;  %v6706_v42 = vmax.f32 %v6231_v37, 0.0 }
 0x474   : > { %v6120_v56 = vpop.f32.mrf.mxu0  ;;  %v6233_v32 = vpop.f32.mrf.mxu1 }
 0x475   : > { %v8247_v6 = vadd.f32 %v13983_v63, %v7216_v25  ;;  %v7729_v52 = vadd.f32 %v13985_v12, %v6706_v42  ;;  %v7217_v15 = vmax.f32 %v6120_v56, 0.0  ;;  %v6707_v50 = vmax.f32 %v6233_v32, 0.0 }
 0x476   : > { %v6124_v34 = vpop.f32.mrf.mxu0  ;;  %v6237_v22 = vpop.f32.mrf.mxu1 }
 0x477   : > { %v14031_v14 = vadd.f32 %v8247_v6, %v7217_v15  ;;  %v14033_v62 = vadd.f32 %v7729_v52, %v6707_v50  ;;  %v7280_v45 = vmax.f32 %v6124_v34, 0.0  ;;  %v6770_v19 = vmax.f32 %v6237_v22, 0.0 }
 0x478   : > { %v6126_v44 = vpop.f32.mrf.mxu0  ;;  %v6239_v20 = vpop.f32.mrf.mxu1 }
 0x479   : > { %v8312_v49 = vadd.f32 %v13989_v27, %v7280_v45  ;;  %v7794_v35 = vadd.f32 %v13991_v4, %v6770_v19  ;;  %v7281_v0 = vmax.f32 %v6126_v44, 0.0  ;;  %v6771_v63 = vmax.f32 %v6239_v20, 0.0 }
 0x47a   : > { %v6130_v48 = vpop.f32.mrf.mxu0  ;;  %v6243_v12 = vpop.f32.mrf.mxu1 }
 0x47b   : > { %v14037_v29 = vadd.f32 %v8312_v49, %v7281_v0  ;;  %v14039_v58 = vadd.f32 %v7794_v35, %v6771_v63  ;;  %v7344_v43 = vmax.f32 %v6130_v48, 0.0  ;;  %v6834_v24 = vmax.f32 %v6243_v12, 0.0 }
 0x47c   : > { %v6132_v23 = vpop.f32.mrf.mxu0  ;;  %v6245_v5 = vpop.f32.mrf.mxu1 }
 0x47d   : > { %v8377_v1 = vadd.f32 %v13995_v55, %v7344_v43  ;;  %v7859_v54 = vadd.f32 %v13997_v7, %v6834_v24  ;;  %v7345_v9 = vmax.f32 %v6132_v23, 0.0  ;;  %v6835_v27 = vmax.f32 %v6245_v5, 0.0 }
 0x47e   : > { %v6136_v8 = vpop.f32.mrf.mxu0  ;;  %v6249_v4 = vpop.f32.mrf.mxu1 }
 0x47f   : > { %v14043_v51 = vadd.f32 %v8377_v1, %v7345_v9  ;;  %v14045_v3 = vadd.f32 %v7859_v54, %v6835_v27  ;;  %v7408_v11 = vmax.f32 %v6136_v8, 0.0  ;;  %v6898_v41 = vmax.f32 %v6249_v4, 0.0 }
 0x480   : > { %v6138_v59 = vpop.f32.mrf.mxu0  ;;  %v6251_v31 = vpop.f32.mrf.mxu1 }
 0x481   : > { %v8442_v10 = vadd.f32 %v14001_v28, %v7408_v11  ;;  %v7924_v30 = vadd.f32 %v14003_v13, %v6898_v41  ;;  %v7409_v16 = vmax.f32 %v6138_v59, 0.0  ;;  %v6899_v55 = vmax.f32 %v6251_v31, 0.0 }
 0x482   : > { %v6142_v2 = vpop.f32.mrf.mxu0  ;;  %v6255_v7 = vpop.f32.mrf.mxu1 }
 0x483   : > { %v14049_v40 = vadd.f32 %v8442_v10, %v7409_v16  ;;  %v14051_v26 = vadd.f32 %v7924_v30, %v6899_v55  ;;  %v7472_v47 = vmax.f32 %v6142_v2, 0.0  ;;  %v6962_v33 = vmax.f32 %v6255_v7, 0.0 }
 0x484   : > { %v6144_v53 = vpop.f32.mrf.mxu0  ;;  %v6257_v17 = vpop.f32.mrf.mxu1 }
 0x485   : > { %v8507_v61 = vadd.f32 %v14007_v21, %v7472_v47  ;;  %v7989_v37 = vadd.f32 %v14009_v57, %v6962_v33  ;;  %v7473_v25 = vmax.f32 %v6144_v53, 0.0  ;;  %v6963_v28 = vmax.f32 %v6257_v17, 0.0 }
 0x486   : > { %v14055_v42 = vpop.f32.mrf.mxu0  ;;  %v6261_v13 = vpop.f32.mrf.mxu1 }
 0x487   : > { %v14057_v56 = vadd.f32 %v8507_v61, %v7473_v25  ;;  %v14059_v32 = vadd.f32 %v7989_v37, %v6963_v28  ;;  %v7026_v6 = vmax.f32 %v6261_v13, 0.0 }
 0x488   : > { %v14061_v52 = vpop.f32.mrf.mxu0  ;;  %v6263_v15 = vpop.f32.mrf.mxu1 }
 0x489   : > { %v8054_v50 = vadd.f32 %v14015_v39, %v7026_v6  ;;  %v7027_v34 = vmax.f32 %v6263_v15, 0.0 }
 0x48a   : > { %v6154_v22 = vpop.f32.mrf.mxu0  ;;  %v6267_v21 = vpop.f32.mrf.mxu1 }
 0x48b   : > { %v14064_v45 = vadd.f32 %v8054_v50, %v7027_v34  ;;  %v7600_v57 = vmax.f32 %v6154_v22, 0.0  ;;  %v7090_v19 = vmax.f32 %v6267_v21, 0.0 }
 0x48c   : > { %v6156_v44 = vpop.f32.mrf.mxu0  ;;  %v6269_v20 = vpop.f32.mrf.mxu1 }
 0x48d   : > { %14382 = vst [vmem:[#allocation2_spill] sm:$0xff] %v14064_v45  ;;  %v8637_v49 = vadd.f32 %v14019_v46, %v7600_v57  ;;  %v8119_v35 = vadd.f32 %v14021_v38, %v7090_v19  ;;  %v7601_v0 = vmax.f32 %v6156_v44, 0.0  ;;  %v7091_v63 = vmax.f32 %v6269_v20, 0.0 }
 0x48e   : > { %v14068_v48 = vpop.f32.mrf.mxu0  ;;  %v6273_v12 = vpop.f32.mrf.mxu1 }
 0x48f   : > { %v14070_v43 = vadd.f32 %v8637_v49, %v7601_v0  ;;  %v14072_v39 = vadd.f32 %v8119_v35, %v7091_v63  ;;  %v7154_v24 = vmax.f32 %v6273_v12, 0.0 }
 0x490   : > { %v14074_v23 = vpop.f32.mrf.mxu0  ;;  %v6275_v5 = vpop.f32.mrf.mxu1 }
 0x491   : > { %v8184_v1 = vadd.f32 %v14027_v18, %v7154_v24  ;;  %v7155_v54 = vmax.f32 %v6275_v5, 0.0 }
 0x492   : > { %v6279_v9 = vpop.f32.mrf.mxu1  ;;  %v6392_v46 = vpop.f32.mrf.mxu0 }
 0x493   : > { %v14077_v27 = vadd.f32 %v8184_v1, %v7155_v54  ;;  %v7218_v38 = vmax.f32 %v6279_v9, 0.0  ;;  %v6708_v8 = vmax.f32 %v6392_v46, 0.0 }
 0x494   : > { %v6281_v4 = vpop.f32.mrf.mxu1  ;;  %v6394_v11 = vpop.f32.mrf.mxu0 }
 0x495   : > { %v8249_v41 = vadd.f32 %v14031_v14, %v7218_v38  ;;  %v7731_v59 = vadd.f32 %v14033_v62, %v6708_v8  ;;  %v7219_v31 = vmax.f32 %v6281_v4, 0.0  ;;  %v6709_v10 = vmax.f32 %v6394_v11, 0.0 }
 0x496   : > { %v6285_v30 = vpop.f32.mrf.mxu1  ;;  %v6398_v16 = vpop.f32.mrf.mxu0 }
 0x497   : > { %v14081_v55 = vadd.f32 %v8249_v41, %v7219_v31  ;;  %v14083_v18 = vadd.f32 %v7731_v59, %v6709_v10  ;;  %v7282_v2 = vmax.f32 %v6285_v30, 0.0  ;;  %v6772_v7 = vmax.f32 %v6398_v16, 0.0 }
 0x498   : > { %v6287_v47 = vpop.f32.mrf.mxu1  ;;  %v6400_v33 = vpop.f32.mrf.mxu0 }
 0x499   : > { %v8314_v53 = vadd.f32 %v14037_v29, %v7282_v2  ;;  %v7796_v17 = vadd.f32 %v14039_v58, %v6772_v7  ;;  %v7283_v61 = vmax.f32 %v6287_v47, 0.0  ;;  %v6773_v14 = vmax.f32 %v6400_v33, 0.0 }
 0x49a   : > { %v6291_v37 = vpop.f32.mrf.mxu1  ;;  %v6404_v62 = vpop.f32.mrf.mxu0 }
 0x49b   : > { %v14087_v25 = vadd.f32 %v8314_v53, %v7283_v61  ;;  %v7797_v28 = vadd.f32 %v7796_v17, %v6773_v14  ;;  %v7346_v13 = vmax.f32 %v6291_v37, 0.0  ;;  %v6836_v6 = vmax.f32 %v6404_v62, 0.0 }
 0x49c   : > { %v6293_v15 = vpop.f32.mrf.mxu1  ;;  %v6406_v50 = vpop.f32.mrf.mxu0 }
 0x49d   : > { %v8379_v34 = vadd.f32 %v14043_v51, %v7346_v13  ;;  %v7861_v22 = vadd.f32 %v14045_v3, %v6836_v6  ;;  %v7347_v21 = vmax.f32 %v6293_v15, 0.0  ;;  %v6837_v57 = vmax.f32 %v6406_v50, 0.0 }
 0x49e   : > { %v6297_v29 = vpop.f32.mrf.mxu1  ;;  %v6410_v19 = vpop.f32.mrf.mxu0 }
 0x49f   : > { %v14091_v58 = vadd.f32 %v8379_v34, %v7347_v21  ;;  %v7862_v44 = vadd.f32 %v7861_v22, %v6837_v57  ;;  %v7410_v20 = vmax.f32 %v6297_v29, 0.0  ;;  %v6900_v49 = vmax.f32 %v6410_v19, 0.0 }
 0x4a0   : > { %v6299_v35 = vpop.f32.mrf.mxu1  ;;  %v6412_v0 = vpop.f32.mrf.mxu0 }
 0x4a1   : > { %v8444_v63 = vadd.f32 %v14049_v40, %v7410_v20  ;;  %v7926_v12 = vadd.f32 %v14051_v26, %v6900_v49  ;;  %v7411_v24 = vmax.f32 %v6299_v35, 0.0  ;;  %v6901_v5 = vmax.f32 %v6412_v0, 0.0 }
 0x4a2   : > { %v6303_v51 = vpop.f32.mrf.mxu1  ;;  %v14095_v1 = vpop.f32.mrf.mxu0 }
 0x4a3   : > { %v14097_v3 = vadd.f32 %v8444_v63, %v7411_v24  ;;  %v7927_v54 = vadd.f32 %v7926_v12, %v6901_v5  ;;  %v7474_v9 = vmax.f32 %v6303_v51, 0.0 }
 0x4a4   : > { %v6305_v46 = vpop.f32.mrf.mxu1  ;;  %v14099_v38 = vpop.f32.mrf.mxu0 }
 0x4a5   : > { %v8509_v8 = vadd.f32 %v14057_v56, %v7474_v9  ;;  %v7475_v4 = vmax.f32 %v6305_v46, 0.0 }
 0x4a6   : > { %v14102_v11 = vpop.f32.mrf.mxu1  ;;  %v14104_v40 = vpop.f32.mrf.mxu0 }
 0x4a7   : > { %v14106_v26 = vadd.f32 %v8509_v8, %v7475_v4 }
 0x4a8   : > { %v14108_v41 = vpop.f32.mrf.mxu1  ;;  %v14110_v59 = vpop.f32.mrf.mxu0 }
 0x4a9   : > { %14383 = vst [vmem:[#allocation3_spill] sm:$0xff] %v14110_v59 }
 0x4aa   : > { %v6315_v31 = vpop.f32.mrf.mxu1  ;;  %v14112_v10 = vpop.f32.mrf.mxu0 }
 0x4ab   : > { %v7602_v30 = vmax.f32 %v6315_v31, 0.0 }
 0x4ac   : > { %v6317_v16 = vpop.f32.mrf.mxu1  ;;  %v14114_v2 = vpop.f32.mrf.mxu0 }
 0x4ad   : > { %v8639_v56 = vadd.f32 %v14070_v43, %v7602_v30  ;;  %v7603_v7 = vmax.f32 %v6317_v16, 0.0 }
 0x4ae   : > { %v14117_v47 = vpop.f32.mrf.mxu1  ;;  %v14119_v33 = vpop.f32.mrf.mxu0 }
 0x4af   : > { %v14121_v53 = vadd.f32 %v8639_v56, %v7603_v7 }
 0x4b0   : > { %v14123_v17 = vpop.f32.mrf.mxu1  ;;  %v14125_v61 = vpop.f32.mrf.mxu0 }
 0x4b2   : > { %v14127_v14 = vpop.f32.mrf.mxu0  ;;  %v6553_v37 = vpop.f32.mrf.mxu1 }
 0x4b3   : > { %v6710_v62 = vmax.f32 %v6553_v37, 0.0 }
 0x4b4   : > { %v14129_v13 = vpop.f32.mrf.mxu0  ;;  %v6555_v6 = vpop.f32.mrf.mxu1 }
 0x4b5   : > { %v7733_v43 = vadd.f32 %v14083_v18, %v6710_v62  ;;  %v6711_v15 = vmax.f32 %v6555_v6, 0.0 }
 0x4b6   : > { %v14132_v50 = vpop.f32.mrf.mxu0  ;;  %v6559_v34 = vpop.f32.mrf.mxu1 }
 0x4b7   : > { %v6774_v22 = vmax.f32 %v6559_v34, 0.0  ;;  %v14134_v21 = vadd.f32 %v7733_v43, %v6711_v15 }
 0x4b8   : > { %v14136_v57 = vpop.f32.mrf.mxu0  ;;  %v6561_v29 = vpop.f32.mrf.mxu1 }
 0x4b9   : > { %14384 = vst [vmem:[#allocation4_spill] sm:$0xff] %v14134_v21  ;;  %v7798_v19 = vadd.f32 %v7797_v28, %v6774_v22  ;;  %v6775_v20 = vmax.f32 %v6561_v29, 0.0  ;;  %v7536_v29 = vmax.f32 %v14055_v42, 0.0 }
 0x4ba   : > { %v6565_v49 = vpop.f32.mrf.mxu1  ;;  %v14138_v35 = vpop.f32.mrf.mxu0 }
 0x4bb   : > { %v6838_v0 = vmax.f32 %v6565_v49, 0.0  ;;  %v14140_v63 = vadd.f32 %v7798_v19, %v6775_v20 }
 0x4bc   : > { %v6567_v12 = vpop.f32.mrf.mxu1  ;;  %v14142_v51 = vpop.f32.mrf.mxu0 }
 0x4bd   : > { %14385 = vst [vmem:[#allocation5_spill] sm:$0xff] %v14140_v63  ;;  %v7863_v18 = vadd.f32 %v7862_v44, %v6838_v0  ;;  %v6839_v24 = vmax.f32 %v6567_v12, 0.0  ;;  %v8572_v0 = vadd.f32 %v14013_v36, %v7536_v29  ;;  %v7537_v12 = vmax.f32 %v14061_v52, 0.0 }
 0x4be   : > { %v6571_v5 = vpop.f32.mrf.mxu1  ;;  %v14148_v30 = vpop.f32.mrf.mxu0  ;;  %v7665_v36 = vmax.f32 %v14074_v23, 0.0  ;;  %v7348_v23 = vmax.f32 %v14138_v35, 0.0 }
 0x4bf   : > { %v6902_v9 = vmax.f32 %v6571_v5, 0.0  ;;  %v14144_v46 = vadd.f32 %v7863_v18, %v6839_v24  ;;  %v7538_v5 = vmax.f32 %v14102_v11, 0.0  ;;  %v7666_v11 = vmax.f32 %v14117_v47, 0.0 }
 0x4c0   : > { %v6573_v8 = vpop.f32.mrf.mxu1  ;;  %v14156_v44 = vpop.f32.mrf.mxu0 }
 0x4c1   : > { %14386 = vst [vmem:[#allocation6_spill] sm:$0xff] %v14144_v46  ;;  %v7928_v4 = vadd.f32 %v7927_v54, %v6902_v9  ;;  %v6903_v31 = vmax.f32 %v6573_v8, 0.0  ;;  %v7664_v9 = vmax.f32 %v14068_v48, 0.0 }
 0x4c2   : > { %v14146_v28 = vpop.f32.mrf.mxu1  ;;  %v6464_v6 = vpop.f32.mrf.mxu0 }
 0x4c3   : > { %v14150_v16 = vadd.f32 %v7928_v4, %v6903_v31  ;;  %v8573_v4 = vadd.f32 %v8572_v0, %v7537_v12  ;;  %v8702_v21 = vadd.f32 %v14025_v60, %v7664_v9  ;;  %v7476_v12 = vmax.f32 %v6464_v6, 0.0 }
 0x4c4   : > { %v14152_v56 = vpop.f32.mrf.mxu1  ;;  %v6466_v15 = vpop.f32.mrf.mxu0  ;;  %v7667_v60 = vmax.f32 %v14123_v17, 0.0  ;;  %v7220_v6 = vmax.f32 %v14127_v14, 0.0 }
 0x4c5   : > { %14387 = vst [vmem:[#allocation7_spill] sm:$0xff] %v14150_v16  ;;  %v8574_v63 = vadd.f32 %v8573_v4, %v7538_v5  ;;  %v7539_v16 = vmax.f32 %v14108_v41, 0.0  ;;  %v7477_v59 = vmax.f32 %v6466_v15, 0.0 }
 0x4c6   : > { %v14154_v7 = vpop.f32.mrf.mxu1  ;;  %v6470_v19 = vpop.f32.mrf.mxu0  ;;  %v8251_v14 = vadd.f32 %v14081_v55, %v7220_v6 }
 0x4c7   : > { %14388 = vst [vmem:[#allocation8_spill] sm:$0xff] %v14154_v7  ;;  %v7540_v29 = vmax.f32 %v6470_v19, 0.0  ;;  %v8575_v0 = vadd.f32 %v8574_v63, %v7539_v16  ;;  %v8511_v19 = vadd.f32 %v14106_v26, %v7476_v12  ;;  %v7092_v26 = vmax.f32 %v14112_v10, 0.0 }
 0x4c8   : > { %v14158_v37 = vpop.f32.mrf.mxu1  ;;  %v6472_v18 = vpop.f32.mrf.mxu0 }
 0x4c9   : > { %14389 = vst [vmem:[#allocation9_spill] sm:$0xff] %v14158_v37  ;;  %v8703_v37 = vadd.f32 %v8702_v21, %v7665_v36  ;;  %v8576_v5 = vadd.f32 %v8575_v0, %v7540_v29  ;;  %v7541_v4 = vmax.f32 %v6472_v18, 0.0  ;;  %v8381_v18 = vadd.f32 %v14091_v58, %v7348_v23 }
 0x4ca   : > { %v14160_v62 = vpop.f32.mrf.mxu1  ;;  %v6476_v31 = vpop.f32.mrf.mxu0  ;;  %v8512_v36 = vadd.f32 %v8511_v19, %v7477_v59  ;;  %v7221_v58 = vmax.f32 %v14129_v13, 0.0  ;;  %v8121_v10 = vadd.f32 %v14072_v39, %v7092_v26  ;;  %v7093_v19 = vmax.f32 %v14114_v2, 0.0 }
 0x4cb   : > { %v8704_v7 = vadd.f32 %v8703_v37, %v7666_v11  ;;  %v7349_v37 = vmax.f32 %v14142_v51, 0.0  ;;  %v7604_v35 = vmax.f32 %v6476_v31, 0.0  ;;  %v7412_v51 = vmax.f32 %v14148_v30, 0.0 }
 0x4cc   : > { %v14162_v43 = vpop.f32.mrf.mxu1  ;;  %v14188_v46 = vpop.f32.mrf.mxu0  ;;  %v6964_v31 = vmax.f32 %v14095_v1, 0.0  ;;  %v8252_v1 = vadd.f32 %v8251_v14, %v7221_v58  ;;  %v7413_v39 = vmax.f32 %v14156_v44, 0.0  ;;  %v8122_v44 = vadd.f32 %v8121_v10, %v7093_v19 }
 0x4cd   : > { %v8705_v21 = vadd.f32 %v8704_v7, %v7667_v60  ;;  %v7095_v26 = vmax.f32 %v14162_v43, 0.0  ;;  %v6967_v43 = vmax.f32 %v14152_v56, 0.0 }
 0x4ce   : > { %v14164_v54 = vpop.f32.mrf.mxu1  ;;  %v6482_v41 = vpop.f32.mrf.mxu0 }
 0x4cf   : > { %14390 = vst [vmem:[#allocation10_spill] sm:$0xff] %v14164_v54  ;;  %v7668_v45 = vmax.f32 %v6482_v41, 0.0  ;;  %v8382_v41 = vadd.f32 %v8381_v18, %v7349_v37 }
 0x4d0   : > { %v14166_v34 = vpop.f32.mrf.mxu1  ;;  %v6484_v54 = vpop.f32.mrf.mxu0 }
 0x4d1   : > { %14391 = vst [vmem:[#allocation11_spill] sm:$0xff] %v14166_v34  ;;  %v8706_v15 = vadd.f32 %v8705_v21, %v7668_v45  ;;  %v7669_v0 = vmax.f32 %v6484_v54, 0.0  ;;  %v7605_v45 = vmax.f32 %v14188_v46, 0.0  ;;  %v8446_v46 = vadd.f32 %v14097_v3, %v7412_v51  ;;  %v14395_v51 = vld [vmem:[#allocation2_spill] sm:$0xff] }
 0x4d2   : > { %v14168_v22 = vpop.f32.mrf.mxu1  ;;  %v7094_v21 = vmax.f32 %v14160_v62, 0.0  ;;  %v7991_v3 = vadd.f32 %v14059_v32, %v6964_v31  ;;  %v7285_v62 = vmax.f32 %v14136_v57, 0.0 }
 0x4d3   : > { %v8707_v54 = vadd.f32 %v8706_v15, %v7669_v0 }
 0x4d4   : > { %v14171_v20 = vpop.f32.mrf.mxu1 }
 0x4d5   : > { %v7223_v6 = vmax.f32 %v14171_v20, 0.0  ;;  %v6966_v20 = vmax.f32 %v14146_v28, 0.0 }
 0x4d6   : > { %v14173_v49 = vpop.f32.mrf.mxu1 }
 0x4d7   : > { %v7286_v15 = vmax.f32 %v14173_v49, 0.0 }
 0x4d8   : > { %v14177_v24 = vpop.f32.mrf.mxu1  ;;  %v14398_v10 = vld [vmem:[#allocation11_spill] sm:$0xff] }
 0x4d9   : > { %14392 = vst [vmem:[#allocation12_spill] sm:$0xff] %v14177_v24  ;;  %v8577_v24 = vadd.f32 %v8576_v5, %v7541_v4 }
 0x4da   : > { %v6613_v8 = vpop.f32.mrf.mxu1 }
 0x4db   : > { %v7350_v12 = vmax.f32 %v6613_v8, 0.0  ;;  %v7222_v8 = vmax.f32 %v14168_v22, 0.0 }
 0x4dc   : > { %v14181_v42 = vpop.f32.mrf.mxu1 }
 0x4dd   : > { %v8383_v60 = vadd.f32 %v8382_v41, %v7350_v12  ;;  %v7351_v13 = vmax.f32 %v14181_v42, 0.0  ;;  %v8253_v42 = vadd.f32 %v8252_v1, %v7222_v8  ;;  %v14401_v1 = vld [vmem:[#allocation4_spill] sm:$0xff] }
 0x4de   : > { %v14186_v52 = vpop.f32.mrf.mxu1 }
 0x4df   : > { %v7414_v18 = vmax.f32 %v14186_v52, 0.0  ;;  %v8123_v52 = vadd.f32 %v8122_v44, %v7094_v21  ;;  %v8254_v0 = vadd.f32 %v8253_v42, %v7223_v6 }
 0x4e0   : > { %v14191_v48 = vpop.f32.mrf.mxu1  ;;  %v14394_v14 = vld [vmem:[#allocation12_spill] sm:$0xff] }
 0x4e1   : > { %v8124_v58 = vadd.f32 %v8123_v52, %v7095_v26  ;;  %v8717_v52 = vld [vmem:[%s14379_s2 + $0x28] sm:$0xff]  ;;  %v8718_v26 = vld [vmem:[%s14379_s2 + $0x30] sm:$0xff] }
 0x4e2   : > { %v6625_v34 = vpop.f32.mrf.mxu1 }
 0x4e3   : > { %v7478_v63 = vmax.f32 %v6625_v34, 0.0 }
 0x4e4   : > { %v6627_v9 = vpop.f32.mrf.mxu1 }
 0x4e5   : > { %v8513_v34 = vadd.f32 %v8512_v36, %v7478_v63  ;;  %v7479_v4 = vmax.f32 %v6627_v9, 0.0  ;;  %v6965_v36 = vmax.f32 %v14099_v38, 0.0  ;;  %v7415_v38 = vmax.f32 %v14191_v48, 0.0 }
 0x4e6   : > { %v6631_v47 = vpop.f32.mrf.mxu1  ;;  %v7287_v48 = vmax.f32 %v14394_v14, 0.0 }
 0x4e7   : > { %v7542_v16 = vmax.f32 %v6631_v47, 0.0  ;;  %v8514_v30 = vadd.f32 %v8513_v34, %v7479_v4  ;;  %v14393_v4 = vld [vmem:[#allocation10_spill] sm:$0xff] }
 0x4e8   : > { %v6633_v17 = vpop.f32.mrf.mxu1  ;;  %v7158_v49 = vmax.f32 %v14393_v4, 0.0 }
 0x4e9   : > { %v7543_v29 = vmax.f32 %v6633_v17, 0.0  ;;  %v8578_v11 = vadd.f32 %v8577_v24, %v7542_v16  ;;  %v8641_v24 = vadd.f32 %v14121_v53, %v7604_v35  ;;  %v7284_v53 = vmax.f32 %v14132_v50, 0.0 }
 0x4ea   : > { %v6637_v5 = vpop.f32.mrf.mxu1  ;;  %v8384_v17 = vadd.f32 %v8383_v60, %v7351_v13  ;;  %v7156_v35 = vmax.f32 %v14119_v33, 0.0  ;;  %v7992_v33 = vadd.f32 %v7991_v3, %v6965_v36  ;;  %v14399_v13 = vld [vmem:[#allocation9_spill] sm:$0xff] }
 0x4eb   : > { %v8579_v7 = vadd.f32 %v8578_v11, %v7543_v29  ;;  %v7606_v23 = vmax.f32 %v6637_v5, 0.0  ;;  %v8642_v63 = vadd.f32 %v8641_v24, %v7605_v45  ;;  %v8316_v29 = vadd.f32 %v14087_v25, %v7284_v53  ;;  %v14402_v53 = vld [vmem:[#allocation7_spill] sm:$0xff] }
 0x4ec   : > { %v6639_v59 = vpop.f32.mrf.mxu1  ;;  %v8447_v11 = vadd.f32 %v8446_v46, %v7413_v39  ;;  %v7028_v25 = vmax.f32 %v14104_v40, 0.0  ;;  %v8186_v57 = vadd.f32 %v14077_v27, %v7156_v35  ;;  %v7157_v5 = vmax.f32 %v14125_v61, 0.0  ;;  %v14396_v40 = vld [vmem:[#allocation3_spill] sm:$0xff]  ;;  %v14397_v61 = vld [vmem:[#allocation8_spill] sm:$0xff]  ;;  %v14403_v46 = vld [vmem:[#allocation5_spill] sm:$0xff] }
 0x4ed   : > { %8580 = vadd.xlane.f32.xlu1 %v8579_v7  ;;  %v8643_v2 = vadd.f32 %v8642_v63, %v7606_v23  ;;  %v7607_v37 = vmax.f32 %v6639_v59, 0.0  ;;  %v8317_v34 = vadd.f32 %v8316_v29, %v7285_v62  ;;  %v7993_v28 = vadd.f32 %v7992_v33, %v6966_v20  ;;  %v8713_v29 = vld [vmem:[%s14379_s2 + $0x8] sm:$0xff]  ;;  %v8714_v62 = vld [vmem:[%s14379_s2 + $0x10] sm:$0xff]  ;;  %v8716_v20 = vld [vmem:[%s14379_s2 + $0x20] sm:$0xff] }
 0x4ee   : > { %v6643_v55 = vpop.f32.mrf.mxu1  ;;  %v8448_v32 = vadd.f32 %v8447_v11, %v7414_v18  ;;  %v8056_v59 = vadd.f32 %v14395_v51, %v7028_v25  ;;  %v7029_v31 = vmax.f32 %v14396_v40, 0.0  ;;  %v8187_v27 = vadd.f32 %v8186_v57, %v7157_v5  ;;  %v8715_v11 = vld [vmem:[%s14379_s2 + $0x18] sm:$0xff]  ;;  %v8724_v33 = vld [vmem:[%s14379_s2 + $0x60] sm:$0xff]  ;;  %v8725_v25 = vld [vmem:[%s14379_s2 + $0x68] sm:$0xff] }
 0x4ef   : > { %v7670_v9 = vmax.f32 %v6643_v55, 0.0  ;;  %v8644_v12 = vadd.f32 %v8643_v2, %v7607_v37  ;;  %v8318_v7 = vadd.f32 %v8317_v34, %v7286_v15  ;;  %v7030_v24 = vmax.f32 %v14397_v61, 0.0  ;;  %v8719_v15 = vld [vmem:[%s14379_s2 + $0x38] sm:$0xff]  ;;  %v8726_v57 = vld [vmem:[%s14379_s2 + $0x70] sm:$0xff]  ;;  %v8729_v34 = vld [vmem:[%s14380_s3 + $0x8] sm:$0xff] }
 0x4f0   : > { %v6645_v47 = vpop.f32.mrf.mxu1  ;;  %v8449_v41 = vadd.f32 %v8448_v32, %v7415_v38  ;;  %v8188_v45 = vadd.f32 %v8187_v27, %v7158_v49  ;;  %v7994_v56 = vadd.f32 %v7993_v28, %v6967_v43  ;;  %v8057_v60 = vadd.f32 %v8056_v59, %v7029_v31  ;;  %v8720_v32 = vld [vmem:[%s14379_s2 + $0x40] sm:$0xff]  ;;  %v8721_v38 = vld [vmem:[%s14379_s2 + $0x48] sm:$0xff]  ;;  %v8727_v5 = vld [vmem:[%s14379_s2 + $0x78] sm:$0xff] }
 0x4f1   : > { %v7671_v16 = vmax.f32 %v6645_v47, 0.0  ;;  %8515 = vadd.xlane.f32.xlu1 %v8514_v30  ;;  %v8708_v22 = vadd.f32 %v8707_v54, %v7670_v9  ;;  %v7159_v54 = vmax.f32 %v14398_v10, 0.0  ;;  %v8319_v8 = vadd.f32 %v8318_v7, %v7287_v48  ;;  %v14400_v30 = vld [vmem:[#allocation6_spill] sm:$0xff]  ;;  %v8731_v7 = vld [vmem:[%s14380_s3 + $0x18] sm:$0xff]  ;;  %v8733_v59 = vld [vmem:[%s14380_s3 + $0x28] sm:$0xff] }
 0x4f2   : > { %v8058_v55 = vadd.f32 %v8057_v60, %v7030_v24  ;;  %v7031_v23 = vmax.f32 %v14399_v13, 0.0  ;;  %v8712_v47 = vld [vmem:[%s14379_s2] sm:$0xff] }
 0x4f3   : > { %v8709_v50 = vadd.f32 %v8708_v22, %v7671_v16  ;;  %v8189_v9 = vadd.f32 %v8188_v45, %v7159_v54  ;;  %9612 = vmatprep.mubr.f32.mxu0 %v8712_v47  ;;  %v8728_v43 = vld [vmem:[%s14380_s3] sm:$0xff]  ;;  %v8735_v45 = vld [vmem:[%s14380_s3 + $0x38] sm:$0xff]  ;;  %v8738_v47 = vld [vmem:[%s14380_s3 + $0x50] sm:$0xff] }
 0x4f4   : > { %v8059_v19 = vadd.f32 %v8058_v55, %v7031_v23  ;;  %v8732_v27 = vld [vmem:[%s14380_s3 + $0x20] sm:$0xff]  ;;  %v8737_v55 = vld [vmem:[%s14380_s3 + $0x48] sm:$0xff] }
 0x4f5   : > { %8385 = vadd.xlane.f32.xlu1 %v8384_v17  ;;  %8710 = vadd.xlane.f32.xlu0 %v8709_v50 }
 0x4f9   : > { %8255 = vadd.xlane.f32.xlu1 %v8254_v0  ;;  %8645 = vadd.xlane.f32.xlu0 %v8644_v12  ;;  %v8722_v0 = vld [vmem:[%s14379_s2 + $0x50] sm:$0xff]  ;;  %v8723_v12 = vld [vmem:[%s14379_s2 + $0x58] sm:$0xff] }
 0x4fd   : > { %8125 = vadd.xlane.f32.xlu1 %v8124_v58  ;;  %8450 = vadd.xlane.f32.xlu0 %v8449_v41  ;;  %v8730_v58 = vld [vmem:[%s14380_s3 + $0x10] sm:$0xff] }
 0x501   : > { %7995 = vadd.xlane.f32.xlu1 %v7994_v56  ;;  %8320 = vadd.xlane.f32.xlu0 %v8319_v8  ;;  %v8734_v56 = vld [vmem:[%s14380_s3 + $0x30] sm:$0xff] }
 0x505   : > { %7865 = vadd.xlane.f32.xlu1 %v14400_v30  ;;  %8190 = vadd.xlane.f32.xlu0 %v8189_v9  ;;  %v8736_v9 = vld [vmem:[%s14380_s3 + $0x40] sm:$0xff] }
 0x509   : > { %7735 = vadd.xlane.f32.xlu1 %v14401_v1  ;;  %8060 = vadd.xlane.f32.xlu0 %v8059_v19  ;;  %v8739_v1 = vld [vmem:[%s14380_s3 + $0x58] sm:$0xff] }
 0x50d   : > { %7930 = vadd.xlane.f32.xlu0 %v14402_v53 }
 0x511   : > { %7800 = vadd.xlane.f32.xlu0 %v14403_v46 }
 0x576   : > { %v8581_v39 = vpop.xlane.xlu1 %8580 }
 0x57a   : > { %v8516_v63 = vpop.xlane.xlu1 %8515 }
 0x57e   : > { %v8711_v16 = vpop.xlane.xlu0 %8710  ;;  %v8386_v22 = vpop.xlane.xlu1 %8385 }
 0x57f   : > { %9580 = vmatprep.subr.mxu0 %v8711_v16 }
 0x580   : > { %9581 = vmatpush3.msra.mxu0 %v8711_v16  ;;  %v8741_v16 = vld [vmem:[%s14380_s3 + $0x68] sm:$0xff] }
 0x582   : > { %v8646_v21 = vpop.xlane.xlu0 %8645  ;;  %v8256_v42 = vpop.xlane.xlu1 %8255 }
 0x583   : > { %9582 = vmatprep.subr.mxu0 %v8646_v21 }
 0x584   : > { %9583 = vmatpush3.msra.mxu0 %v8646_v21 }
 0x585   : > { %9584 = vmatprep.subr.mxu0 %v8581_v39 }
 0x586   : > { %9585 = vmatpush3.msra.mxu0 %v8581_v39  ;;  %v8451_v6 = vpop.xlane.xlu0 %8450  ;;  %v8126_v2 = vpop.xlane.xlu1 %8125 }
 0x587   : > { %9586 = vmatprep.subr.mxu0 %v8516_v63 }
 0x588   : > { %9587 = vmatpush3.msra.mxu0 %v8516_v63 }
 0x589   : > { %9588 = vmatprep.subr.mxu0 %v8451_v6 }
 0x58a   : > { %9589 = vmatpush3.msra.mxu0 %v8451_v6  ;;  %v8321_v18 = vpop.xlane.xlu0 %8320  ;;  %v7996_v17 = vpop.xlane.xlu1 %7995 }
 0x58b   : > { %9590 = vmatprep.subr.mxu0 %v8386_v22 }
 0x58c   : > { %9591 = vmatpush3.msra.mxu0 %v8386_v22 }
 0x58d   : > { %9592 = vmatprep.subr.mxu0 %v8321_v18 }
 0x58e   : > { %9593 = vmatpush3.msra.mxu0 %v8321_v18  ;;  %v8191_v37 = vpop.xlane.xlu0 %8190  ;;  %v7866_v36 = vpop.xlane.xlu1 %7865 }
 0x58f   : > { %9594 = vmatprep.subr.mxu0 %v8256_v42 }
 0x590   : > { %9595 = vmatpush3.msra.mxu0 %v8256_v42  ;;  %v8740_v42 = vld [vmem:[%s14380_s3 + $0x60] sm:$0xff] }
 0x591   : > { %9596 = vmatprep.subr.mxu0 %v8191_v37 }
 0x592   : > { %9597 = vmatpush3.msra.mxu0 %v8191_v37  ;;  %v8061_v50 = vpop.xlane.xlu0 %8060  ;;  %v7736_v35 = vpop.xlane.xlu1 %7735 }
 0x593   : > { %9598 = vmatprep.subr.mxu0 %v8126_v2 }
 0x594   : > { %9599 = vmatpush3.msra.mxu0 %v8126_v2  ;;  %v8743_v2 = vld [vmem:[%s14380_s3 + $0x78] sm:$0xff] }
 0x595   : > { %9600 = vmatprep.subr.mxu0 %v8061_v50 }
 0x596   : > { %9601 = vmatpush3.msra.mxu0 %v8061_v50  ;;  %v7931_v3 = vpop.xlane.xlu0 %7930  ;;  %v8742_v50 = vld [vmem:[%s14380_s3 + $0x70] sm:$0xff] }
 0x597   : > { %9602 = vmatprep.subr.mxu0 %v7996_v17 }
 0x598   : > { %9603 = vmatpush3.msra.mxu0 %v7996_v17 }
 0x599   : > { %9604 = vmatprep.subr.mxu0 %v7931_v3 }
 0x59a   : > { %9605 = vmatpush3.msra.mxu0 %v7931_v3  ;;  %v7801_v44 = vpop.xlane.xlu0 %7800 }
 0x59b   : > { %9606 = vmatprep.subr.mxu0 %v7866_v36 }
 0x59c   : > { %9607 = vmatpush3.msra.mxu0 %v7866_v36 }
 0x59d   : > { %9608 = vmatprep.subr.mxu0 %v7801_v44 }
 0x59e   : > { %9609 = vmatpush3.msra.mxu0 %v7801_v44 }
 0x59f   : > { %9610 = vmatprep.subr.mxu0 %v7736_v35 }
 0x5a0   : > { %9611 = vmatpush3.msra.mxu0 %v7736_v35 }
 0x5a1   : > { %9613 = vmatmul.mubr.f32.vlgmr.msra.gmra.mxu0 %v8713_v29 }
 0x5a2   : > { %9615 = vmatprep.mubr.f32.mxu0 %v8714_v62 }
 0x5a5   : > { %9616 = vmatmul.mubr.f32.gmra.mxu0 %v8715_v11 }
 0x5a6   : > { %9618 = vmatprep.mubr.f32.mxu0 %v8716_v20 }
 0x5a9   : > { %9619 = vmatmul.mubr.f32.gmra.mxu0 %v8717_v52 }
 0x5aa   : > { %9621 = vmatprep.mubr.f32.mxu0 %v8718_v26 }
 0x5ad   : > { %9622 = vmatmul.mubr.f32.gmra.mxu0 %v8719_v15 }
 0x5ae   : > { %9624 = vmatprep.mubr.f32.mxu0 %v8720_v32 }
 0x5b1   : > { %9625 = vmatmul.mubr.f32.gmra.mxu0 %v8721_v38 }
 0x5b2   : > { %9627 = vmatprep.mubr.f32.mxu0 %v8722_v0 }
 0x5b5   : > { %9628 = vmatmul.mubr.f32.gmra.mxu0 %v8723_v12 }
 0x5b6   : > { %9630 = vmatprep.mubr.f32.mxu0 %v8724_v33 }
 0x5b9   : > { %9631 = vmatmul.mubr.f32.gmra.mxu0 %v8725_v25 }
 0x5ba   : > { %9633 = vmatprep.mubr.f32.mxu0 %v8726_v57 }
 0x5bd   : > { %9634 = vmatmul.mubr.f32.gmra.mxu0 %v8727_v5 }
 0x661   : > { %v9614_v28 = vpop.f32.mrf.mxu0 }
 0x662   : > { %v8816_v4 = vadd.f32 %v9614_v28, %v8729_v34 }
 0x663   : > { %v8810_v49 = vpop.f32.mrf.mxu0 }
 0x664   : > { %8891 = vst.msk [vmem:[%s14295_s8 + $0x8] sm:$0xff] %vm8889_vm2, %v8816_v4  ;;  %v8811_v14 = vadd.f32 %v8810_v49, %v8728_v43 }
 0x665   : > { %v9617_v48 = vpop.f32.mrf.mxu0 }
 0x666   : > { %8890 = vst.msk [vmem:[%s14295_s8] sm:$0xff] %vm8889_vm2, %v8811_v14  ;;  %v8826_v41 = vadd.f32 %v9617_v48, %v8731_v7 }
 0x667   : > { %v8820_v51 = vpop.f32.mrf.mxu0 }
 0x668   : > { %8893 = vst.msk [vmem:[%s14295_s8 + $0x18] sm:$0xff] %vm8889_vm2, %v8826_v41  ;;  %v8821_v40 = vadd.f32 %v8820_v51, %v8730_v58 }
 0x669   : > { %v9620_v31 = vpop.f32.mrf.mxu0 }
 0x66a   : > { %8892 = vst.msk [vmem:[%s14295_s8 + $0x10] sm:$0xff] %vm8889_vm2, %v8821_v40  ;;  %v8836_v61 = vadd.f32 %v9620_v31, %v8733_v59 }
 0x66b   : > { %v8830_v24 = vpop.f32.mrf.mxu0 }
 0x66c   : > { %8895 = vst.msk [vmem:[%s14295_s8 + $0x28] sm:$0xff] %vm8889_vm2, %v8836_v61  ;;  %v8831_v10 = vadd.f32 %v8830_v24, %v8732_v27 }
 0x66d   : > { %v9623_v54 = vpop.f32.mrf.mxu0 }
 0x66e   : > { %8894 = vst.msk [vmem:[%s14295_s8 + $0x20] sm:$0xff] %vm8889_vm2, %v8831_v10  ;;  %v8846_v8 = vadd.f32 %v9623_v54, %v8735_v45 }
 0x66f   : > { %v8840_v60 = vpop.f32.mrf.mxu0 }
 0x670   : > { %8897 = vst.msk [vmem:[%s14295_s8 + $0x38] sm:$0xff] %vm8889_vm2, %v8846_v8  ;;  %v8841_v13 = vadd.f32 %v8840_v60, %v8734_v56 }
 0x671   : > { %v9626_v23 = vpop.f32.mrf.mxu0 }
 0x672   : > { %8896 = vst.msk [vmem:[%s14295_s8 + $0x30] sm:$0xff] %vm8889_vm2, %v8841_v13  ;;  %v8856_v30 = vadd.f32 %v9626_v23, %v8737_v55 }
 0x673   : > { %v8850_v19 = vpop.f32.mrf.mxu0 }
 0x674   : > { %8899 = vst.msk [vmem:[%s14295_s8 + $0x48] sm:$0xff] %vm8889_vm2, %v8856_v30  ;;  %v8851_v53 = vadd.f32 %v8850_v19, %v8736_v9 }
 0x675   : > { %v9629_v46 = vpop.f32.mrf.mxu0 }
 0x676   : > { %8898 = vst.msk [vmem:[%s14295_s8 + $0x40] sm:$0xff] %vm8889_vm2, %v8851_v53  ;;  %v8866_v39 = vadd.f32 %v9629_v46, %v8739_v1 }
 0x677   : > { %v8860_v63 = vpop.f32.mrf.mxu0 }
 0x678   : > { %8901 = vst.msk [vmem:[%s14295_s8 + $0x58] sm:$0xff] %vm8889_vm2, %v8866_v39  ;;  %v8861_v22 = vadd.f32 %v8860_v63, %v8738_v47 }
 0x679   : > { %v9632_v21 = vpop.f32.mrf.mxu0 }
 0x67a   : > { %8900 = vst.msk [vmem:[%s14295_s8 + $0x50] sm:$0xff] %vm8889_vm2, %v8861_v22  ;;  %v8876_v6 = vadd.f32 %v9632_v21, %v8741_v16 }
 0x67b   : > { %v8870_v18 = vpop.f32.mrf.mxu0 }
 0x67c   : > { %8903 = vst.msk [vmem:[%s14295_s8 + $0x68] sm:$0xff] %vm8889_vm2, %v8876_v6  ;;  %v8871_v37 = vadd.f32 %v8870_v18, %v8740_v42 }
 0x67d   : > { %v9635_v17 = vpop.f32.mrf.mxu0 }
 0x67e   : > { %8902 = vst.msk [vmem:[%s14295_s8 + $0x60] sm:$0xff] %vm8889_vm2, %v8871_v37  ;;  %v8886_v3 = vadd.f32 %v9635_v17, %v8743_v2 }
 0x67f   : > { %v8880_v36 = vpop.f32.mrf.mxu0 }
 0x680   : > { %8905 = vst.msk [vmem:[%s14295_s8 + $0x78] sm:$0xff] %vm8889_vm2, %v8886_v3  ;;  %v8881_v44 = vadd.f32 %v8880_v36, %v8742_v50 }
 0x682   : > { %8904 = vst.msk [vmem:[%s14295_s8 + $0x70] sm:$0xff] %vm8889_vm2, %v8881_v44 }
 0x683 PF: > { %s14_s15 = sadd.s32 1, %s9774_s15  }
 0x684   : > { %p11_p4 = scmp.ge.s32.totalorder %s14_s15, 4  }
 0x686   :  { %13 = sbr.rel (!%p11_p4) target bundleno = 1 (0x1), region = 66 }

</bundles_post_ra>
